<compile_context>
chip_gen: v5e
topology: v5e:2x2
jax: 0.10.0
libtpu: 0.0.40
codegen_flags: <defaults>
</compile_context>

<pallas_src>
from functools import partial

import jax
import jax.numpy as jnp
from jax.experimental import pallas as pl
from jax.experimental.pallas import tpu as pltpu


# ----------------------------------------------------------------------------- kernel
def _astgcn_kernel(
    xT_ref, xN_ref,
    proj_t_ref, att_t_ref,
    rrow_ref, rcol_ref, mmask_ref,
    proj_s_ref, att_s_ref,
    chebT_ref, theta_ref,
    wtc_ref, wrbig_ref, ln_ref,
    mred_ref, bcast_ref,
    wfT_ref, bf_ref,
    out_ref,
    *, precision,
):
    """One batch element of ASTGCN; loops over (and sums) the submodules in-kernel."""
    f32 = jnp.float32
    n_sub = xT_ref.shape[0]
    K = chebT_ref.shape[1]

    def dot(a, b):
        return jnp.dot(a, b, precision=precision, preferred_element_type=f32)

    def dot_bt(a, b):  # a @ b.T without materializing a transpose
        return jax.lax.dot_general(a, b, (((1,), (1,)), ((), ())),
                                   precision=precision, preferred_element_type=f32)

    def recip(x):  # EUP approximate reciprocal + one Newton refinement
        r = pl.reciprocal(x, approx=True)
        return r * (2.0 - x * r)

    rrow = rrow_ref[...]
    rcol = rcol_ref[...]
    mmask = mmask_ref[...]
    mred = mred_ref[...]
    bcast = bcast_ref[...]

    total = None
    for s in range(n_sub):
        xT = xT_ref[s, 0]                       # (T, N*F)   time-major x
        xN = xN_ref[s, 0]                       # (N, T*F)   vertex-major x

        # ---------------- temporal attention ----------------
        lhs_t = dot(xT, proj_t_ref[s, 0])       # (T, N)
        rhs_t = dot(xT, proj_t_ref[s, 1])       # (T, N)  (= rhs^T)
        prod_t = dot_bt(lhs_t, rhs_t)           # (T, T)
        E = dot(att_t_ref[s, 1], jax.nn.sigmoid(prod_t + att_t_ref[s, 0]))
        E = E - jnp.max(E, axis=0, keepdims=True)          # softmax over dim=1
        Ee = jnp.exp(E)
        Enorm = Ee * recip(jnp.sum(Ee, axis=0, keepdims=True))     # (T, T)

        # x_TAt in vertex-major layout: xtatN = xN @ kron(Enorm, I_F)
        EnormBig = dot(dot(rrow, Enorm), rcol) * mmask
        xtatN = dot(xN, EnormBig)               # (N, T*F)

        # ---------------- spatial attention (computed directly as S^T) --------------
        lhs_s = dot(xtatN, proj_s_ref[s, 0])    # (N, T)
        sr = dot(xtatN, proj_s_ref[s, 1])       # (N, T)
        prod_sT = dot_bt(sr, lhs_s)             # product^T, (N, N)
        psigT = jax.nn.sigmoid(prod_sT + att_s_ref[s, 0])
        S_T = dot_bt(psigT, att_s_ref[s, 1])    # S^T, (N, N)
        S_T = S_T - jnp.max(S_T, axis=1, keepdims=True)     # softmax(S, dim=1)^T
        Se = jnp.exp(S_T)
        SnormT = Se * recip(jnp.sum(Se, axis=1, keepdims=True))

        # -------- Chebyshev graph conv with SAt: sum_k (A_k @ x) @ Theta_k ----------
        parts = [dot(chebT_ref[s, k] * SnormT, xN) for k in range(K)]   # K x (N, TF)
        stacked = jnp.concatenate(parts, axis=1)                        # (N, K*TF)
        gcn = jnp.maximum(dot(stacked, theta_ref[s]), 0.0)              # (N, T*C)

        # ------ time conv (1x3, zero pad) + residual (1x1) + ReLU + LayerNorm -------
        tc = dot(gcn, wtc_ref[s])               # (N, T*FT)
        res = dot(xN, wrbig_ref[s])             # (N, T*FT)
        y = jnp.maximum(tc + res + ln_ref[s, 0:1], 0.0)

        mean_b = dot(dot(y, mred), bcast)
        dev = y - mean_b
        var = dot(dev * dev, mred)
        inv_b = dot(jax.lax.rsqrt(var + 1e-5), bcast)
        h = dev * inv_b * ln_ref[s, 1:2] + ln_ref[s, 2:3]   # (N, T*FT)

        # ---------------- final conv (kernel (1, F_time)) ----------------
        o = dot(h, wfT_ref[s]) + bf_ref[s]      # (N, P)
        total = o if total is None else total + o

    out_ref[0] = total


# ----------------------------------------------------------------------------- wrapper
@partial(jax.jit, static_argnames=("precision",))
def astgcn_forward(x_all, kp, consts, *, precision):
    """x_all: (n_sub, B, N, F, T).  Returns (B, N, P) summed over submodules."""
    S, B, N, F, T = x_all.shape
    NF, TF = N * F, T * F
    P = kp["wfT"].shape[-1]

    # layout plumbing only (no compute): two host-side views of x
    xT = jnp.transpose(x_all, (0, 1, 4, 2, 3)).reshape(S, B, T, NF)   # time-major
    xN = jnp.transpose(x_all, (0, 1, 2, 4, 3)).reshape(S, B, N, TF)   # vertex-major

    def whole(a):  # whole-array block, constant index map -> DMA'd once, stays resident
        return pl.BlockSpec(a.shape, lambda b, _z=(0,) * a.ndim: _z)

    in_specs = [
        pl.BlockSpec((S, 1, T, NF), lambda b: (0, b, 0, 0)),   # xT (per-batch slice)
        pl.BlockSpec((S, 1, N, TF), lambda b: (0, b, 0, 0)),   # xN (per-batch slice)
        whole(kp["proj_t"]), whole(kp["att_t"]),
        whole(consts["rrow"]), whole(consts["rcol"]), whole(consts["mmask"]),
        whole(kp["proj_s"]), whole(kp["att_s"]),
        whole(kp["chebT"]), whole(kp["theta_stack"]),
        whole(kp["wtc"]), whole(kp["wrbig"]), whole(kp["ln_rows"]),
        whole(consts["mred"]), whole(consts["bcast"]),
        whole(kp["wfT"]), whole(kp["bf_row"]),
    ]

    out = pl.pallas_call(
        partial(_astgcn_kernel, precision=precision),
        grid=(B,),
        in_specs=in_specs,
        out_specs=pl.BlockSpec((1, N, P), lambda b: (b, 0, 0)),
        out_shape=jax.ShapeDtypeStruct((B, N, P), jnp.float32),
        compiler_params=pltpu.CompilerParams(dimension_semantics=("parallel",)),
    )(
        xT, xN,
        kp["proj_t"], kp["att_t"],
        consts["rrow"], consts["rcol"], consts["mmask"],
        kp["proj_s"], kp["att_s"],
        kp["chebT"], kp["theta_stack"],
        kp["wtc"], kp["wrbig"], kp["ln_rows"],
        consts["mred"], consts["bcast"],
        kp["wfT"], kp["bf_row"],
    )
    return out
    # TODO(synk): stacking multiple ASTGCNBlocks per submodule (nn.Sequential) would
    # require residual_conv in_channels to track the previous block's output width;
    # a single block per submodule is implemented, matching the reference default.


# ----------------------------------------------------------------------------- params
def _make_cheb(key, K, N):
    A = jax.random.uniform(key, (N, N), jnp.float32)
    A = 0.5 * (A + A.T) * (1.0 - jnp.eye(N, dtype=jnp.float32))
    d = jnp.sum(A, axis=1)
    L = jnp.diag(d) - A
    L_tilde = (2.0 / (2.0 * jnp.max(d))) * L - jnp.eye(N, dtype=jnp.float32)
    polys = [jnp.eye(N, dtype=jnp.float32), L_tilde]
    for _ in range(2, K):
        polys.append(2.0 * L_tilde @ polys[-1] - polys[-2])
    return jnp.stack(polys[:K], axis=0)


def init_submodule_raw(key, N, F, T, K, C, FT, P):
    ks = jax.random.split(key, 20)

    def rn(i, shape, scale=0.3):
        return (scale * jax.random.normal(ks[i], shape)).astype(jnp.float32)

    blk = {
        "U1": rn(0, (N,)), "U2": rn(1, (F, N)), "U3": rn(2, (F,)),
        "b_e": rn(3, (T, T)), "V_e": rn(4, (T, T)),
        "W1": rn(5, (T,)), "W2": rn(6, (F, T)), "W3": rn(7, (F,)),
        "b_s": rn(8, (N, N)), "V_s": rn(9, (N, N)),
        "Theta": rn(10, (K, F, C)),
        "Wt": rn(11, (FT, C, 3), 0.2), "bt": rn(12, (FT,), 0.1),
        "Wr": rn(13, (FT, F), 0.2), "br": rn(14, (FT,), 0.1),
        "gamma": 1.0 + rn(15, (T,), 0.05), "beta": rn(16, (T,), 0.05),
    }
    cheb = _make_cheb(ks[17], K, N)
    Wf = rn(18, (P, T, FT), 0.2)
    bf = rn(19, (P,), 0.1)
    return {"block": blk, "cheb": cheb, "Wf": Wf, "bf": bf}


def fold_submodule(raw, N, F, T, K, C, FT, P):
    """Host-side weight algebra: fold/expand the raw params into 2-D kernel matrices."""
    b, cheb, Wf, bf = raw["block"], raw["cheb"], raw["Wf"], raw["bf"]
    eyeT = jnp.eye(T, dtype=jnp.float32)
    wlhs = (b["U1"][:, None, None] * b["U2"][None, :, :]).reshape(N * F, N)
    u3sel = jnp.kron(jnp.eye(N, dtype=jnp.float32), b["U3"].reshape(F, 1))
    w12 = (b["W1"][:, None, None] * b["W2"][None, :, :]).reshape(T * F, T)
    w3sel = jnp.kron(eyeT, b["W3"].reshape(F, 1))
    chebT = jnp.swapaxes(cheb, 1, 2)
    # vstacked Theta for the single deep Chebyshev matmul: (K*T*F, T*C)
    theta_stack = jnp.concatenate(
        [jnp.kron(eyeT, b["Theta"][k]) for k in range(K)], axis=0)
    # block-banded time-conv matrix (1x3 conv with zero padding built in)
    wtc = jnp.zeros((T * C, T * FT), jnp.float32)
    for t in range(T):
        for d in range(3):
            tp = t + d - 1
            if 0 <= tp < T:
                wtc = wtc.at[tp * C:(tp + 1) * C, t * FT:(t + 1) * FT].set(
                    b["Wt"][:, :, d].T)
    wrbig = jnp.kron(eyeT, b["Wr"].T)
    ln_rows = jnp.stack([
        jnp.tile(b["bt"] + b["br"], T),        # bias  (time conv + residual)
        jnp.repeat(b["gamma"], FT),            # LayerNorm gamma (indexed by t)
        jnp.repeat(b["beta"], FT),             # LayerNorm beta
    ], axis=0)                                  # (3, T*FT)
    return {
        "proj_t": jnp.stack([wlhs, u3sel], axis=0),          # (2, N*F, N)
        "att_t": jnp.stack([b["b_e"], b["V_e"]], axis=0),    # (2, T, T)
        "proj_s": jnp.stack([w12, w3sel], axis=0),           # (2, T*F, T)
        "att_s": jnp.stack([b["b_s"].T, b["V_s"]], axis=0),  # (2, N, N)
        "chebT": chebT,                                      # (K, N, N)
        "theta_stack": theta_stack,                          # (K*T*F, T*C)
        "wtc": wtc,                                          # (T*C, T*FT)
        "wrbig": wrbig,                                      # (T*F, T*FT)
        "ln_rows": ln_rows,                                  # (3, T*FT)
        "wfT": jnp.transpose(Wf, (1, 2, 0)).reshape(T * FT, P),
        "bf_row": bf.reshape(1, P),
    }


def make_consts(F, T, FT):
    eyeT = jnp.eye(T, dtype=jnp.float32)
    eyeFT = jnp.eye(FT, dtype=jnp.float32)
    idx = jnp.arange(T * F) % F
    return {
        "rrow": jnp.repeat(eyeT, F, axis=0),                    # (T*F, T)
        "rcol": jnp.repeat(eyeT, F, axis=1),                    # (T, T*F)
        "mmask": (idx[:, None] == idx[None, :]).astype(jnp.float32),
        "mred": jnp.tile(eyeFT, (T, 1)) / T,                    # mean/var reducer
        "bcast": jnp.tile(eyeFT, (1, T)),                       # broadcast back over T
    }


# --------------------------------------------- pure-JAX reference (mirrors PyTorch ops)
_PREC_REF = jax.lax.Precision.HIGHEST


def _ref_submodule(x, rp):
    B, N, F, T = x.shape
    b = rp["block"]
    pr = _PREC_REF
    lsh = jnp.einsum("bnft,n->btf", x, b["U1"], precision=pr)
    lhs = jnp.einsum("btf,fn->btn", lsh, b["U2"], precision=pr)
    rhs = jnp.einsum("f,bnft->bnt", b["U3"], x, precision=pr)
    prod = jnp.einsum("btn,bnp->btp", lhs, rhs, precision=pr)
    E = jnp.einsum("ik,bkj->bij", b["V_e"],
                   jax.nn.sigmoid(prod + b["b_e"][None]), precision=pr)
    E_norm = jax.nn.softmax(E, axis=1)
    x_TAt = jnp.matmul(x.reshape(B, N * F, T), E_norm,
                       precision=pr).reshape(B, N, F, T)
    sl = jnp.einsum("bnft,t->bnf", x_TAt, b["W1"], precision=pr)
    sl = jnp.einsum("bnf,ft->bnt", sl, b["W2"], precision=pr)
    sr = jnp.swapaxes(jnp.einsum("f,bnft->bnt", b["W3"], x_TAt, precision=pr), -1, -2)
    sp = jnp.einsum("bnt,btm->bnm", sl, sr, precision=pr)
    S = jnp.einsum("nk,bkm->bnm", b["V_s"],
                   jax.nn.sigmoid(sp + b["b_s"][None]), precision=pr)
    S_norm = jax.nn.softmax(S, axis=1)
    gcn = jax.nn.relu(jnp.einsum("kmn,bmn,bmft,kfc->bnct",
                                 rp["cheb"], S_norm, x, b["Theta"], precision=pr))
    gpad = jnp.pad(gcn, ((0, 0), (0, 0), (0, 0), (1, 1)))
    tc = b["bt"][None, None, :, None]
    for d in range(3):
        tc = tc + jnp.einsum("bnct,oc->bnot", gpad[..., d:d + T], b["Wt"][:, :, d],
                             precision=pr)
    rc = jnp.einsum("bnft,of->bnot", x, b["Wr"], precision=pr) \
        + b["br"][None, None, :, None]
    y = jax.nn.relu(tc + rc)
    mean = jnp.mean(y, axis=-1, keepdims=True)
    var = jnp.mean(jnp.square(y - mean), axis=-1, keepdims=True)
    h = (y - mean) / jnp.sqrt(var + 1e-5) * b["gamma"] + b["beta"]
    return jnp.einsum("bnft,ptf->bnp", h, rp["Wf"], precision=pr) \
        + rp["bf"][None, None, :]


def _ref_forward(x_list, rparams_list):
    outs = [_ref_submodule(x, rp) for x, rp in zip(x_list, rparams_list)]
    return sum(outs[1:], outs[0])


# ----------------------------------------------------------------------------- main
if __name__ == "__main__":
    B, N, F_in, T = 2, 16, 2, 8
    K, C_cheb, F_time, P = 3, 8, 8, 4
    n_sub = 2
    # Constraint inherited from the reference PyTorch code (see module docstring).
    assert T == C_cheb == F_time

    key = jax.random.PRNGKey(0)
    k_x, k_p = jax.random.split(key)
    x_keys = jax.random.split(k_x, n_sub)
    p_keys = jax.random.split(k_p, n_sub)

    x_list = [jax.random.normal(xk, (B, N, F_in, T), jnp.float32) for xk in x_keys]
    raw_list = [init_submodule_raw(pk, N, F_in, T, K, C_cheb, F_time, P)
                for pk in p_keys]
    fold_list = [fold_submodule(r, N, F_in, T, K, C_cheb, F_time, P)
                 for r in raw_list]

    x_all = jnp.stack(x_list, axis=0)                               # (S, B, N, F, T)
    kp = {k: jnp.stack([fp[k] for fp in fold_list], axis=0) for k in fold_list[0]}
    consts = make_consts(F_in, T, F_time)

    try:
        y = jax.block_until_ready(
            astgcn_forward(x_all, kp, consts, precision=jax.lax.Precision.HIGH))
    except Exception:
        # Some JAX/Mosaic versions only lower DEFAULT/HIGHEST dot precision; fall back.
        y = jax.block_until_ready(
            astgcn_forward(x_all, kp, consts, precision=jax.lax.Precision.HIGHEST))
    assert y.shape == (B, N, P), y.shape

    y_ref = jax.block_until_ready(_ref_forward(x_list, raw_list))
    max_err = float(jnp.max(jnp.abs(y - y_ref)))
    assert max_err < 1e-3, f"mismatch vs reference: {max_err}"

    print("KERNEL_OK")
</pallas_src>

<mosaic_0001>
module attributes {stable_mosaic.version = 11 : i64} {
  func.func @_astgcn_kernel(%arg0: i32, %arg1: memref<2x1x8x32xf32, #tpu.memory_space<vmem>>, %arg2: memref<2x1x16x16xf32, #tpu.memory_space<vmem>>, %arg3: memref<2x2x32x16xf32, #tpu.memory_space<vmem>>, %arg4: memref<2x2x8x8xf32, #tpu.memory_space<vmem>>, %arg5: memref<16x8xf32, #tpu.memory_space<vmem>>, %arg6: memref<8x16xf32, #tpu.memory_space<vmem>>, %arg7: memref<16x16xf32, #tpu.memory_space<vmem>>, %arg8: memref<2x2x16x8xf32, #tpu.memory_space<vmem>>, %arg9: memref<2x2x16x16xf32, #tpu.memory_space<vmem>>, %arg10: memref<2x3x16x16xf32, #tpu.memory_space<vmem>>, %arg11: memref<2x48x64xf32, #tpu.memory_space<vmem>>, %arg12: memref<2x64x64xf32, #tpu.memory_space<vmem>>, %arg13: memref<2x16x64xf32, #tpu.memory_space<vmem>>, %arg14: memref<2x3x64xf32, #tpu.memory_space<vmem>>, %arg15: memref<64x8xf32, #tpu.memory_space<vmem>>, %arg16: memref<8x64xf32, #tpu.memory_space<vmem>>, %arg17: memref<2x64x4xf32, #tpu.memory_space<vmem>>, %arg18: memref<2x1x4xf32, #tpu.memory_space<vmem>>, %arg19: memref<1x16x4xf32, #tpu.memory_space<vmem>>) attributes {dimension_semantics = [#tpu.dimension_semantics<parallel>], iteration_bounds = array<i64: 2>, scalar_prefetch = 0 : i64, scratch_operands = 0 : i64, tpu.core_type = #tpu.core_type<tc>, window_params = [{transform_indices = @transform_0, window_bounds = array<i64: 2, 1, 8, 32>}, {transform_indices = @transform_1, window_bounds = array<i64: 2, 1, 16, 16>}, {pipeline_mode = #tpu.pipeline_mode<synchronous>, transform_indices = @transform_2, window_bounds = array<i64: 2, 2, 32, 16>}, {pipeline_mode = #tpu.pipeline_mode<synchronous>, transform_indices = @transform_3, window_bounds = array<i64: 2, 2, 8, 8>}, {pipeline_mode = #tpu.pipeline_mode<synchronous>, transform_indices = @transform_4, window_bounds = array<i64: 16, 8>}, {pipeline_mode = #tpu.pipeline_mode<synchronous>, transform_indices = @transform_5, window_bounds = array<i64: 8, 16>}, {pipeline_mode = #tpu.pipeline_mode<synchronous>, transform_indices = @transform_6, window_bounds = array<i64: 16, 16>}, {pipeline_mode = #tpu.pipeline_mode<synchronous>, transform_indices = @transform_7, window_bounds = array<i64: 2, 2, 16, 8>}, {pipeline_mode = #tpu.pipeline_mode<synchronous>, transform_indices = @transform_8, window_bounds = array<i64: 2, 2, 16, 16>}, {pipeline_mode = #tpu.pipeline_mode<synchronous>, transform_indices = @transform_9, window_bounds = array<i64: 2, 3, 16, 16>}, {pipeline_mode = #tpu.pipeline_mode<synchronous>, transform_indices = @transform_10, window_bounds = array<i64: 2, 48, 64>}, {pipeline_mode = #tpu.pipeline_mode<synchronous>, transform_indices = @transform_11, window_bounds = array<i64: 2, 64, 64>}, {pipeline_mode = #tpu.pipeline_mode<synchronous>, transform_indices = @transform_12, window_bounds = array<i64: 2, 16, 64>}, {pipeline_mode = #tpu.pipeline_mode<synchronous>, transform_indices = @transform_13, window_bounds = array<i64: 2, 3, 64>}, {pipeline_mode = #tpu.pipeline_mode<synchronous>, transform_indices = @transform_14, window_bounds = array<i64: 64, 8>}, {pipeline_mode = #tpu.pipeline_mode<synchronous>, transform_indices = @transform_15, window_bounds = array<i64: 8, 64>}, {pipeline_mode = #tpu.pipeline_mode<synchronous>, transform_indices = @transform_16, window_bounds = array<i64: 2, 64, 4>}, {pipeline_mode = #tpu.pipeline_mode<synchronous>, transform_indices = @transform_17, window_bounds = array<i64: 2, 1, 4>}, {transform_indices = @transform_18, window_bounds = array<i64: 1, 16, 4>}]} {
    %c0 = arith.constant 0 : index
    %c0_0 = arith.constant 0 : index
    %0 = vector.load %arg5[%c0, %c0_0] : memref<16x8xf32, #tpu.memory_space<vmem>>, vector<16x8xf32>
    %c0_1 = arith.constant 0 : index
    %c0_2 = arith.constant 0 : index
    %1 = vector.load %arg6[%c0_1, %c0_2] : memref<8x16xf32, #tpu.memory_space<vmem>>, vector<8x16xf32>
    %c0_3 = arith.constant 0 : index
    %c0_4 = arith.constant 0 : index
    %2 = vector.load %arg7[%c0_3, %c0_4] : memref<16x16xf32, #tpu.memory_space<vmem>>, vector<16x16xf32>
    %c0_5 = arith.constant 0 : index
    %c0_6 = arith.constant 0 : index
    %3 = vector.load %arg15[%c0_5, %c0_6] : memref<64x8xf32, #tpu.memory_space<vmem>>, vector<64x8xf32>
    %c0_7 = arith.constant 0 : index
    %c0_8 = arith.constant 0 : index
    %4 = vector.load %arg16[%c0_7, %c0_8] : memref<8x64xf32, #tpu.memory_space<vmem>>, vector<8x64xf32>
    %c0_9 = arith.constant 0 : index
    %c0_10 = arith.constant 0 : index
    %c0_11 = arith.constant 0 : index
    %c0_12 = arith.constant 0 : index
    %5 = vector.load %arg1[%c0_9, %c0_10, %c0_11, %c0_12] : memref<2x1x8x32xf32, #tpu.memory_space<vmem>>, vector<1x1x8x32xf32>
    %6 = vector.shape_cast %5 : vector<1x1x8x32xf32> to vector<8x32xf32>
    %c0_13 = arith.constant 0 : index
    %c0_14 = arith.constant 0 : index
    %c0_15 = arith.constant 0 : index
    %c0_16 = arith.constant 0 : index
    %7 = vector.load %arg2[%c0_13, %c0_14, %c0_15, %c0_16] : memref<2x1x16x16xf32, #tpu.memory_space<vmem>>, vector<1x1x16x16xf32>
    %8 = vector.shape_cast %7 : vector<1x1x16x16xf32> to vector<16x16xf32>
    %c0_17 = arith.constant 0 : index
    %c0_18 = arith.constant 0 : index
    %c0_19 = arith.constant 0 : index
    %c0_20 = arith.constant 0 : index
    %9 = vector.load %arg3[%c0_17, %c0_18, %c0_19, %c0_20] : memref<2x2x32x16xf32, #tpu.memory_space<vmem>>, vector<1x1x32x16xf32>
    %10 = vector.shape_cast %9 : vector<1x1x32x16xf32> to vector<32x16xf32>
    %cst = arith.constant dense<0.000000e+00> : vector<8x16xf32>
    %11 = tpu.matmul %6, %10, %cst {dimension_numbers = #tpu.dot_dimension_numbers<[1], [0], [0], [1], [0, 0, 1, 1], [], []>, precision = #tpu.contract_precision<fp32>} : vector<8x32xf32>, vector<32x16xf32>, vector<8x16xf32> -> vector<8x16xf32>
    %c0_21 = arith.constant 0 : index
    %c1 = arith.constant 1 : index
    %c0_22 = arith.constant 0 : index
    %c0_23 = arith.constant 0 : index
    %12 = vector.load %arg3[%c0_21, %c1, %c0_22, %c0_23] : memref<2x2x32x16xf32, #tpu.memory_space<vmem>>, vector<1x1x32x16xf32>
    %13 = vector.shape_cast %12 : vector<1x1x32x16xf32> to vector<32x16xf32>
    %cst_24 = arith.constant dense<0.000000e+00> : vector<8x16xf32>
    %14 = tpu.matmul %6, %13, %cst_24 {dimension_numbers = #tpu.dot_dimension_numbers<[1], [0], [0], [1], [0, 0, 1, 1], [], []>, precision = #tpu.contract_precision<fp32>} : vector<8x32xf32>, vector<32x16xf32>, vector<8x16xf32> -> vector<8x16xf32>
    %cst_25 = arith.constant dense<0.000000e+00> : vector<8x8xf32>
    %15 = tpu.matmul %11, %14, %cst_25 {dimension_numbers = #tpu.dot_dimension_numbers<[1], [1], [0], [0], [0, 0, 1, 0], [], []>, precision = #tpu.contract_precision<fp32>} : vector<8x16xf32>, vector<8x16xf32>, vector<8x8xf32> -> vector<8x8xf32>
    %c0_26 = arith.constant 0 : index
    %c1_27 = arith.constant 1 : index
    %c0_28 = arith.constant 0 : index
    %c0_29 = arith.constant 0 : index
    %16 = vector.load %arg4[%c0_26, %c1_27, %c0_28, %c0_29] : memref<2x2x8x8xf32, #tpu.memory_space<vmem>>, vector<1x1x8x8xf32>
    %17 = vector.shape_cast %16 : vector<1x1x8x8xf32> to vector<8x8xf32>
    %c0_30 = arith.constant 0 : index
    %c0_31 = arith.constant 0 : index
    %c0_32 = arith.constant 0 : index
    %c0_33 = arith.constant 0 : index
    %18 = vector.load %arg4[%c0_30, %c0_31, %c0_32, %c0_33] : memref<2x2x8x8xf32, #tpu.memory_space<vmem>>, vector<1x1x8x8xf32>
    %19 = vector.shape_cast %18 : vector<1x1x8x8xf32> to vector<8x8xf32>
    %20 = arith.addf %15, %19 : vector<8x8xf32>
    %21 = arith.negf %20 : vector<8x8xf32>
    %22 = math.exp %21 : vector<8x8xf32>
    %cst_34 = arith.constant 1.000000e+00 : f32
    %23 = vector.broadcast %cst_34 : f32 to vector<8x8xf32>
    %24 = arith.addf %23, %22 : vector<8x8xf32>
    %25 = arith.divf %23, %24 : vector<8x8xf32>
    %cst_35 = arith.constant dense<0.000000e+00> : vector<8x8xf32>
    %26 = tpu.matmul %17, %25, %cst_35 {dimension_numbers = #tpu.dot_dimension_numbers<[1], [0], [0], [1], [0, 0, 1, 1], [], []>, precision = #tpu.contract_precision<fp32>} : vector<8x8xf32>, vector<8x8xf32>, vector<8x8xf32> -> vector<8x8xf32>
    %cst_36 = arith.constant dense<0xFF800000> : vector<8xf32>
    %27 = vector.multi_reduction <maximumf>, %26, %cst_36 [0] : vector<8x8xf32> to vector<8xf32>
    %28 = vector.shape_cast %27 : vector<8xf32> to vector<1x8xf32>
    %29 = vector.broadcast %28 : vector<1x8xf32> to vector<8x8xf32>
    %30 = arith.subf %26, %29 : vector<8x8xf32>
    %31 = math.exp %30 : vector<8x8xf32>
    %cst_37 = arith.constant dense<0.000000e+00> : vector<8xf32>
    %32 = vector.multi_reduction <add>, %31, %cst_37 [0] : vector<8x8xf32> to vector<8xf32>
    %33 = vector.shape_cast %32 : vector<8xf32> to vector<1x8xf32>
    %34 = tpu.reciprocal %33 {approx = true} : vector<1x8xf32> -> vector<1x8xf32>
    %35 = arith.mulf %33, %34 : vector<1x8xf32>
    %cst_38 = arith.constant 2.000000e+00 : f32
    %36 = vector.broadcast %cst_38 : f32 to vector<1x8xf32>
    %37 = arith.subf %36, %35 : vector<1x8xf32>
    %38 = arith.mulf %34, %37 : vector<1x8xf32>
    %39 = vector.broadcast %38 : vector<1x8xf32> to vector<8x8xf32>
    %40 = arith.mulf %31, %39 : vector<8x8xf32>
    %cst_39 = arith.constant dense<0.000000e+00> : vector<16x8xf32>
    %41 = tpu.matmul %0, %40, %cst_39 {dimension_numbers = #tpu.dot_dimension_numbers<[1], [0], [0], [1], [0, 0, 1, 1], [], []>, precision = #tpu.contract_precision<fp32>} : vector<16x8xf32>, vector<8x8xf32>, vector<16x8xf32> -> vector<16x8xf32>
    %cst_40 = arith.constant dense<0.000000e+00> : vector<16x16xf32>
    %42 = tpu.matmul %41, %1, %cst_40 {dimension_numbers = #tpu.dot_dimension_numbers<[1], [0], [0], [1], [0, 0, 1, 1], [], []>, precision = #tpu.contract_precision<fp32>} : vector<16x8xf32>, vector<8x16xf32>, vector<16x16xf32> -> vector<16x16xf32>
    %43 = arith.mulf %42, %2 : vector<16x16xf32>
    %cst_41 = arith.constant dense<0.000000e+00> : vector<16x16xf32>
    %44 = tpu.matmul %8, %43, %cst_41 {dimension_numbers = #tpu.dot_dimension_numbers<[1], [0], [0], [1], [0, 0, 1, 1], [], []>, precision = #tpu.contract_precision<fp32>} : vector<16x16xf32>, vector<16x16xf32>, vector<16x16xf32> -> vector<16x16xf32>
    %c0_42 = arith.constant 0 : index
    %c0_43 = arith.constant 0 : index
    %c0_44 = arith.constant 0 : index
    %c0_45 = arith.constant 0 : index
    %45 = vector.load %arg8[%c0_42, %c0_43, %c0_44, %c0_45] : memref<2x2x16x8xf32, #tpu.memory_space<vmem>>, vector<1x1x16x8xf32>
    %46 = vector.shape_cast %45 : vector<1x1x16x8xf32> to vector<16x8xf32>
    %cst_46 = arith.constant dense<0.000000e+00> : vector<16x8xf32>
    %47 = tpu.matmul %44, %46, %cst_46 {dimension_numbers = #tpu.dot_dimension_numbers<[1], [0], [0], [1], [0, 0, 1, 1], [], []>, precision = #tpu.contract_precision<fp32>} : vector<16x16xf32>, vector<16x8xf32>, vector<16x8xf32> -> vector<16x8xf32>
    %c0_47 = arith.constant 0 : index
    %c1_48 = arith.constant 1 : index
    %c0_49 = arith.constant 0 : index
    %c0_50 = arith.constant 0 : index
    %48 = vector.load %arg8[%c0_47, %c1_48, %c0_49, %c0_50] : memref<2x2x16x8xf32, #tpu.memory_space<vmem>>, vector<1x1x16x8xf32>
    %49 = vector.shape_cast %48 : vector<1x1x16x8xf32> to vector<16x8xf32>
    %cst_51 = arith.constant dense<0.000000e+00> : vector<16x8xf32>
    %50 = tpu.matmul %44, %49, %cst_51 {dimension_numbers = #tpu.dot_dimension_numbers<[1], [0], [0], [1], [0, 0, 1, 1], [], []>, precision = #tpu.contract_precision<fp32>} : vector<16x16xf32>, vector<16x8xf32>, vector<16x8xf32> -> vector<16x8xf32>
    %cst_52 = arith.constant dense<0.000000e+00> : vector<16x16xf32>
    %51 = tpu.matmul %50, %47, %cst_52 {dimension_numbers = #tpu.dot_dimension_numbers<[1], [1], [0], [0], [0, 0, 1, 0], [], []>, precision = #tpu.contract_precision<fp32>} : vector<16x8xf32>, vector<16x8xf32>, vector<16x16xf32> -> vector<16x16xf32>
    %c0_53 = arith.constant 0 : index
    %c0_54 = arith.constant 0 : index
    %c0_55 = arith.constant 0 : index
    %c0_56 = arith.constant 0 : index
    %52 = vector.load %arg9[%c0_53, %c0_54, %c0_55, %c0_56] : memref<2x2x16x16xf32, #tpu.memory_space<vmem>>, vector<1x1x16x16xf32>
    %53 = vector.shape_cast %52 : vector<1x1x16x16xf32> to vector<16x16xf32>
    %54 = arith.addf %51, %53 : vector<16x16xf32>
    %55 = arith.negf %54 : vector<16x16xf32>
    %56 = math.exp %55 : vector<16x16xf32>
    %cst_57 = arith.constant 1.000000e+00 : f32
    %57 = vector.broadcast %cst_57 : f32 to vector<16x16xf32>
    %58 = arith.addf %57, %56 : vector<16x16xf32>
    %59 = arith.divf %57, %58 : vector<16x16xf32>
    %c0_58 = arith.constant 0 : index
    %c1_59 = arith.constant 1 : index
    %c0_60 = arith.constant 0 : index
    %c0_61 = arith.constant 0 : index
    %60 = vector.load %arg9[%c0_58, %c1_59, %c0_60, %c0_61] : memref<2x2x16x16xf32, #tpu.memory_space<vmem>>, vector<1x1x16x16xf32>
    %61 = vector.shape_cast %60 : vector<1x1x16x16xf32> to vector<16x16xf32>
    %cst_62 = arith.constant dense<0.000000e+00> : vector<16x16xf32>
    %62 = tpu.matmul %59, %61, %cst_62 {dimension_numbers = #tpu.dot_dimension_numbers<[1], [1], [0], [0], [0, 0, 1, 0], [], []>, precision = #tpu.contract_precision<fp32>} : vector<16x16xf32>, vector<16x16xf32>, vector<16x16xf32> -> vector<16x16xf32>
    %cst_63 = arith.constant dense<0xFF800000> : vector<16xf32>
    %63 = vector.multi_reduction <maximumf>, %62, %cst_63 [1] : vector<16x16xf32> to vector<16xf32>
    %64 = vector.shape_cast %63 : vector<16xf32> to vector<16x1xf32>
    %65 = vector.broadcast %64 : vector<16x1xf32> to vector<16x16xf32>
    %66 = arith.subf %62, %65 : vector<16x16xf32>
    %67 = math.exp %66 : vector<16x16xf32>
    %cst_64 = arith.constant dense<0.000000e+00> : vector<16xf32>
    %68 = vector.multi_reduction <add>, %67, %cst_64 [1] : vector<16x16xf32> to vector<16xf32>
    %69 = vector.shape_cast %68 : vector<16xf32> to vector<16x1xf32>
    %70 = tpu.reciprocal %69 {approx = true} : vector<16x1xf32> -> vector<16x1xf32>
    %71 = arith.mulf %69, %70 : vector<16x1xf32>
    %cst_65 = arith.constant 2.000000e+00 : f32
    %72 = vector.broadcast %cst_65 : f32 to vector<16x1xf32>
    %73 = arith.subf %72, %71 : vector<16x1xf32>
    %74 = arith.mulf %70, %73 : vector<16x1xf32>
    %75 = vector.broadcast %74 : vector<16x1xf32> to vector<16x16xf32>
    %76 = arith.mulf %67, %75 : vector<16x16xf32>
    %c0_66 = arith.constant 0 : index
    %c0_67 = arith.constant 0 : index
    %c0_68 = arith.constant 0 : index
    %c0_69 = arith.constant 0 : index
    %77 = vector.load %arg10[%c0_66, %c0_67, %c0_68, %c0_69] : memref<2x3x16x16xf32, #tpu.memory_space<vmem>>, vector<1x1x16x16xf32>
    %78 = vector.shape_cast %77 : vector<1x1x16x16xf32> to vector<16x16xf32>
    %79 = arith.mulf %78, %76 : vector<16x16xf32>
    %cst_70 = arith.constant dense<0.000000e+00> : vector<16x16xf32>
    %80 = tpu.matmul %79, %8, %cst_70 {dimension_numbers = #tpu.dot_dimension_numbers<[1], [0], [0], [1], [0, 0, 1, 1], [], []>, precision = #tpu.contract_precision<fp32>} : vector<16x16xf32>, vector<16x16xf32>, vector<16x16xf32> -> vector<16x16xf32>
    %c0_71 = arith.constant 0 : index
    %c1_72 = arith.constant 1 : index
    %c0_73 = arith.constant 0 : index
    %c0_74 = arith.constant 0 : index
    %81 = vector.load %arg10[%c0_71, %c1_72, %c0_73, %c0_74] : memref<2x3x16x16xf32, #tpu.memory_space<vmem>>, vector<1x1x16x16xf32>
    %82 = vector.shape_cast %81 : vector<1x1x16x16xf32> to vector<16x16xf32>
    %83 = arith.mulf %82, %76 : vector<16x16xf32>
    %cst_75 = arith.constant dense<0.000000e+00> : vector<16x16xf32>
    %84 = tpu.matmul %83, %8, %cst_75 {dimension_numbers = #tpu.dot_dimension_numbers<[1], [0], [0], [1], [0, 0, 1, 1], [], []>, precision = #tpu.contract_precision<fp32>} : vector<16x16xf32>, vector<16x16xf32>, vector<16x16xf32> -> vector<16x16xf32>
    %c0_76 = arith.constant 0 : index
    %c2 = arith.constant 2 : index
    %c0_77 = arith.constant 0 : index
    %c0_78 = arith.constant 0 : index
    %85 = vector.load %arg10[%c0_76, %c2, %c0_77, %c0_78] : memref<2x3x16x16xf32, #tpu.memory_space<vmem>>, vector<1x1x16x16xf32>
    %86 = vector.shape_cast %85 : vector<1x1x16x16xf32> to vector<16x16xf32>
    %87 = arith.mulf %86, %76 : vector<16x16xf32>
    %cst_79 = arith.constant dense<0.000000e+00> : vector<16x16xf32>
    %88 = tpu.matmul %87, %8, %cst_79 {dimension_numbers = #tpu.dot_dimension_numbers<[1], [0], [0], [1], [0, 0, 1, 1], [], []>, precision = #tpu.contract_precision<fp32>} : vector<16x16xf32>, vector<16x16xf32>, vector<16x16xf32> -> vector<16x16xf32>
    %89 = tpu.concatenate %80, %84, %88 in 1 : vector<16x16xf32>, vector<16x16xf32>, vector<16x16xf32> -> vector<16x48xf32>
    %c0_80 = arith.constant 0 : index
    %c0_81 = arith.constant 0 : index
    %c0_82 = arith.constant 0 : index
    %90 = vector.load %arg11[%c0_80, %c0_81, %c0_82] : memref<2x48x64xf32, #tpu.memory_space<vmem>>, vector<1x48x64xf32>
    %91 = vector.shape_cast %90 : vector<1x48x64xf32> to vector<48x64xf32>
    %cst_83 = arith.constant dense<0.000000e+00> : vector<16x64xf32>
    %92 = tpu.matmul %89, %91, %cst_83 {dimension_numbers = #tpu.dot_dimension_numbers<[1], [0], [0], [1], [0, 0, 1, 1], [], []>, precision = #tpu.contract_precision<fp32>} : vector<16x48xf32>, vector<48x64xf32>, vector<16x64xf32> -> vector<16x64xf32>
    %cst_84 = arith.constant 0.000000e+00 : f32
    %93 = vector.broadcast %cst_84 : f32 to vector<16x64xf32>
    %94 = arith.maximumf %92, %93 : vector<16x64xf32>
    %c0_85 = arith.constant 0 : index
    %c0_86 = arith.constant 0 : index
    %c0_87 = arith.constant 0 : index
    %95 = vector.load %arg12[%c0_85, %c0_86, %c0_87] : memref<2x64x64xf32, #tpu.memory_space<vmem>>, vector<1x64x64xf32>
    %96 = vector.shape_cast %95 : vector<1x64x64xf32> to vector<64x64xf32>
    %cst_88 = arith.constant dense<0.000000e+00> : vector<16x64xf32>
    %97 = tpu.matmul %94, %96, %cst_88 {dimension_numbers = #tpu.dot_dimension_numbers<[1], [0], [0], [1], [0, 0, 1, 1], [], []>, precision = #tpu.contract_precision<fp32>} : vector<16x64xf32>, vector<64x64xf32>, vector<16x64xf32> -> vector<16x64xf32>
    %c0_89 = arith.constant 0 : index
    %c0_90 = arith.constant 0 : index
    %c0_91 = arith.constant 0 : index
    %98 = vector.load %arg13[%c0_89, %c0_90, %c0_91] : memref<2x16x64xf32, #tpu.memory_space<vmem>>, vector<1x16x64xf32>
    %99 = vector.shape_cast %98 : vector<1x16x64xf32> to vector<16x64xf32>
    %cst_92 = arith.constant dense<0.000000e+00> : vector<16x64xf32>
    %100 = tpu.matmul %8, %99, %cst_92 {dimension_numbers = #tpu.dot_dimension_numbers<[1], [0], [0], [1], [0, 0, 1, 1], [], []>, precision = #tpu.contract_precision<fp32>} : vector<16x16xf32>, vector<16x64xf32>, vector<16x64xf32> -> vector<16x64xf32>
    %101 = arith.addf %97, %100 : vector<16x64xf32>
    %c0_93 = arith.constant 0 : index
    %c0_94 = arith.constant 0 : index
    %c0_95 = arith.constant 0 : index
    %102 = vector.load %arg14[%c0_93, %c0_94, %c0_95] : memref<2x3x64xf32, #tpu.memory_space<vmem>>, vector<1x1x64xf32>
    %103 = vector.shape_cast %102 : vector<1x1x64xf32> to vector<1x64xf32>
    %104 = vector.broadcast %103 : vector<1x64xf32> to vector<16x64xf32>
    %105 = arith.addf %101, %104 : vector<16x64xf32>
    %cst_96 = arith.constant 0.000000e+00 : f32
    %106 = vector.broadcast %cst_96 : f32 to vector<16x64xf32>
    %107 = arith.maximumf %105, %106 : vector<16x64xf32>
    %cst_97 = arith.constant dense<0.000000e+00> : vector<16x8xf32>
    %108 = tpu.matmul %107, %3, %cst_97 {dimension_numbers = #tpu.dot_dimension_numbers<[1], [0], [0], [1], [0, 0, 1, 1], [], []>, precision = #tpu.contract_precision<fp32>} : vector<16x64xf32>, vector<64x8xf32>, vector<16x8xf32> -> vector<16x8xf32>
    %cst_98 = arith.constant dense<0.000000e+00> : vector<16x64xf32>
    %109 = tpu.matmul %108, %4, %cst_98 {dimension_numbers = #tpu.dot_dimension_numbers<[1], [0], [0], [1], [0, 0, 1, 1], [], []>, precision = #tpu.contract_precision<fp32>} : vector<16x8xf32>, vector<8x64xf32>, vector<16x64xf32> -> vector<16x64xf32>
    %110 = arith.subf %107, %109 : vector<16x64xf32>
    %111 = arith.mulf %110, %110 : vector<16x64xf32>
    %cst_99 = arith.constant dense<0.000000e+00> : vector<16x8xf32>
    %112 = tpu.matmul %111, %3, %cst_99 {dimension_numbers = #tpu.dot_dimension_numbers<[1], [0], [0], [1], [0, 0, 1, 1], [], []>, precision = #tpu.contract_precision<fp32>} : vector<16x64xf32>, vector<64x8xf32>, vector<16x8xf32> -> vector<16x8xf32>
    %cst_100 = arith.constant 9.99999974E-6 : f32
    %113 = vector.broadcast %cst_100 : f32 to vector<16x8xf32>
    %114 = arith.addf %112, %113 : vector<16x8xf32>
    %115 = math.rsqrt %114 : vector<16x8xf32>
    %cst_101 = arith.constant dense<0.000000e+00> : vector<16x64xf32>
    %116 = tpu.matmul %115, %4, %cst_101 {dimension_numbers = #tpu.dot_dimension_numbers<[1], [0], [0], [1], [0, 0, 1, 1], [], []>, precision = #tpu.contract_precision<fp32>} : vector<16x8xf32>, vector<8x64xf32>, vector<16x64xf32> -> vector<16x64xf32>
    %117 = arith.mulf %110, %116 : vector<16x64xf32>
    %c0_102 = arith.constant 0 : index
    %c1_103 = arith.constant 1 : index
    %c0_104 = arith.constant 0 : index
    %118 = vector.load %arg14[%c0_102, %c1_103, %c0_104] : memref<2x3x64xf32, #tpu.memory_space<vmem>>, vector<1x1x64xf32>
    %119 = vector.shape_cast %118 : vector<1x1x64xf32> to vector<1x64xf32>
    %120 = vector.broadcast %119 : vector<1x64xf32> to vector<16x64xf32>
    %121 = arith.mulf %117, %120 : vector<16x64xf32>
    %c0_105 = arith.constant 0 : index
    %c2_106 = arith.constant 2 : index
    %c0_107 = arith.constant 0 : index
    %122 = vector.load %arg14[%c0_105, %c2_106, %c0_107] : memref<2x3x64xf32, #tpu.memory_space<vmem>>, vector<1x1x64xf32>
    %123 = vector.shape_cast %122 : vector<1x1x64xf32> to vector<1x64xf32>
    %124 = vector.broadcast %123 : vector<1x64xf32> to vector<16x64xf32>
    %125 = arith.addf %121, %124 : vector<16x64xf32>
    %c0_108 = arith.constant 0 : index
    %c0_109 = arith.constant 0 : index
    %c0_110 = arith.constant 0 : index
    %126 = vector.load %arg17[%c0_108, %c0_109, %c0_110] : memref<2x64x4xf32, #tpu.memory_space<vmem>>, vector<1x64x4xf32>
    %127 = vector.shape_cast %126 : vector<1x64x4xf32> to vector<64x4xf32>
    %cst_111 = arith.constant dense<0.000000e+00> : vector<16x4xf32>
    %128 = tpu.matmul %125, %127, %cst_111 {dimension_numbers = #tpu.dot_dimension_numbers<[1], [0], [0], [1], [0, 0, 1, 1], [], []>, precision = #tpu.contract_precision<fp32>} : vector<16x64xf32>, vector<64x4xf32>, vector<16x4xf32> -> vector<16x4xf32>
    %c0_112 = arith.constant 0 : index
    %c0_113 = arith.constant 0 : index
    %c0_114 = arith.constant 0 : index
    %129 = vector.load %arg18[%c0_112, %c0_113, %c0_114] : memref<2x1x4xf32, #tpu.memory_space<vmem>>, vector<1x1x4xf32>
    %130 = vector.shape_cast %129 : vector<1x1x4xf32> to vector<1x4xf32>
    %131 = vector.broadcast %130 : vector<1x4xf32> to vector<16x4xf32>
    %132 = arith.addf %128, %131 : vector<16x4xf32>
    %c1_115 = arith.constant 1 : index
    %c0_116 = arith.constant 0 : index
    %c0_117 = arith.constant 0 : index
    %c0_118 = arith.constant 0 : index
    %133 = vector.load %arg1[%c1_115, %c0_116, %c0_117, %c0_118] : memref<2x1x8x32xf32, #tpu.memory_space<vmem>>, vector<1x1x8x32xf32>
    %134 = vector.shape_cast %133 : vector<1x1x8x32xf32> to vector<8x32xf32>
    %c1_119 = arith.constant 1 : index
    %c0_120 = arith.constant 0 : index
    %c0_121 = arith.constant 0 : index
    %c0_122 = arith.constant 0 : index
    %135 = vector.load %arg2[%c1_119, %c0_120, %c0_121, %c0_122] : memref<2x1x16x16xf32, #tpu.memory_space<vmem>>, vector<1x1x16x16xf32>
    %136 = vector.shape_cast %135 : vector<1x1x16x16xf32> to vector<16x16xf32>
    %c1_123 = arith.constant 1 : index
    %c0_124 = arith.constant 0 : index
    %c0_125 = arith.constant 0 : index
    %c0_126 = arith.constant 0 : index
    %137 = vector.load %arg3[%c1_123, %c0_124, %c0_125, %c0_126] : memref<2x2x32x16xf32, #tpu.memory_space<vmem>>, vector<1x1x32x16xf32>
    %138 = vector.shape_cast %137 : vector<1x1x32x16xf32> to vector<32x16xf32>
    %cst_127 = arith.constant dense<0.000000e+00> : vector<8x16xf32>
    %139 = tpu.matmul %134, %138, %cst_127 {dimension_numbers = #tpu.dot_dimension_numbers<[1], [0], [0], [1], [0, 0, 1, 1], [], []>, precision = #tpu.contract_precision<fp32>} : vector<8x32xf32>, vector<32x16xf32>, vector<8x16xf32> -> vector<8x16xf32>
    %c1_128 = arith.constant 1 : index
    %c1_129 = arith.constant 1 : index
    %c0_130 = arith.constant 0 : index
    %c0_131 = arith.constant 0 : index
    %140 = vector.load %arg3[%c1_128, %c1_129, %c0_130, %c0_131] : memref<2x2x32x16xf32, #tpu.memory_space<vmem>>, vector<1x1x32x16xf32>
    %141 = vector.shape_cast %140 : vector<1x1x32x16xf32> to vector<32x16xf32>
    %cst_132 = arith.constant dense<0.000000e+00> : vector<8x16xf32>
    %142 = tpu.matmul %134, %141, %cst_132 {dimension_numbers = #tpu.dot_dimension_numbers<[1], [0], [0], [1], [0, 0, 1, 1], [], []>, precision = #tpu.contract_precision<fp32>} : vector<8x32xf32>, vector<32x16xf32>, vector<8x16xf32> -> vector<8x16xf32>
    %cst_133 = arith.constant dense<0.000000e+00> : vector<8x8xf32>
    %143 = tpu.matmul %139, %142, %cst_133 {dimension_numbers = #tpu.dot_dimension_numbers<[1], [1], [0], [0], [0, 0, 1, 0], [], []>, precision = #tpu.contract_precision<fp32>} : vector<8x16xf32>, vector<8x16xf32>, vector<8x8xf32> -> vector<8x8xf32>
    %c1_134 = arith.constant 1 : index
    %c1_135 = arith.constant 1 : index
    %c0_136 = arith.constant 0 : index
    %c0_137 = arith.constant 0 : index
    %144 = vector.load %arg4[%c1_134, %c1_135, %c0_136, %c0_137] : memref<2x2x8x8xf32, #tpu.memory_space<vmem>>, vector<1x1x8x8xf32>
    %145 = vector.shape_cast %144 : vector<1x1x8x8xf32> to vector<8x8xf32>
    %c1_138 = arith.constant 1 : index
    %c0_139 = arith.constant 0 : index
    %c0_140 = arith.constant 0 : index
    %c0_141 = arith.constant 0 : index
    %146 = vector.load %arg4[%c1_138, %c0_139, %c0_140, %c0_141] : memref<2x2x8x8xf32, #tpu.memory_space<vmem>>, vector<1x1x8x8xf32>
    %147 = vector.shape_cast %146 : vector<1x1x8x8xf32> to vector<8x8xf32>
    %148 = arith.addf %143, %147 : vector<8x8xf32>
    %149 = arith.negf %148 : vector<8x8xf32>
    %150 = math.exp %149 : vector<8x8xf32>
    %cst_142 = arith.constant 1.000000e+00 : f32
    %151 = vector.broadcast %cst_142 : f32 to vector<8x8xf32>
    %152 = arith.addf %151, %150 : vector<8x8xf32>
    %153 = arith.divf %151, %152 : vector<8x8xf32>
    %cst_143 = arith.constant dense<0.000000e+00> : vector<8x8xf32>
    %154 = tpu.matmul %145, %153, %cst_143 {dimension_numbers = #tpu.dot_dimension_numbers<[1], [0], [0], [1], [0, 0, 1, 1], [], []>, precision = #tpu.contract_precision<fp32>} : vector<8x8xf32>, vector<8x8xf32>, vector<8x8xf32> -> vector<8x8xf32>
    %cst_144 = arith.constant dense<0xFF800000> : vector<8xf32>
    %155 = vector.multi_reduction <maximumf>, %154, %cst_144 [0] : vector<8x8xf32> to vector<8xf32>
    %156 = vector.shape_cast %155 : vector<8xf32> to vector<1x8xf32>
    %157 = vector.broadcast %156 : vector<1x8xf32> to vector<8x8xf32>
    %158 = arith.subf %154, %157 : vector<8x8xf32>
    %159 = math.exp %158 : vector<8x8xf32>
    %cst_145 = arith.constant dense<0.000000e+00> : vector<8xf32>
    %160 = vector.multi_reduction <add>, %159, %cst_145 [0] : vector<8x8xf32> to vector<8xf32>
    %161 = vector.shape_cast %160 : vector<8xf32> to vector<1x8xf32>
    %162 = tpu.reciprocal %161 {approx = true} : vector<1x8xf32> -> vector<1x8xf32>
    %163 = arith.mulf %161, %162 : vector<1x8xf32>
    %cst_146 = arith.constant 2.000000e+00 : f32
    %164 = vector.broadcast %cst_146 : f32 to vector<1x8xf32>
    %165 = arith.subf %164, %163 : vector<1x8xf32>
    %166 = arith.mulf %162, %165 : vector<1x8xf32>
    %167 = vector.broadcast %166 : vector<1x8xf32> to vector<8x8xf32>
    %168 = arith.mulf %159, %167 : vector<8x8xf32>
    %cst_147 = arith.constant dense<0.000000e+00> : vector<16x8xf32>
    %169 = tpu.matmul %0, %168, %cst_147 {dimension_numbers = #tpu.dot_dimension_numbers<[1], [0], [0], [1], [0, 0, 1, 1], [], []>, precision = #tpu.contract_precision<fp32>} : vector<16x8xf32>, vector<8x8xf32>, vector<16x8xf32> -> vector<16x8xf32>
    %cst_148 = arith.constant dense<0.000000e+00> : vector<16x16xf32>
    %170 = tpu.matmul %169, %1, %cst_148 {dimension_numbers = #tpu.dot_dimension_numbers<[1], [0], [0], [1], [0, 0, 1, 1], [], []>, precision = #tpu.contract_precision<fp32>} : vector<16x8xf32>, vector<8x16xf32>, vector<16x16xf32> -> vector<16x16xf32>
    %171 = arith.mulf %170, %2 : vector<16x16xf32>
    %cst_149 = arith.constant dense<0.000000e+00> : vector<16x16xf32>
    %172 = tpu.matmul %136, %171, %cst_149 {dimension_numbers = #tpu.dot_dimension_numbers<[1], [0], [0], [1], [0, 0, 1, 1], [], []>, precision = #tpu.contract_precision<fp32>} : vector<16x16xf32>, vector<16x16xf32>, vector<16x16xf32> -> vector<16x16xf32>
    %c1_150 = arith.constant 1 : index
    %c0_151 = arith.constant 0 : index
    %c0_152 = arith.constant 0 : index
    %c0_153 = arith.constant 0 : index
    %173 = vector.load %arg8[%c1_150, %c0_151, %c0_152, %c0_153] : memref<2x2x16x8xf32, #tpu.memory_space<vmem>>, vector<1x1x16x8xf32>
    %174 = vector.shape_cast %173 : vector<1x1x16x8xf32> to vector<16x8xf32>
    %cst_154 = arith.constant dense<0.000000e+00> : vector<16x8xf32>
    %175 = tpu.matmul %172, %174, %cst_154 {dimension_numbers = #tpu.dot_dimension_numbers<[1], [0], [0], [1], [0, 0, 1, 1], [], []>, precision = #tpu.contract_precision<fp32>} : vector<16x16xf32>, vector<16x8xf32>, vector<16x8xf32> -> vector<16x8xf32>
    %c1_155 = arith.constant 1 : index
    %c1_156 = arith.constant 1 : index
    %c0_157 = arith.constant 0 : index
    %c0_158 = arith.constant 0 : index
    %176 = vector.load %arg8[%c1_155, %c1_156, %c0_157, %c0_158] : memref<2x2x16x8xf32, #tpu.memory_space<vmem>>, vector<1x1x16x8xf32>
    %177 = vector.shape_cast %176 : vector<1x1x16x8xf32> to vector<16x8xf32>
    %cst_159 = arith.constant dense<0.000000e+00> : vector<16x8xf32>
    %178 = tpu.matmul %172, %177, %cst_159 {dimension_numbers = #tpu.dot_dimension_numbers<[1], [0], [0], [1], [0, 0, 1, 1], [], []>, precision = #tpu.contract_precision<fp32>} : vector<16x16xf32>, vector<16x8xf32>, vector<16x8xf32> -> vector<16x8xf32>
    %cst_160 = arith.constant dense<0.000000e+00> : vector<16x16xf32>
    %179 = tpu.matmul %178, %175, %cst_160 {dimension_numbers = #tpu.dot_dimension_numbers<[1], [1], [0], [0], [0, 0, 1, 0], [], []>, precision = #tpu.contract_precision<fp32>} : vector<16x8xf32>, vector<16x8xf32>, vector<16x16xf32> -> vector<16x16xf32>
    %c1_161 = arith.constant 1 : index
    %c0_162 = arith.constant 0 : index
    %c0_163 = arith.constant 0 : index
    %c0_164 = arith.constant 0 : index
    %180 = vector.load %arg9[%c1_161, %c0_162, %c0_163, %c0_164] : memref<2x2x16x16xf32, #tpu.memory_space<vmem>>, vector<1x1x16x16xf32>
    %181 = vector.shape_cast %180 : vector<1x1x16x16xf32> to vector<16x16xf32>
    %182 = arith.addf %179, %181 : vector<16x16xf32>
    %183 = arith.negf %182 : vector<16x16xf32>
    %184 = math.exp %183 : vector<16x16xf32>
    %cst_165 = arith.constant 1.000000e+00 : f32
    %185 = vector.broadcast %cst_165 : f32 to vector<16x16xf32>
    %186 = arith.addf %185, %184 : vector<16x16xf32>
    %187 = arith.divf %185, %186 : vector<16x16xf32>
    %c1_166 = arith.constant 1 : index
    %c1_167 = arith.constant 1 : index
    %c0_168 = arith.constant 0 : index
    %c0_169 = arith.constant 0 : index
    %188 = vector.load %arg9[%c1_166, %c1_167, %c0_168, %c0_169] : memref<2x2x16x16xf32, #tpu.memory_space<vmem>>, vector<1x1x16x16xf32>
    %189 = vector.shape_cast %188 : vector<1x1x16x16xf32> to vector<16x16xf32>
    %cst_170 = arith.constant dense<0.000000e+00> : vector<16x16xf32>
    %190 = tpu.matmul %187, %189, %cst_170 {dimension_numbers = #tpu.dot_dimension_numbers<[1], [1], [0], [0], [0, 0, 1, 0], [], []>, precision = #tpu.contract_precision<fp32>} : vector<16x16xf32>, vector<16x16xf32>, vector<16x16xf32> -> vector<16x16xf32>
    %cst_171 = arith.constant dense<0xFF800000> : vector<16xf32>
    %191 = vector.multi_reduction <maximumf>, %190, %cst_171 [1] : vector<16x16xf32> to vector<16xf32>
    %192 = vector.shape_cast %191 : vector<16xf32> to vector<16x1xf32>
    %193 = vector.broadcast %192 : vector<16x1xf32> to vector<16x16xf32>
    %194 = arith.subf %190, %193 : vector<16x16xf32>
    %195 = math.exp %194 : vector<16x16xf32>
    %cst_172 = arith.constant dense<0.000000e+00> : vector<16xf32>
    %196 = vector.multi_reduction <add>, %195, %cst_172 [1] : vector<16x16xf32> to vector<16xf32>
    %197 = vector.shape_cast %196 : vector<16xf32> to vector<16x1xf32>
    %198 = tpu.reciprocal %197 {approx = true} : vector<16x1xf32> -> vector<16x1xf32>
    %199 = arith.mulf %197, %198 : vector<16x1xf32>
    %cst_173 = arith.constant 2.000000e+00 : f32
    %200 = vector.broadcast %cst_173 : f32 to vector<16x1xf32>
    %201 = arith.subf %200, %199 : vector<16x1xf32>
    %202 = arith.mulf %198, %201 : vector<16x1xf32>
    %203 = vector.broadcast %202 : vector<16x1xf32> to vector<16x16xf32>
    %204 = arith.mulf %195, %203 : vector<16x16xf32>
    %c1_174 = arith.constant 1 : index
    %c0_175 = arith.constant 0 : index
    %c0_176 = arith.constant 0 : index
    %c0_177 = arith.constant 0 : index
    %205 = vector.load %arg10[%c1_174, %c0_175, %c0_176, %c0_177] : memref<2x3x16x16xf32, #tpu.memory_space<vmem>>, vector<1x1x16x16xf32>
    %206 = vector.shape_cast %205 : vector<1x1x16x16xf32> to vector<16x16xf32>
    %207 = arith.mulf %206, %204 : vector<16x16xf32>
    %cst_178 = arith.constant dense<0.000000e+00> : vector<16x16xf32>
    %208 = tpu.matmul %207, %136, %cst_178 {dimension_numbers = #tpu.dot_dimension_numbers<[1], [0], [0], [1], [0, 0, 1, 1], [], []>, precision = #tpu.contract_precision<fp32>} : vector<16x16xf32>, vector<16x16xf32>, vector<16x16xf32> -> vector<16x16xf32>
    %c1_179 = arith.constant 1 : index
    %c1_180 = arith.constant 1 : index
    %c0_181 = arith.constant 0 : index
    %c0_182 = arith.constant 0 : index
    %209 = vector.load %arg10[%c1_179, %c1_180, %c0_181, %c0_182] : memref<2x3x16x16xf32, #tpu.memory_space<vmem>>, vector<1x1x16x16xf32>
    %210 = vector.shape_cast %209 : vector<1x1x16x16xf32> to vector<16x16xf32>
    %211 = arith.mulf %210, %204 : vector<16x16xf32>
    %cst_183 = arith.constant dense<0.000000e+00> : vector<16x16xf32>
    %212 = tpu.matmul %211, %136, %cst_183 {dimension_numbers = #tpu.dot_dimension_numbers<[1], [0], [0], [1], [0, 0, 1, 1], [], []>, precision = #tpu.contract_precision<fp32>} : vector<16x16xf32>, vector<16x16xf32>, vector<16x16xf32> -> vector<16x16xf32>
    %c1_184 = arith.constant 1 : index
    %c2_185 = arith.constant 2 : index
    %c0_186 = arith.constant 0 : index
    %c0_187 = arith.constant 0 : index
    %213 = vector.load %arg10[%c1_184, %c2_185, %c0_186, %c0_187] : memref<2x3x16x16xf32, #tpu.memory_space<vmem>>, vector<1x1x16x16xf32>
    %214 = vector.shape_cast %213 : vector<1x1x16x16xf32> to vector<16x16xf32>
    %215 = arith.mulf %214, %204 : vector<16x16xf32>
    %cst_188 = arith.constant dense<0.000000e+00> : vector<16x16xf32>
    %216 = tpu.matmul %215, %136, %cst_188 {dimension_numbers = #tpu.dot_dimension_numbers<[1], [0], [0], [1], [0, 0, 1, 1], [], []>, precision = #tpu.contract_precision<fp32>} : vector<16x16xf32>, vector<16x16xf32>, vector<16x16xf32> -> vector<16x16xf32>
    %217 = tpu.concatenate %208, %212, %216 in 1 : vector<16x16xf32>, vector<16x16xf32>, vector<16x16xf32> -> vector<16x48xf32>
    %c1_189 = arith.constant 1 : index
    %c0_190 = arith.constant 0 : index
    %c0_191 = arith.constant 0 : index
    %218 = vector.load %arg11[%c1_189, %c0_190, %c0_191] : memref<2x48x64xf32, #tpu.memory_space<vmem>>, vector<1x48x64xf32>
    %219 = vector.shape_cast %218 : vector<1x48x64xf32> to vector<48x64xf32>
    %cst_192 = arith.constant dense<0.000000e+00> : vector<16x64xf32>
    %220 = tpu.matmul %217, %219, %cst_192 {dimension_numbers = #tpu.dot_dimension_numbers<[1], [0], [0], [1], [0, 0, 1, 1], [], []>, precision = #tpu.contract_precision<fp32>} : vector<16x48xf32>, vector<48x64xf32>, vector<16x64xf32> -> vector<16x64xf32>
    %cst_193 = arith.constant 0.000000e+00 : f32
    %221 = vector.broadcast %cst_193 : f32 to vector<16x64xf32>
    %222 = arith.maximumf %220, %221 : vector<16x64xf32>
    %c1_194 = arith.constant 1 : index
    %c0_195 = arith.constant 0 : index
    %c0_196 = arith.constant 0 : index
    %223 = vector.load %arg12[%c1_194, %c0_195, %c0_196] : memref<2x64x64xf32, #tpu.memory_space<vmem>>, vector<1x64x64xf32>
    %224 = vector.shape_cast %223 : vector<1x64x64xf32> to vector<64x64xf32>
    %cst_197 = arith.constant dense<0.000000e+00> : vector<16x64xf32>
    %225 = tpu.matmul %222, %224, %cst_197 {dimension_numbers = #tpu.dot_dimension_numbers<[1], [0], [0], [1], [0, 0, 1, 1], [], []>, precision = #tpu.contract_precision<fp32>} : vector<16x64xf32>, vector<64x64xf32>, vector<16x64xf32> -> vector<16x64xf32>
    %c1_198 = arith.constant 1 : index
    %c0_199 = arith.constant 0 : index
    %c0_200 = arith.constant 0 : index
    %226 = vector.load %arg13[%c1_198, %c0_199, %c0_200] : memref<2x16x64xf32, #tpu.memory_space<vmem>>, vector<1x16x64xf32>
    %227 = vector.shape_cast %226 : vector<1x16x64xf32> to vector<16x64xf32>
    %cst_201 = arith.constant dense<0.000000e+00> : vector<16x64xf32>
    %228 = tpu.matmul %136, %227, %cst_201 {dimension_numbers = #tpu.dot_dimension_numbers<[1], [0], [0], [1], [0, 0, 1, 1], [], []>, precision = #tpu.contract_precision<fp32>} : vector<16x16xf32>, vector<16x64xf32>, vector<16x64xf32> -> vector<16x64xf32>
    %229 = arith.addf %225, %228 : vector<16x64xf32>
    %c1_202 = arith.constant 1 : index
    %c0_203 = arith.constant 0 : index
    %c0_204 = arith.constant 0 : index
    %230 = vector.load %arg14[%c1_202, %c0_203, %c0_204] : memref<2x3x64xf32, #tpu.memory_space<vmem>>, vector<1x1x64xf32>
    %231 = vector.shape_cast %230 : vector<1x1x64xf32> to vector<1x64xf32>
    %232 = vector.broadcast %231 : vector<1x64xf32> to vector<16x64xf32>
    %233 = arith.addf %229, %232 : vector<16x64xf32>
    %cst_205 = arith.constant 0.000000e+00 : f32
    %234 = vector.broadcast %cst_205 : f32 to vector<16x64xf32>
    %235 = arith.maximumf %233, %234 : vector<16x64xf32>
    %cst_206 = arith.constant dense<0.000000e+00> : vector<16x8xf32>
    %236 = tpu.matmul %235, %3, %cst_206 {dimension_numbers = #tpu.dot_dimension_numbers<[1], [0], [0], [1], [0, 0, 1, 1], [], []>, precision = #tpu.contract_precision<fp32>} : vector<16x64xf32>, vector<64x8xf32>, vector<16x8xf32> -> vector<16x8xf32>
    %cst_207 = arith.constant dense<0.000000e+00> : vector<16x64xf32>
    %237 = tpu.matmul %236, %4, %cst_207 {dimension_numbers = #tpu.dot_dimension_numbers<[1], [0], [0], [1], [0, 0, 1, 1], [], []>, precision = #tpu.contract_precision<fp32>} : vector<16x8xf32>, vector<8x64xf32>, vector<16x64xf32> -> vector<16x64xf32>
    %238 = arith.subf %235, %237 : vector<16x64xf32>
    %239 = arith.mulf %238, %238 : vector<16x64xf32>
    %cst_208 = arith.constant dense<0.000000e+00> : vector<16x8xf32>
    %240 = tpu.matmul %239, %3, %cst_208 {dimension_numbers = #tpu.dot_dimension_numbers<[1], [0], [0], [1], [0, 0, 1, 1], [], []>, precision = #tpu.contract_precision<fp32>} : vector<16x64xf32>, vector<64x8xf32>, vector<16x8xf32> -> vector<16x8xf32>
    %cst_209 = arith.constant 9.99999974E-6 : f32
    %241 = vector.broadcast %cst_209 : f32 to vector<16x8xf32>
    %242 = arith.addf %240, %241 : vector<16x8xf32>
    %243 = math.rsqrt %242 : vector<16x8xf32>
    %cst_210 = arith.constant dense<0.000000e+00> : vector<16x64xf32>
    %244 = tpu.matmul %243, %4, %cst_210 {dimension_numbers = #tpu.dot_dimension_numbers<[1], [0], [0], [1], [0, 0, 1, 1], [], []>, precision = #tpu.contract_precision<fp32>} : vector<16x8xf32>, vector<8x64xf32>, vector<16x64xf32> -> vector<16x64xf32>
    %245 = arith.mulf %238, %244 : vector<16x64xf32>
    %c1_211 = arith.constant 1 : index
    %c1_212 = arith.constant 1 : index
    %c0_213 = arith.constant 0 : index
    %246 = vector.load %arg14[%c1_211, %c1_212, %c0_213] : memref<2x3x64xf32, #tpu.memory_space<vmem>>, vector<1x1x64xf32>
    %247 = vector.shape_cast %246 : vector<1x1x64xf32> to vector<1x64xf32>
    %248 = vector.broadcast %247 : vector<1x64xf32> to vector<16x64xf32>
    %249 = arith.mulf %245, %248 : vector<16x64xf32>
    %c1_214 = arith.constant 1 : index
    %c2_215 = arith.constant 2 : index
    %c0_216 = arith.constant 0 : index
    %250 = vector.load %arg14[%c1_214, %c2_215, %c0_216] : memref<2x3x64xf32, #tpu.memory_space<vmem>>, vector<1x1x64xf32>
    %251 = vector.shape_cast %250 : vector<1x1x64xf32> to vector<1x64xf32>
    %252 = vector.broadcast %251 : vector<1x64xf32> to vector<16x64xf32>
    %253 = arith.addf %249, %252 : vector<16x64xf32>
    %c1_217 = arith.constant 1 : index
    %c0_218 = arith.constant 0 : index
    %c0_219 = arith.constant 0 : index
    %254 = vector.load %arg17[%c1_217, %c0_218, %c0_219] : memref<2x64x4xf32, #tpu.memory_space<vmem>>, vector<1x64x4xf32>
    %255 = vector.shape_cast %254 : vector<1x64x4xf32> to vector<64x4xf32>
    %cst_220 = arith.constant dense<0.000000e+00> : vector<16x4xf32>
    %256 = tpu.matmul %253, %255, %cst_220 {dimension_numbers = #tpu.dot_dimension_numbers<[1], [0], [0], [1], [0, 0, 1, 1], [], []>, precision = #tpu.contract_precision<fp32>} : vector<16x64xf32>, vector<64x4xf32>, vector<16x4xf32> -> vector<16x4xf32>
    %c1_221 = arith.constant 1 : index
    %c0_222 = arith.constant 0 : index
    %c0_223 = arith.constant 0 : index
    %257 = vector.load %arg18[%c1_221, %c0_222, %c0_223] : memref<2x1x4xf32, #tpu.memory_space<vmem>>, vector<1x1x4xf32>
    %258 = vector.shape_cast %257 : vector<1x1x4xf32> to vector<1x4xf32>
    %259 = vector.broadcast %258 : vector<1x4xf32> to vector<16x4xf32>
    %260 = arith.addf %256, %259 : vector<16x4xf32>
    %261 = arith.addf %132, %260 : vector<16x4xf32>
    %c0_224 = arith.constant 0 : index
    %c0_225 = arith.constant 0 : index
    %c0_226 = arith.constant 0 : index
    %262 = vector.load %arg19[%c0_224, %c0_225, %c0_226] : memref<1x16x4xf32, #tpu.memory_space<vmem>>, vector<1x16x4xf32>
    %263 = vector.shape_cast %262 : vector<1x16x4xf32> to vector<16x4xf32>
    %264 = vector.shape_cast %261 : vector<16x4xf32> to vector<1x16x4xf32>
    tpu.vector_store %arg19[%c0_224, %c0_225, %c0_226], %264 {strides = array<i32>} : memref<1x16x4xf32, #tpu.memory_space<vmem>>, vector<1x16x4xf32>,
    return
  }
  func.func @transform_0(%arg0: i32) -> (i32, i32, i32, i32) {
    %c0_i32 = arith.constant 0 : i32
    %c0_i32_0 = arith.constant 0 : i32
    %c0_i32_1 = arith.constant 0 : i32
    %c0_i32_2 = arith.constant 0 : i32
    return %c0_i32, %arg0, %c0_i32_0, %c0_i32_1 : i32, i32, i32, i32
  }
  func.func @transform_1(%arg0: i32) -> (i32, i32, i32, i32) {
    %c0_i32 = arith.constant 0 : i32
    %c0_i32_0 = arith.constant 0 : i32
    %c0_i32_1 = arith.constant 0 : i32
    %c0_i32_2 = arith.constant 0 : i32
    return %c0_i32, %arg0, %c0_i32_0, %c0_i32_1 : i32, i32, i32, i32
  }
  func.func @transform_2(%arg0: i32) -> (i32, i32, i32, i32) {
    %c0_i32 = arith.constant 0 : i32
    %c0_i32_0 = arith.constant 0 : i32
    %c0_i32_1 = arith.constant 0 : i32
    %c0_i32_2 = arith.constant 0 : i32
    %c0_i32_3 = arith.constant 0 : i32
    return %c0_i32, %c0_i32_0, %c0_i32_1, %c0_i32_2 : i32, i32, i32, i32
  }
  func.func @transform_3(%arg0: i32) -> (i32, i32, i32, i32) {
    %c0_i32 = arith.constant 0 : i32
    %c0_i32_0 = arith.constant 0 : i32
    %c0_i32_1 = arith.constant 0 : i32
    %c0_i32_2 = arith.constant 0 : i32
    %c0_i32_3 = arith.constant 0 : i32
    return %c0_i32, %c0_i32_0, %c0_i32_1, %c0_i32_2 : i32, i32, i32, i32
  }
  func.func @transform_4(%arg0: i32) -> (i32, i32) {
    %c0_i32 = arith.constant 0 : i32
    %c0_i32_0 = arith.constant 0 : i32
    %c0_i32_1 = arith.constant 0 : i32
    return %c0_i32, %c0_i32_0 : i32, i32
  }
  func.func @transform_5(%arg0: i32) -> (i32, i32) {
    %c0_i32 = arith.constant 0 : i32
    %c0_i32_0 = arith.constant 0 : i32
    %c0_i32_1 = arith.constant 0 : i32
    return %c0_i32, %c0_i32_0 : i32, i32
  }
  func.func @transform_6(%arg0: i32) -> (i32, i32) {
    %c0_i32 = arith.constant 0 : i32
    %c0_i32_0 = arith.constant 0 : i32
    %c0_i32_1 = arith.constant 0 : i32
    return %c0_i32, %c0_i32_0 : i32, i32
  }
  func.func @transform_7(%arg0: i32) -> (i32, i32, i32, i32) {
    %c0_i32 = arith.constant 0 : i32
    %c0_i32_0 = arith.constant 0 : i32
    %c0_i32_1 = arith.constant 0 : i32
    %c0_i32_2 = arith.constant 0 : i32
    %c0_i32_3 = arith.constant 0 : i32
    return %c0_i32, %c0_i32_0, %c0_i32_1, %c0_i32_2 : i32, i32, i32, i32
  }
  func.func @transform_8(%arg0: i32) -> (i32, i32, i32, i32) {
    %c0_i32 = arith.constant 0 : i32
    %c0_i32_0 = arith.constant 0 : i32
    %c0_i32_1 = arith.constant 0 : i32
    %c0_i32_2 = arith.constant 0 : i32
    %c0_i32_3 = arith.constant 0 : i32
    return %c0_i32, %c0_i32_0, %c0_i32_1, %c0_i32_2 : i32, i32, i32, i32
  }
  func.func @transform_9(%arg0: i32) -> (i32, i32, i32, i32) {
    %c0_i32 = arith.constant 0 : i32
    %c0_i32_0 = arith.constant 0 : i32
    %c0_i32_1 = arith.constant 0 : i32
    %c0_i32_2 = arith.constant 0 : i32
    %c0_i32_3 = arith.constant 0 : i32
    return %c0_i32, %c0_i32_0, %c0_i32_1, %c0_i32_2 : i32, i32, i32, i32
  }
  func.func @transform_10(%arg0: i32) -> (i32, i32, i32) {
    %c0_i32 = arith.constant 0 : i32
    %c0_i32_0 = arith.constant 0 : i32
    %c0_i32_1 = arith.constant 0 : i32
    %c0_i32_2 = arith.constant 0 : i32
    return %c0_i32, %c0_i32_0, %c0_i32_1 : i32, i32, i32
  }
  func.func @transform_11(%arg0: i32) -> (i32, i32, i32) {
    %c0_i32 = arith.constant 0 : i32
    %c0_i32_0 = arith.constant 0 : i32
    %c0_i32_1 = arith.constant 0 : i32
    %c0_i32_2 = arith.constant 0 : i32
    return %c0_i32, %c0_i32_0, %c0_i32_1 : i32, i32, i32
  }
  func.func @transform_12(%arg0: i32) -> (i32, i32, i32) {
    %c0_i32 = arith.constant 0 : i32
    %c0_i32_0 = arith.constant 0 : i32
    %c0_i32_1 = arith.constant 0 : i32
    %c0_i32_2 = arith.constant 0 : i32
    return %c0_i32, %c0_i32_0, %c0_i32_1 : i32, i32, i32
  }
  func.func @transform_13(%arg0: i32) -> (i32, i32, i32) {
    %c0_i32 = arith.constant 0 : i32
    %c0_i32_0 = arith.constant 0 : i32
    %c0_i32_1 = arith.constant 0 : i32
    %c0_i32_2 = arith.constant 0 : i32
    return %c0_i32, %c0_i32_0, %c0_i32_1 : i32, i32, i32
  }
  func.func @transform_14(%arg0: i32) -> (i32, i32) {
    %c0_i32 = arith.constant 0 : i32
    %c0_i32_0 = arith.constant 0 : i32
    %c0_i32_1 = arith.constant 0 : i32
    return %c0_i32, %c0_i32_0 : i32, i32
  }
  func.func @transform_15(%arg0: i32) -> (i32, i32) {
    %c0_i32 = arith.constant 0 : i32
    %c0_i32_0 = arith.constant 0 : i32
    %c0_i32_1 = arith.constant 0 : i32
    return %c0_i32, %c0_i32_0 : i32, i32
  }
  func.func @transform_16(%arg0: i32) -> (i32, i32, i32) {
    %c0_i32 = arith.constant 0 : i32
    %c0_i32_0 = arith.constant 0 : i32
    %c0_i32_1 = arith.constant 0 : i32
    %c0_i32_2 = arith.constant 0 : i32
    return %c0_i32, %c0_i32_0, %c0_i32_1 : i32, i32, i32
  }
  func.func @transform_17(%arg0: i32) -> (i32, i32, i32) {
    %c0_i32 = arith.constant 0 : i32
    %c0_i32_0 = arith.constant 0 : i32
    %c0_i32_1 = arith.constant 0 : i32
    %c0_i32_2 = arith.constant 0 : i32
    return %c0_i32, %c0_i32_0, %c0_i32_1 : i32, i32, i32
  }
  func.func @transform_18(%arg0: i32) -> (i32, i32, i32) {
    %c0_i32 = arith.constant 0 : i32
    %c0_i32_0 = arith.constant 0 : i32
    %c0_i32_1 = arith.constant 0 : i32
    return %arg0, %c0_i32, %c0_i32_0 : i32, i32, i32
  }
}

</mosaic_0001>

<bundles_post_ra>
// kernel: astgcn_forward.1
= control target key start
LH: loop header
LB: loop body
LE: loop exit
PB: predicated region body
PF: predicated region fallthrough
CT: control target
= control target key end

     0   :  { %s12405_s0 = inlined_call_operand.vmem [shape: f32[2,2,8,32], index: 0, kind: input, shape index: {}]   ;;  %s12406_s1 = inlined_call_operand.vmem [shape: f32[2,2,16,16], index: 1, kind: input, shape index: {}]   ;;  %s12407_s2 = inlined_call_operand.vmem [shape: f32[2,2,32,16], index: 2, kind: input, shape index: {}]   ;;  %s12408_s3 = inlined_call_operand.vmem [shape: f32[2,2,8,8], index: 3, kind: input, shape index: {}]   ;;  %s12409_s4 = inlined_call_operand.vmem [shape: f32[16,8], index: 4, kind: input, shape index: {}]   ;;  %s12410_s5 = inlined_call_operand.vmem [shape: f32[8,16], index: 5, kind: input, shape index: {}]   ;;  %s12411_s6 = inlined_call_operand.vmem [shape: f32[16,16], index: 6, kind: input, shape index: {}]   ;;  %s12412_s7 = inlined_call_operand.vmem [shape: f32[2,2,16,8], index: 7, kind: input, shape index: {}]   ;;  %s12413_s8 = inlined_call_operand.vmem [shape: f32[2,2,16,16], index: 8, kind: input, shape index: {}]   ;;  %s12414_s9 = inlined_call_operand.vmem [shape: f32[2,3,16,16], index: 9, kind: input, shape index: {}]   ;;  %s12415_s10 = inlined_call_operand.vmem [shape: f32[2,48,64], index: 10, kind: input, shape index: {}]   ;;  %s12416_s11 = inlined_call_operand.vmem [shape: f32[2,64,64], index: 11, kind: input, shape index: {}]   ;;  %s12417_s12 = inlined_call_operand.vmem [shape: f32[2,16,64], index: 12, kind: input, shape index: {}]   ;;  %s12418_s13 = inlined_call_operand.vmem [shape: f32[2,3,64], index: 13, kind: input, shape index: {}]   ;;  %s12419_s14 = inlined_call_operand.vmem [shape: f32[64,8], index: 14, kind: input, shape index: {}]   ;;  %s12420_s15 = inlined_call_operand.vmem [shape: f32[8,64], index: 15, kind: input, shape index: {}]   ;;  %s12421_s16 = inlined_call_operand.vmem [shape: f32[2,64,4], index: 16, kind: input, shape index: {}]   ;;  %s12422_s17 = inlined_call_operand.vmem [shape: f32[2,1,4], index: 17, kind: input, shape index: {}]   ;;  %s12423_s18 = inlined_call_operand.vmem [shape: f32[2,16,4], index: 18, kind: output, shape index: {}]  }
   0x1   :  { %12472 = sst [smem:[#allocation36_spill]] %s12405_s0 }
   0x2   :  { %12473 = sst [smem:[#allocation37_spill]] %s12406_s1 }
   0x3   :  { %12474 = sst [smem:[#allocation38_spill]] %s12407_s2 }
   0x4   :  { %12475 = sst [smem:[#allocation39_spill]] %s12421_s16 }
   0x5   :  { %12476 = sst [smem:[#allocation40_spill]] %s12422_s17 }
   0x6   :  { %12477 = sst [smem:[#allocation41_spill]] %s12423_s18 }
   0x7   :  { %s10602_s27 = smov 0   ;;  %s10604_s28 = smov 0  }
   0x8   :  { %s10606_s29 = smov 0  }
   0x9 LB: > { %s10619_s0 = sadd.s32 1, %s10503_s29   ;;  %s35_s1 = sadd.s32 1, %s10499_s28  ;;  %s10503_s29 = sphi %s10606_s29, %s12556_s29   ;;  %s10499_s28 = sphi %s10604_s28, %s12559_s28   ;;  %s10495_s27 = sphi %s10602_s27, %s12558_s27  }
   0xa   : > { %12478 = sst [smem:[#allocation4_spill]] %s10619_s0  ;;  %s32_s19 = ssub.s32 %s10503_s29, %s10619_s0 }
   0xb   : > { %p33_p0 = scmp.eq.s32.totalorder %s32_s19, 0  ;;  %p42_p1 = scmp.ne.s32.totalorder %s10499_s28, %s10495_s27 }
   0xc   : > { %p43_p2 = scmp.eq.s32.totalorder %s10503_s29, 0  ;;  %p10300_p4 = scmp.ge.s32.totalorder %s10503_s29, 2 }
   0xd   : > { %s10628_s20 = scalar_select %p33_p0, %s10499_s28, %s35_s1  }
   0xe   : > { %p10630_p3 = por %p43_p2, %p42_p1  ;;  %504 = sbr.rel (%p10300_p4) target bundleno = 45 (0x2d), region = 80 }
   0xf   : > { %12479 = sst [smem:[#allocation5_spill]] %s10628_s20 }
  0x13   : > { %507 = sbr.rel (!%p10630_p3) target bundleno = 31 (0x1f), region = 84  ;;  %s509_s22 = sand.u32 (%p10630_p3), 1, %s10499_s28  }
  0x14   : > { %s10302_s2 = sshll.u32 (%p10630_p3), %s10503_s29, 3  ;;  %s10301_s23 = sshll.u32 (%p10630_p3), %s509_s22, 4 }
  0x15   : > { %s12481_s26 = sld [smem:[#allocation36_spill]] (%p10630_p3)  ;;  %s511_s1 = scalar_lea.vmem (%p10630_p3), [#allocation2], %s10301_s23 }
  0x1b   : > { %s513_s19 = scalar_lea.vmem %s12481_s26, %s10302_s2 }
  0x1c   : > { %v544_v0 = vld [vmem:[%s513_s19] sm:$0xff]  ;;  %v546_v1 = vld [vmem:[%s513_s19 + $0x10] sm:$0xff] }
  0x1d   : > { %545 = vst [vmem:[%s511_s1] sm:$0xff] %v544_v0 }
  0x1e   : > { %547 = vst [vmem:[%s511_s1 + $0x8] sm:$0xff] %v546_v1 }
  0x1f PF: > { %553 = sbr.rel (!%p10630_p3) target bundleno = 45 (0x2d), region = 122  ;;  %s555_s30 = sand.u32 (%p10630_p3), 1, %s10499_s28  }
  0x20   : > { %s10387_s20 = sshll.u32 (%p10630_p3), %s10503_s29, 4  ;;  %s10303_s0 = sshll.u32 (%p10630_p3), %s555_s30, 5 }
  0x21   : > { %s12482_s17 = sld [smem:[#allocation37_spill]] (%p10630_p3)  ;;  %s557_s2 = scalar_lea.vmem (%p10630_p3), [#allocation3], %s10303_s0 }
  0x27   : > { %s560_s16 = scalar_lea.vmem %s12482_s17, %s10387_s20 }
  0x28   : > { %v595_v2 = vld [vmem:[%s560_s16] sm:$0xff]  ;;  %v597_v3 = vld [vmem:[%s560_s16 + $0x8] sm:$0xff] }
  0x29   : > { %v599_v4 = vld [vmem:[%s560_s16 + $0x20] sm:$0xff]  ;;  %596 = vst [vmem:[%s557_s2] sm:$0xff] %v595_v2  ;;  %v601_v5 = vld [vmem:[%s560_s16 + $0x28] sm:$0xff] }
  0x2a   : > { %598 = vst [vmem:[%s557_s2 + $0x8] sm:$0xff] %v597_v3 }
  0x2b   : > { %600 = vst [vmem:[%s557_s2 + $0x10] sm:$0xff] %v599_v4 }
  0x2c   : > { %602 = vst [vmem:[%s557_s2 + $0x18] sm:$0xff] %v601_v5 }
  0x2d PF: > { %p10306_p5 = scmp.ge.s32.totalorder %s10503_s29, 1  ;;  %p607_p6 = scmp.lt.s32.totalorder %s10503_s29, 3 }
  0x2f   : > { %p608_p7 = pnand %p10306_p5, %p607_p6 }
  0x31   : > { %611 = sbr.rel (%p608_p7) target bundleno = 6549 (0x1995), region = 160 }
  0x36   : > { %s12483_s17 = sld [smem:[#allocation38_spill]]  ;;  %s614_s23 = sand.u32 1, %s10495_s27   ;;  %vm704_vm0 = vcmask 261120   ;;  %vm1086_vm1 = vcmask 130048   ;;  %vm1258_vm2 = vcmask 64512   ;;  %vm3488_vm15 = vcmask 392192  }
  0x37   : > { %s10672_s26 = sshll.u32 %s614_s23, 4  ;;  %s10308_s16 = sshll.u32 %s614_s23, 5 }
  0x38   : > { %s616_s22 = scalar_lea.vmem [#allocation2], %s10672_s26  ;;  %s10829_s21 = scalar_lea.vmem [#allocation3], %s10308_s16 }
  0x39   : > { %v697_v18 = vld [vmem:[%s616_s22] sm:$0xff]  ;;  %s10505_s18 = smov 16   ;;  %s10506_s0 = smov 32  }
  0x3a   : > { %v706_v21 = vsel %vm704_vm0, %v697_v18, 0  ;;  %s12505_s24 = sld [smem:[#allocation39_spill]]  ;;  %s12545_s20 = sadd.s32 4294967295, %s10503_s29  }
  0x3b   : > { %v10696_v24 = vand.u32 4294901760, %v706_v21  ;;  %p678_p8 = scmp.lt.s32.totalorder %s12545_s20, 1  ;;  %s12548_s16 = smov %s12545_s20 }
  0x3c   : > { %v703_v6 = vld [vmem:[%s12483_s17 + $0x18] sm:$0xff]  ;;  %v702_v7 = vld [vmem:[%s12483_s17 + $0x10] sm:$0xff]  ;;  %v701_v8 = vld [vmem:[%s12483_s17 + $0x8] sm:$0xff] }
  0x3d   : > { %v10661_v9 = vand.u32 4294901760, %v703_v6  ;;  %v10663_v10 = vand.u32 4294901760, %v702_v7  ;;  %v10665_v11 = vand.u32 4294901760, %v701_v8  ;;  %v700_v12 = vld [vmem:[%s12483_s17] sm:$0xff]  ;;  %v10314_v14 = vld [vmem:[%s12483_s17 + $0x38] sm:$0xff]  ;;  %v10313_v27 = vld [vmem:[%s12483_s17 + $0x30] sm:$0xff]  ;;  %v10711_v31 = vsub.f32 %v706_v21, %v10696_v24 }
  0x3e   : > { %v10674_v13 = vand.u32 4294901760, %v700_v12  ;;  %v10689_v19 = vand.u32 4294901760, %v10314_v14  ;;  %v10312_v28 = vld [vmem:[%s12483_s17 + $0x28] sm:$0xff]  ;;  %v10311_v32 = vld [vmem:[%s12483_s17 + $0x20] sm:$0xff]  ;;  %v912_v41 = vand.u32 4294901760, %v10313_v27  ;;  %s12561_s16 = smov (!%p678_p8, %s12548_s16), 1 }
  0x3f   : > { %v750_v15 = vsub.f32 %v703_v6, %v10661_v9  ;;  %821 = vmatpush.msra.mxu3 %v10661_v9  ;;  %721 = vmatpush.msra.mxu0 %v10661_v9  ;;  %v756_v16 = vsub.f32 %v702_v7, %v10663_v10  ;;  %v10684_v17 = vsub.f32 %v701_v8, %v10665_v11  ;;  %v10723_v38 = vand.u32 4294901760, %v10711_v31  ;;  %s10388_s27 = sshll.u32 %s12561_s16, 4 }
  0x40   : > { %v10692_v20 = vsub.f32 %v700_v12, %v10674_v13  ;;  %v10701_v26 = vsub.f32 %v10314_v14, %v10689_v19  ;;  %v914_v44 = vand.u32 4294901760, %v10312_v28  ;;  %v916_v45 = vand.u32 4294901760, %v10311_v32 }
  0x41   : > { %792 = vmatpush.msra.mxu2 %v750_v15  ;;  %823 = vmatpush.msra.mxu3 %v10663_v10  ;;  %v751_v22 = vand.u32 4294901760, %v750_v15  ;;  %v757_v23 = vand.u32 4294901760, %v756_v16  ;;  %v763_v25 = vand.u32 4294901760, %v10684_v17  ;;  %v731_v42 = vsub.f32 %v10711_v31, %v10723_v38 }
  0x42   : > { %723 = vmatpush.msra.mxu0 %v10663_v10  ;;  %v941_v34 = vand.u32 4294901760, %v10701_v26  ;;  %v769_v35 = vand.u32 4294901760, %v10692_v20  ;;  %v946_v47 = vsub.f32 %v10313_v27, %v912_v41  ;;  %v952_v50 = vsub.f32 %v10312_v28, %v914_v44 }
  0x43   : > { %795 = vmatpush.msra.mxu2 %v756_v16  ;;  %v752_v29 = vsub.f32 %v750_v15, %v751_v22  ;;  %825 = vmatpush.msra.mxu3 %v10665_v11  ;;  %v758_v30 = vsub.f32 %v756_v16, %v757_v23  ;;  %v764_v33 = vsub.f32 %v10684_v17, %v763_v25  ;;  %v732_v48 = vand.u32 4294901760, %v731_v42 }
  0x44   : > { %725 = vmatpush.msra.mxu0 %v10665_v11  ;;  %v942_v39 = vsub.f32 %v10701_v26, %v941_v34  ;;  %v770_v40 = vsub.f32 %v10692_v20, %v769_v35  ;;  %v958_v51 = vsub.f32 %v10311_v32, %v916_v45  ;;  %v947_v52 = vand.u32 4294901760, %v946_v47 }
  0x45   : > { %v753_v36 = vand.u32 4294901760, %v752_v29  ;;  %798 = vmatpush.msra.mxu2 %v10684_v17  ;;  %v759_v37 = vand.u32 4294901760, %v758_v30  ;;  %827 = vmatpush.msra.mxu3 %v10674_v13  ;;  %v765_v43 = vand.u32 4294901760, %v764_v33  ;;  %v953_v53 = vand.u32 4294901760, %v952_v50 }
  0x46   : > { %727 = vmatpush.msra.mxu0 %v10674_v13  ;;  %831 = vmatmul.f32.vlgmr.msra.gmra.mxu3 %v10723_v38  ;;  %v943_v46 = vand.u32 4294901760, %v942_v39  ;;  %v771_v49 = vand.u32 4294901760, %v770_v40  ;;  %v959_v54 = vand.u32 4294901760, %v958_v51  ;;  %v948_v55 = vsub.f32 %v946_v47, %v947_v52 }
  0x47   : > { %754 = vmatpush.msra.mxu1 %v753_v36  ;;  %801 = vmatpush.msra.mxu2 %v10692_v20  ;;  %v954_v56 = vsub.f32 %v952_v50, %v953_v53 }
  0x48   : > { %804 = vmatmul.f32.vlgmr.msra.gmra.mxu2 %v10711_v31  ;;  %944 = vmatpush.msrb.mxu3 %v943_v46  ;;  %v960_v57 = vsub.f32 %v958_v51, %v959_v54  ;;  %v949_v58 = vand.u32 4294901760, %v948_v55 }
  0x49   : > { %760 = vmatpush.msra.mxu1 %v759_v37  ;;  %911 = vmatpush.msrb.mxu2 %v10689_v19  ;;  %v955_v59 = vand.u32 4294901760, %v954_v56 }
  0x4a   : > { %850 = vmatpush.msrb.mxu0 %v751_v22  ;;  %950 = vmatpush.msrb.mxu3 %v949_v58  ;;  %v961_v60 = vand.u32 4294901760, %v960_v57 }
  0x4b   : > { %733 = vmatmul.f32.vlgmr.msra.gmra.mxu0 %v732_v48  ;;  %766 = vmatpush.msra.mxu1 %v765_v43 }
  0x4c   : > { %913 = vmatpush.msrb.mxu2 %v912_v41  ;;  %854 = vmatpush.msrb.mxu0 %v757_v23 }
  0x4d   : > { %772 = vmatpush.msra.mxu1 %v771_v49  ;;  %956 = vmatpush.msrb.mxu3 %v955_v59 }
  0x4e   : > { %774 = vmatmul.f32.vlgmr.msra.gmra.mxu1 %v10696_v24  ;;  %915 = vmatpush.msrb.mxu2 %v914_v44 }
  0x4f   : > { %881 = vmatpush.msrb.mxu1 %v10661_v9  ;;  %858 = vmatpush.msrb.mxu0 %v763_v25 }
  0x50   : > { %917 = vmatpush.msrb.mxu2 %v916_v45  ;;  %962 = vmatpush.msrb.mxu3 %v961_v60 }
  0x51   : > { %883 = vmatpush.msrb.mxu1 %v10663_v10  ;;  %862 = vmatpush.msrb.mxu0 %v769_v35 }
  0x52   : > { %923 = vmatmul.f32.vlgmr.msrb.gmra.mxu2 %v732_v48  ;;  %964 = vmatmul.f32.vlgmr.msrb.gmra.mxu3 %v10696_v24 }
  0x53   : > { %864 = vmatmul.f32.vlgmr.msrb.gmra.mxu0 %v10696_v24  ;;  %885 = vmatpush.msrb.mxu1 %v10665_v11 }
  0x54   : > { %1040 = vmatpush.msra.mxu2 %v941_v34  ;;  %982 = vmatpush.msra.mxu0 %v10701_v26 }
  0x55   : > { %887 = vmatpush.msrb.mxu1 %v10674_v13  ;;  %1071 = vmatpush.msra.mxu3 %v10689_v19 }
  0x56   : > { %1044 = vmatpush.msra.mxu2 %v947_v52  ;;  %889 = vmatmul.f32.vlgmr.msrb.gmra.mxu1 %v10696_v24 }
  0x57   : > { %985 = vmatpush.msra.mxu0 %v946_v47  ;;  %1011 = vmatpush.msra.mxu1 %v10689_v19 }
  0x58   : > { %1048 = vmatpush.msra.mxu2 %v953_v53  ;;  %1073 = vmatpush.msra.mxu3 %v912_v41 }
  0x59   : > { %988 = vmatpush.msra.mxu0 %v952_v50  ;;  %1013 = vmatpush.msra.mxu1 %v912_v41 }
  0x5a   : > { %1052 = vmatpush.msra.mxu2 %v959_v54  ;;  %1075 = vmatpush.msra.mxu3 %v914_v44 }
  0x5b   : > { %991 = vmatpush.msra.mxu0 %v958_v51  ;;  %1054 = vmatmul.f32.vlgmr.msra.gmra.mxu2 %v10696_v24 }
  0x5c   : > { %994 = vmatmul.f32.vlgmr.msra.gmra.mxu0 %v10711_v31  ;;  %1015 = vmatpush.msra.mxu1 %v914_v44  ;;  %v1085_v31 = vld [vmem:[%s12408_s3] sm:$0xff] }
  0x5d   : > { %1077 = vmatpush.msra.mxu3 %v916_v45 }
  0x5e   : > { %1079 = vmatmul.f32.vlgmr.msra.gmra.mxu3 %v10696_v24  ;;  %1017 = vmatpush.msra.mxu1 %v916_v45  ;;  %v10315_v45 = vld [vmem:[%s12408_s3 + $0x8] sm:$0xff] }
  0x5f   : > { %1021 = vmatmul.f32.vlgmr.msra.gmra.mxu1 %v10723_v38  ;;  %v1260_v47 = vsel %vm1258_vm2, %v10315_v45, 0 }
  0x60   : > { %v1279_v49 = vand.u32 4294901760, %v1260_v47 }
  0x62   : > { %v1280_v50 = vsub.f32 %v1260_v47, %v1279_v49 }
  0x64   : > { %v1281_v53 = vand.u32 4294901760, %v1280_v50 }
  0x66   : > { %v1282_v58 = vsub.f32 %v1280_v50, %v1281_v53 }
  0xc8   : > { %v734_v61 = vpop.f32.mrf.mxu0 }
  0xc9   : > { %v832_v2 = vpop.f32.mrf.mxu3 }
  0xcb   : > { %v775_v62 = vpop.f32.mrf.mxu1  ;;  %v805_v63 = vpop.f32.mrf.mxu2 }
  0xcc   : > { %v776_v0 = vadd.f32 %v775_v62, %v734_v61 }
  0xce   : > { %v806_v1 = vadd.f32 %v805_v63, %v776_v0  ;;  %v1283_v63 = vand.u32 4294901760, %v1282_v58 }
  0xd0   : > { %v833_v3 = vadd.f32 %v832_v2, %v806_v1  ;;  %v865_v4 = vpop.f32.mrf.mxu0 }
  0xd2   : > { %v866_v5 = vadd.f32 %v865_v4, %v833_v3 }
  0xd3   : > { %v890_v6 = vpop.f32.mrf.mxu1 }
  0xd4   : > { %v891_v7 = vadd.f32 %v890_v6, %v866_v5 }
  0xd5   : > { %v924_v8 = vpop.f32.mrf.mxu2  ;;  %v965_v10 = vpop.f32.mrf.mxu3 }
  0xd6   : > { %v1088_v9 = vsel %vm1086_vm1, %v891_v7, 0  ;;  %v966_v12 = vadd.f32 %v965_v10, %v924_v8 }
  0xd7   : > { %v1110_v11 = vand.u32 4294901760, %v1088_v9 }
  0xd9   : > { %v995_v13 = vpop.f32.mrf.mxu0  ;;  %v1111_v15 = vsub.f32 %v1088_v9, %v1110_v11 }
  0xda   : > { %v996_v14 = vadd.f32 %v995_v13, %v966_v12 }
  0xdb   : > { %v1112_v20 = vand.u32 4294901760, %v1111_v15 }
  0xdc   : > { %v1022_v16 = vpop.f32.mrf.mxu1 }
  0xdd   : > { %v1023_v17 = vadd.f32 %v1022_v16, %v996_v14  ;;  %v1113_v24 = vsub.f32 %v1111_v15, %v1112_v20 }
  0xde   : > { %v1055_v18 = vpop.f32.mrf.mxu2 }
  0xdf   : > { %v1056_v19 = vadd.f32 %v1055_v18, %v1023_v17  ;;  %v1114_v27 = vand.u32 4294901760, %v1113_v24 }
  0xe1   : > { %v1080_v21 = vpop.f32.mrf.mxu3 }
  0xe2   : > { %v1081_v22 = vadd.f32 %v1080_v21, %v1056_v19 }
  0xe4   : > { %v1091_v23 = vsel %vm1086_vm1, %v1081_v22, 0 }
  0xe5   : > { %v1108_v25 = vand.u32 4294901760, %v1091_v23 }
  0xe7   : > { %v1135_v26 = vsub.f32 %v1091_v23, %v1108_v25  ;;  %1109 = vmatpush.xpose.msrb.mxu0 %v1108_v25  ;;  %1185 = vmatpush.xpose.msrb.mxu3 %v1108_v25 }
  0xe9   : > { %1162 = vmatpush.xpose.msrb.mxu2 %v1135_v26  ;;  %v1136_v28 = vand.u32 4294901760, %v1135_v26 }
  0xea   : > { %1115 = vmatmul.f32.vlgmr.msrb.gmra.mxu0 %v1114_v27  ;;  %1189 = vmatmul.f32.vlgmr.msrb.gmra.mxu3 %v1112_v20 }
  0xeb   : > { %1211 = vmatpush.xpose.msra.mxu0 %v1136_v28  ;;  %v1137_v29 = vsub.f32 %v1135_v26, %v1136_v28 }
  0xec   : > { %1165 = vmatmul.f32.vlgmr.msrb.gmra.mxu2 %v1111_v15 }
  0xed   : > { %v1138_v30 = vand.u32 4294901760, %v1137_v29 }
  0xef   : > { %1139 = vmatpush.xpose.msrb.mxu1 %v1138_v30  ;;  %v683_v30 = vld [vmem:[%s12409_s4] sm:$0xff] }
  0xf2   : > { %1141 = vmatmul.f32.vlgmr.msrb.gmra.mxu1 %v1110_v11  ;;  %1213 = vmatmul.f32.vlgmr.msra.gmra.mxu0 %v1110_v11 }
  0xf3   : > { %1233 = vmatpush.xpose.msra.mxu1 %v1108_v25 }
  0xfa   : > { %1235 = vmatmul.f32.vlgmr.msra.gmra.mxu1 %v1110_v11 }
 0x167   : > { %v1116_v32 = vpop.f32.mrf.mxu0 }
 0x168   : > { %v1117_v33 = vadd.f32 %v1116_v32, %v1085_v31  ;;  %v1431_v32 = vsel %vm1258_vm2, %v683_v30, 0 }
 0x16d   : > { %v1190_v38 = vpop.f32.mrf.mxu3 }
 0x16f   : > { %v1142_v34 = vpop.f32.mrf.mxu1  ;;  %v1166_v36 = vpop.f32.mrf.mxu2 }
 0x170   : > { %v1143_v35 = vadd.f32 %v1142_v34, %v1117_v33  ;;  %v1214_v40 = vpop.f32.mrf.mxu0 }
 0x172   : > { %v1167_v37 = vadd.f32 %v1166_v36, %v1143_v35  ;;  %v10764_v35 = vand.u32 4294901760, %v1431_v32  ;;  %v684_v36 = vld [vmem:[%s12409_s4 + $0x8] sm:$0xff] }
 0x174   : > { %v1191_v39 = vadd.f32 %v1190_v38, %v1167_v37  ;;  %v10770_v37 = vsub.f32 %v1431_v32, %v10764_v35  ;;  %v1434_v38 = vsel %vm1258_vm2, %v684_v36, 0 }
 0x176   : > { %v1215_v41 = vadd.f32 %v1214_v40, %v1191_v39  ;;  %v10774_v40 = vand.u32 4294901760, %v10770_v37 }
 0x177   : > { %v1236_v42 = vpop.f32.mrf.mxu1 }
 0x178   : > { %v1237_v43 = vadd.f32 %v1236_v42, %v1215_v41  ;;  %v10776_v41 = vand.u32 4294901760, %v1434_v38 }
 0x17a   : > { %v10316_v44 = vmul.f32 -1.442695, %v1237_v43  ;;  %v10781_v45 = vsub.f32 %v1434_v38, %v10776_v41 }
 0x17c   : > { %10423 = vpow2.f32 %v10316_v44  ;;  %v1456_v44 = vsub.f32 %v10770_v37, %v10774_v40 }
 0x182   : > { %v10424_v46 = vpop.eup %10423 }
 0x183   : > { %v1242_v48 = vadd.f32 1.0, %v10424_v46 }
 0x185   : > { %10425 = vrcp.f32 %v1242_v48  ;;  %v1254_v55 = vand.u32 2147483648, %v1242_v48  ;;  %v1252_v57 = vand.u32 2147483647, %v1242_v48  ;;  %vm1248_vm4 = vweird.f32 %v1242_v48 }
 0x187   : > { %v1255_v60 = vor.u32 1.1754944e-38, %v1254_v55  ;;  %vm1253_vm6 = vcmp.eq.f32.partialorder %v1252_v57, 8.507059e+37  ;;  %v685_v57 = vld [vmem:[%s12410_s5] sm:$0xff] }
 0x188   : > { %v10807_v58 = vand.u32 4294901760, %v685_v57 }
 0x18b   : > { %v10426_v51 = vpop.eup %10425 }
 0x18c   : > { %v1244_v52 = vmul.f32 %v10426_v51, %v1242_v48  ;;  %vm1249_vm3 = vweird.f32 %v10426_v51  ;;  %v10783_v48 = vand.u32 4294901760, %v1456_v44 }
 0x18d   : > { %vm1250_vm5 = vmor %vm1248_vm4, %vm1249_vm3  ;;  %vm3939_vm3 = vcmask 523264  }
 0x18e   : > { %v1245_v54 = vsub.f32 1.0, %v1244_v52 }
 0x190   : > { %v1246_v56 = vmul.f32 %v10426_v51, %v1245_v54 }
 0x192   : > { %v1247_v59 = vadd.f32 %v10426_v51, %v1246_v56 }
 0x194   : > { %v1251_v61 = vsel %vm1250_vm5, %v10426_v51, %v1247_v59  ;;  %v10810_v59 = vsub.f32 %v685_v57, %v10807_v58 }
 0x195   : > { %v1256_v62 = vsel %vm1253_vm6, %v1255_v60, %v1251_v61 }
 0x196   : > { %v1277_v0 = vand.u32 4294901760, %v1256_v62  ;;  %v10815_v60 = vand.u32 4294901760, %v10810_v59 }
 0x198   : > { %1278 = vmatpush.msra.mxu2 %v1277_v0  ;;  %1354 = vmatpush.msrb.mxu1 %v1277_v0  ;;  %v1304_v1 = vsub.f32 %v1256_v62, %v1277_v0  ;;  %v1671_v61 = vsub.f32 %v10810_v59, %v10815_v60 }
 0x199   : > { %1284 = vmatmul.f32.vlgmr.msra.gmra.mxu2 %v1283_v63  ;;  %1358 = vmatmul.f32.vlgmr.msrb.gmra.mxu1 %v1281_v53 }
 0x19a   : > { %1331 = vmatpush.msrb.mxu0 %v1304_v1  ;;  %v1305_v2 = vand.u32 4294901760, %v1304_v1  ;;  %v10821_v62 = vand.u32 4294901760, %v1671_v61  ;;  %v686_v61 = vld [vmem:[%s12411_s6] sm:$0xff] }
 0x19b   : > { %1334 = vmatmul.f32.vlgmr.msrb.gmra.mxu0 %v1280_v50 }
 0x19c   : > { %1380 = vmatpush.msrb.mxu2 %v1305_v2  ;;  %v1306_v3 = vsub.f32 %v1304_v1, %v1305_v2 }
 0x19e   : > { %v1307_v4 = vand.u32 4294901760, %v1306_v3 }
 0x1a0   : > { %1308 = vmatpush.msra.mxu3 %v1307_v4 }
 0x1a1   : > { %1310 = vmatmul.f32.vlgmr.msra.gmra.mxu3 %v1279_v49  ;;  %1382 = vmatmul.f32.vlgmr.msrb.gmra.mxu2 %v1279_v49 }
 0x1a2   : > { %1402 = vmatpush.msrb.mxu3 %v1277_v0 }
 0x1a9   : > { %1404 = vmatmul.f32.vlgmr.msrb.gmra.mxu3 %v1279_v49  ;;  %v10786_v49 = vand.u32 4294901760, %v10781_v45 }
 0x1ab   : > { %v1464_v52 = vsub.f32 %v10781_v45, %v10786_v49 }
 0x1ad   : > { %v10793_v55 = vand.u32 4294901760, %v1464_v52 }
 0x216   : > { %v1359_v9 = vpop.f32.mrf.mxu1 }
 0x218   : > { %v1335_v7 = vpop.f32.mrf.mxu0 }
 0x21c   : > { %v1285_v5 = vpop.f32.mrf.mxu2 }
 0x224   : > { %v1311_v6 = vpop.f32.mrf.mxu3  ;;  %v1383_v11 = vpop.f32.mrf.mxu2 }
 0x225   : > { %v1312_v8 = vadd.f32 %v1311_v6, %v1285_v5 }
 0x227   : > { %v1336_v10 = vadd.f32 %v1335_v7, %v1312_v8 }
 0x229   : > { %v1360_v12 = vadd.f32 %v1359_v9, %v1336_v10 }
 0x22b   : > { %v1384_v13 = vadd.f32 %v1383_v11, %v1360_v12 }
 0x22c   : > { %v1405_v14 = vpop.f32.mrf.mxu3 }
 0x22d   : > { %v1406_v15 = vadd.f32 %v1405_v14, %v1384_v13 }
 0x22f   : > { %v1408_v16 = vsel %vm1258_vm2, %v1406_v15, -inf }
 0x230   : > { %v1409_v17 = vrot.slane %v1408_v16, 4 }
 0x232   : > { %v1410_v18 = vmax.f32 %v1408_v16, %v1409_v17 }
 0x234   : > { %v1411_v19 = vrot.slane %v1410_v18, 2 }
 0x236   : > { %v1412_v20 = vmax.f32 %v1410_v18, %v1411_v19 }
 0x238   : > { %v1413_v21 = vrot.slane %v1412_v20, 1 }
 0x23a   : > { %v1414_v22 = vmax.f32 %v1412_v20, %v1413_v21 }
 0x23c   : > { %v1415_v23 = vsub.f32 %v1406_v15, %v1414_v22 }
 0x23e   : > { %v1416_v24 = vmul.f32 1.442695, %v1415_v23 }
 0x240   : > { %10427 = vpow2.f32 %v1416_v24 }
 0x246   : > { %v10428_v25 = vpop.eup %10427 }
 0x247   : > { %v1418_v26 = vsel %vm1258_vm2, %v10428_v25, 0.0 }
 0x248   : > { %v1419_v27 = vrot.slane %v1418_v26, 4 }
 0x24a   : > { %v1420_v28 = vadd.f32 %v1419_v27, %v1418_v26 }
 0x24c   : > { %v1421_v29 = vrot.slane %v1420_v28, 2 }
 0x24e   : > { %v1422_v31 = vadd.f32 %v1421_v29, %v1420_v28 }
 0x250   : > { %v1423_v33 = vrot.slane %v1422_v31, 1 }
 0x252   : > { %v1424_v34 = vadd.f32 %v1423_v33, %v1422_v31 }
 0x254   : > { %10429 = vrcp.f32 %v1424_v34 }
 0x25a   : > { %v10430_v39 = vpop.eup %10429 }
 0x25b   : > { %v1426_v42 = vmul.f32 %v10430_v39, %v1424_v34 }
 0x25d   : > { %v1427_v43 = vsub.f32 2.0, %v1426_v42 }
 0x25f   : > { %v1428_v46 = vmul.f32 %v10430_v39, %v1427_v43  ;;  %v10832_v43 = vld [vmem:[%s10829_s21] sm:$0xff] }
 0x261   : > { %v1429_v47 = vmul.f32 %v10428_v25, %v1428_v46 }
 0x263   : > { %v1451_v50 = vand.u32 4294901760, %v1429_v47 }
 0x265   : > { %1452 = vmatpush.msra.mxu0 %v1451_v50  ;;  %1545 = vmatpush.msra.mxu3 %v1451_v50  ;;  %v1486_v51 = vsub.f32 %v1429_v47, %v1451_v50  ;;  %v1799_v47 = vsel %vm1086_vm1, %v10832_v43, 0 }
 0x266   : > { %1458 = vmatmul.f32.vlgmr.msra.gmra.mxu0 %v10783_v48  ;;  %1549 = vmatmul.f32.vlgmr.msra.gmra.mxu3 %v10774_v40 }
 0x267   : > { %1517 = vmatpush.msra.mxu2 %v1486_v51  ;;  %v1487_v53 = vand.u32 4294901760, %v1486_v51  ;;  %1673 = vmatpush.msrb.mxu3 %v10821_v62 }
 0x268   : > { %1520 = vmatmul.f32.vlgmr.msra.gmra.mxu2 %v10770_v37 }
 0x269   : > { %1577 = vmatpush.msrb.mxu0 %v1487_v53  ;;  %v1488_v54 = vsub.f32 %v1486_v51, %v1487_v53  ;;  %1635 = vmatpush.msrb.mxu2 %v10807_v58 }
 0x26a   : > { %1786 = vmatpush.msra.mxu3 %v10807_v58 }
 0x26b   : > { %v1489_v56 = vand.u32 4294901760, %v1488_v54  ;;  %1700 = vmatpush.msra.mxu0 %v10810_v59  ;;  %1760 = vmatpush.msra.mxu2 %v10815_v60  ;;  %v10836_v54 = vand.u32 4294901760, %v1799_v47 }
 0x26d   : > { %1490 = vmatpush.msra.mxu1 %v1489_v56 }
 0x26e   : > { %1466 = vmatmul.f32.gmra.mxu0 %v10793_v55  ;;  %1492 = vmatmul.f32.vlgmr.msra.gmra.mxu1 %v10764_v35 }
 0x26f   : > { %1603 = vmatpush.msrb.mxu1 %v1451_v50  ;;  %1555 = vmatmul.f32.gmra.mxu3 %v10786_v49 }
 0x270   : > { %1525 = vmatmul.f32.gmra.mxu2 %v10781_v45 }
 0x271   : > { %1728 = vmatpush.msra.mxu1 %v10807_v58 }
 0x276   : > { %1496 = vmatmul.f32.gmra.mxu1 %v10776_v41  ;;  %1579 = vmatmul.f32.vlgmr.msrb.gmra.mxu0 %v10764_v35 }
 0x27e   : > { %1583 = vmatmul.f32.gmra.mxu0 %v10776_v41  ;;  %1605 = vmatmul.f32.vlgmr.msrb.gmra.mxu1 %v10764_v35 }
 0x286   : > { %1609 = vmatmul.f32.gmra.mxu1 %v10776_v41 }
 0x2e3   : > { %v1459_v63 = vpop.f32.mrf.mxu0 }
 0x2e9   : > { %v1550_v4 = vpop.f32.mrf.mxu3 }
 0x2eb   : > { %v1467_v0 = vpop.f32.mrf.mxu0  ;;  %v1493_v1 = vpop.f32.mrf.mxu1 }
 0x2ec   : > { %v1521_v2 = vpop.f32.mrf.mxu2  ;;  %v1494_v3 = vadd.f32 %v1493_v1, %v1459_v63  ;;  %v10842_v63 = vld [vmem:[%s10829_s21 + $0x8] sm:$0xff] }
 0x2ee   : > { %v1522_v6 = vadd.f32 %v1521_v2, %v1494_v3  ;;  %v10845_v2 = vsub.f32 %v1799_v47, %v10836_v54 }
 0x2f0   : > { %v1551_v8 = vadd.f32 %v1550_v4, %v1522_v6  ;;  %v1802_v4 = vsel %vm1086_vm1, %v10842_v63, 0 }
 0x2f2   : > { %v1556_v15 = vpop.f32.mrf.mxu3 }
 0x2f3   : > { %v1497_v5 = vpop.f32.mrf.mxu1  ;;  %v1580_v7 = vpop.f32.mrf.mxu0 }
 0x2f4   : > { %v1498_v9 = vadd.f32 %v1497_v5, %v1467_v0  ;;  %v1526_v10 = vpop.f32.mrf.mxu2  ;;  %v1581_v11 = vadd.f32 %v1580_v7, %v1551_v8  ;;  %v10850_v8 = vand.u32 4294901760, %v10845_v2 }
 0x2f6   : > { %v1527_v13 = vadd.f32 %v1526_v10, %v1498_v9  ;;  %v10852_v9 = vand.u32 4294901760, %v1802_v4 }
 0x2f8   : > { %v1557_v19 = vadd.f32 %v1556_v15, %v1527_v13  ;;  %v687_v13 = vld [vmem:[%s12411_s6 + $0x8] sm:$0xff]  ;;  %v1825_v15 = vsub.f32 %v10845_v2, %v10850_v8 }
 0x2fb   : > { %v1606_v12 = vpop.f32.mrf.mxu1  ;;  %v1584_v17 = vpop.f32.mrf.mxu0 }
 0x2fc   : > { %v1607_v14 = vadd.f32 %v1606_v12, %v1581_v11  ;;  %v1585_v21 = vadd.f32 %v1584_v17, %v1557_v19 }
 0x2fe   : > { %v1614_v16 = vsel %vm1258_vm2, %v1607_v14, 0 }
 0x2ff   : > { %v1636_v18 = vand.u32 4294901760, %v1614_v16 }
 0x301   : > { %v1637_v20 = vsub.f32 %v1614_v16, %v1636_v18  ;;  %1675 = vmatmul.f32.vlgmr.msrb.gmra.mxu3 %v1636_v18  ;;  %v10860_v16 = vsub.f32 %v1802_v4, %v10852_v9 }
 0x303   : > { %v1610_v22 = vpop.f32.mrf.mxu1  ;;  %1703 = vmatmul.f32.vlgmr.msra.gmra.mxu0 %v1637_v20  ;;  %v1638_v23 = vand.u32 4294901760, %v1637_v20 }
 0x304   : > { %v1611_v24 = vadd.f32 %v1610_v22, %v1585_v21  ;;  %v10865_v21 = vand.u32 4294901760, %v10860_v16 }
 0x305   : > { %1732 = vmatmul.f32.vlgmr.msra.gmra.mxu1 %v1638_v23  ;;  %v1639_v25 = vsub.f32 %v1637_v20, %v1638_v23  ;;  %v10862_v20 = vand.u32 4294901760, %v1825_v15 }
 0x306   : > { %v1617_v26 = vsel %vm1258_vm2, %v1611_v24, 0 }
 0x307   : > { %v1644_v27 = vand.u32 4294901760, %v1617_v26  ;;  %v1640_v28 = vand.u32 4294901760, %v1639_v25  ;;  %v1833_v25 = vsub.f32 %v10860_v16, %v10865_v21 }
 0x309   : > { %1641 = vmatmul.f32.vlgmr.msrb.gmra.mxu2 %v1640_v28  ;;  %1679 = vmatmul.f32.gmra.mxu3 %v1644_v27  ;;  %v1645_v29 = vsub.f32 %v1617_v26, %v1644_v27 }
 0x30b   : > { %1708 = vmatmul.f32.gmra.mxu0 %v1645_v29  ;;  %v1646_v30 = vand.u32 4294901760, %v1645_v29 }
 0x30d   : > { %1738 = vmatmul.f32.gmra.mxu1 %v1646_v30  ;;  %v1647_v31 = vsub.f32 %v1645_v29, %v1646_v30  ;;  %v10872_v29 = vand.u32 4294901760, %v1833_v25 }
 0x30f   : > { %v1648_v32 = vand.u32 4294901760, %v1647_v31  ;;  %v1995_v31 = vld [vmem:[%s12412_s7 + $0x8] sm:$0xff] }
 0x311   : > { %1649 = vmatmul.f32.gmra.mxu2 %v1648_v32  ;;  %1788 = vmatmul.f32.vlgmr.msra.gmra.mxu3 %v1636_v18  ;;  %v2016_v32 = vand.u32 4294901760, %v1995_v31 }
 0x319   : > { %1762 = vmatmul.f32.vlgmr.msra.gmra.mxu2 %v1636_v18  ;;  %1792 = vmatmul.f32.gmra.mxu3 %v1644_v27 }
 0x321   : > { %1766 = vmatmul.f32.gmra.mxu2 %v1644_v27 }
 0x380   : > { %v1704_v39 = vpop.f32.mrf.mxu0 }
 0x382   : > { %v1733_v46 = vpop.f32.mrf.mxu1 }
 0x384   : > { %v1676_v33 = vpop.f32.mrf.mxu3 }
 0x388   : > { %v1709_v57 = vpop.f32.mrf.mxu0 }
 0x38a   : > { %v1739_v5 = vpop.f32.mrf.mxu1 }
 0x38c   : > { %v1642_v34 = vpop.f32.mrf.mxu2  ;;  %v1680_v36 = vpop.f32.mrf.mxu3 }
 0x38d   : > { %v1677_v38 = vadd.f32 %v1676_v33, %v1642_v34  ;;  %v1994_v33 = vld [vmem:[%s12412_s7] sm:$0xff]  ;;  %v2052_v34 = vsub.f32 %v1995_v31, %v2016_v32 }
 0x38f   : > { %v1705_v44 = vadd.f32 %v1704_v39, %v1677_v38  ;;  %v2053_v38 = vand.u32 4294901760, %v2052_v34 }
 0x391   : > { %v1734_v51 = vadd.f32 %v1733_v46, %v1705_v44 }
 0x394   : > { %v1650_v42 = vpop.f32.mrf.mxu2  ;;  %v1789_v52 = vpop.f32.mrf.mxu3 }
 0x395   : > { %v1681_v50 = vadd.f32 %v1680_v36, %v1650_v42  ;;  %v2018_v36 = vand.u32 4294901760, %v1994_v33  ;;  %v2054_v42 = vsub.f32 %v2052_v34, %v2053_v38 }
 0x397   : > { %v1710_v0 = vadd.f32 %v1709_v57, %v1681_v50  ;;  %v2058_v39 = vsub.f32 %v1994_v33, %v2018_v36  ;;  %v2055_v46 = vand.u32 4294901760, %v2054_v42 }
 0x399   : > { %v1740_v6 = vadd.f32 %v1739_v5, %v1710_v0  ;;  %v2059_v44 = vand.u32 4294901760, %v2058_v39 }
 0x39b   : > { %v2060_v47 = vsub.f32 %v2058_v39, %v2059_v44 }
 0x39c   : > { %v1763_v53 = vpop.f32.mrf.mxu2  ;;  %v1793_v12 = vpop.f32.mrf.mxu3 }
 0x39d   : > { %v1764_v56 = vadd.f32 %v1763_v53, %v1734_v51  ;;  %v2061_v50 = vand.u32 4294901760, %v2060_v47 }
 0x39f   : > { %v1790_v1 = vadd.f32 %v1789_v52, %v1764_v56  ;;  %v10318_v52 = vld [vmem:[%s12412_s7 + $0x18] sm:$0xff]  ;;  %v10317_v56 = vld [vmem:[%s12412_s7 + $0x10] sm:$0xff] }
 0x3a0   : > { %v2209_v53 = vand.u32 4294901760, %v10318_v52 }
 0x3a1   : > { %v1796_v3 = vmul.f32 %v1790_v1, %v686_v61  ;;  %v2211_v1 = vand.u32 4294901760, %v10317_v56 }
 0x3a2   : > { %v2245_v0 = vsub.f32 %v10318_v52, %v2209_v53 }
 0x3a3   : > { %v1820_v11 = vand.u32 4294901760, %v1796_v3  ;;  %v2251_v4 = vsub.f32 %v10317_v56, %v2211_v1 }
 0x3a4   : > { %v1767_v7 = vpop.f32.mrf.mxu2 }
 0x3a5   : > { %v1768_v10 = vadd.f32 %v1767_v7, %v1740_v6  ;;  %v1860_v18 = vsub.f32 %v1796_v3, %v1820_v11  ;;  %v2246_v3 = vand.u32 4294901760, %v2245_v0  ;;  %v2252_v7 = vand.u32 4294901760, %v2251_v4 }
 0x3a7   : > { %v1794_v14 = vadd.f32 %v1793_v12, %v1768_v10  ;;  %v1861_v23 = vand.u32 4294901760, %v1860_v18  ;;  %v2247_v6 = vsub.f32 %v2245_v0, %v2246_v3  ;;  %v2253_v12 = vsub.f32 %v2251_v4, %v2252_v7 }
 0x3a9   : > { %v1797_v17 = vmul.f32 %v1794_v14, %v687_v13  ;;  %v1862_v27 = vsub.f32 %v1860_v18, %v1861_v23  ;;  %v2254_v15 = vand.u32 4294901760, %v2253_v12 }
 0x3ab   : > { %v1818_v19 = vand.u32 4294901760, %v1797_v17  ;;  %v1863_v30 = vand.u32 4294901760, %v1862_v27 }
 0x3ad   : > { %1819 = vmatpush.msrb.mxu0 %v1818_v19  ;;  %1920 = vmatpush.msrb.mxu3 %v1818_v19  ;;  %v1854_v22 = vsub.f32 %v1797_v17, %v1818_v19 }
 0x3af   : > { %1821 = vmatpush.msrb.mxu0 %v1820_v11  ;;  %1890 = vmatpush.msrb.mxu2 %v1854_v22  ;;  %v1855_v24 = vand.u32 4294901760, %v1854_v22 }
 0x3b0   : > { %1922 = vmatpush.msrb.mxu3 %v1820_v11  ;;  %1827 = vmatmul.f32.vlgmr.msrb.gmra.mxu0 %v10862_v20 }
 0x3b1   : > { %1893 = vmatpush.msrb.mxu2 %v1860_v18  ;;  %1953 = vmatpush.msra.mxu0 %v1855_v24  ;;  %v1856_v26 = vsub.f32 %v1854_v22, %v1855_v24 }
 0x3b2   : > { %1896 = vmatmul.f32.vlgmr.msrb.gmra.mxu2 %v10845_v2  ;;  %1926 = vmatmul.f32.vlgmr.msrb.gmra.mxu3 %v10850_v8 }
 0x3b3   : > { %1957 = vmatpush.msra.mxu0 %v1861_v23  ;;  %v1857_v28 = vand.u32 4294901760, %v1856_v26  ;;  %2017 = vmatpush.msra.mxu2 %v2016_v32 }
 0x3b4   : > { %2056 = vmatpush.msra.mxu3 %v2055_v46 }
 0x3b5   : > { %1858 = vmatpush.msrb.mxu1 %v1857_v28  ;;  %2088 = vmatpush.msrb.mxu0 %v2052_v34 }
 0x3b6   : > { %2019 = vmatpush.msra.mxu2 %v2018_v36  ;;  %2062 = vmatpush.msra.mxu3 %v2061_v50 }
 0x3b7   : > { %1864 = vmatpush.msrb.mxu1 %v1863_v30  ;;  %2091 = vmatpush.msrb.mxu0 %v2058_v39 }
 0x3b8   : > { %1835 = vmatmul.f32.gmra.mxu0 %v10872_v29  ;;  %1866 = vmatmul.f32.vlgmr.msrb.gmra.mxu1 %v10836_v54 }
 0x3b9   : > { %1982 = vmatpush.msra.mxu1 %v1818_v19  ;;  %2151 = vmatpush.msrb.mxu2 %v2053_v38 }
 0x3ba   : > { %1901 = vmatmul.f32.gmra.mxu2 %v10860_v16  ;;  %1932 = vmatmul.f32.gmra.mxu3 %v10865_v21 }
 0x3bb   : > { %1984 = vmatpush.msra.mxu1 %v1820_v11  ;;  %2155 = vmatpush.msrb.mxu2 %v2059_v44  ;;  %v2248_v11 = vand.u32 4294901760, %v2247_v6 }
 0x3bc   : > { %2180 = vmatpush.msrb.mxu3 %v2016_v32 }
 0x3bd   : > { %2118 = vmatpush.msrb.mxu1 %v2016_v32 }
 0x3be   : > { %2182 = vmatpush.msrb.mxu3 %v2018_v36 }
 0x3bf   : > { %2120 = vmatpush.msrb.mxu1 %v2018_v36 }
 0x3c0   : > { %1870 = vmatmul.f32.gmra.mxu1 %v10852_v9  ;;  %1959 = vmatmul.f32.vlgmr.msra.gmra.mxu0 %v10836_v54 }
 0x3c1   : > { %2210 = vmatpush.msra.mxu0 %v2209_v53 }
 0x3c3   : > { %2212 = vmatpush.msra.mxu0 %v2211_v1 }
 0x3c8   : > { %1963 = vmatmul.f32.gmra.mxu0 %v10852_v9  ;;  %1986 = vmatmul.f32.vlgmr.msra.gmra.mxu1 %v10836_v54 }
 0x3c9   : > { %2249 = vmatpush.msra.mxu1 %v2248_v11 }
 0x3cb   : > { %2255 = vmatpush.msra.mxu1 %v2254_v15 }
 0x3d0   : > { %1990 = vmatmul.f32.gmra.mxu1 %v10852_v9 }
 0x42d   : > { %v1828_v51 = vpop.f32.mrf.mxu0 }
 0x435   : > { %v1836_v57 = vpop.f32.mrf.mxu0  ;;  %v1867_v61 = vpop.f32.mrf.mxu1 }
 0x436   : > { %v1897_v5 = vpop.f32.mrf.mxu2  ;;  %v1868_v10 = vadd.f32 %v1867_v61, %v1828_v51  ;;  %v1927_v13 = vpop.f32.mrf.mxu3 }
 0x438   : > { %v1898_v17 = vadd.f32 %v1897_v5, %v1868_v10 }
 0x43a   : > { %v1928_v19 = vadd.f32 %v1927_v13, %v1898_v17 }
 0x43d   : > { %v1871_v14 = vpop.f32.mrf.mxu1  ;;  %v1960_v18 = vpop.f32.mrf.mxu0 }
 0x43e   : > { %v1872_v22 = vadd.f32 %v1871_v14, %v1836_v57  ;;  %v1902_v23 = vpop.f32.mrf.mxu2  ;;  %v1961_v24 = vadd.f32 %v1960_v18, %v1928_v19  ;;  %v1933_v28 = vpop.f32.mrf.mxu3 }
 0x440   : > { %v1903_v26 = vadd.f32 %v1902_v23, %v1872_v22 }
 0x442   : > { %v1934_v33 = vadd.f32 %v1933_v28, %v1903_v26 }
 0x445   : > { %v1987_v25 = vpop.f32.mrf.mxu1  ;;  %v1964_v31 = vpop.f32.mrf.mxu0 }
 0x446   : > { %v1988_v27 = vadd.f32 %v1987_v25, %v1961_v24  ;;  %v1965_v36 = vadd.f32 %v1964_v31, %v1934_v33 }
 0x448   : > { %v1997_v30 = vsel %vm1086_vm1, %v1988_v27, 0 }
 0x449   : > { %v2020_v32 = vand.u32 4294901760, %v1997_v30 }
 0x44b   : > { %v2021_v34 = vsub.f32 %v1997_v30, %v2020_v32  ;;  %2064 = vmatmul.f32.vlgmr.msra.gmra.mxu3 %v2020_v32 }
 0x44c   : > { %2311 = vmatpush.msra.mxu3 %v2209_v53 }
 0x44d   : > { %v1991_v38 = vpop.f32.mrf.mxu1  ;;  %2094 = vmatmul.f32.vlgmr.msrb.gmra.mxu0 %v2021_v34  ;;  %v2022_v39 = vand.u32 4294901760, %v2021_v34 }
 0x44e   : > { %v1992_v42 = vadd.f32 %v1991_v38, %v1965_v36  ;;  %2313 = vmatpush.msra.mxu3 %v2211_v1  ;;  %2344 = vmatpush.msrb.mxu0 %v2246_v3 }
 0x44f   : > { %2124 = vmatmul.f32.vlgmr.msrb.gmra.mxu1 %v2022_v39  ;;  %v2023_v44 = vsub.f32 %v2021_v34, %v2022_v39 }
 0x450   : > { %v2000_v46 = vsel %vm1086_vm1, %v1992_v42, 0  ;;  %2348 = vmatpush.msrb.mxu0 %v2252_v7  ;;  %2373 = vmatpush.msrb.mxu1 %v2209_v53 }
 0x451   : > { %v2028_v47 = vand.u32 4294901760, %v2000_v46  ;;  %v2024_v50 = vand.u32 4294901760, %v2023_v44 }
 0x452   : > { %2375 = vmatpush.msrb.mxu1 %v2211_v1 }
 0x453   : > { %v2029_v51 = vsub.f32 %v2000_v46, %v2028_v47  ;;  %2025 = vmatmul.f32.vlgmr.msra.gmra.mxu2 %v2024_v50  ;;  %2068 = vmatmul.f32.gmra.mxu3 %v2028_v47 }
 0x454   : > { %2281 = vmatpush.msra.mxu2 %v2245_v0 }
 0x455   : > { %2099 = vmatmul.f32.gmra.mxu0 %v2029_v51  ;;  %v2030_v52 = vand.u32 4294901760, %v2029_v51 }
 0x456   : > { %2284 = vmatpush.msra.mxu2 %v2251_v4 }
 0x457   : > { %2130 = vmatmul.f32.gmra.mxu1 %v2030_v52  ;;  %v2031_v56 = vsub.f32 %v2029_v51, %v2030_v52 }
 0x459   : > { %v2032_v57 = vand.u32 4294901760, %v2031_v56 }
 0x45b   : > { %2033 = vmatmul.f32.gmra.mxu2 %v2032_v57  ;;  %2184 = vmatmul.f32.vlgmr.msrb.gmra.mxu3 %v2020_v32 }
 0x45d   : > { %2218 = vmatmul.f32.vlgmr.msra.gmra.mxu0 %v2024_v50 }
 0x45f   : > { %2257 = vmatmul.f32.vlgmr.msra.gmra.mxu1 %v2020_v32 }
 0x463   : > { %2157 = vmatmul.f32.vlgmr.msrb.gmra.mxu2 %v2020_v32  ;;  %2188 = vmatmul.f32.gmra.mxu3 %v2028_v47 }
 0x465   : > { %2226 = vmatmul.f32.gmra.mxu0 %v2032_v57 }
 0x467   : > { %2261 = vmatmul.f32.gmra.mxu1 %v2028_v47 }
 0x46b   : > { %2161 = vmatmul.f32.gmra.mxu2 %v2028_v47  ;;  %2317 = vmatmul.f32.vlgmr.msra.gmra.mxu3 %v2022_v39 }
 0x46d   : > { %2350 = vmatmul.f32.vlgmr.msrb.gmra.mxu0 %v2020_v32 }
 0x46f   : > { %2377 = vmatmul.f32.vlgmr.msrb.gmra.mxu1 %v2020_v32 }
 0x473   : > { %2287 = vmatmul.f32.vlgmr.msra.gmra.mxu2 %v2021_v34  ;;  %2323 = vmatmul.f32.gmra.mxu3 %v2030_v52 }
 0x475   : > { %2354 = vmatmul.f32.gmra.mxu0 %v2028_v47 }
 0x477   : > { %2381 = vmatmul.f32.gmra.mxu1 %v2028_v47 }
 0x47b   : > { %2292 = vmatmul.f32.gmra.mxu2 %v2029_v51 }
 0x4ca   : > { %v2095_v61 = vpop.f32.mrf.mxu0 }
 0x4cc   : > { %v2125_v0 = vpop.f32.mrf.mxu1 }
 0x4ce   : > { %v2065_v53 = vpop.f32.mrf.mxu3 }
 0x4d2   : > { %v2100_v4 = vpop.f32.mrf.mxu0 }
 0x4d4   : > { %v2131_v5 = vpop.f32.mrf.mxu1 }
 0x4d6   : > { %v2026_v1 = vpop.f32.mrf.mxu2  ;;  %v2069_v3 = vpop.f32.mrf.mxu3 }
 0x4d7   : > { %v2066_v6 = vadd.f32 %v2065_v53, %v2026_v1 }
 0x4d9   : > { %v2096_v10 = vadd.f32 %v2095_v61, %v2066_v6 }
 0x4da   : > { %v2219_v12 = vpop.f32.mrf.mxu0 }
 0x4db   : > { %v2126_v14 = vadd.f32 %v2125_v0, %v2096_v10 }
 0x4dc   : > { %v2258_v15 = vpop.f32.mrf.mxu1 }
 0x4dd   : > { %v2259_v38 = vadd.f32 %v2258_v15, %v2219_v12 }
 0x4de   : > { %v2034_v7 = vpop.f32.mrf.mxu2  ;;  %v2185_v11 = vpop.f32.mrf.mxu3 }
 0x4df   : > { %v2070_v13 = vadd.f32 %v2069_v3, %v2034_v7 }
 0x4e1   : > { %v2101_v19 = vadd.f32 %v2100_v4, %v2070_v13 }
 0x4e2   : > { %v2227_v26 = vpop.f32.mrf.mxu0 }
 0x4e3   : > { %v2132_v25 = vadd.f32 %v2131_v5, %v2101_v19 }
 0x4e4   : > { %v2262_v30 = vpop.f32.mrf.mxu1 }
 0x4e5   : > { %v2263_v1 = vadd.f32 %v2262_v30, %v2227_v26 }
 0x4e6   : > { %v2158_v17 = vpop.f32.mrf.mxu2  ;;  %v2189_v23 = vpop.f32.mrf.mxu3 }
 0x4e7   : > { %v2159_v18 = vadd.f32 %v2158_v17, %v2126_v14 }
 0x4e9   : > { %v2186_v22 = vadd.f32 %v2185_v11, %v2159_v18 }
 0x4ea   : > { %v2351_v47 = vpop.f32.mrf.mxu0 }
 0x4eb   : > { %v2394_v24 = vsel %vm1258_vm2, %v2186_v22, 0 }
 0x4ec   : > { %v2415_v31 = vand.u32 4294901760, %v2394_v24  ;;  %v2378_v56 = vpop.f32.mrf.mxu1 }
 0x4ee   : > { %v2162_v27 = vpop.f32.mrf.mxu2  ;;  %v2455_v36 = vsub.f32 %v2394_v24, %v2415_v31  ;;  %v2318_v42 = vpop.f32.mrf.mxu3 }
 0x4ef   : > { %v2163_v28 = vadd.f32 %v2162_v27, %v2132_v25 }
 0x4f0   : > { %v2456_v51 = vand.u32 4294901760, %v2455_v36 }
 0x4f1   : > { %v2190_v32 = vadd.f32 %v2189_v23, %v2163_v28 }
 0x4f2   : > { %v2457_v0 = vsub.f32 %v2455_v36, %v2456_v51  ;;  %v2355_v13 = vpop.f32.mrf.mxu0 }
 0x4f3   : > { %v2397_v33 = vsel %vm1258_vm2, %v2190_v32, 0 }
 0x4f4   : > { %v2413_v34 = vand.u32 4294901760, %v2397_v33  ;;  %v2458_v10 = vand.u32 4294901760, %v2457_v0  ;;  %v2382_v17 = vpop.f32.mrf.mxu1 }
 0x4f6   : > { %v2449_v39 = vsub.f32 %v2397_v33, %v2413_v34  ;;  %v2288_v44 = vpop.f32.mrf.mxu2  ;;  %2414 = vmatpush.xpose.msrb.mxu2 %v2413_v34  ;;  %2515 = vmatpush.xpose.msra.mxu1 %v2413_v34  ;;  %v2324_v7 = vpop.f32.mrf.mxu3 }
 0x4f7   : > { %v2289_v46 = vadd.f32 %v2288_v44, %v2259_v38 }
 0x4f8   : > { %2485 = vmatpush.xpose.msra.mxu0 %v2449_v39  ;;  %v2450_v50 = vand.u32 4294901760, %v2449_v39 }
 0x4f9   : > { %v2319_v52 = vadd.f32 %v2318_v42, %v2289_v46  ;;  %v10321_v46 = vld [vmem:[%s12413_s8 + $0x10] sm:$0xff] }
 0x4fa   : > { %2416 = vmatpush.xpose.msrb.mxu2 %v2415_v31  ;;  %2517 = vmatpush.xpose.msra.mxu1 %v2415_v31  ;;  %v2451_v57 = vsub.f32 %v2449_v39, %v2450_v50 }
 0x4fb   : > { %v2352_v53 = vadd.f32 %v2351_v47, %v2319_v52  ;;  %v2386_v52 = vld [vmem:[%s12413_s8 + $0x8] sm:$0xff] }
 0x4fc   : > { %2488 = vmatpush.xpose.msra.mxu0 %v2455_v36  ;;  %v2452_v61 = vand.u32 4294901760, %v2451_v57 }
 0x4fd   : > { %v2379_v3 = vadd.f32 %v2378_v56, %v2352_v53 }
 0x4fe   : > { %2548 = vmatpush.xpose.msra.mxu2 %v2450_v50  ;;  %v2293_v4 = vpop.f32.mrf.mxu2  ;;  %2453 = vmatpush.xpose.msrb.mxu3 %v2452_v61  ;;  %v2637_v50 = vsel %vm1086_vm1, %v10321_v46, 0 }
 0x4ff   : > { %v2294_v5 = vadd.f32 %v2293_v4, %v2263_v1  ;;  %v2388_v6 = vsel %vm1258_vm2, %v2379_v3, 0  ;;  %v2658_v53 = vand.u32 4294901760, %v2637_v50  ;;  %v10916_v1 = vand.u32 4294901760, %v10842_v63 }
 0x500   : > { %v2417_v11 = vand.u32 4294901760, %v2388_v6 }
 0x501   : > { %v2325_v12 = vadd.f32 %v2324_v7, %v2294_v5  ;;  %v2698_v0 = vsub.f32 %v2637_v50, %v2658_v53 }
 0x502   : > { %2552 = vmatpush.xpose.msra.mxu2 %v2456_v51  ;;  %2459 = vmatpush.xpose.msrb.mxu3 %v2458_v10  ;;  %v2418_v14 = vsub.f32 %v2388_v6, %v2417_v11  ;;  %v10919_v10 = vand.u32 4294901760, %v10832_v43 }
 0x503   : > { %v2356_v15 = vadd.f32 %v2355_v13, %v2325_v12  ;;  %v2699_v7 = vand.u32 4294901760, %v2698_v0 }
 0x504   : > { %2491 = vmatmul.f32.vlgmr.msra.gmra.mxu0 %v2418_v14  ;;  %v2419_v18 = vand.u32 4294901760, %v2418_v14 }
 0x505   : > { %2461 = vmatmul.f32.vlgmr.msrb.gmra.mxu3 %v2417_v11  ;;  %v2383_v19 = vadd.f32 %v2382_v17, %v2356_v15 }
 0x506   : > { %2577 = vmatpush.xpose.msra.mxu3 %v2413_v34  ;;  %2521 = vmatmul.f32.vlgmr.msra.gmra.mxu1 %v2419_v18  ;;  %v2420_v22 = vsub.f32 %v2418_v14, %v2419_v18  ;;  %v10322_v34 = vld [vmem:[%s12413_s8 + $0x18] sm:$0xff] }
 0x507   : > { %v2391_v23 = vsel %vm1258_vm2, %v2383_v19, 0  ;;  %v2640_v38 = vsel %vm1086_vm1, %v10322_v34, 0 }
 0x508   : > { %v2421_v24 = vand.u32 4294901760, %v2420_v22  ;;  %v2425_v25 = vand.u32 4294901760, %v2391_v23  ;;  %v2656_v39 = vand.u32 4294901760, %v2640_v38 }
 0x50a   : > { %2579 = vmatpush.xpose.msra.mxu3 %v2415_v31  ;;  %2422 = vmatmul.f32.vlgmr.msrb.gmra.mxu2 %v2421_v24  ;;  %v2426_v26 = vsub.f32 %v2391_v23, %v2425_v25  ;;  %v2385_v31 = vld [vmem:[%s12413_s8] sm:$0xff]  ;;  %v2692_v44 = vsub.f32 %v2640_v38, %v2656_v39 }
 0x50b   : > { %2657 = vmatpush.xpose.msrb.mxu0 %v2656_v39 }
 0x50c   : > { %2496 = vmatmul.f32.gmra.mxu0 %v2426_v26  ;;  %v2427_v27 = vand.u32 4294901760, %v2426_v26  ;;  %v2693_v57 = vand.u32 4294901760, %v2692_v44  ;;  %2728 = vmatpush.xpose.msrb.mxu2 %v2692_v44 }
 0x50d   : > { %2465 = vmatmul.f32.gmra.mxu3 %v2425_v25 }
 0x50e   : > { %2527 = vmatmul.f32.gmra.mxu1 %v2427_v27  ;;  %v2428_v28 = vsub.f32 %v2426_v26, %v2427_v27  ;;  %2758 = vmatpush.xpose.msrb.mxu3 %v2656_v39  ;;  %v2694_v61 = vsub.f32 %v2692_v44, %v2693_v57 }
 0x50f   : > { %2659 = vmatpush.xpose.msrb.mxu0 %v2658_v53 }
 0x510   : > { %v2429_v30 = vand.u32 4294901760, %v2428_v28  ;;  %v2695_v6 = vand.u32 4294901760, %v2694_v61  ;;  %2731 = vmatpush.xpose.msrb.mxu2 %v2698_v0 }
 0x512   : > { %2430 = vmatmul.f32.gmra.mxu2 %v2429_v30  ;;  %2760 = vmatpush.xpose.msrb.mxu3 %v2658_v53 }
 0x513   : > { %2791 = vmatpush.xpose.msra.mxu0 %v2693_v57  ;;  %2696 = vmatpush.xpose.msrb.mxu1 %v2695_v6 }
 0x515   : > { %2581 = vmatmul.f32.vlgmr.msra.gmra.mxu3 %v2417_v11 }
 0x517   : > { %2795 = vmatpush.xpose.msra.mxu0 %v2699_v7 }
 0x51a   : > { %2554 = vmatmul.f32.vlgmr.msra.gmra.mxu2 %v2417_v11  ;;  %v2700_v11 = vsub.f32 %v2698_v0, %v2699_v7 }
 0x51b   : > { %2885 = vmatpush.msra.mxu2 %v10916_v1 }
 0x51c   : > { %v2701_v17 = vand.u32 4294901760, %v2700_v11 }
 0x51d   : > { %2585 = vmatmul.f32.gmra.mxu3 %v2425_v25  ;;  %2887 = vmatpush.msra.mxu2 %v10919_v10 }
 0x51e   : > { %2702 = vmatpush.xpose.msrb.mxu1 %v2701_v17 }
 0x522   : > { %2558 = vmatmul.f32.gmra.mxu2 %v2425_v25  ;;  %2820 = vmatpush.xpose.msra.mxu1 %v2656_v39 }
 0x526   : > { %2822 = vmatpush.xpose.msra.mxu1 %v2658_v53 }
 0x581   : > { %v2492_v51 = vpop.f32.mrf.mxu0 }
 0x583   : > { %v2522_v5 = vpop.f32.mrf.mxu1 }
 0x588   : > { %v2462_v32 = vpop.f32.mrf.mxu3 }
 0x589   : > { %v2497_v19 = vpop.f32.mrf.mxu0 }
 0x58b   : > { %v2528_v25 = vpop.f32.mrf.mxu1 }
 0x58d   : > { %v2423_v33 = vpop.f32.mrf.mxu2 }
 0x58e   : > { %v2424_v36 = vadd.f32 %v2423_v33, %v2385_v31 }
 0x590   : > { %v2466_v42 = vpop.f32.mrf.mxu3  ;;  %v2463_v47 = vadd.f32 %v2462_v32, %v2424_v36 }
 0x592   : > { %v2493_v4 = vadd.f32 %v2492_v51, %v2463_v47 }
 0x594   : > { %v2523_v13 = vadd.f32 %v2522_v5, %v2493_v4 }
 0x595   : > { %v2431_v56 = vpop.f32.mrf.mxu2 }
 0x596   : > { %v2432_v3 = vadd.f32 %v2431_v56, %v2386_v52 }
 0x598   : > { %v2467_v12 = vadd.f32 %v2466_v42, %v2432_v3  ;;  %v2582_v14 = vpop.f32.mrf.mxu3 }
 0x59a   : > { %v2498_v23 = vadd.f32 %v2497_v19, %v2467_v12 }
 0x59c   : > { %v2529_v26 = vadd.f32 %v2528_v25, %v2498_v23 }
 0x59d   : > { %v2555_v15 = vpop.f32.mrf.mxu2 }
 0x59e   : > { %v2556_v18 = vadd.f32 %v2555_v15, %v2523_v13 }
 0x5a0   : > { %v2583_v22 = vadd.f32 %v2582_v14, %v2556_v18  ;;  %v2586_v30 = vpop.f32.mrf.mxu3 }
 0x5a2   : > { %v10319_v24 = vmul.f32 -1.442695, %v2583_v22 }
 0x5a4   : > { %10431 = vpow2.f32 %v10319_v24  ;;  %v10929_v24 = vsub.f32 %v10842_v63, %v10916_v1 }
 0x5a5   : > { %v2559_v27 = vpop.f32.mrf.mxu2 }
 0x5a6   : > { %v2560_v28 = vadd.f32 %v2559_v27, %v2529_v26 }
 0x5a8   : > { %v2587_v32 = vadd.f32 %v2586_v30, %v2560_v28 }
 0x5aa   : > { %v10432_v31 = vpop.eup %10431  ;;  %v10320_v33 = vmul.f32 -1.442695, %v2587_v32 }
 0x5ab   : > { %v2595_v34 = vadd.f32 1.0, %v10432_v31 }
 0x5ac   : > { %10433 = vpow2.f32 %v10320_v33 }
 0x5ad   : > { %10435 = vrcp.f32 %v2595_v34  ;;  %v2608_v46 = vand.u32 2147483648, %v2595_v34  ;;  %v2606_v50 = vand.u32 2147483647, %v2595_v34  ;;  %vm2602_vm8 = vweird.f32 %v2595_v34 }
 0x5af   : > { %v2609_v56 = vor.u32 1.1754944e-38, %v2608_v46  ;;  %vm2607_vm10 = vcmp.eq.f32.partialorder %v2606_v50, 8.507059e+37 }
 0x5b2   : > { %v10434_v36 = vpop.eup %10433 }
 0x5b3   : > { %v10436_v38 = vpop.eup %10435  ;;  %v2596_v42 = vadd.f32 1.0, %v10434_v36 }
 0x5b4   : > { %v2598_v44 = vmul.f32 %v10436_v38, %v2595_v34  ;;  %vm2603_vm7 = vweird.f32 %v10436_v38 }
 0x5b5   : > { %10437 = vrcp.f32 %v2596_v42  ;;  %vm2604_vm9 = vmor %vm2602_vm8, %vm2603_vm7  ;;  %v2623_v5 = vand.u32 2147483648, %v2596_v42  ;;  %v2621_v7 = vand.u32 2147483647, %v2596_v42  ;;  %vm2617_vm12 = vweird.f32 %v2596_v42 }
 0x5b6   : > { %v2599_v39 = vsub.f32 1.0, %v2598_v44 }
 0x5b7   : > { %v2624_v14 = vor.u32 1.1754944e-38, %v2623_v5  ;;  %vm2622_vm14 = vcmp.eq.f32.partialorder %v2621_v7, 8.507059e+37 }
 0x5b8   : > { %v2600_v47 = vmul.f32 %v10436_v38, %v2599_v39 }
 0x5ba   : > { %v2601_v51 = vadd.f32 %v10436_v38, %v2600_v47 }
 0x5bb   : > { %v10438_v52 = vpop.eup %10437 }
 0x5bc   : > { %v2613_v57 = vmul.f32 %v10438_v52, %v2596_v42  ;;  %v2605_v53 = vsel %vm2604_vm9, %v10436_v38, %v2601_v51  ;;  %vm2618_vm11 = vweird.f32 %v10438_v52 }
 0x5bd   : > { %v2610_v61 = vsel %vm2607_vm10, %v2609_v56, %v2605_v53  ;;  %vm2619_vm13 = vmor %vm2617_vm12, %vm2618_vm11 }
 0x5be   : > { %v2614_v0 = vsub.f32 1.0, %v2613_v57  ;;  %v2631_v3 = vsel %vm1086_vm1, %v2610_v61, 0 }
 0x5bf   : > { %v2660_v4 = vand.u32 4294901760, %v2631_v3 }
 0x5c0   : > { %v2615_v6 = vmul.f32 %v10438_v52, %v2614_v0 }
 0x5c1   : > { %2704 = vmatmul.f32.vlgmr.msrb.gmra.mxu1 %v2660_v4  ;;  %v2661_v11 = vsub.f32 %v2631_v3, %v2660_v4 }
 0x5c2   : > { %v2616_v12 = vadd.f32 %v10438_v52, %v2615_v6  ;;  %2986 = vmatpush.msrb.mxu1 %v10916_v1 }
 0x5c3   : > { %2734 = vmatmul.f32.vlgmr.msrb.gmra.mxu2 %v2661_v11  ;;  %v2662_v13 = vand.u32 4294901760, %v2661_v11 }
 0x5c4   : > { %v2620_v15 = vsel %vm2619_vm13, %v10438_v52, %v2616_v12  ;;  %2988 = vmatpush.msrb.mxu1 %v10919_v10 }
 0x5c5   : > { %2764 = vmatmul.f32.vlgmr.msrb.gmra.mxu3 %v2662_v13  ;;  %v2663_v17 = vsub.f32 %v2661_v11, %v2662_v13  ;;  %v2625_v18 = vsel %vm2622_vm14, %v2624_v14, %v2620_v15 }
 0x5c6   : > { %v2634_v19 = vsel %vm1086_vm1, %v2625_v18, 0 }
 0x5c7   : > { %v2664_v22 = vand.u32 4294901760, %v2663_v17  ;;  %v2668_v23 = vand.u32 4294901760, %v2634_v19 }
 0x5c9   : > { %2665 = vmatmul.f32.vlgmr.msrb.gmra.mxu0 %v2664_v22  ;;  %2708 = vmatmul.f32.gmra.mxu1 %v2668_v23  ;;  %v2669_v25 = vsub.f32 %v2634_v19, %v2668_v23  ;;  %v10937_v22 = vand.u32 4294901760, %v10929_v24 }
 0x5ca   : > { %2956 = vmatpush.msrb.mxu0 %v10929_v24 }
 0x5cb   : > { %2739 = vmatmul.f32.gmra.mxu2 %v2669_v25  ;;  %v2670_v26 = vand.u32 4294901760, %v2669_v25 }
 0x5cc   : > { %3019 = vmatpush.msrb.mxu2 %v10937_v22 }
 0x5cd   : > { %2770 = vmatmul.f32.gmra.mxu3 %v2670_v26  ;;  %v2671_v27 = vsub.f32 %v2669_v25, %v2670_v26  ;;  %v2922_v25 = vsub.f32 %v10929_v24, %v10937_v22 }
 0x5cf   : > { %v2672_v28 = vand.u32 4294901760, %v2671_v27  ;;  %v10951_v27 = vand.u32 4294901760, %v2922_v25 }
 0x5d1   : > { %2673 = vmatmul.f32.gmra.mxu0 %v2672_v28  ;;  %2824 = vmatmul.f32.vlgmr.msra.gmra.mxu1 %v2660_v4 }
 0x5d2   : > { %2924 = vmatpush.msra.mxu3 %v10951_v27  ;;  %3125 = vmatpush.msra.mxu1 %v10951_v27 }
 0x5d9   : > { %2797 = vmatmul.f32.vlgmr.msra.gmra.mxu0 %v2660_v4  ;;  %2828 = vmatmul.f32.gmra.mxu1 %v2668_v23 }
 0x5e1   : > { %2801 = vmatmul.f32.gmra.mxu0 %v2668_v23  ;;  %v10941_v23 = vsub.f32 %v10832_v43, %v10919_v10 }
 0x5e3   : > { %v10946_v26 = vand.u32 4294901760, %v10941_v23  ;;  %2959 = vmatpush.msrb.mxu0 %v10941_v23 }
 0x5e5   : > { %3086 = vmatpush.msra.mxu0 %v10916_v1  ;;  %v2928_v28 = vsub.f32 %v10941_v23, %v10946_v26  ;;  %3023 = vmatpush.msrb.mxu2 %v10946_v26 }
 0x5e7   : > { %3088 = vmatpush.msra.mxu0 %v10919_v10  ;;  %v10958_v43 = vand.u32 4294901760, %v2928_v28 }
 0x5e9   : > { %2930 = vmatpush.msra.mxu3 %v10958_v43  ;;  %3131 = vmatpush.msra.mxu1 %v10958_v43 }
 0x5eb   : > { %3048 = vmatpush.msrb.mxu3 %v10916_v1 }
 0x5ed   : > { %3050 = vmatpush.msrb.mxu3 %v10919_v10 }
 0x63e   : > { %v2705_v30 = vpop.f32.mrf.mxu1 }
 0x646   : > { %v2666_v32 = vpop.f32.mrf.mxu0  ;;  %v2709_v31 = vpop.f32.mrf.mxu1 }
 0x647   : > { %v2706_v63 = vadd.f32 %v2705_v30, %v2666_v32  ;;  %v2735_v33 = vpop.f32.mrf.mxu2 }
 0x648   : > { %v2765_v38 = vpop.f32.mrf.mxu3 }
 0x649   : > { %v2736_v36 = vadd.f32 %v2735_v33, %v2706_v63 }
 0x64b   : > { %v2766_v42 = vadd.f32 %v2765_v38, %v2736_v36  ;;  %v2860_v36 = vld [vmem:[%s12414_s9] sm:$0xff]  ;;  %v10323_v38 = vld [vmem:[%s12414_s9 + $0x10] sm:$0xff] }
 0x64e   : > { %v2674_v34 = vpop.f32.mrf.mxu0  ;;  %v2825_v39 = vpop.f32.mrf.mxu1 }
 0x64f   : > { %v2710_v44 = vadd.f32 %v2709_v31, %v2674_v34  ;;  %v2740_v50 = vpop.f32.mrf.mxu2 }
 0x650   : > { %v2771_v57 = vpop.f32.mrf.mxu3 }
 0x651   : > { %v2741_v51 = vadd.f32 %v2740_v50, %v2710_v44 }
 0x653   : > { %v2772_v53 = vadd.f32 %v2771_v57, %v2741_v51 }
 0x656   : > { %v2798_v46 = vpop.f32.mrf.mxu0  ;;  %v2829_v3 = vpop.f32.mrf.mxu1 }
 0x657   : > { %v2799_v47 = vadd.f32 %v2798_v46, %v2766_v42 }
 0x659   : > { %v2826_v52 = vadd.f32 %v2825_v39, %v2799_v47 }
 0x65b   : > { %v2832_v56 = vsel %vm1086_vm1, %v2826_v52, -inf }
 0x65c   : > { %2833 = vmax.xlane.f32.xlu0 %v2832_v56 }
 0x65e   : > { %v2802_v61 = vpop.f32.mrf.mxu0 }
 0x65f   : > { %v2803_v0 = vadd.f32 %v2802_v61, %v2772_v53  ;;  %v10324_v61 = vld [vmem:[%s12414_s9 + $0x18] sm:$0xff] }
 0x661   : > { %v2830_v4 = vadd.f32 %v2829_v3, %v2803_v0  ;;  %v2861_v3 = vld [vmem:[%s12414_s9 + $0x8] sm:$0xff] }
 0x663   : > { %v2835_v5 = vsel %vm1086_vm1, %v2830_v4, -inf }
 0x664   : > { %2836 = vmax.xlane.f32.xlu0 %v2835_v5 }
 0x6cf   : > { %v2834_v6 = vpop.xlane.xlu0 %2833 }
 0x6d0   : > { %v2838_v7 = vsub.f32 %v2826_v52, %v2834_v6 }
 0x6d2   : > { %v2840_v11 = vmul.f32 1.442695, %v2838_v7 }
 0x6d4   : > { %10439 = vpow2.f32 %v2840_v11 }
 0x6d7   : > { %v2837_v12 = vpop.xlane.xlu0 %2836 }
 0x6d8   : > { %v2839_v13 = vsub.f32 %v2830_v4, %v2837_v12 }
 0x6da   : > { %v10440_v14 = vpop.eup %10439  ;;  %v2842_v15 = vmul.f32 1.442695, %v2839_v13 }
 0x6db   : > { %v2844_v17 = vsel %vm1086_vm1, %v10440_v14, 0.0 }
 0x6dc   : > { %10441 = vpow2.f32 %v2842_v15  ;;  %2845 = vadd.xlane.f32.xlu1 %v2844_v17 }
 0x6e2   : > { %v10442_v18 = vpop.eup %10441 }
 0x6e3   : > { %v2847_v19 = vsel %vm1086_vm1, %v10442_v18, 0.0 }
 0x6e4   : > { %2848 = vadd.xlane.f32.xlu1 %v2847_v19 }
 0x74f   : > { %v2846_v30 = vpop.xlane.xlu1 %2845 }
 0x750   : > { %10443 = vrcp.f32 %v2846_v30 }
 0x756   : > { %v10444_v32 = vpop.eup %10443 }
 0x757   : > { %v2852_v31 = vmul.f32 %v10444_v32, %v2846_v30  ;;  %v2849_v63 = vpop.xlane.xlu1 %2848 }
 0x758   : > { %10445 = vrcp.f32 %v2849_v63 }
 0x759   : > { %v2854_v33 = vsub.f32 2.0, %v2852_v31 }
 0x75b   : > { %v2856_v34 = vmul.f32 %v10444_v32, %v2854_v33 }
 0x75d   : > { %v10971_v42 = vmul.f32 %v10440_v14, %v2856_v34 }
 0x75e   : > { %v10446_v44 = vpop.eup %10445 }
 0x75f   : > { %v2862_v39 = vmul.f32 %v2860_v36, %v10971_v42  ;;  %v3063_v46 = vmul.f32 %v10323_v38, %v10971_v42  ;;  %v2853_v47 = vmul.f32 %v10446_v44, %v2849_v63 }
 0x761   : > { %v2865_v50 = vsel %vm1086_vm1, %v2862_v39, 0  ;;  %v3066_v51 = vsel %vm1086_vm1, %v3063_v46, 0  ;;  %v2855_v52 = vsub.f32 2.0, %v2853_v47 }
 0x762   : > { %v2888_v56 = vand.u32 4294901760, %v2865_v50  ;;  %v10977_v53 = vand.u32 4294901760, %v3066_v51 }
 0x763   : > { %v2857_v57 = vmul.f32 %v10446_v44, %v2855_v52 }
 0x764   : > { %2932 = vmatmul.f32.vlgmr.msra.gmra.mxu3 %v2888_v56  ;;  %v2889_v0 = vsub.f32 %v2865_v50, %v2888_v56  ;;  %v3090_v11 = vsub.f32 %v3066_v51, %v10977_v53 }
 0x765   : > { %v10985_v4 = vmul.f32 %v10442_v18, %v2857_v57  ;;  %3187 = vmatpush.msra.mxu3 %v10916_v1 }
 0x766   : > { %2962 = vmatmul.f32.vlgmr.msrb.gmra.mxu0 %v2889_v0  ;;  %v2890_v5 = vand.u32 4294901760, %v2889_v0  ;;  %v3091_v19 = vand.u32 4294901760, %v3090_v11 }
 0x767   : > { %v3064_v6 = vmul.f32 %v10324_v61, %v10985_v4  ;;  %v2863_v7 = vmul.f32 %v2861_v3, %v10985_v4  ;;  %3189 = vmatpush.msra.mxu3 %v10919_v10  ;;  %3220 = vmatpush.msrb.mxu0 %v10937_v22 }
 0x768   : > { %2992 = vmatmul.f32.vlgmr.msrb.gmra.mxu1 %v2890_v5  ;;  %v2891_v12 = vsub.f32 %v2889_v0, %v2890_v5  ;;  %v3092_v32 = vsub.f32 %v3090_v11, %v3091_v19 }
 0x769   : > { %v2868_v13 = vsel %vm1086_vm1, %v2863_v7, 0  ;;  %v3069_v14 = vsel %vm1086_vm1, %v3064_v6, 0  ;;  %3224 = vmatpush.msrb.mxu0 %v10946_v26  ;;  %3249 = vmatpush.msrb.mxu1 %v10916_v1 }
 0x76a   : > { %v2892_v15 = vand.u32 4294901760, %v2891_v12  ;;  %v2896_v17 = vand.u32 4294901760, %v2868_v13  ;;  %v3097_v25 = vand.u32 4294901760, %v3069_v14  ;;  %v3093_v33 = vand.u32 4294901760, %v3092_v32 }
 0x76b   : > { %3251 = vmatpush.msrb.mxu1 %v10919_v10 }
 0x76c   : > { %2893 = vmatmul.f32.vlgmr.msra.gmra.mxu2 %v2892_v15  ;;  %2936 = vmatmul.f32.gmra.mxu3 %v2896_v17  ;;  %v2897_v18 = vsub.f32 %v2868_v13, %v2896_v17  ;;  %v3098_v31 = vsub.f32 %v3069_v14, %v3097_v25 }
 0x76d   : > { %3157 = vmatpush.msra.mxu2 %v10929_v24 }
 0x76e   : > { %2967 = vmatmul.f32.gmra.mxu0 %v2897_v18  ;;  %v2898_v28 = vand.u32 4294901760, %v2897_v18  ;;  %v3099_v34 = vand.u32 4294901760, %v3098_v31 }
 0x76f   : > { %3160 = vmatpush.msra.mxu2 %v10941_v23 }
 0x770   : > { %2998 = vmatmul.f32.gmra.mxu1 %v2898_v28  ;;  %v2899_v30 = vsub.f32 %v2897_v18, %v2898_v28  ;;  %v3100_v36 = vsub.f32 %v3098_v31, %v3099_v34 }
 0x772   : > { %v2900_v63 = vand.u32 4294901760, %v2899_v30  ;;  %v3101_v38 = vand.u32 4294901760, %v3100_v36 }
 0x774   : > { %2901 = vmatmul.f32.gmra.mxu2 %v2900_v63  ;;  %3052 = vmatmul.f32.vlgmr.msrb.gmra.mxu3 %v2888_v56 }
 0x775   : > { %3326 = vmatpush.msrb.mxu3 %v10951_v27 }
 0x776   : > { %3094 = vmatmul.f32.vlgmr.msra.gmra.mxu0 %v3093_v33 }
 0x777   : > { %3332 = vmatpush.msrb.mxu3 %v10958_v43  ;;  %3358 = vmatpush.msra.mxu0 %v10929_v24  ;;  %v10325_v24 = vld [vmem:[%s12414_s9 + $0x20] sm:$0xff]  ;;  %v10326_v43 = vld [vmem:[%s12414_s9 + $0x28] sm:$0xff] }
 0x778   : > { %3133 = vmatmul.f32.vlgmr.msra.gmra.mxu1 %v10977_v53  ;;  %v3264_v27 = vmul.f32 %v10325_v24, %v10971_v42  ;;  %v3265_v39 = vmul.f32 %v10326_v43, %v10985_v4 }
 0x779   : > { %3361 = vmatpush.msra.mxu0 %v10941_v23  ;;  %3388 = vmatpush.msra.mxu1 %v10916_v1 }
 0x77a   : > { %v3267_v23 = vsel %vm1086_vm1, %v3264_v27, 0  ;;  %v3270_v42 = vsel %vm1086_vm1, %v3265_v39, 0 }
 0x77b   : > { %3390 = vmatpush.msra.mxu1 %v10919_v10  ;;  %v3290_v44 = vand.u32 4294901760, %v3267_v23  ;;  %v3298_v46 = vand.u32 4294901760, %v3270_v42 }
 0x77c   : > { %3025 = vmatmul.f32.vlgmr.msrb.gmra.mxu2 %v2888_v56  ;;  %3056 = vmatmul.f32.gmra.mxu3 %v2896_v17 }
 0x77d   : > { %3287 = vmatpush.msrb.mxu2 %v10916_v1  ;;  %v3299_v50 = vsub.f32 %v3270_v42, %v3298_v46 }
 0x77e   : > { %3102 = vmatmul.f32.gmra.mxu0 %v3101_v38 }
 0x77f   : > { %3289 = vmatpush.msrb.mxu2 %v10919_v10  ;;  %v3300_v52 = vand.u32 4294901760, %v3299_v50 }
 0x780   : > { %3137 = vmatmul.f32.gmra.mxu1 %v3097_v25 }
 0x784   : > { %3029 = vmatmul.f32.gmra.mxu2 %v2896_v17  ;;  %3193 = vmatmul.f32.vlgmr.msra.gmra.mxu3 %v3091_v19 }
 0x785   : > { %3450 = vmatpush.msra.mxu3 %v10916_v1  ;;  %v3291_v1 = vsub.f32 %v3267_v23, %v3290_v44 }
 0x786   : > { %3226 = vmatmul.f32.vlgmr.msrb.gmra.mxu0 %v10977_v53 }
 0x787   : > { %3452 = vmatpush.msra.mxu3 %v10919_v10  ;;  %v3292_v10 = vand.u32 4294901760, %v3291_v1 }
 0x788   : > { %3253 = vmatmul.f32.vlgmr.msrb.gmra.mxu1 %v10977_v53 }
 0x789   : > { %v3293_v47 = vsub.f32 %v3291_v1, %v3292_v10 }
 0x78b   : > { %v3294_v51 = vand.u32 4294901760, %v3293_v47 }
 0x78c   : > { %3163 = vmatmul.f32.vlgmr.msra.gmra.mxu2 %v3090_v11  ;;  %3199 = vmatmul.f32.gmra.mxu3 %v3099_v34 }
 0x78d   : > { %3421 = vmatpush.msra.mxu2 %v10937_v22  ;;  %v3301_v22 = vsub.f32 %v3299_v50, %v3300_v52 }
 0x78e   : > { %3230 = vmatmul.f32.gmra.mxu0 %v3097_v25 }
 0x78f   : > { %3425 = vmatpush.msra.mxu2 %v10946_v26  ;;  %v3302_v56 = vand.u32 4294901760, %v3301_v22 }
 0x790   : > { %3257 = vmatmul.f32.gmra.mxu1 %v3097_v25 }
 0x794   : > { %3168 = vmatmul.f32.gmra.mxu2 %v3098_v31  ;;  %3334 = vmatmul.f32.vlgmr.msrb.gmra.mxu3 %v3290_v44 }
 0x796   : > { %3364 = vmatmul.f32.vlgmr.msra.gmra.mxu0 %v3291_v1 }
 0x798   : > { %3394 = vmatmul.f32.vlgmr.msra.gmra.mxu1 %v3292_v10 }
 0x79c   : > { %3295 = vmatmul.f32.vlgmr.msrb.gmra.mxu2 %v3294_v51  ;;  %3338 = vmatmul.f32.gmra.mxu3 %v3298_v46 }
 0x79e   : > { %3369 = vmatmul.f32.gmra.mxu0 %v3299_v50 }
 0x7a0   : > { %3400 = vmatmul.f32.gmra.mxu1 %v3300_v52 }
 0x7a4   : > { %3303 = vmatmul.f32.gmra.mxu2 %v3302_v56  ;;  %3454 = vmatmul.f32.vlgmr.msra.gmra.mxu3 %v3290_v44 }
 0x7ac   : > { %3427 = vmatmul.f32.vlgmr.msra.gmra.mxu2 %v3290_v44  ;;  %3458 = vmatmul.f32.gmra.mxu3 %v3298_v46 }
 0x7b4   : > { %3431 = vmatmul.f32.gmra.mxu2 %v3298_v46 }
 0x7e3   : > { %v11027_v57 = vpop.f32.mrf.mxu0 }
 0x7e5   : > { %v11029_v53 = vpop.f32.mrf.mxu1 }
 0x7e7   : > { %v11025_v26 = vpop.f32.mrf.mxu3 }
 0x7eb   : > { %v11035_v3 = vpop.f32.mrf.mxu0 }
 0x7ed   : > { %v11037_v4 = vpop.f32.mrf.mxu1 }
 0x7ef   : > { %v11031_v61 = vpop.f32.mrf.mxu2  ;;  %v11033_v0 = vpop.f32.mrf.mxu3 }
 0x7f3   : > { %v3095_v7 = vpop.f32.mrf.mxu0 }
 0x7f5   : > { %v3134_v11 = vpop.f32.mrf.mxu1 }
 0x7f6   : > { %v3135_v19 = vadd.f32 %v3134_v11, %v3095_v7 }
 0x7f7   : > { %v11039_v5 = vpop.f32.mrf.mxu2  ;;  %v11041_v6 = vpop.f32.mrf.mxu3 }
 0x7fb   : > { %v3103_v14 = vpop.f32.mrf.mxu0 }
 0x7fd   : > { %v3138_v18 = vpop.f32.mrf.mxu1 }
 0x7fe   : > { %v3139_v34 = vadd.f32 %v3138_v18, %v3103_v14 }
 0x7ff   : > { %v11043_v12 = vpop.f32.mrf.mxu2  ;;  %v11045_v13 = vpop.f32.mrf.mxu3 }
 0x803   : > { %v3227_v30 = vpop.f32.mrf.mxu0 }
 0x805   : > { %v3254_v63 = vpop.f32.mrf.mxu1 }
 0x807   : > { %v11047_v15 = vpop.f32.mrf.mxu2  ;;  %v3194_v17 = vpop.f32.mrf.mxu3 }
 0x80b   : > { %v3231_v23 = vpop.f32.mrf.mxu0 }
 0x80d   : > { %v3258_v39 = vpop.f32.mrf.mxu1 }
 0x80f   : > { %v3164_v25 = vpop.f32.mrf.mxu2  ;;  %v3200_v32 = vpop.f32.mrf.mxu3 }
 0x810   : > { %v3165_v28 = vadd.f32 %v3164_v25, %v3135_v19 }
 0x812   : > { %v3195_v31 = vadd.f32 %v3194_v17, %v3165_v28 }
 0x813   : > { %v3365_v47 = vpop.f32.mrf.mxu0 }
 0x814   : > { %v3228_v33 = vadd.f32 %v3227_v30, %v3195_v31 }
 0x815   : > { %v3395_v52 = vpop.f32.mrf.mxu1 }
 0x816   : > { %v3255_v36 = vadd.f32 %v3254_v63, %v3228_v33  ;;  %v3487_v33 = vld [vmem:[%s12415_s10 + $0x28] sm:$0xff] }
 0x817   : > { %v3169_v38 = vpop.f32.mrf.mxu2  ;;  %v3335_v43 = vpop.f32.mrf.mxu3 }
 0x818   : > { %v3170_v24 = vadd.f32 %v3169_v38, %v3139_v34  ;;  %3464 = vrot.lane.b32.xlu2 %v3255_v36, %s10505_s18  ;;  %v3486_v34 = vld [vmem:[%s12415_s10 + $0x20] sm:$0xff]  ;;  %v3485_v36 = vld [vmem:[%s12415_s10 + $0x18] sm:$0xff]  ;;  %v3505_v38 = vand.u32 4294901760, %v3487_v33 }
 0x81a   : > { %v3201_v27 = vadd.f32 %v3200_v32, %v3170_v24  ;;  %v3507_v24 = vand.u32 4294901760, %v3486_v34  ;;  %3639 = vmatpush.msrb.mxu3 %v3505_v38  ;;  %3506 = vmatpush.msrb.mxu0 %v3505_v38 }
 0x81b   : > { %v3370_v17 = vpop.f32.mrf.mxu0 }
 0x81c   : > { %v3232_v44 = vadd.f32 %v3231_v23, %v3201_v27  ;;  %v3509_v27 = vand.u32 4294901760, %v3485_v36  ;;  %v3484_v23 = vld [vmem:[%s12415_s10 + $0x10] sm:$0xff]  ;;  %3641 = vmatpush.msrb.mxu3 %v3507_v24  ;;  %3508 = vmatpush.msrb.mxu0 %v3507_v24 }
 0x81d   : > { %v3401_v25 = vpop.f32.mrf.mxu1 }
 0x81e   : > { %v3259_v1 = vadd.f32 %v3258_v39, %v3232_v44  ;;  %v3545_v44 = vsub.f32 %v3487_v33, %v3505_v38  ;;  %v3551_v39 = vsub.f32 %v3486_v34, %v3507_v24  ;;  %3643 = vmatpush.msrb.mxu3 %v3509_v27  ;;  %3510 = vmatpush.msrb.mxu0 %v3509_v27 }
 0x81f   : > { %v3296_v42 = vpop.f32.mrf.mxu2  ;;  %v3339_v10 = vpop.f32.mrf.mxu3 }
 0x820   : > { %3466 = vrot.lane.b32.xlu0 %v3259_v1, %s10505_s18  ;;  %v3336_v46 = vadd.f32 %v3335_v43, %v3296_v42  ;;  %v3511_v43 = vand.u32 4294901760, %v3484_v23  ;;  %v3557_v1 = vsub.f32 %v3485_v36, %v3509_v27  ;;  %3601 = vmatpush.msrb.mxu2 %v3545_v44 }
 0x822   : > { %v3366_v51 = vadd.f32 %v3365_v47, %v3336_v46  ;;  %v3563_v42 = vsub.f32 %v3484_v23, %v3511_v43  ;;  %v3552_v46 = vand.u32 4294901760, %v3551_v39  ;;  %v3558_v47 = vand.u32 4294901760, %v3557_v1  ;;  %3604 = vmatpush.msrb.mxu2 %v3551_v39  ;;  %3645 = vmatpush.msrb.mxu3 %v3511_v43 }
 0x823   : > { %3512 = vmatpush.msrb.mxu0 %v3511_v43 }
 0x824   : > { %v3396_v56 = vadd.f32 %v3395_v52, %v3366_v51  ;;  %v3553_v52 = vsub.f32 %v3551_v39, %v3552_v46  ;;  %3607 = vmatpush.msrb.mxu2 %v3557_v1 }
 0x826   : > { %3610 = vmatpush.msrb.mxu2 %v3563_v42 }
 0x827   : > { %v3304_v50 = vpop.f32.mrf.mxu2  ;;  %v3455_v7 = vpop.f32.mrf.mxu3 }
 0x828   : > { %v3340_v22 = vadd.f32 %v3339_v10, %v3304_v50  ;;  %v3546_v10 = vand.u32 4294901760, %v3545_v44  ;;  %v3564_v50 = vand.u32 4294901760, %v3563_v42 }
 0x82a   : > { %v3371_v18 = vadd.f32 %v3370_v17, %v3340_v22  ;;  %v3547_v51 = vsub.f32 %v3545_v44, %v3546_v10  ;;  %v3559_v22 = vsub.f32 %v3557_v1, %v3558_v47  ;;  %v2934_v44 = vadd.f32 %v11025_v26, %v11031_v61 }
 0x82c   : > { %v3402_v28 = vadd.f32 %v3401_v25, %v3371_v18  ;;  %v3483_v18 = vld [vmem:[%s12415_s10 + $0x8] sm:$0xff]  ;;  %v3482_v25 = vld [vmem:[%s12415_s10] sm:$0xff]  ;;  %v2964_v39 = vadd.f32 %v11027_v57, %v2934_v44 }
 0x82e   : > { %v2994_v1 = vadd.f32 %v11029_v53, %v2964_v39  ;;  %v3743_v39 = vld [vmem:[%s12416_s11 + $0x20] sm:$0xff] }
 0x82f   : > { %v3428_v11 = vpop.f32.mrf.mxu2  ;;  %v3459_v31 = vpop.f32.mrf.mxu3 }
 0x830   : > { %v3429_v14 = vadd.f32 %v3428_v11, %v3396_v56  ;;  %v3548_v56 = vand.u32 4294901760, %v3547_v51  ;;  %v3565_v11 = vsub.f32 %v3563_v42, %v3564_v50 }
 0x832   : > { %v3456_v19 = vadd.f32 %v3455_v7, %v3429_v14  ;;  %v3554_v7 = vand.u32 4294901760, %v3553_v52  ;;  %3549 = vmatpush.msrb.mxu1 %v3548_v56  ;;  %v3560_v14 = vand.u32 4294901760, %v3559_v22  ;;  %v3566_v17 = vand.u32 4294901760, %v3565_v11 }
 0x834   : > { %3472 = vrot.lane.b32.xlu2 %v3456_v19, %s10506_s0  ;;  %3555 = vmatpush.msrb.mxu1 %v3554_v7  ;;  %v3513_v19 = vand.u32 4294901760, %v3483_v18 }
 0x836   : > { %3561 = vmatpush.msrb.mxu1 %v3560_v14  ;;  %3647 = vmatpush.msrb.mxu3 %v3513_v19 }
 0x837   : > { %v3432_v30 = vpop.f32.mrf.mxu2  ;;  %3514 = vmatpush.msrb.mxu0 %v3513_v19 }
 0x838   : > { %v3433_v32 = vadd.f32 %v3432_v30, %v3402_v28  ;;  %3567 = vmatpush.msrb.mxu1 %v3566_v17  ;;  %v3569_v28 = vsub.f32 %v3483_v18, %v3513_v19  ;;  %v3515_v30 = vand.u32 4294901760, %v3482_v25 }
 0x83a   : > { %v3460_v63 = vadd.f32 %v3459_v31, %v3433_v32  ;;  %v3570_v32 = vand.u32 4294901760, %v3569_v28  ;;  %v3575_v31 = vsub.f32 %v3482_v25, %v3515_v30  ;;  %3613 = vmatpush.msrb.mxu2 %v3569_v28  ;;  %3649 = vmatpush.msrb.mxu3 %v3515_v30 }
 0x83b   : > { %3516 = vmatpush.msrb.mxu0 %v3515_v30 }
 0x83c   : > { %3474 = vrot.lane.b32.xlu1 %v3460_v63, %s10506_s0  ;;  %v3571_v63 = vsub.f32 %v3569_v28, %v3570_v32  ;;  %v3576_v33 = vand.u32 4294901760, %v3575_v31  ;;  %3616 = vmatpush.msrb.mxu2 %v3575_v31 }
 0x83d   : > { %3676 = vmatpush.msra.mxu0 %v3546_v10  ;;  %v3027_v10 = vadd.f32 %v11043_v12, %v2994_v1 }
 0x83e   : > { %v3572_v34 = vand.u32 4294901760, %v3571_v63  ;;  %v3577_v36 = vsub.f32 %v3575_v31, %v3576_v33 }
 0x83f   : > { %3680 = vmatpush.msra.mxu0 %v3552_v46  ;;  %v3054_v46 = vadd.f32 %v11041_v6, %v3027_v10  ;;  %v2938_v6 = vadd.f32 %v11033_v0, %v11039_v5  ;;  %v3748_v5 = vld [vmem:[%s12417_s12 + $0x8] sm:$0xff] }
 0x840   : > { %3573 = vmatpush.msrb.mxu1 %v3572_v34  ;;  %v3578_v23 = vand.u32 4294901760, %v3577_v36 }
 0x841   : > { %3684 = vmatpush.msra.mxu0 %v3558_v47  ;;  %v2969_v12 = vadd.f32 %v11035_v3, %v2938_v6 }
 0x842   : > { %3579 = vmatpush.msrb.mxu1 %v3578_v23 }
 0x843   : > { %3688 = vmatpush.msra.mxu0 %v3564_v50  ;;  %v3000_v50 = vadd.f32 %v11037_v4, %v2969_v12 }
 0x844   : > { %3717 = vmatpush.msra.mxu1 %v3505_v38 }
 0x845   : > { %3692 = vmatpush.msra.mxu0 %v3570_v32  ;;  %v3031_v51 = vadd.f32 %v11047_v15, %v3000_v50  ;;  %v3763_v15 = vand.u32 4294901760, %v3748_v5 }
 0x846   : > { %3719 = vmatpush.msra.mxu1 %v3507_v24 }
 0x847   : > { %3696 = vmatpush.msra.mxu0 %v3576_v33  ;;  %v3058_v22 = vadd.f32 %v11045_v13, %v3031_v51  ;;  %v3747_v13 = vld [vmem:[%s12417_s12] sm:$0xff]  ;;  %3764 = vmatpush.msra.mxu2 %v3763_v15  ;;  %v3799_v25 = vsub.f32 %v3748_v5, %v3763_v15 }
 0x848   : > { %3721 = vmatpush.msra.mxu1 %v3509_v27 }
 0x84a   : > { %3723 = vmatpush.msra.mxu1 %v3511_v43 }
 0x84c   : > { %3725 = vmatpush.msra.mxu1 %v3513_v19  ;;  %v3765_v19 = vand.u32 4294901760, %v3747_v13 }
 0x84e   : > { %3727 = vmatpush.msra.mxu1 %v3515_v30  ;;  %v3805_v28 = vsub.f32 %v3747_v13, %v3765_v19  ;;  %3766 = vmatpush.msra.mxu2 %v3765_v19  ;;  %v3800_v30 = vand.u32 4294901760, %v3799_v25 }
 0x850   : > { %v3806_v32 = vand.u32 4294901760, %v3805_v28  ;;  %v3801_v31 = vsub.f32 %v3799_v25, %v3800_v30 }
 0x852   : > { %v3807_v63 = vsub.f32 %v3805_v28, %v3806_v32  ;;  %v3802_v33 = vand.u32 4294901760, %v3801_v31 }
 0x854   : > { %v3808_v34 = vand.u32 4294901760, %v3807_v63  ;;  %3803 = vmatpush.msra.mxu3 %v3802_v33 }
 0x856   : > { %3809 = vmatpush.msra.mxu3 %v3808_v34 }
 0x872   : > { %v3465_v42 = vpop.permute.xlu2 %3464 }
 0x873   : > { %v3478_v38 = vsel %vm1086_vm1, %v3054_v46, %v3465_v42  ;;  %v11142_v46 = vand.u32 4294901760, %v3743_v39 }
 0x88e   : > { %v3473_v24 = vpop.permute.xlu2 %3472 }
 0x88f   : > { %v3480_v27 = vsel %vm704_vm0, %v3478_v38, %v3473_v24  ;;  %v3742_v38 = vld [vmem:[%s12416_s11 + $0x18] sm:$0xff] }
 0x890   : > { %v3490_v43 = vsel %vm3488_vm15, %v3480_v27, 0 }
 0x891   : > { %v3517_v47 = vand.u32 4294901760, %v3490_v43 }
 0x892   : > { %v3467_v52 = vpop.permute.xlu0 %3466 }
 0x893   : > { %v3518_v26 = vsub.f32 %v3490_v43, %v3517_v47  ;;  %3581 = vmatmul.f32.vlgmr.msrb.gmra.mxu1 %v3517_v47  ;;  %v3479_v56 = vsel %vm1086_vm1, %v3058_v22, %v3467_v52 }
 0x894   : > { %3865 = vmatpush.msrb.mxu1 %v3763_v15 }
 0x895   : > { %v3519_v61 = vand.u32 4294901760, %v3518_v26  ;;  %3619 = vmatmul.f32.vlgmr.msrb.gmra.mxu2 %v3518_v26 }
 0x896   : > { %3867 = vmatpush.msrb.mxu1 %v3765_v19  ;;  %3898 = vmatpush.msrb.mxu2 %v3800_v30 }
 0x897   : > { %v3520_v57 = vsub.f32 %v3518_v26, %v3519_v61  ;;  %3653 = vmatmul.f32.vlgmr.msrb.gmra.mxu3 %v3519_v61  ;;  %v11157_v26 = vand.u32 4294901760, %v3742_v38  ;;  %v3741_v61 = vld [vmem:[%s12416_s11 + $0x10] sm:$0xff] }
 0x898   : > { %3902 = vmatpush.msrb.mxu2 %v3806_v32  ;;  %3927 = vmatpush.msrb.mxu3 %v3763_v15  ;;  %v3964_v12 = vand.u32 4294901760, %v3741_v61 }
 0x899   : > { %v3521_v53 = vand.u32 4294901760, %v3520_v57  ;;  %v4020_v50 = vsub.f32 %v3742_v38, %v11157_v26 }
 0x89a   : > { %3929 = vmatpush.msrb.mxu3 %v3765_v19  ;;  %v4026_v22 = vsub.f32 %v3741_v61, %v3964_v12 }
 0x89b   : > { %3522 = vmatmul.f32.vlgmr.msrb.gmra.mxu0 %v3521_v53 }
 0x89c   : > { %3835 = vmatpush.msrb.mxu0 %v3799_v25 }
 0x89e   : > { %3838 = vmatpush.msrb.mxu0 %v3805_v28 }
 0x8ae   : > { %v3475_v7 = vpop.permute.xlu1 %3474 }
 0x8af   : > { %v3481_v11 = vsel %vm704_vm0, %v3479_v56, %v3475_v7  ;;  %v4021_v7 = vand.u32 4294901760, %v4020_v50 }
 0x8b0   : > { %v3493_v14 = vsel %vm3488_vm15, %v3481_v11, 0  ;;  %v3739_v11 = vld [vmem:[%s12416_s11] sm:$0xff] }
 0x8b1   : > { %v3525_v17 = vand.u32 4294901760, %v3493_v14 }
 0x8b3   : > { %v3526_v18 = vsub.f32 %v3493_v14, %v3525_v17  ;;  %3585 = vmatmul.f32.gmra.mxu1 %v3525_v17 }
 0x8b5   : > { %3624 = vmatmul.f32.gmra.mxu2 %v3526_v18  ;;  %v3527_v0 = vand.u32 4294901760, %v3526_v18 }
 0x8b7   : > { %3659 = vmatmul.f32.gmra.mxu3 %v3527_v0  ;;  %v3528_v3 = vsub.f32 %v3526_v18, %v3527_v0  ;;  %v3968_v0 = vand.u32 4294901760, %v3739_v11 }
 0x8b9   : > { %v3529_v4 = vand.u32 4294901760, %v3528_v3  ;;  %v4022_v3 = vsub.f32 %v4020_v50, %v4021_v7  ;;  %v4038_v13 = vsub.f32 %v3739_v11, %v3968_v0 }
 0x8bb   : > { %3530 = vmatmul.f32.gmra.mxu0 %v3529_v4  ;;  %3729 = vmatmul.f32.vlgmr.msra.gmra.mxu1 %v3517_v47  ;;  %v4023_v15 = vand.u32 4294901760, %v4022_v3  ;;  %v4039_v28 = vand.u32 4294901760, %v4038_v13 }
 0x8bd   : > { %3772 = vmatmul.f32.vlgmr.msra.gmra.mxu2 %v10862_v20  ;;  %v4040_v32 = vsub.f32 %v4038_v13, %v4039_v28 }
 0x8bf   : > { %3811 = vmatmul.f32.vlgmr.msra.gmra.mxu3 %v10836_v54  ;;  %v4041_v31 = vand.u32 4294901760, %v4040_v32 }
 0x8c3   : > { %3698 = vmatmul.f32.vlgmr.msra.gmra.mxu0 %v3517_v47  ;;  %3733 = vmatmul.f32.gmra.mxu1 %v3525_v17  ;;  %v4014_v47 = vsub.f32 %v3743_v39, %v11142_v46 }
 0x8c5   : > { %3780 = vmatmul.f32.gmra.mxu2 %v10872_v29  ;;  %v4015_v6 = vand.u32 4294901760, %v4014_v47 }
 0x8c7   : > { %3815 = vmatmul.f32.gmra.mxu3 %v10852_v9  ;;  %v4016_v52 = vsub.f32 %v4014_v47, %v4015_v6 }
 0x8c9   : > { %v4017_v14 = vand.u32 4294901760, %v4016_v52 }
 0x8cb   : > { %3702 = vmatmul.f32.gmra.mxu0 %v3525_v17  ;;  %3871 = vmatmul.f32.vlgmr.msrb.gmra.mxu1 %v10850_v8  ;;  %v3746_v8 = vld [vmem:[%s12416_s11 + $0x38] sm:$0xff]  ;;  %v4027_v17 = vand.u32 4294901760, %v4026_v22 }
 0x8cc   : > { %v11105_v20 = vand.u32 4294901760, %v3746_v8 }
 0x8cd   : > { %3904 = vmatmul.f32.vlgmr.msrb.gmra.mxu2 %v10836_v54  ;;  %v4028_v4 = vsub.f32 %v4026_v22, %v4027_v17 }
 0x8ce   : > { %v11113_v29 = vsub.f32 %v3746_v8, %v11105_v20  ;;  %4104 = vmatpush.msra.mxu3 %v11105_v20  ;;  %3955 = vmatpush.msra.mxu0 %v11105_v20 }
 0x8cf   : > { %3931 = vmatmul.f32.vlgmr.msrb.gmra.mxu3 %v10836_v54  ;;  %v3740_v54 = vld [vmem:[%s12416_s11 + $0x8] sm:$0xff]  ;;  %v4029_v19 = vand.u32 4294901760, %v4028_v4 }
 0x8d0   : > { %v3997_v36 = vand.u32 4294901760, %v11113_v29  ;;  %4062 = vmatpush.msra.mxu2 %v11113_v29  ;;  %v3966_v56 = vand.u32 4294901760, %v3740_v54 }
 0x8d2   : > { %v3998_v1 = vsub.f32 %v11113_v29, %v3997_v36  ;;  %v4032_v18 = vsub.f32 %v3740_v54, %v3966_v56 }
 0x8d3   : > { %3841 = vmatmul.f32.vlgmr.msrb.gmra.mxu0 %v10845_v2  ;;  %3877 = vmatmul.f32.gmra.mxu1 %v10865_v21  ;;  %v3745_v2 = vld [vmem:[%s12416_s11 + $0x30] sm:$0xff] }
 0x8d4   : > { %v11115_v21 = vand.u32 4294901760, %v3745_v2  ;;  %v3999_v24 = vand.u32 4294901760, %v3998_v1  ;;  %v4033_v5 = vand.u32 4294901760, %v4032_v18 }
 0x8d5   : > { %3908 = vmatmul.f32.gmra.mxu2 %v10852_v9 }
 0x8d6   : > { %v11124_v23 = vsub.f32 %v3745_v2, %v11115_v21  ;;  %4106 = vmatpush.msra.mxu3 %v11115_v21  ;;  %3957 = vmatpush.msra.mxu0 %v11115_v21  ;;  %v4034_v25 = vsub.f32 %v4032_v18, %v4033_v5 }
 0x8d7   : > { %4000 = vmatpush.msra.mxu1 %v3999_v24  ;;  %3935 = vmatmul.f32.gmra.mxu3 %v10852_v9 }
 0x8d8   : > { %v4003_v42 = vand.u32 4294901760, %v11124_v23  ;;  %4065 = vmatpush.msra.mxu2 %v11124_v23  ;;  %v4035_v30 = vand.u32 4294901760, %v4034_v25 }
 0x8da   : > { %v4004_v27 = vsub.f32 %v11124_v23, %v4003_v42 }
 0x8db   : > { %3846 = vmatmul.f32.gmra.mxu0 %v10860_v16  ;;  %v3744_v16 = vld [vmem:[%s12416_s11 + $0x28] sm:$0xff] }
 0x8dc   : > { %v11127_v44 = vand.u32 4294901760, %v3744_v16  ;;  %v4005_v57 = vand.u32 4294901760, %v4004_v27 }
 0x8de   : > { %v11139_v10 = vsub.f32 %v3744_v16, %v11127_v44  ;;  %4108 = vmatpush.msra.mxu3 %v11127_v44  ;;  %3959 = vmatpush.msra.mxu0 %v11127_v44 }
 0x8df   : > { %4006 = vmatpush.msra.mxu1 %v4005_v57 }
 0x8e0   : > { %v4009_v43 = vand.u32 4294901760, %v11139_v10  ;;  %4068 = vmatpush.msra.mxu2 %v11139_v10  ;;  %4110 = vmatpush.msra.mxu3 %v11142_v46 }
 0x8e1   : > { %3961 = vmatpush.msra.mxu0 %v11142_v46 }
 0x8e2   : > { %v4010_v53 = vsub.f32 %v11139_v10, %v4009_v43  ;;  %4071 = vmatpush.msra.mxu2 %v4014_v47  ;;  %4112 = vmatpush.msra.mxu3 %v11157_v26 }
 0x8e3   : > { %3963 = vmatpush.msra.mxu0 %v11157_v26 }
 0x8e4   : > { %v4011_v51 = vand.u32 4294901760, %v4010_v53  ;;  %4074 = vmatpush.msra.mxu2 %v4020_v50  ;;  %4114 = vmatpush.msra.mxu3 %v3964_v12 }
 0x8e5   : > { %3965 = vmatpush.msra.mxu0 %v3964_v12 }
 0x8e6   : > { %4012 = vmatpush.msra.mxu1 %v4011_v51  ;;  %4077 = vmatpush.msra.mxu2 %v4026_v22 }
 0x8e7   : > { %4116 = vmatpush.msra.mxu3 %v3966_v56  ;;  %3967 = vmatpush.msra.mxu0 %v3966_v56 }
 0x8e8   : > { %4018 = vmatpush.msra.mxu1 %v4017_v14  ;;  %4080 = vmatpush.msra.mxu2 %v4032_v18  ;;  %v695_v14 = vld [vmem:[%s12419_s14 + $0x38] sm:$0xff] }
 0x8e9   : > { %4118 = vmatpush.msra.mxu3 %v3968_v0  ;;  %3969 = vmatpush.msra.mxu0 %v3968_v0  ;;  %v11189_v18 = vand.u32 4294901760, %v695_v14 }
 0x8ea   : > { %4024 = vmatpush.msra.mxu1 %v4023_v15  ;;  %4083 = vmatpush.msra.mxu2 %v4038_v13 }
 0x8eb   : > { %4143 = vmatpush.msrb.mxu0 %v3997_v36  ;;  %v11195_v3 = vsub.f32 %v695_v14, %v11189_v18 }
 0x8ec   : > { %4030 = vmatpush.msra.mxu1 %v4029_v19  ;;  %4235 = vmatpush.msrb.mxu2 %v11189_v18 }
 0x8ed   : > { %4147 = vmatpush.msrb.mxu0 %v4003_v42  ;;  %v11207_v15 = vand.u32 4294901760, %v11195_v3 }
 0x8ee   : > { %4036 = vmatpush.msra.mxu1 %v4035_v30 }
 0x8ef   : > { %4151 = vmatpush.msrb.mxu0 %v4009_v43  ;;  %v4278_v32 = vsub.f32 %v11195_v3, %v11207_v15 }
 0x8f0   : > { %4042 = vmatpush.msra.mxu1 %v4041_v31 }
 0x8f1   : > { %4155 = vmatpush.msrb.mxu0 %v4015_v6 }
 0x8f2   : > { %4190 = vmatpush.msrb.mxu1 %v11105_v20 }
 0x8f3   : > { %4159 = vmatpush.msrb.mxu0 %v4021_v7 }
 0x8f4   : > { %4192 = vmatpush.msrb.mxu1 %v11115_v21 }
 0x8f5   : > { %4163 = vmatpush.msrb.mxu0 %v4027_v17 }
 0x8f6   : > { %4194 = vmatpush.msrb.mxu1 %v11127_v44 }
 0x8f7   : > { %4167 = vmatpush.msrb.mxu0 %v4033_v5  ;;  %v693_v5 = vld [vmem:[%s12419_s14 + $0x28] sm:$0xff] }
 0x8f8   : > { %4196 = vmatpush.msrb.mxu1 %v11142_v46  ;;  %v11213_v25 = vand.u32 4294901760, %v693_v5 }
 0x8f9   : > { %4171 = vmatpush.msrb.mxu0 %v4039_v28  ;;  %v692_v28 = vld [vmem:[%s12419_s14 + $0x20] sm:$0xff] }
 0x8fa   : > { %4198 = vmatpush.msrb.mxu1 %v11157_v26 }
 0x8fc   : > { %4200 = vmatpush.msrb.mxu1 %v3964_v12 }
 0x8fe   : > { %4202 = vmatpush.msrb.mxu1 %v3966_v56 }
 0x900   : > { %4204 = vmatpush.msrb.mxu1 %v3968_v0  ;;  %v694_v0 = vld [vmem:[%s12419_s14 + $0x30] sm:$0xff] }
 0x901   : > { %v11197_v4 = vand.u32 4294901760, %v694_v0 }
 0x903   : > { %v11210_v19 = vsub.f32 %v694_v0, %v11197_v4  ;;  %4237 = vmatpush.msrb.mxu2 %v11197_v4 }
 0x905   : > { %v11225_v31 = vand.u32 4294901760, %v11210_v19  ;;  %4239 = vmatpush.msrb.mxu2 %v11213_v25 }
 0x910   : > { %v3582_v9 = vpop.f32.mrf.mxu1 }
 0x918   : > { %v3523_v63 = vpop.f32.mrf.mxu0  ;;  %v3620_v20 = vpop.f32.mrf.mxu2 }
 0x919   : > { %v3583_v34 = vadd.f32 %v3582_v9, %v3523_v63  ;;  %v11228_v9 = vsub.f32 %v693_v5, %v11213_v25  ;;  %v11231_v63 = vand.u32 4294901760, %v692_v28 }
 0x91a   : > { %v3654_v29 = vpop.f32.mrf.mxu3 }
 0x91b   : > { %v3621_v2 = vadd.f32 %v3620_v20, %v3583_v34  ;;  %v11238_v34 = vand.u32 4294901760, %v4278_v32  ;;  %v11243_v20 = vand.u32 4294901760, %v11228_v9  ;;  %4241 = vmatpush.msrb.mxu2 %v11231_v63 }
 0x91d   : > { %v3655_v21 = vadd.f32 %v3654_v29, %v3621_v2  ;;  %12484 = vst [vmem:[#allocation6_spill] sm:$0xff] %v11238_v34  ;;  %v11246_v2 = vsub.f32 %v692_v28, %v11231_v63  ;;  %4280 = vmatpush.msrb.mxu3 %v11238_v34 }
 0x930   : > { %v3586_v33 = vpop.f32.mrf.mxu1 }
 0x938   : > { %v3531_v8 = vpop.f32.mrf.mxu0  ;;  %v3730_v36 = vpop.f32.mrf.mxu1 }
 0x939   : > { %v3587_v16 = vadd.f32 %v3586_v33, %v3531_v8  ;;  %v3625_v39 = vpop.f32.mrf.mxu2  ;;  %v691_v33 = vld [vmem:[%s12419_s14 + $0x18] sm:$0xff]  ;;  %v4284_v8 = vsub.f32 %v11210_v19, %v11225_v31 }
 0x93a   : > { %v3660_v46 = vpop.f32.mrf.mxu3  ;;  %v11250_v29 = vand.u32 4294901760, %v691_v33 }
 0x93b   : > { %v3626_v1 = vadd.f32 %v3625_v39, %v3587_v16  ;;  %v11262_v39 = vand.u32 4294901760, %v11246_v2 }
 0x93c   : > { %4243 = vmatpush.msrb.mxu2 %v11250_v29 }
 0x93d   : > { %v3661_v38 = vadd.f32 %v3660_v46, %v3626_v1 }
 0x940   : > { %v3699_v23 = vpop.f32.mrf.mxu0  ;;  %v3734_v61 = vpop.f32.mrf.mxu1 }
 0x941   : > { %v3700_v44 = vadd.f32 %v3699_v23, %v3655_v21  ;;  %v3773_v11 = vpop.f32.mrf.mxu2  ;;  %v690_v21 = vld [vmem:[%s12419_s14 + $0x10] sm:$0xff]  ;;  %v11257_v23 = vand.u32 4294901760, %v4284_v8 }
 0x942   : > { %v3812_v17 = vpop.f32.mrf.mxu3  ;;  %v11265_v1 = vand.u32 4294901760, %v690_v21 }
 0x943   : > { %v3731_v42 = vadd.f32 %v3730_v36, %v3700_v44  ;;  %12485 = vst [vmem:[#allocation7_spill] sm:$0xff] %v11257_v23  ;;  %v4290_v44 = vsub.f32 %v11228_v9, %v11243_v20  ;;  %4286 = vmatpush.msrb.mxu3 %v11257_v23 }
 0x944   : > { %4245 = vmatpush.msrb.mxu2 %v11265_v1 }
 0x945   : > { %v3737_v10 = vmax.f32 %v3731_v42, 0.0  ;;  %v11268_v42 = vsub.f32 %v691_v33, %v11250_v29  ;;  %v11276_v46 = vand.u32 4294901760, %v4290_v44 }
 0x947   : > { %v3941_v24 = vsel %vm3939_vm3, %v3737_v10, 0  ;;  %v689_v10 = vld [vmem:[%s12419_s14 + $0x8] sm:$0xff]  ;;  %12486 = vst [vmem:[#allocation8_spill] sm:$0xff] %v11276_v46  ;;  %4292 = vmatpush.msrb.mxu3 %v11276_v46 }
 0x948   : > { %v3970_v27 = vand.u32 4294901760, %v3941_v24  ;;  %v3703_v43 = vpop.f32.mrf.mxu0  ;;  %v11204_v13 = vpop.f32.mrf.mxu1 }
 0x949   : > { %v3704_v47 = vadd.f32 %v3703_v43, %v3661_v38  ;;  %v11220_v30 = vpop.f32.mrf.mxu2  ;;  %v4296_v38 = vsub.f32 %v11246_v2, %v11262_v39  ;;  %v3813_v43 = vadd.f32 %v3812_v17, %v3773_v11 }
 0x94a   : > { %v3971_v26 = vsub.f32 %v3941_v24, %v3970_v27  ;;  %4044 = vmatmul.f32.vlgmr.msra.gmra.mxu1 %v3970_v27  ;;  %v3816_v16 = vpop.f32.mrf.mxu3  ;;  %v11281_v24 = vsub.f32 %v690_v21, %v11265_v1 }
 0x94b   : > { %v3735_v57 = vadd.f32 %v3734_v61, %v3704_v47  ;;  %4384 = vmatpush.msra.mxu1 %v11189_v18  ;;  %v11286_v47 = vand.u32 4294901760, %v11268_v42  ;;  %v3817_v33 = vadd.f32 %v3816_v16, %v11220_v30 }
 0x94c   : > { %v3972_v53 = vand.u32 4294901760, %v3971_v26  ;;  %4086 = vmatmul.f32.vlgmr.msra.gmra.mxu2 %v3971_v26  ;;  %12487 = vst [vmem:[#allocation9_spill] sm:$0xff] %v11281_v24 }
 0x94d   : > { %v3738_v6 = vmax.f32 %v3735_v57, 0.0  ;;  %4386 = vmatpush.msra.mxu1 %v11197_v4  ;;  %12488 = vst [vmem:[#allocation10_spill] sm:$0xff] %v11286_v47  ;;  %v11294_v57 = vand.u32 4294901760, %v4296_v38 }
 0x94e   : > { %v3973_v12 = vsub.f32 %v3971_v26, %v3972_v53  ;;  %4122 = vmatmul.f32.vlgmr.msra.gmra.mxu3 %v3972_v53  ;;  %v688_v26 = vld [vmem:[%s12419_s14] sm:$0xff]  ;;  %v11297_v53 = vand.u32 4294901760, %v11281_v24 }
 0x94f   : > { %v3944_v50 = vsel %vm3939_vm3, %v3738_v6, 0  ;;  %4388 = vmatpush.msra.mxu1 %v11213_v25  ;;  %12489 = vst [vmem:[#allocation11_spill] sm:$0xff] %v11294_v57  ;;  %4298 = vmatpush.msrb.mxu3 %v11294_v57 }
 0x950   : > { %v3978_v54 = vand.u32 4294901760, %v3944_v50  ;;  %v3974_v51 = vand.u32 4294901760, %v3973_v12  ;;  %v3842_v36 = vpop.f32.mrf.mxu0  ;;  %v3878_v61 = vpop.f32.mrf.mxu1  ;;  %12490 = vst [vmem:[#allocation12_spill] sm:$0xff] %v11297_v53  ;;  %v11302_v12 = vand.u32 4294901760, %v688_v26 }
 0x951   : > { %4390 = vmatpush.msra.mxu1 %v11231_v63 }
 0x952   : > { %3975 = vmatmul.f32.vlgmr.msra.gmra.mxu0 %v3974_v51  ;;  %4048 = vmatmul.f32.gmra.mxu1 %v3978_v54  ;;  %v3979_v52 = vsub.f32 %v3944_v50, %v3978_v54  ;;  %v4302_v50 = vsub.f32 %v11268_v42, %v11286_v47  ;;  %v4308_v51 = vsub.f32 %v11281_v24, %v11297_v53  ;;  %v3932_v0 = vpop.f32.mrf.mxu3 }
 0x953   : > { %4342 = vmatpush.msra.mxu0 %v11195_v3  ;;  %4392 = vmatpush.msra.mxu1 %v11250_v29 }
 0x954   : > { %4091 = vmatmul.f32.gmra.mxu2 %v3979_v52  ;;  %v3980_v22 = vand.u32 4294901760, %v3979_v52  ;;  %v11323_v11 = vand.u32 4294901760, %v4308_v51 }
 0x955   : > { %4345 = vmatpush.msra.mxu0 %v11210_v19  ;;  %4394 = vmatpush.msra.mxu1 %v11265_v1 }
 0x956   : > { %4128 = vmatmul.f32.gmra.mxu3 %v3980_v22  ;;  %v3981_v56 = vsub.f32 %v3979_v52, %v3980_v22  ;;  %v11316_v22 = vsub.f32 %v688_v26, %v11302_v12  ;;  %12495 = vst [vmem:[#allocation17_spill] sm:$0xff] %v11323_v11 }
 0x957   : > { %4348 = vmatpush.msra.mxu0 %v11228_v9 }
 0x958   : > { %v3982_v7 = vand.u32 4294901760, %v3981_v56  ;;  %12493 = vst [vmem:[#allocation15_spill] sm:$0xff] %v11316_v22  ;;  %v3843_v56 = vadd.f32 %v3842_v36, %v3813_v43  ;;  %v11328_v17 = vand.u32 4294901760, %v11316_v22  ;;  %v3847_v5 = vpop.f32.mrf.mxu0 }
 0x959   : > { %4351 = vmatpush.msra.mxu0 %v11246_v2 }
 0x95a   : > { %3983 = vmatmul.f32.gmra.mxu0 %v3982_v7  ;;  %4206 = vmatmul.f32.vlgmr.msrb.gmra.mxu1 %v3970_v27  ;;  %v11319_v7 = vand.u32 4294901760, %v4302_v50  ;;  %12496 = vst [vmem:[#allocation18_spill] sm:$0xff] %v11328_v17  ;;  %v4320_v32 = vsub.f32 %v11316_v22, %v11328_v17  ;;  %v3873_v8 = vadd.f32 %v11204_v13, %v3843_v56  ;;  %v3936_v43 = vpop.f32.mrf.mxu3 }
 0x95b   : > { %4354 = vmatpush.msra.mxu0 %v11268_v42 }
 0x95c   : > { %12494 = vst [vmem:[#allocation16_spill] sm:$0xff] %v11319_v7  ;;  %4304 = vmatpush.msrb.mxu3 %v11319_v7  ;;  %v11341_v21 = vand.u32 4294901760, %v4320_v32 }
 0x95d   : > { %4357 = vmatpush.msra.mxu0 %v11281_v24 }
 0x95e   : > { %4310 = vmatpush.msrb.mxu3 %v11323_v11  ;;  %12498 = vst [vmem:[#allocation20_spill] sm:$0xff] %v11341_v21 }
 0x962   : > { %4173 = vmatmul.f32.vlgmr.msrb.gmra.mxu0 %v3970_v27  ;;  %4210 = vmatmul.f32.gmra.mxu1 %v3978_v54  ;;  %v11283_v27 = vand.u32 4294901760, %v689_v10 }
 0x964   : > { %v11300_v6 = vsub.f32 %v689_v10, %v11283_v27  ;;  %4396 = vmatpush.msra.mxu1 %v11283_v27  ;;  %4247 = vmatpush.msrb.mxu2 %v11283_v27  ;;  %v3848_v10 = vadd.f32 %v3847_v5, %v3817_v33 }
 0x966   : > { %12491 = vst [vmem:[#allocation13_spill] sm:$0xff] %v11300_v6  ;;  %v11313_v52 = vand.u32 4294901760, %v11300_v6  ;;  %4360 = vmatpush.msra.mxu0 %v11300_v6  ;;  %4398 = vmatpush.msra.mxu1 %v11302_v12  ;;  %v3879_v16 = vadd.f32 %v3878_v61, %v3848_v10 }
 0x967   : > { %4249 = vmatpush.msrb.mxu2 %v11302_v12 }
 0x968   : > { %12492 = vst [vmem:[#allocation14_spill] sm:$0xff] %v11313_v52  ;;  %v4314_v14 = vsub.f32 %v11300_v6, %v11313_v52  ;;  %4363 = vmatpush.msra.mxu0 %v11316_v22 }
 0x969   : > { %4423 = vmatpush.msra.mxu2 %v11207_v15 }
 0x96a   : > { %4177 = vmatmul.f32.gmra.mxu0 %v3978_v54  ;;  %v3905_v54 = vpop.f32.mrf.mxu2  ;;  %v11333_v28 = vand.u32 4294901760, %v4314_v14 }
 0x96b   : > { %4427 = vmatpush.msra.mxu2 %v11225_v31  ;;  %v3906_v44 = vadd.f32 %v3905_v54, %v3873_v8 }
 0x96c   : > { %12497 = vst [vmem:[#allocation19_spill] sm:$0xff] %v11333_v28  ;;  %4316 = vmatpush.msrb.mxu3 %v11333_v28 }
 0x96d   : > { %4431 = vmatpush.msra.mxu2 %v11243_v20  ;;  %v3933_v30 = vadd.f32 %v3932_v0, %v3906_v44 }
 0x96e   : > { %4322 = vmatpush.msrb.mxu3 %v11341_v21 }
 0x96f   : > { %4435 = vmatpush.msra.mxu2 %v11262_v39 }
 0x970   : > { %4470 = vmatpush.msra.mxu3 %v11189_v18 }
 0x971   : > { %4439 = vmatpush.msra.mxu2 %v11286_v47 }
 0x972   : > { %v3909_v38 = vpop.f32.mrf.mxu2  ;;  %4472 = vmatpush.msra.mxu3 %v11197_v4 }
 0x973   : > { %4443 = vmatpush.msra.mxu2 %v11297_v53  ;;  %v3910_v50 = vadd.f32 %v3909_v38, %v3879_v16 }
 0x974   : > { %4474 = vmatpush.msra.mxu3 %v11213_v25 }
 0x975   : > { %4447 = vmatpush.msra.mxu2 %v11313_v52  ;;  %v3937_v61 = vadd.f32 %v3936_v43, %v3910_v50 }
 0x976   : > { %4476 = vmatpush.msra.mxu3 %v11231_v63 }
 0x977   : > { %4451 = vmatpush.msra.mxu2 %v11328_v17 }
 0x978   : > { %4478 = vmatpush.msra.mxu3 %v11250_v29 }
 0x97a   : > { %4480 = vmatpush.msra.mxu3 %v11265_v1 }
 0x97c   : > { %4482 = vmatpush.msra.mxu3 %v11283_v27 }
 0x97e   : > { %4484 = vmatpush.msra.mxu3 %v11302_v12 }
 0x9c7   : > { %v4045_v36 = vpop.f32.mrf.mxu1 }
 0x9cf   : > { %v3976_v13 = vpop.f32.mrf.mxu0  ;;  %v4049_v54 = vpop.f32.mrf.mxu1 }
 0x9d0   : > { %v3977_v26 = vadd.f32 %v3976_v13, %v3933_v30  ;;  %v4087_v56 = vpop.f32.mrf.mxu2 }
 0x9d1   : > { %v4123_v32 = vpop.f32.mrf.mxu3 }
 0x9d2   : > { %v4046_v51 = vadd.f32 %v4045_v36, %v3977_v26  ;;  %v10415_v36 = vld [vmem:[%s12418_s13] ss:$0 sm:$0xff] }
 0x9d4   : > { %v4088_v0 = vadd.f32 %v4087_v56, %v4046_v51 }
 0x9d6   : > { %v4124_v33 = vadd.f32 %v4123_v32, %v4088_v0 }
 0x9d7   : > { %v3984_v14 = vpop.f32.mrf.mxu0  ;;  %v4207_v44 = vpop.f32.mrf.mxu1 }
 0x9d8   : > { %v3985_v5 = vadd.f32 %v3984_v14, %v3937_v61  ;;  %v4092_v13 = vpop.f32.mrf.mxu2 }
 0x9d9   : > { %v4129_v26 = vpop.f32.mrf.mxu3 }
 0x9da   : > { %v4050_v8 = vadd.f32 %v4049_v54, %v3985_v5 }
 0x9dc   : > { %v4093_v30 = vadd.f32 %v4092_v13, %v4050_v8 }
 0x9de   : > { %v4130_v50 = vadd.f32 %v4129_v26, %v4093_v30 }
 0x9df   : > { %v4174_v10 = vpop.f32.mrf.mxu0  ;;  %v4211_v0 = vpop.f32.mrf.mxu1 }
 0x9e0   : > { %v4175_v38 = vadd.f32 %v4174_v10, %v4124_v33 }
 0x9e2   : > { %v4208_v16 = vadd.f32 %v4207_v44, %v4175_v38 }
 0x9e4   : > { %v11363_v43 = vadd.f32 %v10415_v36, %v4208_v16 }
 0x9e6   : > { %v12430_v51 = vmax.f32 %v11363_v43, 0.0 }
 0x9e7   : > { %v4178_v56 = vpop.f32.mrf.mxu0 }
 0x9e8   : > { %v4221_v54 = vsel %vm3939_vm3, %v12430_v51, 0  ;;  %v4179_v14 = vadd.f32 %v4178_v56, %v4130_v50  ;;  %v696_v56 = vld [vmem:[%s12420_s15] sm:$0xff] }
 0x9e9   : > { %v4250_v61 = vand.u32 4294901760, %v4221_v54 }
 0x9ea   : > { %v4212_v5 = vadd.f32 %v4211_v0, %v4179_v14 }
 0x9eb   : > { %v4251_v32 = vsub.f32 %v4221_v54, %v4250_v61  ;;  %4324 = vmatmul.f32.vlgmr.msrb.gmra.mxu3 %v4250_v61  ;;  %v11378_v54 = vand.u32 4294901760, %v696_v56 }
 0x9ec   : > { %v11369_v33 = vadd.f32 %v10415_v36, %v4212_v5 }
 0x9ed   : > { %4366 = vmatmul.f32.vlgmr.msra.gmra.mxu0 %v4251_v32  ;;  %v4252_v8 = vand.u32 4294901760, %v4251_v32  ;;  %12499 = vst [vmem:[#allocation21_spill] sm:$0xff] %v11378_v54  ;;  %v11381_v14 = vsub.f32 %v696_v56, %v11378_v54  ;;  %4609 = vmatpush.msrb.mxu3 %v11378_v54 }
 0x9ee   : > { %v12429_v44 = vmax.f32 %v11369_v33, 0.0  ;;  %4516 = vmatpush.msrb.mxu0 %v11378_v54 }
 0x9ef   : > { %4402 = vmatmul.f32.vlgmr.msra.gmra.mxu1 %v4252_v8  ;;  %v4253_v10 = vsub.f32 %v4251_v32, %v4252_v8  ;;  %12500 = vst [vmem:[#allocation22_spill] sm:$0xff] %v11381_v14  ;;  %v11387_v0 = vand.u32 4294901760, %v11381_v14 }
 0x9f0   : > { %v4224_v38 = vsel %vm3939_vm3, %v12429_v44, 0 }
 0x9f1   : > { %v4254_v13 = vand.u32 4294901760, %v4253_v10  ;;  %v4258_v30 = vand.u32 4294901760, %v4224_v38  ;;  %12501 = vst [vmem:[#allocation23_spill] sm:$0xff] %v11387_v0  ;;  %4641 = vmatpush.msra.mxu0 %v11387_v0 }
 0x9f3   : > { %4255 = vmatmul.f32.vlgmr.msrb.gmra.mxu2 %v4254_v13  ;;  %4328 = vmatmul.f32.gmra.mxu3 %v4258_v30  ;;  %v4259_v16 = vsub.f32 %v4224_v38, %v4258_v30 }
 0x9f4   : > { %4581 = vmatpush.msrb.mxu2 %v11381_v14 }
 0x9f5   : > { %4371 = vmatmul.f32.gmra.mxu0 %v4259_v16  ;;  %v4260_v26 = vand.u32 4294901760, %v4259_v16 }
 0x9f7   : > { %4408 = vmatmul.f32.gmra.mxu1 %v4260_v26  ;;  %v4261_v36 = vsub.f32 %v4259_v16, %v4260_v26 }
 0x9f9   : > { %v4262_v50 = vand.u32 4294901760, %v4261_v36 }
 0x9fb   : > { %4263 = vmatmul.f32.gmra.mxu2 %v4262_v50  ;;  %4486 = vmatmul.f32.vlgmr.msra.gmra.mxu3 %v4250_v61 }
 0x9fc   : > { %4741 = vmatpush.msra.mxu3 %v11238_v34 }
 0x9fe   : > { %4747 = vmatpush.msra.mxu3 %v11257_v23 }
 0xa00   : > { %4753 = vmatpush.msra.mxu3 %v11276_v46 }
 0xa02   : > { %4759 = vmatpush.msra.mxu3 %v11294_v57 }
 0xa03   : > { %4453 = vmatmul.f32.vlgmr.msra.gmra.mxu2 %v4250_v61  ;;  %4490 = vmatmul.f32.gmra.mxu3 %v4258_v30  ;;  %v4552_v61 = vsub.f32 %v11381_v14, %v11387_v0 }
 0xa04   : > { %4696 = vmatpush.msra.mxu2 %v11189_v18  ;;  %4765 = vmatpush.msra.mxu3 %v11319_v7 }
 0xa05   : > { %v11397_v5 = vand.u32 4294901760, %v4552_v61 }
 0xa06   : > { %4698 = vmatpush.msra.mxu2 %v11197_v4  ;;  %4771 = vmatpush.msra.mxu3 %v11323_v11 }
 0xa07   : > { %12502 = vst [vmem:[#allocation24_spill] sm:$0xff] %v11397_v5  ;;  %4554 = vmatpush.msrb.mxu1 %v11397_v5 }
 0xa08   : > { %4700 = vmatpush.msra.mxu2 %v11213_v25  ;;  %4777 = vmatpush.msra.mxu3 %v11333_v28 }
 0xa09   : > { %4667 = vmatpush.msra.mxu1 %v11378_v54 }
 0xa0a   : > { %4702 = vmatpush.msra.mxu2 %v11231_v63  ;;  %4783 = vmatpush.msra.mxu3 %v11341_v21 }
 0xa0b   : > { %4457 = vmatmul.f32.gmra.mxu2 %v4258_v30 }
 0xa0c   : > { %4704 = vmatpush.msra.mxu2 %v11250_v29 }
 0xa0e   : > { %4706 = vmatpush.msra.mxu2 %v11265_v1 }
 0xa10   : > { %4708 = vmatpush.msra.mxu2 %v11283_v27 }
 0xa12   : > { %4710 = vmatpush.msra.mxu2 %v11302_v12 }
 0xa6a   : > { %v4367_v13 = vpop.f32.mrf.mxu0 }
 0xa6c   : > { %v4403_v26 = vpop.f32.mrf.mxu1 }
 0xa6e   : > { %v4325_v32 = vpop.f32.mrf.mxu3 }
 0xa72   : > { %v4372_v51 = vpop.f32.mrf.mxu0 }
 0xa74   : > { %v4409_v7 = vpop.f32.mrf.mxu1 }
 0xa76   : > { %v4256_v8 = vpop.f32.mrf.mxu2  ;;  %v4329_v10 = vpop.f32.mrf.mxu3 }
 0xa77   : > { %v4326_v38 = vadd.f32 %v4325_v32, %v4256_v8 }
 0xa79   : > { %v4368_v16 = vadd.f32 %v4367_v13, %v4326_v38 }
 0xa7b   : > { %v4404_v50 = vadd.f32 %v4403_v26, %v4368_v16 }
 0xa7e   : > { %v4264_v30 = vpop.f32.mrf.mxu2  ;;  %v4487_v56 = vpop.f32.mrf.mxu3 }
 0xa7f   : > { %v4330_v36 = vadd.f32 %v4329_v10, %v4264_v30 }
 0xa81   : > { %v4373_v28 = vadd.f32 %v4372_v51, %v4330_v36 }
 0xa83   : > { %v4410_v46 = vadd.f32 %v4409_v7, %v4373_v28 }
 0xa86   : > { %v4454_v61 = vpop.f32.mrf.mxu2  ;;  %v4491_v10 = vpop.f32.mrf.mxu3 }
 0xa87   : > { %v4455_v44 = vadd.f32 %v4454_v61, %v4404_v50 }
 0xa89   : > { %v4488_v11 = vadd.f32 %v4487_v56, %v4455_v44 }
 0xa8b   : > { %v4495_v21 = vsel %vm1258_vm2, %v4488_v11, 0 }
 0xa8c   : > { %v4517_v57 = vand.u32 4294901760, %v4495_v21 }
 0xa8e   : > { %v4518_v23 = vsub.f32 %v4495_v21, %v4517_v57  ;;  %v4458_v34 = vpop.f32.mrf.mxu2  ;;  %4556 = vmatmul.f32.vlgmr.msrb.gmra.mxu1 %v4517_v57 }
 0xa8f   : > { %v4459_v32 = vadd.f32 %v4458_v34, %v4410_v46  ;;  %4845 = vmatpush.msrb.mxu1 %v11189_v18 }
 0xa90   : > { %v4519_v8 = vand.u32 4294901760, %v4518_v23  ;;  %4584 = vmatmul.f32.vlgmr.msrb.gmra.mxu2 %v4518_v23 }
 0xa91   : > { %v4492_v38 = vadd.f32 %v4491_v10, %v4459_v32  ;;  %4847 = vmatpush.msrb.mxu1 %v11197_v4  ;;  %4884 = vmatpush.msrb.mxu2 %v11207_v15 }
 0xa92   : > { %v4520_v51 = vsub.f32 %v4518_v23, %v4519_v8  ;;  %4613 = vmatmul.f32.vlgmr.msrb.gmra.mxu3 %v4519_v8 }
 0xa93   : > { %v4498_v11 = vsel %vm1258_vm2, %v4492_v38, 0  ;;  %4849 = vmatpush.msrb.mxu1 %v11213_v25  ;;  %4931 = vmatpush.msrb.mxu3 %v11189_v18 }
 0xa94   : > { %v4521_v7 = vand.u32 4294901760, %v4520_v51  ;;  %v4525_v34 = vand.u32 4294901760, %v4498_v11  ;;  %4888 = vmatpush.msrb.mxu2 %v11225_v31 }
 0xa95   : > { %4851 = vmatpush.msrb.mxu1 %v11231_v63  ;;  %4933 = vmatpush.msrb.mxu3 %v11197_v4 }
 0xa96   : > { %4522 = vmatmul.f32.vlgmr.msrb.gmra.mxu0 %v4521_v7  ;;  %4560 = vmatmul.f32.gmra.mxu1 %v4525_v34  ;;  %v4526_v46 = vsub.f32 %v4498_v11, %v4525_v34  ;;  %v12503_v7 = vmax.f32 %v11363_v43, 0.0 }
 0xa97   : > { %4803 = vmatpush.msrb.mxu0 %v11195_v3  ;;  %4853 = vmatpush.msrb.mxu1 %v11250_v29 }
 0xa98   : > { %4589 = vmatmul.f32.gmra.mxu2 %v4526_v46  ;;  %v4527_v23 = vand.u32 4294901760, %v4526_v46  ;;  %4935 = vmatpush.msrb.mxu3 %v11213_v25 }
 0xa99   : > { %4806 = vmatpush.msrb.mxu0 %v11210_v19  ;;  %4855 = vmatpush.msrb.mxu1 %v11265_v1 }
 0xa9a   : > { %4619 = vmatmul.f32.gmra.mxu3 %v4527_v23  ;;  %v4528_v28 = vsub.f32 %v4526_v46, %v4527_v23  ;;  %4892 = vmatpush.msrb.mxu2 %v11243_v20 }
 0xa9b   : > { %4809 = vmatpush.msrb.mxu0 %v11228_v9  ;;  %4857 = vmatpush.msrb.mxu1 %v11283_v27 }
 0xa9c   : > { %v4529_v21 = vand.u32 4294901760, %v4528_v28  ;;  %4937 = vmatpush.msrb.mxu3 %v11231_v63  ;;  %4896 = vmatpush.msrb.mxu2 %v11262_v39 }
 0xa9d   : > { %4812 = vmatpush.msrb.mxu0 %v11246_v2  ;;  %4859 = vmatpush.msrb.mxu1 %v11302_v12 }
 0xa9e   : > { %4530 = vmatmul.f32.gmra.mxu0 %v4529_v21  ;;  %4669 = vmatmul.f32.vlgmr.msra.gmra.mxu1 %v4517_v57 }
 0xa9f   : > { %4815 = vmatpush.msrb.mxu0 %v11268_v42  ;;  %4939 = vmatpush.msrb.mxu3 %v11250_v29 }
 0xaa0   : > { %4900 = vmatpush.msrb.mxu2 %v11286_v47  ;;  %5035 = vmatpush.msra.mxu1 %v11397_v5 }
 0xaa1   : > { %4818 = vmatpush.msrb.mxu0 %v11281_v24  ;;  %4941 = vmatpush.msrb.mxu3 %v11265_v1 }
 0xaa2   : > { %4904 = vmatpush.msrb.mxu2 %v11297_v53 }
 0xaa3   : > { %4821 = vmatpush.msrb.mxu0 %v11300_v6  ;;  %4943 = vmatpush.msrb.mxu3 %v11283_v27 }
 0xaa4   : > { %4908 = vmatpush.msrb.mxu2 %v11313_v52 }
 0xaa5   : > { %4824 = vmatpush.msrb.mxu0 %v11316_v22  ;;  %4945 = vmatpush.msrb.mxu3 %v11302_v12 }
 0xaa6   : > { %4643 = vmatmul.f32.vlgmr.msra.gmra.mxu0 %v4517_v57  ;;  %4673 = vmatmul.f32.gmra.mxu1 %v4525_v34 }
 0xaa7   : > { %4912 = vmatpush.msrb.mxu2 %v11328_v17  ;;  %4997 = vmatpush.msra.mxu0 %v11378_v54 }
 0xaae   : > { %4647 = vmatmul.f32.gmra.mxu0 %v4525_v34 }
 0xb0b   : > { %v4557_v44 = vpop.f32.mrf.mxu1 }
 0xb13   : > { %v4523_v13 = vpop.f32.mrf.mxu0  ;;  %v4561_v30 = vpop.f32.mrf.mxu1 }
 0xb14   : > { %v4558_v16 = vadd.f32 %v4557_v44, %v4523_v13  ;;  %v4585_v26 = vpop.f32.mrf.mxu2 }
 0xb15   : > { %v4614_v56 = vpop.f32.mrf.mxu3 }
 0xb16   : > { %v4586_v50 = vadd.f32 %v4585_v26, %v4558_v16 }
 0xb18   : > { %v4615_v61 = vadd.f32 %v4614_v56, %v4586_v50  ;;  %v12504_v50 = vmax.f32 %v11369_v33, 0.0 }
 0xb1b   : > { %v4531_v36 = vpop.f32.mrf.mxu0  ;;  %v4670_v8 = vpop.f32.mrf.mxu1 }
 0xb1c   : > { %v4562_v32 = vadd.f32 %v4561_v30, %v4531_v36  ;;  %v4590_v57 = vpop.f32.mrf.mxu2 }
 0xb1d   : > { %v4620_v34 = vpop.f32.mrf.mxu3 }
 0xb1e   : > { %v4591_v51 = vadd.f32 %v4590_v57, %v4562_v32 }
 0xb20   : > { %v4621_v23 = vadd.f32 %v4620_v34, %v4591_v51 }
 0xb23   : > { %v4644_v10 = vpop.f32.mrf.mxu0  ;;  %v4674_v16 = vpop.f32.mrf.mxu1 }
 0xb24   : > { %v4645_v38 = vadd.f32 %v4644_v10, %v4615_v61 }
 0xb26   : > { %v4671_v11 = vadd.f32 %v4670_v8, %v4645_v38 }
 0xb28   : > { %v11450_v46 = vsub.f32 %v12503_v7, %v4671_v11 }
 0xb2a   : > { %v4679_v28 = vmul.f32 %v11450_v46, %v11450_v46 }
 0xb2b   : > { %v4648_v21 = vpop.f32.mrf.mxu0 }
 0xb2c   : > { %v4682_v44 = vsel %vm3939_vm3, %v4679_v28, 0  ;;  %v4649_v13 = vadd.f32 %v4648_v21, %v4621_v23 }
 0xb2d   : > { %v4711_v30 = vand.u32 4294901760, %v4682_v44 }
 0xb2e   : > { %v4675_v26 = vadd.f32 %v4674_v16, %v4649_v13 }
 0xb2f   : > { %v4712_v36 = vsub.f32 %v4682_v44, %v4711_v30  ;;  %4785 = vmatmul.f32.vlgmr.msra.gmra.mxu3 %v4711_v30 }
 0xb30   : > { %v11457_v56 = vsub.f32 %v12504_v50, %v4675_v26  ;;  %5090 = vmatpush.msra.mxu3 %v11378_v54 }
 0xb31   : > { %4827 = vmatmul.f32.vlgmr.msrb.gmra.mxu0 %v4712_v36  ;;  %v4713_v43 = vand.u32 4294901760, %v4712_v36 }
 0xb32   : > { %v4680_v61 = vmul.f32 %v11457_v56, %v11457_v56  ;;  %5122 = vmatpush.msrb.mxu0 %v11387_v0 }
 0xb33   : > { %4863 = vmatmul.f32.vlgmr.msrb.gmra.mxu1 %v4713_v43  ;;  %v4714_v32 = vsub.f32 %v4712_v36, %v4713_v43 }
 0xb34   : > { %v4685_v8 = vsel %vm3939_vm3, %v4680_v61, 0  ;;  %5148 = vmatpush.msrb.mxu1 %v11378_v54 }
 0xb35   : > { %v4715_v10 = vand.u32 4294901760, %v4714_v32  ;;  %v4719_v38 = vand.u32 4294901760, %v4685_v8 }
 0xb37   : > { %4716 = vmatmul.f32.vlgmr.msra.gmra.mxu2 %v4715_v10  ;;  %4789 = vmatmul.f32.gmra.mxu3 %v4719_v38  ;;  %v4720_v33 = vsub.f32 %v4685_v8, %v4719_v38 }
 0xb38   : > { %5062 = vmatpush.msra.mxu2 %v11381_v14 }
 0xb39   : > { %4832 = vmatmul.f32.gmra.mxu0 %v4720_v33  ;;  %v4721_v57 = vand.u32 4294901760, %v4720_v33 }
 0xb3b   : > { %4869 = vmatmul.f32.gmra.mxu1 %v4721_v57  ;;  %v4722_v51 = vsub.f32 %v4720_v33, %v4721_v57 }
 0xb3d   : > { %v4723_v11 = vand.u32 4294901760, %v4722_v51 }
 0xb3f   : > { %4724 = vmatmul.f32.gmra.mxu2 %v4723_v11  ;;  %4947 = vmatmul.f32.vlgmr.msrb.gmra.mxu3 %v4711_v30 }
 0xb47   : > { %4914 = vmatmul.f32.vlgmr.msrb.gmra.mxu2 %v4711_v30  ;;  %4951 = vmatmul.f32.gmra.mxu3 %v4719_v38 }
 0xb4f   : > { %4918 = vmatmul.f32.gmra.mxu2 %v4719_v38 }
 0xbae   : > { %v4828_v44 = vpop.f32.mrf.mxu0 }
 0xbb0   : > { %v4864_v36 = vpop.f32.mrf.mxu1 }
 0xbb2   : > { %v4786_v7 = vpop.f32.mrf.mxu3 }
 0xbb6   : > { %v4833_v10 = vpop.f32.mrf.mxu0 }
 0xbb8   : > { %v4870_v38 = vpop.f32.mrf.mxu1 }
 0xbba   : > { %v4717_v34 = vpop.f32.mrf.mxu2  ;;  %v4790_v28 = vpop.f32.mrf.mxu3 }
 0xbbb   : > { %v4718_v23 = vadd.f32 1e-05, %v4717_v34 }
 0xbbd   : > { %v4787_v21 = vadd.f32 %v4786_v7, %v4718_v23 }
 0xbbf   : > { %v4829_v26 = vadd.f32 %v4828_v44, %v4787_v21 }
 0xbc1   : > { %v4865_v43 = vadd.f32 %v4864_v36, %v4829_v26 }
 0xbc2   : > { %v4725_v13 = vpop.f32.mrf.mxu2  ;;  %v4948_v61 = vpop.f32.mrf.mxu3 }
 0xbc3   : > { %v4726_v16 = vadd.f32 1e-05, %v4725_v13 }
 0xbc5   : > { %v4791_v50 = vadd.f32 %v4790_v28, %v4726_v16 }
 0xbc7   : > { %v4834_v30 = vadd.f32 %v4833_v10, %v4791_v50 }
 0xbc9   : > { %v4871_v57 = vadd.f32 %v4870_v38, %v4834_v30 }
 0xbca   : > { %v4915_v32 = vpop.f32.mrf.mxu2  ;;  %v4952_v34 = vpop.f32.mrf.mxu3 }
 0xbcb   : > { %v4916_v8 = vadd.f32 %v4915_v32, %v4865_v43 }
 0xbcd   : > { %v4949_v33 = vadd.f32 %v4948_v61, %v4916_v8 }
 0xbcf   : > { %10447 = vrsqrt.f32 %v4949_v33  ;;  %vm4961_vm5 = vweird.f32 %v4949_v33 }
 0xbd2   : > { %v4919_v51 = vpop.f32.mrf.mxu2 }
 0xbd3   : > { %v4920_v11 = vadd.f32 %v4919_v51, %v4871_v57 }
 0xbd5   : > { %v10448_v7 = vpop.eup %10447  ;;  %v4953_v23 = vadd.f32 %v4952_v34, %v4920_v11 }
 0xbd6   : > { %v4956_v14 = vmul.f32 %v10448_v7, %v4949_v33  ;;  %vm4962_vm4 = vweird.f32 %v10448_v7 }
 0xbd7   : > { %10449 = vrsqrt.f32 %v4953_v23  ;;  %vm4963_vm6 = vmor %vm4961_vm5, %vm4962_vm4  ;;  %vm4971_vm8 = vweird.f32 %v4953_v23 }
 0xbd8   : > { %v4957_v21 = vmul.f32 %v10448_v7, %v4956_v14 }
 0xbda   : > { %v4958_v44 = vmul.f32 0.5, %v4957_v21 }
 0xbdc   : > { %v4959_v28 = vsub.f32 1.5, %v4958_v44 }
 0xbdd   : > { %v10450_v13 = vpop.eup %10449 }
 0xbde   : > { %v4960_v16 = vmul.f32 %v10448_v7, %v4959_v28  ;;  %v4966_v26 = vmul.f32 %v10450_v13, %v4953_v23  ;;  %vm4972_vm7 = vweird.f32 %v10450_v13  ;;  %v5175_v23 = vld [vmem:[%s12505_s24 + $0x38] sm:$0xff] }
 0xbdf   : > { %vm4973_vm9 = vmor %vm4971_vm8, %vm4972_vm7  ;;  %v11471_v28 = vand.u32 4294901760, %v5175_v23 }
 0xbe0   : > { %v4964_v36 = vsel %vm4963_vm6, %v10448_v7, %v4960_v16  ;;  %v4967_v50 = vmul.f32 %v10450_v13, %v4966_v26 }
 0xbe1   : > { %v4976_v43 = vsel %vm1258_vm2, %v4964_v36, 0  ;;  %v11477_v16 = vsub.f32 %v5175_v23, %v11471_v28  ;;  %5195 = vmatpush.msrb.mxu2 %v11471_v28  ;;  %v5173_v36 = vld [vmem:[%s12505_s24 + $0x28] sm:$0xff] }
 0xbe2   : > { %v4968_v61 = vmul.f32 0.5, %v4967_v50  ;;  %v4998_v32 = vand.u32 4294901760, %v4976_v43 }
 0xbe3   : > { %v12450_v50 = vand.u32 4294901760, %v11477_v16 }
 0xbe4   : > { %v4969_v8 = vsub.f32 1.5, %v4968_v61  ;;  %5037 = vmatmul.f32.vlgmr.msra.gmra.mxu1 %v4998_v32  ;;  %v4999_v10 = vsub.f32 %v4976_v43, %v4998_v32  ;;  %v11491_v61 = vand.u32 4294901760, %v5173_v36 }
 0xbe5   : > { %5344 = vmatpush.msra.mxu1 %v11471_v28 }
 0xbe6   : > { %v4970_v30 = vmul.f32 %v10450_v13, %v4969_v8  ;;  %5065 = vmatmul.f32.vlgmr.msra.gmra.mxu2 %v4999_v10  ;;  %v5000_v14 = vand.u32 4294901760, %v4999_v10  ;;  %v5238_v8 = vsub.f32 %v11477_v16, %v12450_v50 }
 0xbe8   : > { %5094 = vmatmul.f32.vlgmr.msra.gmra.mxu3 %v5000_v14  ;;  %v5001_v38 = vsub.f32 %v4999_v10, %v5000_v14  ;;  %v4974_v33 = vsel %vm4973_vm9, %v10450_v13, %v4970_v30  ;;  %v5174_v13 = vld [vmem:[%s12505_s24 + $0x30] sm:$0xff]  ;;  %v11503_v30 = vsub.f32 %v5173_v36, %v11491_v61 }
 0xbe9   : > { %v4979_v57 = vsel %vm1258_vm2, %v4974_v33, 0  ;;  %v11479_v26 = vand.u32 4294901760, %v5174_v13  ;;  %v5239_v33 = vand.u32 4294901760, %v5238_v8 }
 0xbea   : > { %v5002_v51 = vand.u32 4294901760, %v5001_v38  ;;  %v5006_v11 = vand.u32 4294901760, %v4979_v57  ;;  %v5171_v38 = vld [vmem:[%s12505_s24 + $0x18] sm:$0xff] }
 0xbeb   : > { %v11488_v43 = vsub.f32 %v5174_v13, %v11479_v26  ;;  %5346 = vmatpush.msra.mxu1 %v11479_v26  ;;  %5197 = vmatpush.msrb.mxu2 %v11479_v26 }
 0xbec   : > { %5003 = vmatmul.f32.vlgmr.msra.gmra.mxu0 %v5002_v51  ;;  %5041 = vmatmul.f32.gmra.mxu1 %v5006_v11  ;;  %v5007_v34 = vsub.f32 %v4979_v57, %v5006_v11  ;;  %v5249_v51 = vand.u32 4294901760, %v11503_v30 }
 0xbed   : > { %5302 = vmatpush.msra.mxu0 %v11477_v16  ;;  %v12449_v10 = vand.u32 4294901760, %v11488_v43  ;;  %5348 = vmatpush.msra.mxu1 %v11491_v61 }
 0xbee   : > { %5070 = vmatmul.f32.gmra.mxu2 %v5007_v34  ;;  %v5008_v7 = vand.u32 4294901760, %v5007_v34  ;;  %5240 = vmatpush.msrb.mxu3 %v5239_v33 }
 0xbef   : > { %5305 = vmatpush.msra.mxu0 %v11488_v43  ;;  %5199 = vmatpush.msrb.mxu2 %v11491_v61  ;;  %v5244_v57 = vsub.f32 %v11488_v43, %v12449_v10 }
 0xbf0   : > { %5100 = vmatmul.f32.gmra.mxu3 %v5008_v7  ;;  %v5009_v21 = vsub.f32 %v5007_v34, %v5008_v7  ;;  %v11520_v34 = vand.u32 4294901760, %v5171_v38  ;;  %v5170_v7 = vld [vmem:[%s12505_s24 + $0x10] sm:$0xff] }
 0xbf1   : > { %5308 = vmatpush.msra.mxu0 %v11503_v30  ;;  %v5204_v13 = vand.u32 4294901760, %v5170_v7 }
 0xbf2   : > { %v5010_v44 = vand.u32 4294901760, %v5009_v21  ;;  %v5245_v21 = vand.u32 4294901760, %v5244_v57  ;;  %v5260_v36 = vsub.f32 %v5171_v38, %v11520_v34 }
 0xbf3   : > { %v5266_v33 = vsub.f32 %v5170_v7, %v5204_v13 }
 0xbf4   : > { %5011 = vmatmul.f32.gmra.mxu0 %v5010_v44  ;;  %5150 = vmatmul.f32.vlgmr.msrb.gmra.mxu1 %v4998_v32  ;;  %v5250_v44 = vsub.f32 %v11503_v30, %v5249_v51  ;;  %v5261_v50 = vand.u32 4294901760, %v5260_v36  ;;  %v5168_v30 = vld [vmem:[%s12505_s24] sm:$0xff] }
 0xbf5   : > { %5246 = vmatpush.msrb.mxu3 %v5245_v21  ;;  %v5267_v0 = vand.u32 4294901760, %v5266_v33  ;;  %v5208_v17 = vand.u32 4294901760, %v5168_v30 }
 0xbf6   : > { %v5251_v8 = vand.u32 4294901760, %v5250_v44  ;;  %v5262_v22 = vsub.f32 %v5260_v36, %v5261_v50 }
 0xbf7   : > { %v5278_v21 = vsub.f32 %v5168_v30, %v5208_v17  ;;  %v12507_v30 = vand.u32 4294901760, %v11488_v43 }
 0xbf8   : > { %5252 = vmatpush.msrb.mxu3 %v5251_v8  ;;  %v5263_v44 = vand.u32 4294901760, %v5262_v22 }
 0xbf9   : > { %v5279_v53 = vand.u32 4294901760, %v5278_v21 }
 0xbfc   : > { %5124 = vmatmul.f32.vlgmr.msrb.gmra.mxu0 %v4998_v32  ;;  %5154 = vmatmul.f32.gmra.mxu1 %v5006_v11  ;;  %v5172_v32 = vld [vmem:[%s12505_s24 + $0x20] sm:$0xff] }
 0xbfd   : > { %v11506_v14 = vand.u32 4294901760, %v5172_v32 }
 0xbff   : > { %5350 = vmatpush.msra.mxu1 %v11506_v14  ;;  %5201 = vmatpush.msrb.mxu2 %v11506_v14 }
 0xc01   : > { %5352 = vmatpush.msra.mxu1 %v11520_v34  ;;  %5203 = vmatpush.msrb.mxu2 %v11520_v34 }
 0xc03   : > { %5354 = vmatpush.msra.mxu1 %v5204_v13  ;;  %5205 = vmatpush.msrb.mxu2 %v5204_v13 }
 0xc04   : > { %5128 = vmatmul.f32.gmra.mxu0 %v5006_v11  ;;  %v5254_v11 = vsub.f32 %v5172_v32, %v11506_v14  ;;  %v5169_v32 = vld [vmem:[%s12505_s24 + $0x8] sm:$0xff] }
 0xc05   : > { %v5206_v57 = vand.u32 4294901760, %v5169_v32 }
 0xc06   : > { %v5255_v23 = vand.u32 4294901760, %v5254_v11  ;;  %5311 = vmatpush.msra.mxu0 %v5254_v11 }
 0xc07   : > { %v5272_v54 = vsub.f32 %v5169_v32, %v5206_v57  ;;  %5356 = vmatpush.msra.mxu1 %v5206_v57  ;;  %5207 = vmatpush.msrb.mxu2 %v5206_v57  ;;  %v5280_v32 = vsub.f32 %v5278_v21, %v5279_v53 }
 0xc08   : > { %v5256_v10 = vsub.f32 %v5254_v11, %v5255_v23  ;;  %5314 = vmatpush.msra.mxu0 %v5260_v36  ;;  %v5268_v11 = vsub.f32 %v5266_v33, %v5267_v0  ;;  %v12506_v36 = vand.u32 4294901760, %v11477_v16 }
 0xc09   : > { %v5273_v7 = vand.u32 4294901760, %v5272_v54  ;;  %5358 = vmatpush.msra.mxu1 %v5208_v17  ;;  %5209 = vmatpush.msrb.mxu2 %v5208_v17 }
 0xc0a   : > { %v5257_v38 = vand.u32 4294901760, %v5256_v10  ;;  %5317 = vmatpush.msra.mxu0 %v5266_v33  ;;  %v5269_v52 = vand.u32 4294901760, %v5268_v11  ;;  %v5281_v33 = vand.u32 4294901760, %v5280_v32  ;;  %v10416_v11 = vld [vmem:[%s12418_s13 + $0x1] ss:$0 sm:$0xff] }
 0xc0b   : > { %v5274_v6 = vsub.f32 %v5272_v54, %v5273_v7  ;;  %5383 = vmatpush.msra.mxu2 %v12506_v36 }
 0xc0c   : > { %5258 = vmatpush.msrb.mxu3 %v5257_v38  ;;  %5320 = vmatpush.msra.mxu0 %v5272_v54 }
 0xc0d   : > { %v5275_v10 = vand.u32 4294901760, %v5274_v6  ;;  %5387 = vmatpush.msra.mxu2 %v12507_v30 }
 0xc0e   : > { %5264 = vmatpush.msrb.mxu3 %v5263_v44  ;;  %5323 = vmatpush.msra.mxu0 %v5278_v21  ;;  %v10333_v21 = vld [vmem:[%s12483_s17 + $0x58] sm:$0xff] }
 0xc0f   : > { %5391 = vmatpush.msra.mxu2 %v5249_v51  ;;  %v11558_v32 = vand.u32 4294901760, %v10333_v21 }
 0xc10   : > { %5270 = vmatpush.msrb.mxu3 %v5269_v52 }
 0xc11   : > { %5395 = vmatpush.msra.mxu2 %v5255_v23  ;;  %5480 = vmatpush.msrb.mxu0 %v11558_v32  ;;  %v11565_v30 = vsub.f32 %v10333_v21, %v11558_v32 }
 0xc12   : > { %5276 = vmatpush.msrb.mxu3 %v5275_v10 }
 0xc13   : > { %5399 = vmatpush.msra.mxu2 %v5261_v50 }
 0xc14   : > { %5282 = vmatpush.msrb.mxu3 %v5281_v33 }
 0xc15   : > { %5403 = vmatpush.msra.mxu2 %v5267_v0 }
 0xc16   : > { %5430 = vmatpush.msra.mxu3 %v11471_v28 }
 0xc17   : > { %5407 = vmatpush.msra.mxu2 %v5273_v7 }
 0xc18   : > { %5432 = vmatpush.msra.mxu3 %v11479_v26 }
 0xc19   : > { %5411 = vmatpush.msra.mxu2 %v5279_v53 }
 0xc1a   : > { %5434 = vmatpush.msra.mxu3 %v11491_v61 }
 0xc1c   : > { %5436 = vmatpush.msra.mxu3 %v11506_v14 }
 0xc1e   : > { %5438 = vmatpush.msra.mxu3 %v11520_v34  ;;  %v10327_v34 = vld [vmem:[%s616_s22 + $0x8] sm:$0xff] }
 0xc1f   : > { %v5465_v44 = vsel %vm704_vm0, %v10327_v34, 0 }
 0xc20   : > { %5440 = vmatpush.msra.mxu3 %v5204_v13 }
 0xc22   : > { %5442 = vmatpush.msra.mxu3 %v5206_v57 }
 0xc24   : > { %5444 = vmatpush.msra.mxu3 %v5208_v17  ;;  %v10417_v17 = vld [vmem:[%s12418_s13 + $0x2] ss:$0 sm:$0xff] }
 0xc61   : > { %v5038_v8 = vpop.f32.mrf.mxu1 }
 0xc69   : > { %v5004_v22 = vpop.f32.mrf.mxu0  ;;  %v5042_v6 = vpop.f32.mrf.mxu1 }
 0xc6a   : > { %v5039_v52 = vadd.f32 %v5038_v8, %v5004_v22  ;;  %v5066_v54 = vpop.f32.mrf.mxu2 }
 0xc6b   : > { %v5095_v43 = vpop.f32.mrf.mxu3 }
 0xc6c   : > { %v5067_v28 = vadd.f32 %v5066_v54, %v5039_v52 }
 0xc6e   : > { %v5096_v26 = vadd.f32 %v5095_v43, %v5067_v28  ;;  %v5510_v43 = vand.u32 4294901760, %v11565_v30 }
 0xc71   : > { %v5012_v16 = vpop.f32.mrf.mxu0  ;;  %v5151_v61 = vpop.f32.mrf.mxu1 }
 0xc72   : > { %v5043_v50 = vadd.f32 %v5042_v6, %v5012_v16  ;;  %v5071_v23 = vpop.f32.mrf.mxu2  ;;  %v11569_v6 = vand.u32 4294901760, %v5465_v44  ;;  %v10331_v16 = vld [vmem:[%s12483_s17 + $0x48] sm:$0xff] }
 0xc73   : > { %v5101_v13 = vpop.f32.mrf.mxu3 }
 0xc74   : > { %v5072_v14 = vadd.f32 %v5071_v23, %v5043_v50  ;;  %v11582_v50 = vand.u32 4294901760, %v10331_v16  ;;  %v11598_v34 = vsub.f32 %v5465_v44, %v11569_v6 }
 0xc76   : > { %v5102_v57 = vadd.f32 %v5101_v13, %v5072_v14  ;;  %v5511_v14 = vsub.f32 %v11565_v30, %v5510_v43 }
 0xc79   : > { %v5125_v0 = vpop.f32.mrf.mxu0  ;;  %v5155_v33 = vpop.f32.mrf.mxu1 }
 0xc7a   : > { %v5126_v51 = vadd.f32 %v5125_v0, %v5096_v26  ;;  %v10330_v0 = vld [vmem:[%s12483_s17 + $0x40] sm:$0xff] }
 0xc7b   : > { %v11601_v13 = vand.u32 4294901760, %v10330_v0 }
 0xc7c   : > { %v5152_v38 = vadd.f32 %v5151_v61, %v5126_v51  ;;  %v10337_v51 = vld [vmem:[%s12483_s17 + $0x78] sm:$0xff] }
 0xc7e   : > { %v5158_v53 = vmul.f32 %v5152_v38, %v11450_v46  ;;  %v10332_v46 = vld [vmem:[%s12483_s17 + $0x50] sm:$0xff] }
 0xc7f   : > { %v11567_v22 = vand.u32 4294901760, %v10332_v46 }
 0xc80   : > { %v5162_v7 = vmul.f32 %v10416_v11, %v5158_v53 }
 0xc81   : > { %v5129_v10 = vpop.f32.mrf.mxu0  ;;  %5482 = vmatpush.msrb.mxu0 %v11567_v22  ;;  %v11580_v26 = vsub.f32 %v10332_v46, %v11567_v22 }
 0xc82   : > { %v5166_v36 = vadd.f32 %v10417_v17, %v5162_v7  ;;  %v5130_v8 = vadd.f32 %v5129_v10, %v5102_v57  ;;  %v11603_v57 = vand.u32 4294901760, %v10337_v51  ;;  %v10336_v7 = vld [vmem:[%s12483_s17 + $0x70] sm:$0xff]  ;;  %v5512_v10 = vand.u32 4294901760, %v5511_v14 }
 0xc83   : > { %5484 = vmatpush.msrb.mxu0 %v11582_v50  ;;  %v5516_v38 = vand.u32 4294901760, %v11580_v26  ;;  %v11612_v44 = vand.u32 4294901760, %v10336_v7 }
 0xc84   : > { %v5181_v52 = vsel %vm3939_vm3, %v5166_v36, 0  ;;  %v5156_v54 = vadd.f32 %v5155_v33, %v5130_v8  ;;  %5513 = vmatpush.msrb.mxu1 %v5512_v10 }
 0xc85   : > { %v11575_v28 = vand.u32 4294901760, %v5181_v52  ;;  %v5517_v36 = vsub.f32 %v11580_v26, %v5516_v38  ;;  %5486 = vmatpush.msrb.mxu0 %v11601_v13 }
 0xc86   : > { %v5159_v61 = vmul.f32 %v5156_v54, %v11457_v56  ;;  %v5521_v56 = vsub.f32 %v10331_v16, %v11582_v50  ;;  %v11615_v16 = vsub.f32 %v10337_v51, %v11603_v57 }
 0xc87   : > { %5284 = vmatmul.f32.vlgmr.msrb.gmra.mxu3 %v11575_v28  ;;  %v5211_v23 = vsub.f32 %v5181_v52, %v11575_v28  ;;  %v5518_v52 = vand.u32 4294901760, %v5517_v36 }
 0xc88   : > { %v5163_v53 = vmul.f32 %v10416_v11, %v5159_v61  ;;  %5580 = vmatpush.msrb.mxu3 %v11558_v32  ;;  %v5522_v8 = vand.u32 4294901760, %v5521_v56  ;;  %v5527_v11 = vsub.f32 %v10330_v0, %v11601_v13  ;;  %v11623_v0 = vand.u32 4294901760, %v11598_v34 }
 0xc89   : > { %5326 = vmatmul.f32.vlgmr.msra.gmra.mxu0 %v5211_v23  ;;  %v5212_v21 = vand.u32 4294901760, %v5211_v23  ;;  %v12469_v36 = vand.u32 4294901760, %v11615_v16  ;;  %5519 = vmatpush.msrb.mxu1 %v5518_v52 }
 0xc8a   : > { %v5167_v46 = vadd.f32 %v10417_v17, %v5163_v53  ;;  %5582 = vmatpush.msrb.mxu3 %v11567_v22  ;;  %v5523_v54 = vsub.f32 %v5521_v56, %v5522_v8  ;;  %5609 = vmatpush.msra.mxu0 %v5510_v43  ;;  %v10335_v17 = vld [vmem:[%s12483_s17 + $0x68] sm:$0xff]  ;;  %v5528_v14 = vand.u32 4294901760, %v5527_v11  ;;  %v10334_v43 = vld [vmem:[%s12483_s17 + $0x60] sm:$0xff]  ;;  %v5490_v5 = vsub.f32 %v11598_v34, %v11623_v0 }
 0xc8b   : > { %5362 = vmatmul.f32.vlgmr.msra.gmra.mxu1 %v5212_v21  ;;  %v5213_v33 = vsub.f32 %v5211_v23, %v5212_v21  ;;  %v11626_v23 = vsub.f32 %v10336_v7, %v11612_v44  ;;  %v11636_v24 = vand.u32 4294901760, %v10335_v17  ;;  %v11638_v7 = vand.u32 4294901760, %v10334_v43 }
 0xc8c   : > { %v5184_v61 = vsel %vm3939_vm3, %v5167_v46, 0  ;;  %5584 = vmatpush.msrb.mxu3 %v11582_v50  ;;  %v5524_v21 = vand.u32 4294901760, %v5523_v54  ;;  %5613 = vmatpush.msra.mxu0 %v5516_v38  ;;  %v5529_v10 = vsub.f32 %v5527_v11, %v5528_v14  ;;  %v5701_v38 = vsub.f32 %v11615_v16, %v12469_v36 }
 0xc8d   : > { %v5214_v51 = vand.u32 4294901760, %v5213_v33  ;;  %v11631_v53 = vand.u32 4294901760, %v5184_v61  ;;  %v11647_v52 = vsub.f32 %v10335_v17, %v11636_v24  ;;  %v11650_v46 = vsub.f32 %v10334_v43, %v11638_v7 }
 0xc8e   : > { %5586 = vmatpush.msrb.mxu3 %v11601_v13  ;;  %5525 = vmatpush.msrb.mxu1 %v5524_v21  ;;  %v5530_v54 = vand.u32 4294901760, %v5529_v10  ;;  %v5702_v43 = vand.u32 4294901760, %v5701_v38 }
 0xc8f   : > { %5215 = vmatmul.f32.vlgmr.msrb.gmra.mxu2 %v5214_v51  ;;  %5288 = vmatmul.f32.gmra.mxu3 %v11631_v53  ;;  %v5219_v33 = vsub.f32 %v5184_v61, %v11631_v53  ;;  %v5712_v21 = vand.u32 4294901760, %v11647_v52  ;;  %v5718_v17 = vand.u32 4294901760, %v11650_v46 }
 0xc90   : > { %5551 = vmatpush.msrb.mxu2 %v11565_v30  ;;  %5531 = vmatpush.msrb.mxu1 %v5530_v54  ;;  %v12508_v30 = vand.u32 4294901760, %v11626_v23 }
 0xc91   : > { %5331 = vmatmul.f32.gmra.mxu0 %v5219_v33  ;;  %v5220_v51 = vand.u32 4294901760, %v5219_v33  ;;  %v5713_v36 = vsub.f32 %v11647_v52, %v5712_v21 }
 0xc92   : > { %5554 = vmatpush.msrb.mxu2 %v11580_v26  ;;  %v5707_v61 = vsub.f32 %v11626_v23, %v12508_v30  ;;  %5617 = vmatpush.msra.mxu0 %v5522_v8  ;;  %v5491_v26 = vand.u32 4294901760, %v5490_v5  ;;  %v5719_v30 = vsub.f32 %v11650_v46, %v5718_v17  ;;  %v12510_v5 = vand.u32 4294901760, %v11626_v23 }
 0xc93   : > { %5368 = vmatmul.f32.gmra.mxu1 %v5220_v51  ;;  %v5221_v10 = vsub.f32 %v5219_v33, %v5220_v51  ;;  %v5714_v8 = vand.u32 4294901760, %v5713_v36 }
 0xc94   : > { %5557 = vmatpush.msrb.mxu2 %v5521_v56  ;;  %5640 = vmatpush.msra.mxu1 %v11558_v32  ;;  %v5708_v54 = vand.u32 4294901760, %v5707_v61  ;;  %v5720_v32 = vand.u32 4294901760, %v5719_v30 }
 0xc95   : > { %v5222_v47 = vand.u32 4294901760, %v5221_v10  ;;  %5621 = vmatpush.msra.mxu0 %v5528_v14 }
 0xc96   : > { %5560 = vmatpush.msrb.mxu2 %v5527_v11  ;;  %5642 = vmatpush.msra.mxu1 %v11567_v22 }
 0xc97   : > { %5223 = vmatmul.f32.gmra.mxu2 %v5222_v47  ;;  %5446 = vmatmul.f32.vlgmr.msra.gmra.mxu3 %v11575_v28  ;;  %v12509_v47 = vand.u32 4294901760, %v11615_v16 }
 0xc98   : > { %5703 = vmatpush.msra.mxu3 %v5702_v43  ;;  %5644 = vmatpush.msra.mxu1 %v11582_v50 }
 0xc99   : > { %5492 = vmatmul.f32.vlgmr.msrb.gmra.mxu0 %v5491_v26 }
 0xc9a   : > { %5709 = vmatpush.msra.mxu3 %v5708_v54  ;;  %5646 = vmatpush.msra.mxu1 %v11601_v13 }
 0xc9b   : > { %5533 = vmatmul.f32.vlgmr.msrb.gmra.mxu1 %v11569_v6  ;;  %5741 = vmatpush.msrb.mxu0 %v11615_v16 }
 0xc9c   : > { %5715 = vmatpush.msra.mxu3 %v5714_v8  ;;  %5770 = vmatpush.msrb.mxu1 %v11603_v57 }
 0xc9d   : > { %5744 = vmatpush.msrb.mxu0 %v11626_v23 }
 0xc9e   : > { %5721 = vmatpush.msra.mxu3 %v5720_v32  ;;  %5772 = vmatpush.msrb.mxu1 %v11612_v44 }
 0xc9f   : > { %5413 = vmatmul.f32.vlgmr.msra.gmra.mxu2 %v11575_v28  ;;  %5450 = vmatmul.f32.gmra.mxu3 %v11631_v53 }
 0xca0   : > { %5670 = vmatpush.msra.mxu2 %v11603_v57  ;;  %5747 = vmatpush.msrb.mxu0 %v11647_v52 }
 0xca1   : > { %5623 = vmatmul.f32.vlgmr.msra.gmra.mxu0 %v11569_v6  ;;  %5774 = vmatpush.msrb.mxu1 %v11636_v24 }
 0xca2   : > { %5672 = vmatpush.msra.mxu2 %v11612_v44  ;;  %5750 = vmatpush.msrb.mxu0 %v11650_v46 }
 0xca3   : > { %5648 = vmatmul.f32.vlgmr.msra.gmra.mxu1 %v11569_v6 }
 0xca4   : > { %5674 = vmatpush.msra.mxu2 %v11636_v24  ;;  %5776 = vmatpush.msrb.mxu1 %v11638_v7 }
 0xca6   : > { %5676 = vmatpush.msra.mxu2 %v11638_v7 }
 0xca7   : > { %5417 = vmatmul.f32.gmra.mxu2 %v11631_v53  ;;  %5590 = vmatmul.f32.vlgmr.msrb.gmra.mxu3 %v11623_v0 }
 0xca8   : > { %5830 = vmatpush.msrb.mxu3 %v11603_v57 }
 0xca9   : > { %5753 = vmatmul.f32.vlgmr.msrb.gmra.mxu0 %v11598_v34 }
 0xcaa   : > { %5832 = vmatpush.msrb.mxu3 %v11612_v44 }
 0xcab   : > { %5780 = vmatmul.f32.vlgmr.msrb.gmra.mxu1 %v11623_v0 }
 0xcac   : > { %5834 = vmatpush.msrb.mxu3 %v11636_v24 }
 0xcae   : > { %5836 = vmatpush.msrb.mxu3 %v11638_v7 }
 0xcaf   : > { %5563 = vmatmul.f32.vlgmr.msrb.gmra.mxu2 %v11598_v34  ;;  %5723 = vmatmul.f32.vlgmr.msra.gmra.mxu3 %v11569_v6 }
 0xcb0   : > { %5799 = vmatpush.msrb.mxu2 %v12509_v47 }
 0xcb2   : > { %5803 = vmatpush.msrb.mxu2 %v12510_v5 }
 0xcb4   : > { %5807 = vmatpush.msrb.mxu2 %v5712_v21 }
 0xcb6   : > { %5811 = vmatpush.msrb.mxu2 %v5718_v17 }
 0xcb7   : > { %5682 = vmatmul.f32.vlgmr.msra.gmra.mxu2 %v5491_v26  ;;  %5838 = vmatmul.f32.vlgmr.msrb.gmra.mxu3 %v11569_v6 }
 0xcbf   : > { %5813 = vmatmul.f32.vlgmr.msrb.gmra.mxu2 %v11569_v6 }
 0xd06   : > { %v11706_v50 = vpop.f32.mrf.mxu0 }
 0xd07   : > { %12513 = vst [vmem:[#allocation27_spill] sm:$0xff] %v11706_v50 }
 0xd08   : > { %v11708_v56 = vpop.f32.mrf.mxu1 }
 0xd09   : > { %12514 = vst [vmem:[#allocation28_spill] sm:$0xff] %v11708_v56 }
 0xd0a   : > { %v11700_v24 = vpop.f32.mrf.mxu3 }
 0xd0b   : > { %12511 = vst [vmem:[#allocation25_spill] sm:$0xff] %v11700_v24 }
 0xd0e   : > { %v11714_v57 = vpop.f32.mrf.mxu0 }
 0xd0f   : > { %12517 = vst [vmem:[#allocation31_spill] sm:$0xff] %v11714_v57 }
 0xd10   : > { %v11716_v11 = vpop.f32.mrf.mxu1 }
 0xd11   : > { %12518 = vst [vmem:[#allocation32_spill] sm:$0xff] %v11716_v11 }
 0xd12   : > { %v11702_v22 = vpop.f32.mrf.mxu2  ;;  %v11704_v28 = vpop.f32.mrf.mxu3 }
 0xd13   : > { %12512 = vst [vmem:[#allocation26_spill] sm:$0xff] %v11704_v28 }
 0xd16   : > { %v5493_v16 = vpop.f32.mrf.mxu0 }
 0xd18   : > { %v5534_v14 = vpop.f32.mrf.mxu1 }
 0xd19   : > { %v5535_v36 = vadd.f32 %v5534_v14, %v5493_v16 }
 0xd1a   : > { %v11710_v34 = vpop.f32.mrf.mxu2  ;;  %v11712_v13 = vpop.f32.mrf.mxu3 }
 0xd1b   : > { %12515 = vst [vmem:[#allocation29_spill] sm:$0xff] %v11710_v34 }
 0xd1c   : > { %12516 = vst [vmem:[#allocation30_spill] sm:$0xff] %v11712_v13 }
 0xd1e   : > { %v5624_v53 = vpop.f32.mrf.mxu0 }
 0xd20   : > { %v5649_v33 = vpop.f32.mrf.mxu1 }
 0xd22   : > { %v11718_v44 = vpop.f32.mrf.mxu2  ;;  %v11720_v6 = vpop.f32.mrf.mxu3 }
 0xd23   : > { %12519 = vst [vmem:[#allocation33_spill] sm:$0xff] %v11718_v44 }
 0xd24   : > { %12520 = vst [vmem:[#allocation34_spill] sm:$0xff] %v11720_v6 }
 0xd26   : > { %v5754_v17 = vpop.f32.mrf.mxu0 }
 0xd28   : > { %v5781_v30 = vpop.f32.mrf.mxu1 }
 0xd2a   : > { %v11722_v0 = vpop.f32.mrf.mxu2  ;;  %v5591_v23 = vpop.f32.mrf.mxu3 }
 0xd2b   : > { %12521 = vst [vmem:[#allocation35_spill] sm:$0xff] %v11722_v0 }
 0xd32   : > { %v5564_v46 = vpop.f32.mrf.mxu2  ;;  %v5724_v51 = vpop.f32.mrf.mxu3 }
 0xd33   : > { %v5565_v7 = vadd.f32 %v5564_v46, %v5535_v36 }
 0xd35   : > { %v5592_v38 = vadd.f32 %v5591_v23, %v5565_v7 }
 0xd37   : > { %v5625_v52 = vadd.f32 %v5624_v53, %v5592_v38 }
 0xd39   : > { %v5650_v61 = vadd.f32 %v5649_v33, %v5625_v52 }
 0xd3a   : > { %v5683_v21 = vpop.f32.mrf.mxu2  ;;  %v5839_v5 = vpop.f32.mrf.mxu3 }
 0xd3b   : > { %v5847_v10 = vsel %vm1086_vm1, %v5650_v61, 0  ;;  %v5725_v43 = vadd.f32 %v5724_v51, %v5683_v21  ;;  %v10339_v61 = vld [vmem:[%s12408_s3 + $0x10] sm:$0xff] }
 0xd3c   : > { %v5869_v26 = vand.u32 4294901760, %v5847_v10 }
 0xd3d   : > { %v5755_v54 = vadd.f32 %v5754_v17, %v5725_v43 }
 0xd3e   : > { %v5870_v8 = vsub.f32 %v5847_v10, %v5869_v26 }
 0xd3f   : > { %v5782_v32 = vadd.f32 %v5781_v30, %v5755_v54 }
 0xd40   : > { %v5871_v16 = vand.u32 4294901760, %v5870_v8 }
 0xd42   : > { %v5814_v47 = vpop.f32.mrf.mxu2  ;;  %v5872_v46 = vsub.f32 %v5870_v8, %v5871_v16 }
 0xd43   : > { %v5815_v14 = vadd.f32 %v5814_v47, %v5782_v32 }
 0xd44   : > { %v5873_v33 = vand.u32 4294901760, %v5872_v46 }
 0xd45   : > { %v5840_v36 = vadd.f32 %v5839_v5, %v5815_v14 }
 0xd47   : > { %v5850_v23 = vsel %vm1086_vm1, %v5840_v36, 0 }
 0xd48   : > { %v5867_v53 = vand.u32 4294901760, %v5850_v23 }
 0xd4a   : > { %v5894_v7 = vsub.f32 %v5850_v23, %v5867_v53  ;;  %5868 = vmatpush.xpose.msra.mxu0 %v5867_v53  ;;  %5944 = vmatpush.xpose.msra.mxu3 %v5867_v53 }
 0xd4c   : > { %5921 = vmatpush.xpose.msra.mxu2 %v5894_v7  ;;  %v5895_v38 = vand.u32 4294901760, %v5894_v7 }
 0xd4d   : > { %5874 = vmatmul.f32.vlgmr.msra.gmra.mxu0 %v5873_v33  ;;  %5948 = vmatmul.f32.vlgmr.msra.gmra.mxu3 %v5871_v16 }
 0xd4e   : > { %5970 = vmatpush.xpose.msrb.mxu0 %v5895_v38  ;;  %v5896_v52 = vsub.f32 %v5894_v7, %v5895_v38 }
 0xd4f   : > { %5924 = vmatmul.f32.vlgmr.msra.gmra.mxu2 %v5870_v8 }
 0xd50   : > { %v5897_v51 = vand.u32 4294901760, %v5896_v52 }
 0xd52   : > { %5898 = vmatpush.xpose.msra.mxu1 %v5897_v51 }
 0xd55   : > { %5900 = vmatmul.f32.vlgmr.msra.gmra.mxu1 %v5869_v26  ;;  %5972 = vmatmul.f32.vlgmr.msrb.gmra.mxu0 %v5869_v26 }
 0xd56   : > { %5992 = vmatpush.xpose.msrb.mxu1 %v5867_v53 }
 0xd5d   : > { %5994 = vmatmul.f32.vlgmr.msrb.gmra.mxu1 %v5869_v26  ;;  %v10338_v26 = vld [vmem:[%s12408_s3 + $0x18] sm:$0xff] }
 0xd5e   : > { %v6018_v23 = vsel %vm1258_vm2, %v10338_v26, 0 }
 0xd5f   : > { %v6037_v7 = vand.u32 4294901760, %v6018_v23 }
 0xd61   : > { %v6038_v33 = vsub.f32 %v6018_v23, %v6037_v7 }
 0xd63   : > { %v6039_v51 = vand.u32 4294901760, %v6038_v33 }
 0xdca   : > { %v5875_v21 = vpop.f32.mrf.mxu0 }
 0xdcb   : > { %v5876_v17 = vadd.f32 %v10339_v61, %v5875_v21 }
 0xdd0   : > { %v5949_v32 = vpop.f32.mrf.mxu3 }
 0xdd2   : > { %v5901_v10 = vpop.f32.mrf.mxu1  ;;  %v5925_v54 = vpop.f32.mrf.mxu2 }
 0xdd3   : > { %v5902_v43 = vadd.f32 %v5901_v10, %v5876_v17  ;;  %v5973_v5 = vpop.f32.mrf.mxu0 }
 0xdd5   : > { %v5926_v30 = vadd.f32 %v5925_v54, %v5902_v43  ;;  %v6040_v43 = vsub.f32 %v6038_v33, %v6039_v51 }
 0xdd7   : > { %v5950_v47 = vadd.f32 %v5949_v32, %v5926_v30 }
 0xdd9   : > { %v5974_v8 = vadd.f32 %v5973_v5, %v5950_v47  ;;  %v6041_v5 = vand.u32 4294901760, %v6040_v43 }
 0xdda   : > { %v5995_v16 = vpop.f32.mrf.mxu1 }
 0xddb   : > { %v5996_v14 = vadd.f32 %v5995_v16, %v5974_v8 }
 0xddd   : > { %v10340_v36 = vmul.f32 -1.442695, %v5996_v14 }
 0xddf   : > { %10451 = vpow2.f32 %v10340_v36 }
 0xde5   : > { %v10452_v46 = vpop.eup %10451 }
 0xde6   : > { %v6001_v53 = vadd.f32 1.0, %v10452_v46 }
 0xde8   : > { %10453 = vrcp.f32 %v6001_v53  ;;  %v6013_v21 = vand.u32 2147483648, %v6001_v53  ;;  %v6011_v10 = vand.u32 2147483647, %v6001_v53  ;;  %vm6007_vm11 = vweird.f32 %v6001_v53 }
 0xdea   : > { %v6014_v30 = vor.u32 1.1754944e-38, %v6013_v21  ;;  %vm6012_vm13 = vcmp.eq.f32.partialorder %v6011_v10, 8.507059e+37 }
 0xdee   : > { %v10454_v38 = vpop.eup %10453 }
 0xdef   : > { %v6003_v52 = vmul.f32 %v10454_v38, %v6001_v53  ;;  %vm6008_vm10 = vweird.f32 %v10454_v38 }
 0xdf0   : > { %vm6009_vm12 = vmor %vm6007_vm11, %vm6008_vm10 }
 0xdf1   : > { %v6004_v61 = vsub.f32 1.0, %v6003_v52 }
 0xdf3   : > { %v6005_v17 = vmul.f32 %v10454_v38, %v6004_v61 }
 0xdf5   : > { %v6006_v54 = vadd.f32 %v10454_v38, %v6005_v17 }
 0xdf7   : > { %v6010_v32 = vsel %vm6009_vm12, %v10454_v38, %v6006_v54 }
 0xdf8   : > { %v6015_v47 = vsel %vm6012_vm13, %v6014_v30, %v6010_v32 }
 0xdf9   : > { %v6035_v8 = vand.u32 4294901760, %v6015_v47 }
 0xdfb   : > { %6036 = vmatpush.msrb.mxu2 %v6035_v8  ;;  %6112 = vmatpush.msra.mxu1 %v6035_v8  ;;  %v6062_v16 = vsub.f32 %v6015_v47, %v6035_v8 }
 0xdfc   : > { %6042 = vmatmul.f32.vlgmr.msrb.gmra.mxu2 %v6041_v5  ;;  %6116 = vmatmul.f32.vlgmr.msra.gmra.mxu1 %v6039_v51 }
 0xdfd   : > { %6089 = vmatpush.msra.mxu0 %v6062_v16  ;;  %v6063_v14 = vand.u32 4294901760, %v6062_v16 }
 0xdfe   : > { %6092 = vmatmul.f32.vlgmr.msra.gmra.mxu0 %v6038_v33 }
 0xdff   : > { %6138 = vmatpush.msra.mxu2 %v6063_v14  ;;  %v6064_v36 = vsub.f32 %v6062_v16, %v6063_v14 }
 0xe01   : > { %v6065_v26 = vand.u32 4294901760, %v6064_v36 }
 0xe03   : > { %6066 = vmatpush.msrb.mxu3 %v6065_v26 }
 0xe04   : > { %6068 = vmatmul.f32.vlgmr.msrb.gmra.mxu3 %v6037_v7  ;;  %6140 = vmatmul.f32.vlgmr.msra.gmra.mxu2 %v6037_v7 }
 0xe05   : > { %6160 = vmatpush.msra.mxu3 %v6035_v8 }
 0xe0c   : > { %6162 = vmatmul.f32.vlgmr.msra.gmra.mxu3 %v6037_v7 }
 0xe79   : > { %v6117_v52 = vpop.f32.mrf.mxu1 }
 0xe7b   : > { %v6093_v53 = vpop.f32.mrf.mxu0 }
 0xe7f   : > { %v6043_v46 = vpop.f32.mrf.mxu2 }
 0xe87   : > { %v6069_v23 = vpop.f32.mrf.mxu3  ;;  %v6141_v21 = vpop.f32.mrf.mxu2 }
 0xe88   : > { %v6070_v38 = vadd.f32 %v6069_v23, %v6043_v46 }
 0xe8a   : > { %v6094_v61 = vadd.f32 %v6093_v53, %v6070_v38 }
 0xe8c   : > { %v6118_v17 = vadd.f32 %v6117_v52, %v6094_v61 }
 0xe8e   : > { %v6142_v51 = vadd.f32 %v6141_v21, %v6118_v17 }
 0xe8f   : > { %v6163_v10 = vpop.f32.mrf.mxu3 }
 0xe90   : > { %v6164_v43 = vadd.f32 %v6163_v10, %v6142_v51 }
 0xe92   : > { %v6166_v33 = vsel %vm1258_vm2, %v6164_v43, -inf }
 0xe93   : > { %v6167_v54 = vrot.slane %v6166_v33, 4 }
 0xe95   : > { %v6168_v30 = vmax.f32 %v6166_v33, %v6167_v54 }
 0xe97   : > { %v6169_v32 = vrot.slane %v6168_v30, 2 }
 0xe99   : > { %v6170_v47 = vmax.f32 %v6168_v30, %v6169_v32 }
 0xe9b   : > { %v6171_v5 = vrot.slane %v6170_v47, 1 }
 0xe9d   : > { %v6172_v8 = vmax.f32 %v6170_v47, %v6171_v5 }
 0xe9f   : > { %v6173_v7 = vsub.f32 %v6164_v43, %v6172_v8 }
 0xea1   : > { %v6174_v16 = vmul.f32 1.442695, %v6173_v7 }
 0xea3   : > { %10455 = vpow2.f32 %v6174_v16 }
 0xea9   : > { %v10456_v14 = vpop.eup %10455 }
 0xeaa   : > { %v6176_v36 = vsel %vm1258_vm2, %v10456_v14, 0.0 }
 0xeab   : > { %v6177_v26 = vrot.slane %v6176_v36, 4 }
 0xead   : > { %v6178_v46 = vadd.f32 %v6177_v26, %v6176_v36 }
 0xeaf   : > { %v6179_v23 = vrot.slane %v6178_v46, 2 }
 0xeb1   : > { %v6180_v53 = vadd.f32 %v6179_v23, %v6178_v46 }
 0xeb3   : > { %v6181_v38 = vrot.slane %v6180_v53, 1 }
 0xeb5   : > { %v6182_v52 = vadd.f32 %v6181_v38, %v6180_v53 }
 0xeb7   : > { %10457 = vrcp.f32 %v6182_v52 }
 0xebd   : > { %v10458_v61 = vpop.eup %10457 }
 0xebe   : > { %v6184_v21 = vmul.f32 %v10458_v61, %v6182_v52 }
 0xec0   : > { %v6185_v17 = vsub.f32 2.0, %v6184_v21 }
 0xec2   : > { %v6186_v51 = vmul.f32 %v10458_v61, %v6185_v17 }
 0xec4   : > { %v6187_v10 = vmul.f32 %v10456_v14, %v6186_v51 }
 0xec6   : > { %v6203_v33 = vand.u32 4294901760, %v6187_v10 }
 0xec8   : > { %6204 = vmatpush.msrb.mxu0 %v6203_v33  ;;  %6297 = vmatpush.msrb.mxu3 %v6203_v33  ;;  %v6238_v43 = vsub.f32 %v6187_v10, %v6203_v33 }
 0xec9   : > { %6210 = vmatmul.f32.vlgmr.msrb.gmra.mxu0 %v10783_v48  ;;  %6301 = vmatmul.f32.vlgmr.msrb.gmra.mxu3 %v10774_v40 }
 0xeca   : > { %6269 = vmatpush.msrb.mxu2 %v6238_v43  ;;  %v6239_v54 = vand.u32 4294901760, %v6238_v43  ;;  %6425 = vmatpush.msra.mxu3 %v10821_v62 }
 0xecb   : > { %6272 = vmatmul.f32.vlgmr.msrb.gmra.mxu2 %v10770_v37 }
 0xecc   : > { %6538 = vmatpush.msrb.mxu3 %v10807_v58  ;;  %6329 = vmatpush.msra.mxu0 %v6239_v54  ;;  %v6240_v30 = vsub.f32 %v6238_v43, %v6239_v54 }
 0xecd   : > { %6387 = vmatpush.msra.mxu2 %v10807_v58 }
 0xece   : > { %6452 = vmatpush.msrb.mxu0 %v10810_v59  ;;  %v6241_v32 = vand.u32 4294901760, %v6240_v30 }
 0xecf   : > { %6512 = vmatpush.msrb.mxu2 %v10815_v60 }
 0xed0   : > { %6242 = vmatpush.msrb.mxu1 %v6241_v32 }
 0xed1   : > { %6218 = vmatmul.f32.gmra.mxu0 %v10793_v55  ;;  %6244 = vmatmul.f32.vlgmr.msrb.gmra.mxu1 %v10764_v35 }
 0xed2   : > { %6355 = vmatpush.msra.mxu1 %v6203_v33  ;;  %6307 = vmatmul.f32.gmra.mxu3 %v10786_v49 }
 0xed3   : > { %6277 = vmatmul.f32.gmra.mxu2 %v10781_v45 }
 0xed4   : > { %6480 = vmatpush.msrb.mxu1 %v10807_v58 }
 0xed9   : > { %6248 = vmatmul.f32.gmra.mxu1 %v10776_v41  ;;  %6331 = vmatmul.f32.vlgmr.msra.gmra.mxu0 %v10764_v35 }
 0xee1   : > { %6335 = vmatmul.f32.gmra.mxu0 %v10776_v41  ;;  %6357 = vmatmul.f32.vlgmr.msra.gmra.mxu1 %v10764_v35 }
 0xee9   : > { %6361 = vmatmul.f32.gmra.mxu1 %v10776_v41 }
 0xf46   : > { %v6211_v37 = vpop.f32.mrf.mxu0 }
 0xf4c   : > { %v6302_v49 = vpop.f32.mrf.mxu3 }
 0xf4e   : > { %v6219_v40 = vpop.f32.mrf.mxu0  ;;  %v6245_v48 = vpop.f32.mrf.mxu1 }
 0xf4f   : > { %v6273_v55 = vpop.f32.mrf.mxu2  ;;  %v6246_v59 = vadd.f32 %v6245_v48, %v6211_v37 }
 0xf51   : > { %v6274_v45 = vadd.f32 %v6273_v55, %v6246_v59 }
 0xf53   : > { %v6303_v58 = vadd.f32 %v6302_v49, %v6274_v45  ;;  %v11756_v49 = vld [vmem:[%s10829_s21 + $0x10] sm:$0xff] }
 0xf55   : > { %v6308_v36 = vpop.f32.mrf.mxu3 }
 0xf56   : > { %v6249_v60 = vpop.f32.mrf.mxu1  ;;  %v6332_v62 = vpop.f32.mrf.mxu0 }
 0xf57   : > { %v6250_v47 = vadd.f32 %v6249_v60, %v6219_v40  ;;  %v6278_v5 = vpop.f32.mrf.mxu2  ;;  %v6333_v8 = vadd.f32 %v6332_v62, %v6303_v58  ;;  %v6551_v62 = vsel %vm1086_vm1, %v11756_v49, 0 }
 0xf59   : > { %v6279_v16 = vadd.f32 %v6278_v5, %v6250_v47  ;;  %v11760_v5 = vand.u32 4294901760, %v6551_v62 }
 0xf5b   : > { %v6309_v46 = vadd.f32 %v6308_v36, %v6279_v16  ;;  %v11763_v36 = vld [vmem:[%s10829_s21 + $0x18] sm:$0xff]  ;;  %s12552_s21 = sld [smem:[#allocation41_spill]] }
 0xf5e   : > { %v6358_v7 = vpop.f32.mrf.mxu1  ;;  %v6336_v41 = vpop.f32.mrf.mxu0 }
 0xf5f   : > { %v6359_v14 = vadd.f32 %v6358_v7, %v6333_v8  ;;  %v6337_v53 = vadd.f32 %v6336_v41, %v6309_v46  ;;  %v10479_v46 = vld [vmem:[%s12411_s6] sm:$0xff] }
 0xf61   : > { %v6366_v35 = vsel %vm1258_vm2, %v6359_v14, 0  ;;  %s682_s29 = scalar_lea.vmem %s12552_s21, %s10388_s27 }
 0xf62   : > { %v6388_v26 = vand.u32 4294901760, %v6366_v35 }
 0xf64   : > { %v6389_v23 = vsub.f32 %v6366_v35, %v6388_v26  ;;  %6427 = vmatmul.f32.vlgmr.msra.gmra.mxu3 %v6388_v26 }
 0xf66   : > { %v6390_v38 = vand.u32 4294901760, %v6389_v23  ;;  %v6362_v52 = vpop.f32.mrf.mxu1  ;;  %6455 = vmatmul.f32.vlgmr.msrb.gmra.mxu0 %v6389_v23 }
 0xf67   : > { %v6363_v61 = vadd.f32 %v6362_v52, %v6337_v53  ;;  %v6554_v53 = vsel %vm1086_vm1, %v11763_v36, 0 }
 0xf68   : > { %v6391_v21 = vsub.f32 %v6389_v23, %v6390_v38  ;;  %6484 = vmatmul.f32.vlgmr.msrb.gmra.mxu1 %v6390_v38 }
 0xf69   : > { %v6369_v17 = vsel %vm1258_vm2, %v6363_v61, 0 }
 0xf6a   : > { %v6392_v51 = vand.u32 4294901760, %v6391_v21  ;;  %v6396_v10 = vand.u32 4294901760, %v6369_v17 }
 0xf6c   : > { %6393 = vmatmul.f32.vlgmr.msra.gmra.mxu2 %v6392_v51  ;;  %6431 = vmatmul.f32.gmra.mxu3 %v6396_v10  ;;  %v6397_v33 = vsub.f32 %v6369_v17, %v6396_v10  ;;  %v11776_v17 = vand.u32 4294901760, %v6554_v53 }
 0xf6e   : > { %6460 = vmatmul.f32.gmra.mxu0 %v6397_v33  ;;  %v6398_v43 = vand.u32 4294901760, %v6397_v33 }
 0xf70   : > { %6490 = vmatmul.f32.gmra.mxu1 %v6398_v43  ;;  %v6399_v54 = vsub.f32 %v6397_v33, %v6398_v43 }
 0xf72   : > { %v6400_v30 = vand.u32 4294901760, %v6399_v54 }
 0xf74   : > { %6401 = vmatmul.f32.gmra.mxu2 %v6400_v30  ;;  %6540 = vmatmul.f32.vlgmr.msrb.gmra.mxu3 %v6388_v26  ;;  %v11781_v30 = vsub.f32 %v6554_v53, %v11776_v17 }
 0xf7c   : > { %6514 = vmatmul.f32.vlgmr.msrb.gmra.mxu2 %v6388_v26  ;;  %6544 = vmatmul.f32.gmra.mxu3 %v6396_v10  ;;  %v11766_v26 = vsub.f32 %v6551_v62, %v11760_v5 }
 0xf7e   : > { %v11774_v21 = vand.u32 4294901760, %v11766_v26 }
 0xf80   : > { %v6577_v54 = vsub.f32 %v11766_v26, %v11774_v21 }
 0xf84   : > { %6518 = vmatmul.f32.gmra.mxu2 %v6396_v10 }
 0xfe3   : > { %v6456_v55 = vpop.f32.mrf.mxu0 }
 0xfe5   : > { %v6485_v45 = vpop.f32.mrf.mxu1 }
 0xfe7   : > { %v6428_v32 = vpop.f32.mrf.mxu3 }
 0xfeb   : > { %v6461_v14 = vpop.f32.mrf.mxu0 }
 0xfed   : > { %v6491_v38 = vpop.f32.mrf.mxu1 }
 0xfef   : > { %v6394_v37 = vpop.f32.mrf.mxu2  ;;  %v6432_v40 = vpop.f32.mrf.mxu3 }
 0xff0   : > { %v6429_v48 = vadd.f32 %v6428_v32, %v6394_v37  ;;  %v10480_v32 = vld [vmem:[%s12411_s6 + $0x8] sm:$0xff] }
 0xff2   : > { %v6457_v60 = vadd.f32 %v6456_v55, %v6429_v48  ;;  %v11786_v55 = vand.u32 4294901760, %v6577_v54 }
 0xff4   : > { %v6486_v47 = vadd.f32 %v6485_v45, %v6457_v60 }
 0xff7   : > { %v6402_v59 = vpop.f32.mrf.mxu2  ;;  %v6541_v8 = vpop.f32.mrf.mxu3 }
 0xff8   : > { %v6433_v58 = vadd.f32 %v6432_v40, %v6402_v59  ;;  %v11789_v59 = vand.u32 4294901760, %v11781_v30 }
 0xffa   : > { %v6462_v35 = vadd.f32 %v6461_v14, %v6433_v58  ;;  %v6585_v58 = vsub.f32 %v11781_v30, %v11789_v59 }
 0xffc   : > { %v6492_v52 = vadd.f32 %v6491_v38, %v6462_v35  ;;  %v10342_v35 = vld [vmem:[%s12412_s7 + $0x28] sm:$0xff] }
 0xfff   : > { %v6515_v7 = vpop.f32.mrf.mxu2  ;;  %v6545_v33 = vpop.f32.mrf.mxu3 }
0x1000   : > { %v6516_v16 = vadd.f32 %v6515_v7, %v6486_v47 }
0x1002   : > { %v6542_v41 = vadd.f32 %v6541_v8, %v6516_v16  ;;  %v11796_v16 = vand.u32 4294901760, %v6585_v58 }
0x1004   : > { %v6548_v23 = vmul.f32 %v10479_v46, %v6542_v41  ;;  %v6769_v41 = vand.u32 4294901760, %v10342_v35  ;;  %v10341_v46 = vld [vmem:[%s12412_s7 + $0x20] sm:$0xff] }
0x1005   : > { %v6771_v53 = vand.u32 4294901760, %v10341_v46 }
0x1006   : > { %v6572_v10 = vand.u32 4294901760, %v6548_v23 }
0x1007   : > { %v6519_v61 = vpop.f32.mrf.mxu2 }
0x1008   : > { %v6520_v51 = vadd.f32 %v6519_v61, %v6492_v52  ;;  %v6612_v40 = vsub.f32 %v6548_v23, %v6572_v10  ;;  %v6805_v23 = vsub.f32 %v10342_v35, %v6769_v41  ;;  %v6811_v52 = vsub.f32 %v10341_v46, %v6771_v53 }
0x100a   : > { %v6546_v43 = vadd.f32 %v6545_v33, %v6520_v51  ;;  %v6613_v45 = vand.u32 4294901760, %v6612_v40  ;;  %v6806_v38 = vand.u32 4294901760, %v6805_v23  ;;  %v6812_v51 = vand.u32 4294901760, %v6811_v52 }
0x100c   : > { %v6549_v37 = vmul.f32 %v10480_v32, %v6546_v43  ;;  %v6614_v8 = vsub.f32 %v6612_v40, %v6613_v45  ;;  %v6807_v61 = vsub.f32 %v6805_v23, %v6806_v38  ;;  %v6813_v33 = vsub.f32 %v6811_v52, %v6812_v51  ;;  %v10344_v32 = vld [vmem:[%s12412_s7 + $0x38] sm:$0xff] }
0x100e   : > { %v6570_v48 = vand.u32 4294901760, %v6549_v37  ;;  %v6615_v14 = vand.u32 4294901760, %v6614_v8  ;;  %v6814_v43 = vand.u32 4294901760, %v6813_v33 }
0x1010   : > { %6571 = vmatpush.msra.mxu0 %v6570_v48  ;;  %6672 = vmatpush.msra.mxu3 %v6570_v48  ;;  %v6606_v60 = vsub.f32 %v6549_v37, %v6570_v48  ;;  %v6962_v37 = vand.u32 4294901760, %v10344_v32 }
0x1012   : > { %6573 = vmatpush.msra.mxu0 %v6572_v10  ;;  %6642 = vmatpush.msra.mxu2 %v6606_v60  ;;  %v6607_v62 = vand.u32 4294901760, %v6606_v60 }
0x1013   : > { %6674 = vmatpush.msra.mxu3 %v6572_v10  ;;  %6579 = vmatmul.f32.vlgmr.msra.gmra.mxu0 %v11786_v55 }
0x1014   : > { %6645 = vmatpush.msra.mxu2 %v6612_v40  ;;  %6705 = vmatpush.msrb.mxu0 %v6607_v62  ;;  %v6608_v47 = vsub.f32 %v6606_v60, %v6607_v62  ;;  %v10343_v40 = vld [vmem:[%s12412_s7 + $0x30] sm:$0xff] }
0x1015   : > { %6648 = vmatmul.f32.vlgmr.msra.gmra.mxu2 %v11766_v26  ;;  %6678 = vmatmul.f32.vlgmr.msra.gmra.mxu3 %v11774_v21  ;;  %v6964_v62 = vand.u32 4294901760, %v10343_v40 }
0x1016   : > { %6709 = vmatpush.msrb.mxu0 %v6613_v45  ;;  %v6609_v7 = vand.u32 4294901760, %v6608_v47  ;;  %6770 = vmatpush.msrb.mxu2 %v6769_v41  ;;  %v6998_v45 = vsub.f32 %v10344_v32, %v6962_v37 }
0x1017   : > { %v7004_v47 = vsub.f32 %v10343_v40, %v6964_v62 }
0x1018   : > { %6610 = vmatpush.msra.mxu1 %v6609_v7  ;;  %6841 = vmatpush.msra.mxu0 %v6805_v23  ;;  %v6999_v58 = vand.u32 4294901760, %v6998_v45 }
0x1019   : > { %6772 = vmatpush.msrb.mxu2 %v6771_v53 }
0x101a   : > { %6616 = vmatpush.msra.mxu1 %v6615_v14  ;;  %6844 = vmatpush.msra.mxu0 %v6811_v52  ;;  %v7000_v7 = vsub.f32 %v6998_v45, %v6999_v58  ;;  %v7005_v14 = vand.u32 4294901760, %v7004_v47 }
0x101b   : > { %6618 = vmatmul.f32.vlgmr.msra.gmra.mxu1 %v11760_v5  ;;  %6587 = vmatmul.f32.gmra.mxu0 %v11796_v16 }
0x101c   : > { %6734 = vmatpush.msrb.mxu1 %v6570_v48  ;;  %6904 = vmatpush.msra.mxu2 %v6806_v38  ;;  %v7006_v46 = vsub.f32 %v7004_v47, %v7005_v14 }
0x101d   : > { %6653 = vmatmul.f32.gmra.mxu2 %v11781_v30  ;;  %6684 = vmatmul.f32.gmra.mxu3 %v11789_v59 }
0x101e   : > { %6736 = vmatpush.msrb.mxu1 %v6572_v10  ;;  %v6808_v10 = vand.u32 4294901760, %v6807_v61  ;;  %6908 = vmatpush.msra.mxu2 %v6812_v51  ;;  %v7007_v38 = vand.u32 4294901760, %v7006_v46 }
0x1020   : > { %6871 = vmatpush.msra.mxu1 %v6769_v41  ;;  %6809 = vmatpush.msrb.mxu3 %v6808_v10 }
0x1022   : > { %6873 = vmatpush.msra.mxu1 %v6771_v53  ;;  %6815 = vmatpush.msrb.mxu3 %v6814_v43 }
0x1023   : > { %6622 = vmatmul.f32.gmra.mxu1 %v11776_v17  ;;  %6711 = vmatmul.f32.vlgmr.msrb.gmra.mxu0 %v11760_v5 }
0x1024   : > { %6933 = vmatpush.msra.mxu3 %v6769_v41  ;;  %6963 = vmatpush.msrb.mxu0 %v6962_v37  ;;  %v7001_v41 = vand.u32 4294901760, %v7000_v7 }
0x1026   : > { %6935 = vmatpush.msra.mxu3 %v6771_v53  ;;  %6965 = vmatpush.msrb.mxu0 %v6964_v62 }
0x102b   : > { %6738 = vmatmul.f32.vlgmr.msrb.gmra.mxu1 %v11760_v5  ;;  %6715 = vmatmul.f32.gmra.mxu0 %v11776_v17 }
0x102c   : > { %7002 = vmatpush.msrb.mxu1 %v7001_v41 }
0x102e   : > { %7008 = vmatpush.msrb.mxu1 %v7007_v38 }
0x1033   : > { %6742 = vmatmul.f32.gmra.mxu1 %v11776_v17 }
0x1090   : > { %v6580_v54 = vpop.f32.mrf.mxu0 }
0x1098   : > { %v6619_v48 = vpop.f32.mrf.mxu1  ;;  %v6588_v60 = vpop.f32.mrf.mxu0 }
0x1099   : > { %v6649_v8 = vpop.f32.mrf.mxu2  ;;  %v6620_v35 = vadd.f32 %v6619_v48, %v6580_v54  ;;  %v6679_v53 = vpop.f32.mrf.mxu3 }
0x109b   : > { %v6650_v52 = vadd.f32 %v6649_v8, %v6620_v35 }
0x109d   : > { %v6680_v10 = vadd.f32 %v6679_v53, %v6650_v52 }
0x10a0   : > { %v6623_v23 = vpop.f32.mrf.mxu1  ;;  %v6712_v61 = vpop.f32.mrf.mxu0 }
0x10a1   : > { %v6624_v51 = vadd.f32 %v6623_v23, %v6588_v60  ;;  %v6654_v33 = vpop.f32.mrf.mxu2  ;;  %v6713_v43 = vadd.f32 %v6712_v61, %v6680_v10  ;;  %v6685_v0 = vpop.f32.mrf.mxu3 }
0x10a3   : > { %v6655_v40 = vadd.f32 %v6654_v33, %v6624_v51 }
0x10a5   : > { %v6686_v7 = vadd.f32 %v6685_v0, %v6655_v40 }
0x10a8   : > { %v6739_v32 = vpop.f32.mrf.mxu1  ;;  %v6716_v48 = vpop.f32.mrf.mxu0 }
0x10a9   : > { %v6740_v6 = vadd.f32 %v6739_v32, %v6713_v43  ;;  %v6717_v41 = vadd.f32 %v6716_v48, %v6686_v7 }
0x10ab   : > { %v6750_v11 = vsel %vm1086_vm1, %v6740_v6, 0 }
0x10ac   : > { %v6773_v54 = vand.u32 4294901760, %v6750_v11 }
0x10ae   : > { %v6774_v13 = vsub.f32 %v6750_v11, %v6773_v54  ;;  %6817 = vmatmul.f32.vlgmr.msrb.gmra.mxu3 %v6773_v54 }
0x10af   : > { %7064 = vmatpush.msrb.mxu3 %v6962_v37 }
0x10b0   : > { %v6743_v8 = vpop.f32.mrf.mxu1  ;;  %6847 = vmatmul.f32.vlgmr.msra.gmra.mxu0 %v6774_v13  ;;  %v6775_v35 = vand.u32 4294901760, %v6774_v13 }
0x10b1   : > { %v6744_v60 = vadd.f32 %v6743_v8, %v6717_v41  ;;  %7066 = vmatpush.msrb.mxu3 %v6964_v62  ;;  %7097 = vmatpush.msra.mxu0 %v6999_v58 }
0x10b2   : > { %6877 = vmatmul.f32.vlgmr.msra.gmra.mxu1 %v6775_v35  ;;  %v6776_v46 = vsub.f32 %v6774_v13, %v6775_v35 }
0x10b3   : > { %v6753_v23 = vsel %vm1086_vm1, %v6744_v60, 0  ;;  %7101 = vmatpush.msra.mxu0 %v7005_v14  ;;  %7126 = vmatpush.msra.mxu1 %v6962_v37 }
0x10b4   : > { %v6781_v6 = vand.u32 4294901760, %v6753_v23  ;;  %v6777_v53 = vand.u32 4294901760, %v6776_v46 }
0x10b5   : > { %7128 = vmatpush.msra.mxu1 %v6964_v62 }
0x10b6   : > { %v6782_v0 = vsub.f32 %v6753_v23, %v6781_v6  ;;  %6778 = vmatmul.f32.vlgmr.msrb.gmra.mxu2 %v6777_v53  ;;  %6821 = vmatmul.f32.gmra.mxu3 %v6781_v6 }
0x10b7   : > { %7034 = vmatpush.msrb.mxu2 %v6998_v45 }
0x10b8   : > { %6852 = vmatmul.f32.gmra.mxu0 %v6782_v0  ;;  %v6783_v11 = vand.u32 4294901760, %v6782_v0 }
0x10b9   : > { %7037 = vmatpush.msrb.mxu2 %v7004_v47 }
0x10ba   : > { %6883 = vmatmul.f32.gmra.mxu1 %v6783_v11  ;;  %v6784_v38 = vsub.f32 %v6782_v0, %v6783_v11 }
0x10bc   : > { %v6785_v52 = vand.u32 4294901760, %v6784_v38 }
0x10be   : > { %6786 = vmatmul.f32.gmra.mxu2 %v6785_v52  ;;  %6937 = vmatmul.f32.vlgmr.msra.gmra.mxu3 %v6773_v54 }
0x10c0   : > { %6971 = vmatmul.f32.vlgmr.msrb.gmra.mxu0 %v6777_v53 }
0x10c2   : > { %7010 = vmatmul.f32.vlgmr.msrb.gmra.mxu1 %v6773_v54 }
0x10c6   : > { %6910 = vmatmul.f32.vlgmr.msra.gmra.mxu2 %v6773_v54  ;;  %6941 = vmatmul.f32.gmra.mxu3 %v6781_v6 }
0x10c8   : > { %6979 = vmatmul.f32.gmra.mxu0 %v6785_v52 }
0x10ca   : > { %7014 = vmatmul.f32.gmra.mxu1 %v6781_v6 }
0x10ce   : > { %6914 = vmatmul.f32.gmra.mxu2 %v6781_v6  ;;  %7070 = vmatmul.f32.vlgmr.msrb.gmra.mxu3 %v6775_v35 }
0x10d0   : > { %7103 = vmatmul.f32.vlgmr.msra.gmra.mxu0 %v6773_v54 }
0x10d2   : > { %7130 = vmatmul.f32.vlgmr.msra.gmra.mxu1 %v6773_v54 }
0x10d6   : > { %7040 = vmatmul.f32.vlgmr.msrb.gmra.mxu2 %v6774_v13  ;;  %7076 = vmatmul.f32.gmra.mxu3 %v6783_v11 }
0x10d8   : > { %7107 = vmatmul.f32.gmra.mxu0 %v6781_v6 }
0x10da   : > { %7134 = vmatmul.f32.gmra.mxu1 %v6781_v6 }
0x10de   : > { %7045 = vmatmul.f32.gmra.mxu2 %v6782_v0 }
0x112d   : > { %v6848_v45 = vpop.f32.mrf.mxu0 }
0x112f   : > { %v6878_v62 = vpop.f32.mrf.mxu1 }
0x1131   : > { %v6818_v37 = vpop.f32.mrf.mxu3 }
0x1135   : > { %v6853_v14 = vpop.f32.mrf.mxu0 }
0x1137   : > { %v6884_v61 = vpop.f32.mrf.mxu1 }
0x1139   : > { %v6779_v58 = vpop.f32.mrf.mxu2  ;;  %v6822_v47 = vpop.f32.mrf.mxu3 }
0x113a   : > { %v6819_v51 = vadd.f32 %v6818_v37, %v6779_v58 }
0x113c   : > { %v6849_v33 = vadd.f32 %v6848_v45, %v6819_v51 }
0x113d   : > { %v6972_v32 = vpop.f32.mrf.mxu0 }
0x113e   : > { %v6879_v48 = vadd.f32 %v6878_v62, %v6849_v33 }
0x113f   : > { %v7011_v54 = vpop.f32.mrf.mxu1 }
0x1140   : > { %v7012_v62 = vadd.f32 %v7011_v54, %v6972_v32 }
0x1141   : > { %v6787_v10 = vpop.f32.mrf.mxu2  ;;  %v6938_v43 = vpop.f32.mrf.mxu3 }
0x1142   : > { %v6823_v40 = vadd.f32 %v6822_v47, %v6787_v10 }
0x1144   : > { %v6854_v41 = vadd.f32 %v6853_v14, %v6823_v40 }
0x1145   : > { %v6980_v23 = vpop.f32.mrf.mxu0 }
0x1146   : > { %v6885_v46 = vadd.f32 %v6884_v61, %v6854_v41 }
0x1147   : > { %v7015_v0 = vpop.f32.mrf.mxu1 }
0x1148   : > { %v7016_v54 = vadd.f32 %v7015_v0, %v6980_v23 }
0x1149   : > { %v6911_v13 = vpop.f32.mrf.mxu2  ;;  %v6942_v35 = vpop.f32.mrf.mxu3 }
0x114a   : > { %v6912_v7 = vadd.f32 %v6911_v13, %v6879_v48 }
0x114c   : > { %v6939_v8 = vadd.f32 %v6938_v43, %v6912_v7 }
0x114d   : > { %v7104_v10 = vpop.f32.mrf.mxu0 }
0x114e   : > { %v7148_v60 = vsel %vm1258_vm2, %v6939_v8, 0 }
0x114f   : > { %v7169_v11 = vand.u32 4294901760, %v7148_v60  ;;  %v7131_v40 = vpop.f32.mrf.mxu1 }
0x1151   : > { %v6915_v6 = vpop.f32.mrf.mxu2  ;;  %v7209_v45 = vsub.f32 %v7148_v60, %v7169_v11  ;;  %v7071_v47 = vpop.f32.mrf.mxu3 }
0x1152   : > { %v6916_v53 = vadd.f32 %v6915_v6, %v6885_v46 }
0x1153   : > { %v7210_v33 = vand.u32 4294901760, %v7209_v45 }
0x1154   : > { %v6943_v38 = vadd.f32 %v6942_v35, %v6916_v53 }
0x1155   : > { %v7211_v32 = vsub.f32 %v7209_v45, %v7210_v33 }
0x1156   : > { %v7151_v52 = vsel %vm1258_vm2, %v6943_v38, 0 }
0x1157   : > { %v7167_v37 = vand.u32 4294901760, %v7151_v52  ;;  %v7212_v53 = vand.u32 4294901760, %v7211_v32 }
0x1159   : > { %v7203_v58 = vsub.f32 %v7151_v52, %v7167_v37  ;;  %v7041_v51 = vpop.f32.mrf.mxu2  ;;  %7168 = vmatpush.xpose.msra.mxu2 %v7167_v37  ;;  %7269 = vmatpush.xpose.msrb.mxu1 %v7167_v37  ;;  %v7077_v6 = vpop.f32.mrf.mxu3 }
0x115a   : > { %v7042_v14 = vadd.f32 %v7041_v51, %v7012_v62  ;;  %v7108_v52 = vpop.f32.mrf.mxu0 }
0x115b   : > { %7239 = vmatpush.xpose.msrb.mxu0 %v7203_v58  ;;  %v7204_v61 = vand.u32 4294901760, %v7203_v58 }
0x115c   : > { %v7072_v43 = vadd.f32 %v7071_v47, %v7042_v14  ;;  %v7135_v47 = vpop.f32.mrf.mxu1 }
0x115d   : > { %7170 = vmatpush.xpose.msra.mxu2 %v7169_v11  ;;  %7271 = vmatpush.xpose.msrb.mxu1 %v7169_v11  ;;  %v7205_v48 = vsub.f32 %v7203_v58, %v7204_v61 }
0x115e   : > { %v7105_v13 = vadd.f32 %v7104_v10, %v7072_v43 }
0x115f   : > { %7242 = vmatpush.xpose.msrb.mxu0 %v7209_v45  ;;  %v7206_v7 = vand.u32 4294901760, %v7205_v48 }
0x1160   : > { %v7132_v41 = vadd.f32 %v7131_v40, %v7105_v13  ;;  %v10350_v13 = vld [vmem:[%s12413_s8 + $0x38] sm:$0xff] }
0x1161   : > { %7302 = vmatpush.xpose.msrb.mxu2 %v7204_v61  ;;  %v7046_v8 = vpop.f32.mrf.mxu2  ;;  %7207 = vmatpush.xpose.msra.mxu3 %v7206_v7  ;;  %v7394_v32 = vsel %vm1086_vm1, %v10350_v13, 0 }
0x1162   : > { %v7142_v35 = vsel %vm1258_vm2, %v7132_v41, 0  ;;  %v7047_v60 = vadd.f32 %v7046_v8, %v7016_v54  ;;  %v7410_v54 = vand.u32 4294901760, %v7394_v32 }
0x1163   : > { %v7171_v46 = vand.u32 4294901760, %v7142_v35 }
0x1164   : > { %v7078_v38 = vadd.f32 %v7077_v6, %v7047_v60  ;;  %v7446_v8 = vsub.f32 %v7394_v32, %v7410_v54  ;;  %7411 = vmatpush.xpose.msra.mxu0 %v7410_v54 }
0x1165   : > { %7306 = vmatpush.xpose.msrb.mxu2 %v7210_v33  ;;  %v7172_v62 = vsub.f32 %v7142_v35, %v7171_v46  ;;  %7213 = vmatpush.xpose.msra.mxu3 %v7212_v53  ;;  %v10349_v35 = vld [vmem:[%s12413_s8 + $0x30] sm:$0xff]  ;;  %v10346_v53 = vld [vmem:[%s12413_s8 + $0x28] sm:$0xff] }
0x1166   : > { %v7109_v58 = vadd.f32 %v7108_v52, %v7078_v38  ;;  %v7447_v52 = vand.u32 4294901760, %v7446_v8 }
0x1167   : > { %7245 = vmatmul.f32.vlgmr.msrb.gmra.mxu0 %v7172_v62  ;;  %v7173_v45 = vand.u32 4294901760, %v7172_v62 }
0x1168   : > { %7215 = vmatmul.f32.vlgmr.msra.gmra.mxu3 %v7171_v46  ;;  %v7136_v23 = vadd.f32 %v7135_v47, %v7109_v58  ;;  %v7448_v58 = vsub.f32 %v7446_v8, %v7447_v52 }
0x1169   : > { %7331 = vmatpush.xpose.msrb.mxu3 %v7167_v37  ;;  %7275 = vmatmul.f32.vlgmr.msrb.gmra.mxu1 %v7173_v45  ;;  %v7174_v0 = vsub.f32 %v7172_v62, %v7173_v45  ;;  %v11840_v45 = vand.u32 4294901760, %v11763_v36 }
0x116a   : > { %v7145_v51 = vsel %vm1258_vm2, %v7136_v23, 0 }
0x116b   : > { %v7175_v14 = vand.u32 4294901760, %v7174_v0  ;;  %v7179_v10 = vand.u32 4294901760, %v7145_v51 }
0x116d   : > { %7333 = vmatpush.xpose.msrb.mxu3 %v7169_v11  ;;  %7176 = vmatmul.f32.vlgmr.msra.gmra.mxu2 %v7175_v14  ;;  %v7180_v61 = vsub.f32 %v7145_v51, %v7179_v10  ;;  %v10345_v11 = vld [vmem:[%s12413_s8 + $0x20] sm:$0xff]  ;;  %v7449_v14 = vand.u32 4294901760, %v7448_v58 }
0x116e   : > { %7482 = vmatpush.xpose.msra.mxu2 %v7446_v8 }
0x116f   : > { %7250 = vmatmul.f32.gmra.mxu0 %v7180_v61  ;;  %v7181_v33 = vand.u32 4294901760, %v7180_v61  ;;  %7450 = vmatpush.xpose.msra.mxu1 %v7449_v14 }
0x1170   : > { %7219 = vmatmul.f32.gmra.mxu3 %v7179_v10 }
0x1171   : > { %7281 = vmatmul.f32.gmra.mxu1 %v7181_v33  ;;  %v7182_v43 = vsub.f32 %v7180_v61, %v7181_v33  ;;  %7512 = vmatpush.xpose.msra.mxu3 %v7410_v54  ;;  %v11843_v61 = vand.u32 4294901760, %v11756_v49 }
0x1173   : > { %v7183_v37 = vand.u32 4294901760, %v7182_v43 }
0x1175   : > { %7184 = vmatmul.f32.gmra.mxu2 %v7183_v37 }
0x1178   : > { %7335 = vmatmul.f32.vlgmr.msrb.gmra.mxu3 %v7171_v46 }
0x117d   : > { %7308 = vmatmul.f32.vlgmr.msrb.gmra.mxu2 %v7171_v46  ;;  %v7391_v46 = vsel %vm1086_vm1, %v10349_v35, 0 }
0x117e   : > { %v7412_v62 = vand.u32 4294901760, %v7391_v46 }
0x1180   : > { %7339 = vmatmul.f32.gmra.mxu3 %v7179_v10  ;;  %v7452_v47 = vsub.f32 %v7391_v46, %v7412_v62  ;;  %7413 = vmatpush.xpose.msra.mxu0 %v7412_v62 }
0x1181   : > { %7514 = vmatpush.xpose.msra.mxu3 %v7412_v62 }
0x1182   : > { %7485 = vmatpush.xpose.msra.mxu2 %v7452_v47 }
0x1184   : > { %7545 = vmatpush.xpose.msrb.mxu0 %v7447_v52 }
0x1185   : > { %7312 = vmatmul.f32.gmra.mxu2 %v7179_v10  ;;  %v7453_v10 = vand.u32 4294901760, %v7452_v47 }
0x1186   : > { %7640 = vmatpush.msrb.mxu2 %v11840_v45 }
0x1187   : > { %v7454_v33 = vsub.f32 %v7452_v47, %v7453_v10 }
0x1188   : > { %7549 = vmatpush.xpose.msrb.mxu0 %v7453_v10  ;;  %7642 = vmatpush.msrb.mxu2 %v11843_v61 }
0x11e4   : > { %v7246_v6 = vpop.f32.mrf.mxu0 }
0x11e6   : > { %v7276_v51 = vpop.f32.mrf.mxu1 }
0x11eb   : > { %v7216_v40 = vpop.f32.mrf.mxu3 }
0x11f0   : > { %v7177_v48 = vpop.f32.mrf.mxu2 }
0x11f1   : > { %v7178_v7 = vadd.f32 %v10345_v11, %v7177_v48  ;;  %v7455_v48 = vand.u32 4294901760, %v7454_v33 }
0x11f3   : > { %v7220_v41 = vpop.f32.mrf.mxu3  ;;  %v7217_v60 = vadd.f32 %v7216_v40, %v7178_v7  ;;  %v7251_v7 = vpop.f32.mrf.mxu0  ;;  %7456 = vmatpush.xpose.msra.mxu1 %v7455_v48 }
0x11f5   : > { %v7247_v0 = vadd.f32 %v7246_v6, %v7217_v60  ;;  %v7282_v60 = vpop.f32.mrf.mxu1 }
0x11f7   : > { %v7277_v37 = vadd.f32 %v7276_v51, %v7247_v0  ;;  %7574 = vmatpush.xpose.msrb.mxu1 %v7410_v54 }
0x11f8   : > { %v7185_v38 = vpop.f32.mrf.mxu2 }
0x11f9   : > { %v7186_v23 = vadd.f32 %v10346_v53, %v7185_v38 }
0x11fb   : > { %v7221_v43 = vadd.f32 %v7220_v41, %v7186_v23  ;;  %v7336_v40 = vpop.f32.mrf.mxu3  ;;  %7576 = vmatpush.xpose.msrb.mxu1 %v7412_v62 }
0x11fd   : > { %v7252_v8 = vadd.f32 %v7251_v7, %v7221_v43 }
0x11ff   : > { %v7283_v46 = vadd.f32 %v7282_v60, %v7252_v8 }
0x1200   : > { %v7309_v11 = vpop.f32.mrf.mxu2 }
0x1201   : > { %v7310_v13 = vadd.f32 %v7309_v11, %v7277_v37 }
0x1203   : > { %v7337_v32 = vadd.f32 %v7336_v40, %v7310_v13  ;;  %v7340_v53 = vpop.f32.mrf.mxu3 }
0x1205   : > { %v10347_v35 = vmul.f32 -1.442695, %v7337_v32 }
0x1207   : > { %10459 = vpow2.f32 %v10347_v35 }
0x1208   : > { %v7313_v6 = vpop.f32.mrf.mxu2 }
0x1209   : > { %v7314_v41 = vadd.f32 %v7313_v6, %v7283_v46 }
0x120b   : > { %v7341_v38 = vadd.f32 %v7340_v53, %v7314_v41 }
0x120d   : > { %v10460_v52 = vpop.eup %10459  ;;  %v10348_v58 = vmul.f32 -1.442695, %v7341_v38 }
0x120e   : > { %v7349_v47 = vadd.f32 1.0, %v10460_v52 }
0x120f   : > { %10461 = vpow2.f32 %v10348_v58 }
0x1210   : > { %10463 = vrcp.f32 %v7349_v47  ;;  %v7362_v10 = vand.u32 2147483648, %v7349_v47  ;;  %v7360_v43 = vand.u32 2147483647, %v7349_v47  ;;  %vm7356_vm4 = vweird.f32 %v7349_v47 }
0x1212   : > { %v7363_v40 = vor.u32 1.1754944e-38, %v7362_v10  ;;  %vm7361_vm6 = vcmp.eq.f32.partialorder %v7360_v43, 8.507059e+37 }
0x1215   : > { %v10462_v23 = vpop.eup %10461 }
0x1216   : > { %v10464_v0 = vpop.eup %10463  ;;  %v7350_v51 = vadd.f32 1.0, %v10462_v23 }
0x1217   : > { %v7352_v14 = vmul.f32 %v10464_v0, %v7349_v47  ;;  %vm7357_vm14 = vweird.f32 %v10464_v0 }
0x1218   : > { %10465 = vrcp.f32 %v7350_v51  ;;  %vm7358_vm5 = vmor %vm7356_vm4, %vm7357_vm14  ;;  %v7377_v35 = vand.u32 2147483648, %v7350_v51  ;;  %v7375_v46 = vand.u32 2147483647, %v7350_v51  ;;  %vm7371_vm8 = vweird.f32 %v7350_v51 }
0x1219   : > { %v7353_v54 = vsub.f32 1.0, %v7352_v14 }
0x121a   : > { %v7378_v38 = vor.u32 1.1754944e-38, %v7377_v35  ;;  %vm7376_vm10 = vcmp.eq.f32.partialorder %v7375_v46, 8.507059e+37 }
0x121b   : > { %v7354_v33 = vmul.f32 %v10464_v0, %v7353_v54 }
0x121d   : > { %v7355_v62 = vadd.f32 %v10464_v0, %v7354_v33 }
0x121e   : > { %v10466_v37 = vpop.eup %10465 }
0x121f   : > { %v7367_v11 = vmul.f32 %v10466_v37, %v7350_v51  ;;  %v7359_v48 = vsel %vm7358_vm5, %v10464_v0, %v7355_v62  ;;  %vm7372_vm7 = vweird.f32 %v10466_v37  ;;  %v11853_v51 = vsub.f32 %v11763_v36, %v11840_v45 }
0x1220   : > { %v7364_v13 = vsel %vm7361_vm6, %v7363_v40, %v7359_v48  ;;  %vm7373_vm9 = vmor %vm7371_vm8, %vm7372_vm7 }
0x1221   : > { %v7368_v7 = vsub.f32 1.0, %v7367_v11  ;;  %v7385_v32 = vsel %vm1086_vm1, %v7364_v13, 0 }
0x1222   : > { %v7414_v8 = vand.u32 4294901760, %v7385_v32 }
0x1223   : > { %v7369_v60 = vmul.f32 %v10466_v37, %v7368_v7 }
0x1224   : > { %7458 = vmatmul.f32.vlgmr.msra.gmra.mxu1 %v7414_v8  ;;  %v7415_v6 = vsub.f32 %v7385_v32, %v7414_v8 }
0x1225   : > { %v7370_v41 = vadd.f32 %v10466_v37, %v7369_v60  ;;  %7741 = vmatpush.msra.mxu1 %v11840_v45 }
0x1226   : > { %7488 = vmatmul.f32.vlgmr.msra.gmra.mxu2 %v7415_v6  ;;  %v7416_v53 = vand.u32 4294901760, %v7415_v6 }
0x1227   : > { %v7374_v52 = vsel %vm7373_vm9, %v10466_v37, %v7370_v41  ;;  %7743 = vmatpush.msra.mxu1 %v11843_v61 }
0x1228   : > { %7518 = vmatmul.f32.vlgmr.msra.gmra.mxu3 %v7416_v53  ;;  %v7417_v58 = vsub.f32 %v7415_v6, %v7416_v53  ;;  %v7379_v47 = vsel %vm7376_vm10, %v7378_v38, %v7374_v52 }
0x1229   : > { %v7388_v23 = vsel %vm1086_vm1, %v7379_v47, 0 }
0x122a   : > { %v7418_v0 = vand.u32 4294901760, %v7417_v58  ;;  %v7422_v14 = vand.u32 4294901760, %v7388_v23 }
0x122c   : > { %7419 = vmatmul.f32.vlgmr.msra.gmra.mxu0 %v7418_v0  ;;  %7462 = vmatmul.f32.gmra.mxu1 %v7422_v14  ;;  %v7423_v54 = vsub.f32 %v7388_v23, %v7422_v14 }
0x122d   : > { %7711 = vmatpush.msra.mxu0 %v11853_v51 }
0x122e   : > { %7493 = vmatmul.f32.gmra.mxu2 %v7423_v54  ;;  %v7424_v10 = vand.u32 4294901760, %v7423_v54 }
0x1230   : > { %7524 = vmatmul.f32.gmra.mxu3 %v7424_v10  ;;  %v7425_v33 = vsub.f32 %v7423_v54, %v7424_v10 }
0x1232   : > { %v7426_v43 = vand.u32 4294901760, %v7425_v33 }
0x1234   : > { %7427 = vmatmul.f32.gmra.mxu0 %v7426_v43  ;;  %7578 = vmatmul.f32.vlgmr.msrb.gmra.mxu1 %v7414_v8 }
0x123c   : > { %7551 = vmatmul.f32.vlgmr.msrb.gmra.mxu0 %v7414_v8  ;;  %7582 = vmatmul.f32.gmra.mxu1 %v7422_v14 }
0x1244   : > { %7555 = vmatmul.f32.gmra.mxu0 %v7422_v14 }
0x12a1   : > { %v7459_v62 = vpop.f32.mrf.mxu1 }
0x12a9   : > { %v7420_v37 = vpop.f32.mrf.mxu0  ;;  %v7463_v40 = vpop.f32.mrf.mxu1 }
0x12aa   : > { %v7460_v36 = vadd.f32 %v7459_v62, %v7420_v37  ;;  %v7489_v11 = vpop.f32.mrf.mxu2 }
0x12ab   : > { %v7519_v7 = vpop.f32.mrf.mxu3 }
0x12ac   : > { %v7490_v13 = vadd.f32 %v7489_v11, %v7460_v36 }
0x12ae   : > { %v7520_v32 = vadd.f32 %v7519_v7, %v7490_v13  ;;  %v11861_v7 = vand.u32 4294901760, %v11853_v51 }
0x12b0   : > { %7774 = vmatpush.msra.mxu2 %v11861_v7 }
0x12b1   : > { %v7428_v48 = vpop.f32.mrf.mxu0  ;;  %v7579_v60 = vpop.f32.mrf.mxu1 }
0x12b2   : > { %v7464_v35 = vadd.f32 %v7463_v40, %v7428_v48  ;;  %v7494_v41 = vpop.f32.mrf.mxu2 }
0x12b3   : > { %v7525_v52 = vpop.f32.mrf.mxu3 }
0x12b4   : > { %v7495_v53 = vadd.f32 %v7494_v41, %v7464_v35  ;;  %v7677_v35 = vsub.f32 %v11853_v51, %v11861_v7 }
0x12b6   : > { %v7526_v58 = vadd.f32 %v7525_v52, %v7495_v53 }
0x12b9   : > { %v7552_v46 = vpop.f32.mrf.mxu0  ;;  %v7583_v0 = vpop.f32.mrf.mxu1 }
0x12ba   : > { %v7553_v6 = vadd.f32 %v7552_v46, %v7520_v32  ;;  %v11865_v32 = vsub.f32 %v11756_v49, %v11843_v61  ;;  %v11875_v46 = vand.u32 4294901760, %v7677_v35 }
0x12bc   : > { %v7580_v38 = vadd.f32 %v7579_v60, %v7553_v6  ;;  %v11870_v60 = vand.u32 4294901760, %v11865_v32  ;;  %7714 = vmatpush.msra.mxu0 %v11865_v32  ;;  %7679 = vmatpush.msrb.mxu3 %v11875_v46 }
0x12bd   : > { %7880 = vmatpush.msrb.mxu1 %v11875_v46 }
0x12be   : > { %v7586_v8 = vsel %vm1086_vm1, %v7580_v38, -inf  ;;  %7841 = vmatpush.msrb.mxu0 %v11840_v45  ;;  %v7683_v6 = vsub.f32 %v11865_v32, %v11870_v60  ;;  %7778 = vmatpush.msra.mxu2 %v11870_v60 }
0x12bf   : > { %7587 = vmax.xlane.f32.xlu2 %v7586_v8 }
0x12c0   : > { %7843 = vmatpush.msrb.mxu0 %v11843_v61  ;;  %v11882_v49 = vand.u32 4294901760, %v7683_v6  ;;  %v10352_v6 = vld [vmem:[%s12414_s9 + $0x38] sm:$0xff] }
0x12c1   : > { %v7556_v47 = vpop.f32.mrf.mxu0 }
0x12c2   : > { %v7557_v23 = vadd.f32 %v7556_v47, %v7526_v58  ;;  %7685 = vmatpush.msrb.mxu3 %v11882_v49  ;;  %7886 = vmatpush.msrb.mxu1 %v11882_v49  ;;  %v10351_v47 = vld [vmem:[%s12414_s9 + $0x30] sm:$0xff] }
0x12c4   : > { %v7584_v14 = vadd.f32 %v7583_v0, %v7557_v23  ;;  %7803 = vmatpush.msra.mxu3 %v11840_v45  ;;  %v10353_v23 = vld [vmem:[%s12414_s9 + $0x40] sm:$0xff] }
0x12c6   : > { %v7589_v54 = vsel %vm1086_vm1, %v7584_v14, -inf  ;;  %7805 = vmatpush.msra.mxu3 %v11843_v61 }
0x12c7   : > { %7590 = vmax.xlane.f32.xlu0 %v7589_v54 }
0x1332   : > { %v7588_v10 = vpop.xlane.xlu2 %7587 }
0x1333   : > { %v7592_v33 = vsub.f32 %v7580_v38, %v7588_v10 }
0x1335   : > { %v7594_v43 = vmul.f32 1.442695, %v7592_v33 }
0x1337   : > { %10467 = vpow2.f32 %v7594_v43 }
0x133a   : > { %v7591_v62 = vpop.xlane.xlu0 %7590 }
0x133b   : > { %v7593_v37 = vsub.f32 %v7584_v14, %v7591_v62 }
0x133d   : > { %v10468_v40 = vpop.eup %10467  ;;  %v7596_v36 = vmul.f32 1.442695, %v7593_v37 }
0x133e   : > { %v7598_v11 = vsel %vm1086_vm1, %v10468_v40, 0.0 }
0x133f   : > { %10469 = vpow2.f32 %v7596_v36  ;;  %7599 = vadd.xlane.f32.xlu1 %v7598_v11 }
0x1345   : > { %v10470_v48 = vpop.eup %10469 }
0x1346   : > { %v7601_v13 = vsel %vm1086_vm1, %v10470_v48, 0.0 }
0x1347   : > { %7602 = vadd.xlane.f32.xlu2 %v7601_v13 }
0x13b2   : > { %v7600_v41 = vpop.xlane.xlu1 %7599 }
0x13b3   : > { %10471 = vrcp.f32 %v7600_v41 }
0x13b9   : > { %v10472_v53 = vpop.eup %10471 }
0x13ba   : > { %v7606_v38 = vmul.f32 %v10472_v53, %v7600_v41  ;;  %v7603_v8 = vpop.xlane.xlu2 %7602 }
0x13bb   : > { %10473 = vrcp.f32 %v7603_v8 }
0x13bc   : > { %v7608_v52 = vsub.f32 2.0, %v7606_v38 }
0x13be   : > { %v7610_v58 = vmul.f32 %v10472_v53, %v7608_v52 }
0x13c0   : > { %v11895_v0 = vmul.f32 %v10468_v40, %v7610_v58  ;;  %v10354_v40 = vld [vmem:[%s12414_s9 + $0x48] sm:$0xff] }
0x13c1   : > { %v10474_v14 = vpop.eup %10473 }
0x13c2   : > { %v7617_v54 = vmul.f32 %v10351_v47, %v11895_v0  ;;  %v7818_v10 = vmul.f32 %v10353_v23, %v11895_v0  ;;  %v7607_v33 = vmul.f32 %v10474_v14, %v7603_v8 }
0x13c4   : > { %v7620_v43 = vsel %vm1086_vm1, %v7617_v54, 0  ;;  %v7821_v62 = vsel %vm1086_vm1, %v7818_v10, 0  ;;  %v7609_v37 = vsub.f32 2.0, %v7607_v33 }
0x13c5   : > { %v7643_v36 = vand.u32 4294901760, %v7620_v43  ;;  %v11901_v13 = vand.u32 4294901760, %v7821_v62 }
0x13c6   : > { %v7611_v11 = vmul.f32 %v10474_v14, %v7609_v37 }
0x13c7   : > { %7687 = vmatmul.f32.vlgmr.msrb.gmra.mxu3 %v7643_v36  ;;  %v7644_v35 = vsub.f32 %v7620_v43, %v7643_v36  ;;  %v7845_v52 = vsub.f32 %v7821_v62, %v11901_v13 }
0x13c8   : > { %v11909_v41 = vmul.f32 %v10470_v48, %v7611_v11  ;;  %7942 = vmatpush.msrb.mxu3 %v11840_v45 }
0x13c9   : > { %7717 = vmatmul.f32.vlgmr.msra.gmra.mxu0 %v7644_v35  ;;  %v7645_v53 = vand.u32 4294901760, %v7644_v35  ;;  %v7846_v10 = vand.u32 4294901760, %v7845_v52 }
0x13ca   : > { %v7819_v38 = vmul.f32 %v10354_v40, %v11909_v41  ;;  %v7618_v8 = vmul.f32 %v10352_v6, %v11909_v41  ;;  %7944 = vmatpush.msrb.mxu3 %v11843_v61  ;;  %7975 = vmatpush.msra.mxu0 %v11861_v7 }
0x13cb   : > { %7747 = vmatmul.f32.vlgmr.msra.gmra.mxu1 %v7645_v53  ;;  %v7646_v58 = vsub.f32 %v7644_v35, %v7645_v53  ;;  %v7847_v37 = vsub.f32 %v7845_v52, %v7846_v10 }
0x13cc   : > { %v7623_v47 = vsel %vm1086_vm1, %v7618_v8, 0  ;;  %v7824_v48 = vsel %vm1086_vm1, %v7819_v38, 0  ;;  %7979 = vmatpush.msra.mxu0 %v11870_v60  ;;  %8004 = vmatpush.msra.mxu1 %v11840_v45 }
0x13cd   : > { %v7647_v23 = vand.u32 4294901760, %v7646_v58  ;;  %v7651_v14 = vand.u32 4294901760, %v7623_v47  ;;  %v7852_v33 = vand.u32 4294901760, %v7824_v48  ;;  %v7848_v35 = vand.u32 4294901760, %v7847_v37 }
0x13ce   : > { %8006 = vmatpush.msra.mxu1 %v11843_v61 }
0x13cf   : > { %7648 = vmatmul.f32.vlgmr.msrb.gmra.mxu2 %v7647_v23  ;;  %7691 = vmatmul.f32.gmra.mxu3 %v7651_v14  ;;  %v7652_v54 = vsub.f32 %v7623_v47, %v7651_v14  ;;  %v7853_v11 = vsub.f32 %v7824_v48, %v7852_v33 }
0x13d0   : > { %7912 = vmatpush.msrb.mxu2 %v11853_v51 }
0x13d1   : > { %7722 = vmatmul.f32.gmra.mxu0 %v7652_v54  ;;  %v7653_v43 = vand.u32 4294901760, %v7652_v54  ;;  %v7854_v6 = vand.u32 4294901760, %v7853_v11 }
0x13d2   : > { %7915 = vmatpush.msrb.mxu2 %v11865_v32 }
0x13d3   : > { %7753 = vmatmul.f32.gmra.mxu1 %v7653_v43  ;;  %v7654_v62 = vsub.f32 %v7652_v54, %v7653_v43  ;;  %v7855_v53 = vsub.f32 %v7853_v11, %v7854_v6 }
0x13d5   : > { %v7655_v40 = vand.u32 4294901760, %v7654_v62  ;;  %v7856_v38 = vand.u32 4294901760, %v7855_v53 }
0x13d7   : > { %7656 = vmatmul.f32.gmra.mxu2 %v7655_v40  ;;  %7807 = vmatmul.f32.vlgmr.msra.gmra.mxu3 %v7643_v36 }
0x13d8   : > { %8081 = vmatpush.msra.mxu3 %v11875_v46 }
0x13d9   : > { %7849 = vmatmul.f32.vlgmr.msrb.gmra.mxu0 %v7848_v35 }
0x13da   : > { %8087 = vmatpush.msra.mxu3 %v11882_v49  ;;  %8113 = vmatpush.msrb.mxu0 %v11853_v51  ;;  %v10355_v51 = vld [vmem:[%s12414_s9 + $0x50] sm:$0xff]  ;;  %v10356_v49 = vld [vmem:[%s12414_s9 + $0x58] sm:$0xff] }
0x13db   : > { %7888 = vmatmul.f32.vlgmr.msrb.gmra.mxu1 %v11901_v13  ;;  %v8019_v46 = vmul.f32 %v10355_v51, %v11895_v0  ;;  %v8020_v8 = vmul.f32 %v10356_v49, %v11909_v41 }
0x13dc   : > { %8116 = vmatpush.msrb.mxu0 %v11865_v32  ;;  %8143 = vmatpush.msrb.mxu1 %v11840_v45 }
0x13dd   : > { %v8022_v32 = vsel %vm1086_vm1, %v8019_v46, 0  ;;  %v8025_v0 = vsel %vm1086_vm1, %v8020_v8, 0 }
0x13de   : > { %8145 = vmatpush.msrb.mxu1 %v11843_v61 }
0x13df   : > { %7780 = vmatmul.f32.vlgmr.msra.gmra.mxu2 %v7643_v36  ;;  %7811 = vmatmul.f32.gmra.mxu3 %v7651_v14  ;;  %v8045_v36 = vand.u32 4294901760, %v8022_v32 }
0x13e0   : > { %8042 = vmatpush.msra.mxu2 %v11840_v45 }
0x13e1   : > { %7857 = vmatmul.f32.gmra.mxu0 %v7856_v38 }
0x13e2   : > { %8044 = vmatpush.msra.mxu2 %v11843_v61 }
0x13e3   : > { %7892 = vmatmul.f32.gmra.mxu1 %v7852_v33 }
0x13e7   : > { %7784 = vmatmul.f32.gmra.mxu2 %v7651_v14  ;;  %7948 = vmatmul.f32.vlgmr.msrb.gmra.mxu3 %v7846_v10 }
0x13e8   : > { %8205 = vmatpush.msrb.mxu3 %v11840_v45  ;;  %v8046_v45 = vsub.f32 %v8022_v32, %v8045_v36 }
0x13e9   : > { %7981 = vmatmul.f32.vlgmr.msra.gmra.mxu0 %v11901_v13 }
0x13ea   : > { %8207 = vmatpush.msrb.mxu3 %v11843_v61  ;;  %v8047_v61 = vand.u32 4294901760, %v8046_v45 }
0x13eb   : > { %8008 = vmatmul.f32.vlgmr.msra.gmra.mxu1 %v11901_v13  ;;  %v8053_v13 = vand.u32 4294901760, %v8025_v0 }
0x13ec   : > { %v8048_v58 = vsub.f32 %v8046_v45, %v8047_v61 }
0x13ed   : > { %v8054_v47 = vsub.f32 %v8025_v0, %v8053_v13 }
0x13ee   : > { %v8049_v41 = vand.u32 4294901760, %v8048_v58 }
0x13ef   : > { %7918 = vmatmul.f32.vlgmr.msrb.gmra.mxu2 %v7845_v52  ;;  %7954 = vmatmul.f32.gmra.mxu3 %v7854_v6  ;;  %v8055_v52 = vand.u32 4294901760, %v8054_v47 }
0x13f0   : > { %8176 = vmatpush.msrb.mxu2 %v11861_v7 }
0x13f1   : > { %7985 = vmatmul.f32.gmra.mxu0 %v7852_v33  ;;  %v8056_v7 = vsub.f32 %v8054_v47, %v8055_v52 }
0x13f2   : > { %8180 = vmatpush.msrb.mxu2 %v11870_v60 }
0x13f3   : > { %8012 = vmatmul.f32.gmra.mxu1 %v7852_v33  ;;  %v8057_v48 = vand.u32 4294901760, %v8056_v7 }
0x13f7   : > { %7923 = vmatmul.f32.gmra.mxu2 %v7853_v11  ;;  %8089 = vmatmul.f32.vlgmr.msra.gmra.mxu3 %v8045_v36 }
0x13f9   : > { %8119 = vmatmul.f32.vlgmr.msrb.gmra.mxu0 %v8046_v45 }
0x13fb   : > { %8149 = vmatmul.f32.vlgmr.msrb.gmra.mxu1 %v8047_v61 }
0x13ff   : > { %8050 = vmatmul.f32.vlgmr.msra.gmra.mxu2 %v8049_v41  ;;  %8093 = vmatmul.f32.gmra.mxu3 %v8053_v13 }
0x1401   : > { %8124 = vmatmul.f32.gmra.mxu0 %v8054_v47 }
0x1403   : > { %8155 = vmatmul.f32.gmra.mxu1 %v8055_v52 }
0x1407   : > { %8058 = vmatmul.f32.gmra.mxu2 %v8057_v48  ;;  %8209 = vmatmul.f32.vlgmr.msrb.gmra.mxu3 %v8045_v36 }
0x140f   : > { %8182 = vmatmul.f32.vlgmr.msrb.gmra.mxu2 %v8045_v36  ;;  %8213 = vmatmul.f32.gmra.mxu3 %v8053_v13 }
0x1417   : > { %8186 = vmatmul.f32.gmra.mxu2 %v8053_v13 }
0x1446   : > { %v11951_v23 = vpop.f32.mrf.mxu0 }
0x1448   : > { %v11953_v14 = vpop.f32.mrf.mxu1 }
0x144a   : > { %v11949_v60 = vpop.f32.mrf.mxu3 }
0x144e   : > { %v11959_v33 = vpop.f32.mrf.mxu0 }
0x1450   : > { %v11961_v43 = vpop.f32.mrf.mxu1 }
0x1452   : > { %v11955_v54 = vpop.f32.mrf.mxu2  ;;  %v11957_v10 = vpop.f32.mrf.mxu3 }
0x1456   : > { %v7850_v11 = vpop.f32.mrf.mxu0 }
0x1458   : > { %v7889_v40 = vpop.f32.mrf.mxu1 }
0x1459   : > { %v7890_v32 = vadd.f32 %v7889_v40, %v7850_v11 }
0x145a   : > { %v11963_v62 = vpop.f32.mrf.mxu2  ;;  %v11965_v37 = vpop.f32.mrf.mxu3 }
0x145e   : > { %v7858_v53 = vpop.f32.mrf.mxu0 }
0x1460   : > { %v7893_v46 = vpop.f32.mrf.mxu1 }
0x1461   : > { %v7894_v58 = vadd.f32 %v7893_v46, %v7858_v53 }
0x1462   : > { %v11967_v35 = vpop.f32.mrf.mxu2  ;;  %v11969_v6 = vpop.f32.mrf.mxu3 }
0x1466   : > { %v7982_v8 = vpop.f32.mrf.mxu0 }
0x1468   : > { %v8009_v61 = vpop.f32.mrf.mxu1 }
0x146a   : > { %v11971_v38 = vpop.f32.mrf.mxu2  ;;  %v7949_v51 = vpop.f32.mrf.mxu3 }
0x146e   : > { %v7986_v48 = vpop.f32.mrf.mxu0 }
0x1470   : > { %v8013_v56 = vpop.f32.mrf.mxu1 }
0x1472   : > { %v7919_v49 = vpop.f32.mrf.mxu2  ;;  %v7955_v45 = vpop.f32.mrf.mxu3 }
0x1473   : > { %v7920_v36 = vadd.f32 %v7919_v49, %v7890_v32 }
0x1475   : > { %v7950_v0 = vadd.f32 %v7949_v51, %v7920_v36 }
0x1476   : > { %v8120_v51 = vpop.f32.mrf.mxu0 }
0x1477   : > { %v7983_v13 = vadd.f32 %v7982_v8, %v7950_v0 }
0x1478   : > { %v8150_v53 = vpop.f32.mrf.mxu1 }
0x1479   : > { %v8010_v47 = vadd.f32 %v8009_v61, %v7983_v13 }
0x147a   : > { %v7924_v41 = vpop.f32.mrf.mxu2  ;;  %v8090_v57 = vpop.f32.mrf.mxu3 }
0x147b   : > { %v7925_v52 = vadd.f32 %v7924_v41, %v7894_v58  ;;  %8219 = vrot.lane.b32.xlu2 %v8010_v47, %s10505_s18 }
0x147d   : > { %v7956_v7 = vadd.f32 %v7955_v45, %v7925_v52 }
0x147e   : > { %v8125_v45 = vpop.f32.mrf.mxu0 }
0x147f   : > { %v7987_v44 = vadd.f32 %v7986_v48, %v7956_v7  ;;  %v10362_v7 = vld [vmem:[%s12415_s10 + $0x58] sm:$0xff] }
0x1480   : > { %v8260_v48 = vand.u32 4294901760, %v10362_v7 }
0x1481   : > { %v8014_v28 = vadd.f32 %v8013_v56, %v7987_v44  ;;  %v8156_v56 = vpop.f32.mrf.mxu1 }
0x1482   : > { %v8051_v11 = vpop.f32.mrf.mxu2  ;;  %v8094_v40 = vpop.f32.mrf.mxu3  ;;  %8394 = vmatpush.msra.mxu3 %v8260_v48  ;;  %8261 = vmatpush.msra.mxu0 %v8260_v48 }
0x1483   : > { %8221 = vrot.lane.b32.xlu1 %v8014_v28, %s10505_s18  ;;  %v8091_v32 = vadd.f32 %v8090_v57, %v8051_v11  ;;  %v10361_v11 = vld [vmem:[%s12415_s10 + $0x50] sm:$0xff]  ;;  %s12541_s18 = sld [smem:[#allocation40_spill]] }
0x1485   : > { %v8121_v36 = vadd.f32 %v8120_v51, %v8091_v32  ;;  %v8262_v32 = vand.u32 4294901760, %v10361_v11  ;;  %v10360_v51 = vld [vmem:[%s12415_s10 + $0x48] sm:$0xff] }
0x1487   : > { %v8151_v8 = vadd.f32 %v8150_v53, %v8121_v36  ;;  %v8306_v36 = vsub.f32 %v10361_v11, %v8262_v32  ;;  %v8264_v53 = vand.u32 4294901760, %v10360_v51  ;;  %8396 = vmatpush.msra.mxu3 %v8262_v32  ;;  %8263 = vmatpush.msra.mxu0 %v8262_v32 }
0x1489   : > { %8398 = vmatpush.msra.mxu3 %v8264_v53  ;;  %8265 = vmatpush.msra.mxu0 %v8264_v53 }
0x148a   : > { %v8059_v49 = vpop.f32.mrf.mxu2  ;;  %v8210_v0 = vpop.f32.mrf.mxu3 }
0x148b   : > { %v8095_v46 = vadd.f32 %v8094_v40, %v8059_v49  ;;  %v8300_v40 = vsub.f32 %v10362_v7, %v8260_v48 }
0x148d   : > { %v8126_v58 = vadd.f32 %v8125_v45, %v8095_v46  ;;  %v8301_v49 = vand.u32 4294901760, %v8300_v40  ;;  %8356 = vmatpush.msra.mxu2 %v8300_v40  ;;  %v10359_v46 = vld [vmem:[%s12415_s10 + $0x40] sm:$0xff] }
0x148f   : > { %v8157_v44 = vadd.f32 %v8156_v56, %v8126_v58  ;;  %8359 = vmatpush.msra.mxu2 %v8306_v36  ;;  %v10358_v58 = vld [vmem:[%s12415_s10 + $0x38] sm:$0xff] }
0x1492   : > { %v8183_v61 = vpop.f32.mrf.mxu2  ;;  %v8214_v52 = vpop.f32.mrf.mxu3 }
0x1493   : > { %v8184_v13 = vadd.f32 %v8183_v61, %v8151_v8  ;;  %v8266_v8 = vand.u32 4294901760, %v10359_v46  ;;  %v8307_v61 = vand.u32 4294901760, %v8306_v36 }
0x1495   : > { %v8211_v47 = vadd.f32 %v8210_v0, %v8184_v13  ;;  %v8302_v0 = vsub.f32 %v8300_v40, %v8301_v49  ;;  %v8312_v13 = vsub.f32 %v10360_v51, %v8264_v53  ;;  %v8318_v45 = vsub.f32 %v10359_v46, %v8266_v8  ;;  %8400 = vmatpush.msra.mxu3 %v8266_v8 }
0x1496   : > { %v8308_v56 = vsub.f32 %v8306_v36, %v8307_v61  ;;  %8267 = vmatpush.msra.mxu0 %v8266_v8 }
0x1497   : > { %8227 = vrot.lane.b32.xlu0 %v8211_v47, %s10506_s0  ;;  %v8303_v47 = vand.u32 4294901760, %v8302_v0  ;;  %8362 = vmatpush.msra.mxu2 %v8312_v13 }
0x1499   : > { %8304 = vmatpush.msra.mxu1 %v8303_v47  ;;  %8365 = vmatpush.msra.mxu2 %v8318_v45  ;;  %v7693_v47 = vadd.f32 %v11957_v10, %v11963_v62 }
0x149a   : > { %v8187_v41 = vpop.f32.mrf.mxu2 }
0x149b   : > { %v8188_v28 = vadd.f32 %v8187_v41, %v8157_v44  ;;  %v8313_v44 = vand.u32 4294901760, %v8312_v13  ;;  %v8268_v41 = vand.u32 4294901760, %v10358_v58 }
0x149d   : > { %v8215_v57 = vadd.f32 %v8214_v52, %v8188_v28  ;;  %v8319_v28 = vand.u32 4294901760, %v8318_v45  ;;  %v10357_v52 = vld [vmem:[%s12415_s10 + $0x30] sm:$0xff]  ;;  %v8314_v7 = vsub.f32 %v8312_v13, %v8313_v44  ;;  %v8324_v11 = vsub.f32 %v10358_v58, %v8268_v41  ;;  %8402 = vmatpush.msra.mxu3 %v8268_v41  ;;  %8269 = vmatpush.msra.mxu0 %v8268_v41 }
0x149e   : > { %v8270_v40 = vand.u32 4294901760, %v10357_v52 }
0x149f   : > { %8229 = vrot.lane.b32.xlu2 %v8215_v57, %s10506_s0  ;;  %v8309_v57 = vand.u32 4294901760, %v8308_v56  ;;  %v8320_v51 = vsub.f32 %v8318_v45, %v8319_v28  ;;  %v8315_v36 = vand.u32 4294901760, %v8314_v7  ;;  %v8325_v46 = vand.u32 4294901760, %v8324_v11  ;;  %8368 = vmatpush.msra.mxu2 %v8324_v11 }
0x14a0   : > { %v8330_v0 = vsub.f32 %v10357_v52, %v8270_v40  ;;  %8404 = vmatpush.msra.mxu3 %v8270_v40  ;;  %8271 = vmatpush.msra.mxu0 %v8270_v40 }
0x14a1   : > { %8310 = vmatpush.msra.mxu1 %v8309_v57  ;;  %v8321_v50 = vand.u32 4294901760, %v8320_v51  ;;  %v8326_v34 = vsub.f32 %v8324_v11, %v8325_v46 }
0x14a2   : > { %v8331_v24 = vand.u32 4294901760, %v8330_v0  ;;  %8371 = vmatpush.msra.mxu2 %v8330_v0  ;;  %8431 = vmatpush.msrb.mxu0 %v8301_v49 }
0x14a3   : > { %8316 = vmatpush.msra.mxu1 %v8315_v36  ;;  %v8327_v13 = vand.u32 4294901760, %v8326_v34  ;;  %v7724_v34 = vadd.f32 %v11959_v33, %v7693_v47  ;;  %v10371_v36 = vld [vmem:[%s12417_s12 + $0x10] sm:$0xff] }
0x14a4   : > { %v8332_v58 = vsub.f32 %v8330_v0, %v8331_v24  ;;  %8435 = vmatpush.msrb.mxu0 %v8307_v61  ;;  %v8522_v0 = vand.u32 4294901760, %v10371_v36 }
0x14a5   : > { %8322 = vmatpush.msra.mxu1 %v8321_v50  ;;  %v7689_v50 = vadd.f32 %v11949_v60, %v11955_v54 }
0x14a6   : > { %v8333_v45 = vand.u32 4294901760, %v8332_v58  ;;  %8439 = vmatpush.msrb.mxu0 %v8313_v44  ;;  %v8562_v58 = vsub.f32 %v10371_v36, %v8522_v0 }
0x14a7   : > { %8328 = vmatpush.msra.mxu1 %v8327_v13  ;;  %v7719_v61 = vadd.f32 %v11951_v23, %v7689_v50 }
0x14a8   : > { %8443 = vmatpush.msrb.mxu0 %v8319_v28  ;;  %v8563_v47 = vand.u32 4294901760, %v8562_v58 }
0x14a9   : > { %8334 = vmatpush.msra.mxu1 %v8333_v45 }
0x14aa   : > { %8447 = vmatpush.msrb.mxu0 %v8325_v46 }
0x14ab   : > { %8472 = vmatpush.msrb.mxu1 %v8260_v48  ;;  %v7755_v48 = vadd.f32 %v11961_v43, %v7724_v34  ;;  %v8564_v34 = vsub.f32 %v8562_v58, %v8563_v47 }
0x14ac   : > { %8451 = vmatpush.msrb.mxu0 %v8331_v24  ;;  %v7749_v24 = vadd.f32 %v11953_v14, %v7719_v61 }
0x14ad   : > { %8474 = vmatpush.msrb.mxu1 %v8262_v32  ;;  %v7786_v32 = vadd.f32 %v11971_v38, %v7755_v48 }
0x14ae   : > { %v7782_v10 = vadd.f32 %v11967_v35, %v7749_v24  ;;  %v10367_v24 = vld [vmem:[%s12416_s11 + $0x60] sm:$0xff] }
0x14af   : > { %8476 = vmatpush.msrb.mxu1 %v8264_v53  ;;  %v7813_v62 = vadd.f32 %v11969_v6, %v7786_v32 }
0x14b0   : > { %v7809_v33 = vadd.f32 %v11965_v37, %v7782_v10 }
0x14b1   : > { %8478 = vmatpush.msrb.mxu1 %v8266_v8 }
0x14b3   : > { %8480 = vmatpush.msrb.mxu1 %v8268_v41 }
0x14b5   : > { %8482 = vmatpush.msrb.mxu1 %v8270_v40  ;;  %v10372_v40 = vld [vmem:[%s12417_s12 + $0x18] sm:$0xff] }
0x14b6   : > { %v8520_v51 = vand.u32 4294901760, %v10372_v40 }
0x14b8   : > { %8521 = vmatpush.msrb.mxu2 %v8520_v51  ;;  %v8556_v46 = vsub.f32 %v10372_v40, %v8520_v51  ;;  %v10363_v40 = vld [vmem:[%s12416_s11 + $0x40] sm:$0xff] }
0x14ba   : > { %8523 = vmatpush.msrb.mxu2 %v8522_v0  ;;  %v8557_v13 = vand.u32 4294901760, %v8556_v46 }
0x14bc   : > { %v8558_v45 = vsub.f32 %v8556_v46, %v8557_v13 }
0x14be   : > { %v8559_v50 = vand.u32 4294901760, %v8558_v45 }
0x14c0   : > { %8560 = vmatpush.msrb.mxu3 %v8559_v50 }
0x14d5   : > { %v8220_v49 = vpop.permute.xlu2 %8219 }
0x14d6   : > { %v8233_v23 = vsel %vm1086_vm1, %v7809_v33, %v8220_v49  ;;  %v8565_v49 = vand.u32 4294901760, %v8564_v34 }
0x14d8   : > { %8566 = vmatpush.msrb.mxu3 %v8565_v49 }
0x14f5   : > { %v8222_v53 = vpop.permute.xlu1 %8221 }
0x14f6   : > { %v8234_v60 = vsel %vm1086_vm1, %v7813_v62, %v8222_v53 }
0x14f9   : > { %v8230_v8 = vpop.permute.xlu2 %8229 }
0x14fa   : > { %v8236_v54 = vsel %vm704_vm0, %v8234_v60, %v8230_v8  ;;  %v12065_v8 = vand.u32 4294901760, %v10367_v24  ;;  %v10366_v60 = vld [vmem:[%s12416_s11 + $0x58] sm:$0xff] }
0x14fb   : > { %v8248_v43 = vsel %vm3488_vm15, %v8236_v54, 0 }
0x14fc   : > { %v8280_v44 = vand.u32 4294901760, %v8248_v43 }
0x14fe   : > { %v8281_v6 = vsub.f32 %v8248_v43, %v8280_v44  ;;  %v12077_v43 = vsub.f32 %v10367_v24, %v12065_v8  ;;  %v12522_v24 = vld [vmem:[#allocation6_spill] sm:$0xff] }
0x1500   : > { %v8282_v37 = vand.u32 4294901760, %v8281_v6 }
0x1502   : > { %v8283_v7 = vsub.f32 %v8281_v6, %v8282_v37 }
0x1504   : > { %v8284_v11 = vand.u32 4294901760, %v8283_v7 }
0x1509   : > { %v8228_v56 = vpop.permute.xlu0 %8227 }
0x150a   : > { %v8235_v38 = vsel %vm704_vm0, %v8233_v23, %v8228_v56  ;;  %v12081_v56 = vand.u32 4294901760, %v10366_v60 }
0x150b   : > { %v8245_v14 = vsel %vm3488_vm15, %v8235_v38, 0  ;;  %v10365_v38 = vld [vmem:[%s12416_s11 + $0x50] sm:$0xff] }
0x150c   : > { %v8272_v35 = vand.u32 4294901760, %v8245_v14 }
0x150e   : > { %v8273_v41 = vsub.f32 %v8245_v14, %v8272_v35  ;;  %8336 = vmatmul.f32.vlgmr.msra.gmra.mxu1 %v8272_v35 }
0x150f   : > { %8622 = vmatpush.msra.mxu1 %v8520_v51 }
0x1510   : > { %v8274_v28 = vand.u32 4294901760, %v8273_v41  ;;  %8374 = vmatmul.f32.vlgmr.msra.gmra.mxu2 %v8273_v41 }
0x1511   : > { %8624 = vmatpush.msra.mxu1 %v8522_v0  ;;  %8655 = vmatpush.msra.mxu2 %v8557_v13 }
0x1512   : > { %v8275_v52 = vsub.f32 %v8273_v41, %v8274_v28  ;;  %8408 = vmatmul.f32.vlgmr.msra.gmra.mxu3 %v8274_v28  ;;  %v12092_v41 = vand.u32 4294901760, %v10365_v38  ;;  %v10364_v28 = vld [vmem:[%s12416_s11 + $0x48] sm:$0xff] }
0x1513   : > { %8659 = vmatpush.msra.mxu2 %v8563_v47  ;;  %8684 = vmatpush.msra.mxu3 %v8520_v51  ;;  %v12104_v7 = vand.u32 4294901760, %v10364_v28 }
0x1514   : > { %v8276_v57 = vand.u32 4294901760, %v8275_v52 }
0x1515   : > { %8686 = vmatpush.msra.mxu3 %v8522_v0  ;;  %v12114_v0 = vand.u32 4294901760, %v10363_v40 }
0x1516   : > { %8277 = vmatmul.f32.vlgmr.msra.gmra.mxu0 %v8276_v57  ;;  %8340 = vmatmul.f32.gmra.mxu1 %v8280_v44 }
0x1517   : > { %8592 = vmatpush.msra.mxu0 %v8556_v46  ;;  %v8788_v46 = vsub.f32 %v10364_v28, %v12104_v7  ;;  %v8794_v45 = vsub.f32 %v10363_v40, %v12114_v0 }
0x1518   : > { %8379 = vmatmul.f32.gmra.mxu2 %v8281_v6  ;;  %v12095_v6 = vsub.f32 %v10366_v60, %v12081_v56 }
0x1519   : > { %8595 = vmatpush.msra.mxu0 %v8562_v58  ;;  %v8789_v58 = vand.u32 4294901760, %v8788_v46  ;;  %v8795_v49 = vand.u32 4294901760, %v8794_v45 }
0x151a   : > { %8414 = vmatmul.f32.gmra.mxu3 %v8282_v37  ;;  %v8782_v37 = vsub.f32 %v10365_v38, %v12092_v41 }
0x151b   : > { %v8790_v34 = vsub.f32 %v8788_v46, %v8789_v58 }
0x151c   : > { %v8783_v36 = vand.u32 4294901760, %v8782_v37 }
0x151e   : > { %8285 = vmatmul.f32.gmra.mxu0 %v8284_v11  ;;  %8484 = vmatmul.f32.vlgmr.msrb.gmra.mxu1 %v8272_v35  ;;  %v8777_v11 = vand.u32 4294901760, %v12095_v6 }
0x1520   : > { %8529 = vmatmul.f32.vlgmr.msrb.gmra.mxu2 %v11786_v55  ;;  %v8778_v13 = vsub.f32 %v12095_v6, %v8777_v11 }
0x1522   : > { %8568 = vmatmul.f32.vlgmr.msrb.gmra.mxu3 %v11760_v5  ;;  %v8779_v47 = vand.u32 4294901760, %v8778_v13 }
0x1526   : > { %8453 = vmatmul.f32.vlgmr.msrb.gmra.mxu0 %v8272_v35  ;;  %8488 = vmatmul.f32.gmra.mxu1 %v8280_v44  ;;  %v8771_v35 = vand.u32 4294901760, %v12077_v43 }
0x1528   : > { %8537 = vmatmul.f32.gmra.mxu2 %v11796_v16  ;;  %v8772_v57 = vsub.f32 %v12077_v43, %v8771_v35 }
0x152a   : > { %8572 = vmatmul.f32.gmra.mxu3 %v11776_v17  ;;  %v8773_v51 = vand.u32 4294901760, %v8772_v57 }
0x152e   : > { %8457 = vmatmul.f32.gmra.mxu0 %v8280_v44  ;;  %8628 = vmatmul.f32.vlgmr.msra.gmra.mxu1 %v11774_v21  ;;  %v10370_v21 = vld [vmem:[%s12416_s11 + $0x78] sm:$0xff] }
0x152f   : > { %v12028_v55 = vand.u32 4294901760, %v10370_v21 }
0x1530   : > { %8661 = vmatmul.f32.vlgmr.msra.gmra.mxu2 %v11760_v5 }
0x1531   : > { %v12035_v61 = vsub.f32 %v10370_v21, %v12028_v55  ;;  %8860 = vmatpush.msrb.mxu3 %v12028_v55  ;;  %8711 = vmatpush.msrb.mxu0 %v12028_v55  ;;  %v8791_v21 = vand.u32 4294901760, %v8790_v34 }
0x1532   : > { %8688 = vmatmul.f32.vlgmr.msra.gmra.mxu3 %v11760_v5  ;;  %v8784_v5 = vsub.f32 %v8782_v37, %v8783_v36 }
0x1533   : > { %v8753_v48 = vand.u32 4294901760, %v12035_v61  ;;  %8818 = vmatpush.msrb.mxu2 %v12035_v61 }
0x1534   : > { %v8785_v50 = vand.u32 4294901760, %v8784_v5 }
0x1535   : > { %v8754_v53 = vsub.f32 %v12035_v61, %v8753_v48  ;;  %v12525_v61 = vld [vmem:[#allocation11_spill] sm:$0xff] }
0x1536   : > { %8598 = vmatmul.f32.vlgmr.msra.gmra.mxu0 %v11766_v26  ;;  %8634 = vmatmul.f32.gmra.mxu1 %v11789_v59  ;;  %v10369_v26 = vld [vmem:[%s12416_s11 + $0x70] sm:$0xff]  ;;  %v10368_v59 = vld [vmem:[%s12416_s11 + $0x68] sm:$0xff] }
0x1537   : > { %v12037_v16 = vand.u32 4294901760, %v10369_v26  ;;  %v8755_v54 = vand.u32 4294901760, %v8754_v53  ;;  %v12523_v53 = vld [vmem:[#allocation7_spill] sm:$0xff] }
0x1538   : > { %8665 = vmatmul.f32.gmra.mxu2 %v11776_v17 }
0x1539   : > { %v12046_v32 = vsub.f32 %v10369_v26, %v12037_v16  ;;  %8862 = vmatpush.msrb.mxu3 %v12037_v16  ;;  %8713 = vmatpush.msrb.mxu0 %v12037_v16  ;;  %v8796_v26 = vsub.f32 %v8794_v45, %v8795_v49 }
0x153a   : > { %8756 = vmatpush.msrb.mxu1 %v8755_v54  ;;  %8692 = vmatmul.f32.gmra.mxu3 %v11776_v17  ;;  %v12524_v17 = vld [vmem:[#allocation8_spill] sm:$0xff] }
0x153b   : > { %v8759_v10 = vand.u32 4294901760, %v12046_v32  ;;  %8821 = vmatpush.msrb.mxu2 %v12046_v32 }
0x153d   : > { %v8760_v33 = vsub.f32 %v12046_v32, %v8759_v10  ;;  %v12526_v32 = vld [vmem:[#allocation16_spill] sm:$0xff] }
0x153e   : > { %8603 = vmatmul.f32.gmra.mxu0 %v11781_v30  ;;  %v12049_v30 = vand.u32 4294901760, %v10368_v59 }
0x153f   : > { %v8761_v14 = vand.u32 4294901760, %v8760_v33 }
0x1540   : > { %v12062_v62 = vsub.f32 %v10368_v59, %v12049_v30  ;;  %8864 = vmatpush.msrb.mxu3 %v12049_v30  ;;  %8715 = vmatpush.msrb.mxu0 %v12049_v30  ;;  %v8797_v59 = vand.u32 4294901760, %v8796_v26  ;;  %v12530_v26 = vld [vmem:[#allocation10_spill] sm:$0xff] }
0x1541   : > { %8762 = vmatpush.msrb.mxu1 %v8761_v14 }
0x1542   : > { %v8765_v23 = vand.u32 4294901760, %v12062_v62  ;;  %8824 = vmatpush.msrb.mxu2 %v12062_v62  ;;  %8866 = vmatpush.msrb.mxu3 %v12065_v8 }
0x1543   : > { %8717 = vmatpush.msrb.mxu0 %v12065_v8 }
0x1544   : > { %v8766_v44 = vsub.f32 %v12062_v62, %v8765_v23  ;;  %8827 = vmatpush.msrb.mxu2 %v12077_v43  ;;  %8868 = vmatpush.msrb.mxu3 %v12081_v56 }
0x1545   : > { %8719 = vmatpush.msrb.mxu0 %v12081_v56 }
0x1546   : > { %v8767_v52 = vand.u32 4294901760, %v8766_v44  ;;  %8830 = vmatpush.msrb.mxu2 %v12095_v6  ;;  %8870 = vmatpush.msrb.mxu3 %v12092_v41 }
0x1547   : > { %8721 = vmatpush.msrb.mxu0 %v12092_v41 }
0x1548   : > { %8768 = vmatpush.msrb.mxu1 %v8767_v52  ;;  %8833 = vmatpush.msrb.mxu2 %v8782_v37 }
0x1549   : > { %8872 = vmatpush.msrb.mxu3 %v12104_v7  ;;  %8723 = vmatpush.msrb.mxu0 %v12104_v7 }
0x154a   : > { %8774 = vmatpush.msrb.mxu1 %v8773_v51  ;;  %8836 = vmatpush.msrb.mxu2 %v8788_v46 }
0x154b   : > { %8874 = vmatpush.msrb.mxu3 %v12114_v0  ;;  %8725 = vmatpush.msrb.mxu0 %v12114_v0 }
0x154c   : > { %8780 = vmatpush.msrb.mxu1 %v8779_v47  ;;  %8839 = vmatpush.msrb.mxu2 %v8794_v45 }
0x154d   : > { %9037 = vmatpush.msra.mxu3 %v12522_v24  ;;  %8899 = vmatpush.msra.mxu0 %v8753_v48 }
0x154e   : > { %8786 = vmatpush.msrb.mxu1 %v8785_v50  ;;  %8992 = vmatpush.msra.mxu2 %v11189_v18 }
0x154f   : > { %9043 = vmatpush.msra.mxu3 %v12523_v53  ;;  %8903 = vmatpush.msra.mxu0 %v8759_v10  ;;  %v12529_v10 = vld [vmem:[#allocation20_spill] sm:$0xff] }
0x1550   : > { %8792 = vmatpush.msrb.mxu1 %v8791_v21  ;;  %8994 = vmatpush.msra.mxu2 %v11197_v4 }
0x1551   : > { %9049 = vmatpush.msra.mxu3 %v12524_v17  ;;  %8907 = vmatpush.msra.mxu0 %v8765_v23 }
0x1552   : > { %8798 = vmatpush.msrb.mxu1 %v8797_v59  ;;  %8996 = vmatpush.msra.mxu2 %v11213_v25  ;;  %v12531_v59 = vld [vmem:[#allocation24_spill] sm:$0xff] }
0x1553   : > { %9055 = vmatpush.msra.mxu3 %v12525_v61  ;;  %8911 = vmatpush.msra.mxu0 %v8771_v35 }
0x1554   : > { %8946 = vmatpush.msra.mxu1 %v12028_v55  ;;  %8998 = vmatpush.msra.mxu2 %v11231_v63  ;;  %v12527_v55 = vld [vmem:[#allocation17_spill] sm:$0xff] }
0x1555   : > { %9061 = vmatpush.msra.mxu3 %v12526_v32  ;;  %8915 = vmatpush.msra.mxu0 %v8777_v11 }
0x1556   : > { %8948 = vmatpush.msra.mxu1 %v12037_v16  ;;  %9000 = vmatpush.msra.mxu2 %v11250_v29  ;;  %v12528_v16 = vld [vmem:[#allocation19_spill] sm:$0xff] }
0x1557   : > { %9067 = vmatpush.msra.mxu3 %v12527_v55  ;;  %8919 = vmatpush.msra.mxu0 %v8783_v36 }
0x1558   : > { %8950 = vmatpush.msra.mxu1 %v12049_v30  ;;  %9002 = vmatpush.msra.mxu2 %v11265_v1 }
0x1559   : > { %9073 = vmatpush.msra.mxu3 %v12528_v16  ;;  %8923 = vmatpush.msra.mxu0 %v8789_v58 }
0x155a   : > { %8952 = vmatpush.msra.mxu1 %v12065_v8  ;;  %9004 = vmatpush.msra.mxu2 %v11283_v27 }
0x155b   : > { %9079 = vmatpush.msra.mxu3 %v12529_v10  ;;  %8927 = vmatpush.msra.mxu0 %v8795_v49 }
0x155c   : > { %8954 = vmatpush.msra.mxu1 %v12081_v56  ;;  %9006 = vmatpush.msra.mxu2 %v11302_v12 }
0x155e   : > { %8956 = vmatpush.msra.mxu1 %v12092_v41 }
0x1560   : > { %8958 = vmatpush.msra.mxu1 %v12104_v7 }
0x1562   : > { %8960 = vmatpush.msra.mxu1 %v12114_v0 }
0x158b   : > { %v8337_v60 = vpop.f32.mrf.mxu1 }
0x1593   : > { %v8278_v48 = vpop.f32.mrf.mxu0  ;;  %v8341_v30 = vpop.f32.mrf.mxu1 }
0x1594   : > { %v8338_v62 = vadd.f32 %v8337_v60, %v8278_v48  ;;  %v8375_v8 = vpop.f32.mrf.mxu2  ;;  %v12532_v60 = vld [vmem:[#allocation9_spill] sm:$0xff]  ;;  %v12533_v48 = vld [vmem:[#allocation12_spill] sm:$0xff] }
0x1595   : > { %v8409_v23 = vpop.f32.mrf.mxu3 }
0x1596   : > { %v8376_v33 = vadd.f32 %v8375_v8, %v8338_v62  ;;  %v12535_v62 = vld [vmem:[#allocation14_spill] sm:$0xff]  ;;  %v12536_v8 = vld [vmem:[#allocation15_spill] sm:$0xff] }
0x1598   : > { %v8410_v43 = vadd.f32 %v8409_v23, %v8376_v33  ;;  %v12538_v33 = vld [vmem:[#allocation21_spill] sm:$0xff] }
0x159b   : > { %v8286_v54 = vpop.f32.mrf.mxu0  ;;  %v8485_v38 = vpop.f32.mrf.mxu1 }
0x159c   : > { %v8342_v56 = vadd.f32 %v8341_v30, %v8286_v54  ;;  %v8380_v35 = vpop.f32.mrf.mxu2  ;;  %v12534_v30 = vld [vmem:[#allocation13_spill] sm:$0xff]  ;;  %v12537_v54 = vld [vmem:[#allocation18_spill] sm:$0xff] }
0x159d   : > { %v8415_v52 = vpop.f32.mrf.mxu3 }
0x159e   : > { %v8381_v41 = vadd.f32 %v8380_v35, %v8342_v56 }
0x15a0   : > { %v8416_v57 = vadd.f32 %v8415_v52, %v8381_v41 }
0x15a3   : > { %v8454_v14 = vpop.f32.mrf.mxu0  ;;  %v8489_v36 = vpop.f32.mrf.mxu1 }
0x15a4   : > { %v8455_v44 = vadd.f32 %v8454_v14, %v8410_v43  ;;  %v8530_v23 = vpop.f32.mrf.mxu2 }
0x15a5   : > { %v8569_v43 = vpop.f32.mrf.mxu3 }
0x15a6   : > { %v8486_v6 = vadd.f32 %v8485_v38, %v8455_v44  ;;  %v8570_v35 = vadd.f32 %v8569_v43, %v8530_v23 }
0x15a8   : > { %v8492_v28 = vmax.f32 %v8486_v6, 0.0 }
0x15aa   : > { %v8697_v37 = vsel %vm3939_vm3, %v8492_v28, 0 }
0x15ab   : > { %v8726_v7 = vand.u32 4294901760, %v8697_v37  ;;  %v8458_v11 = vpop.f32.mrf.mxu0  ;;  %v8629_v56 = vpop.f32.mrf.mxu1 }
0x15ac   : > { %v8459_v40 = vadd.f32 %v8458_v11, %v8416_v57  ;;  %v8538_v38 = vpop.f32.mrf.mxu2 }
0x15ad   : > { %v8727_v51 = vsub.f32 %v8697_v37, %v8726_v7  ;;  %8800 = vmatmul.f32.vlgmr.msrb.gmra.mxu1 %v8726_v7  ;;  %v8573_v14 = vpop.f32.mrf.mxu3 }
0x15ae   : > { %v8490_v46 = vadd.f32 %v8489_v36, %v8459_v40  ;;  %9141 = vmatpush.msrb.mxu1 %v11189_v18  ;;  %v8574_v37 = vadd.f32 %v8573_v14, %v8538_v38 }
0x15af   : > { %v8728_v0 = vand.u32 4294901760, %v8727_v51  ;;  %8842 = vmatmul.f32.vlgmr.msrb.gmra.mxu2 %v8727_v51 }
0x15b0   : > { %v8493_v13 = vmax.f32 %v8490_v46, 0.0  ;;  %9143 = vmatpush.msrb.mxu1 %v11197_v4  ;;  %9180 = vmatpush.msrb.mxu2 %v11207_v15 }
0x15b1   : > { %v8729_v5 = vsub.f32 %v8727_v51, %v8728_v0  ;;  %8878 = vmatmul.f32.vlgmr.msrb.gmra.mxu3 %v8728_v0 }
0x15b2   : > { %v8700_v58 = vsel %vm3939_vm3, %v8493_v13, 0  ;;  %9145 = vmatpush.msrb.mxu1 %v11213_v25  ;;  %9227 = vmatpush.msrb.mxu3 %v11189_v18 }
0x15b3   : > { %v8730_v45 = vand.u32 4294901760, %v8729_v5  ;;  %v8734_v47 = vand.u32 4294901760, %v8700_v58  ;;  %9184 = vmatpush.msrb.mxu2 %v11225_v31  ;;  %v8599_v44 = vpop.f32.mrf.mxu0  ;;  %v8635_v41 = vpop.f32.mrf.mxu1 }
0x15b4   : > { %9147 = vmatpush.msrb.mxu1 %v11231_v63  ;;  %9229 = vmatpush.msrb.mxu3 %v11197_v4  ;;  %v8662_v6 = vpop.f32.mrf.mxu2  ;;  %v8600_v28 = vadd.f32 %v8599_v44, %v8570_v35 }
0x15b5   : > { %8731 = vmatmul.f32.vlgmr.msrb.gmra.mxu0 %v8730_v45  ;;  %8804 = vmatmul.f32.gmra.mxu1 %v8734_v47  ;;  %v8735_v50 = vsub.f32 %v8700_v58, %v8734_v47  ;;  %v8689_v52 = vpop.f32.mrf.mxu3 }
0x15b6   : > { %9099 = vmatpush.msrb.mxu0 %v11195_v3  ;;  %9149 = vmatpush.msrb.mxu1 %v11250_v29 }
0x15b7   : > { %8847 = vmatmul.f32.gmra.mxu2 %v8735_v50  ;;  %v8736_v34 = vand.u32 4294901760, %v8735_v50  ;;  %9231 = vmatpush.msrb.mxu3 %v11213_v25 }
0x15b8   : > { %9102 = vmatpush.msrb.mxu0 %v11210_v19  ;;  %9151 = vmatpush.msrb.mxu1 %v11265_v1 }
0x15b9   : > { %8884 = vmatmul.f32.gmra.mxu3 %v8736_v34  ;;  %v8737_v49 = vsub.f32 %v8735_v50, %v8736_v34  ;;  %9188 = vmatpush.msrb.mxu2 %v11243_v20 }
0x15ba   : > { %9105 = vmatpush.msrb.mxu0 %v11228_v9  ;;  %9153 = vmatpush.msrb.mxu1 %v11283_v27 }
0x15bb   : > { %v8738_v21 = vand.u32 4294901760, %v8737_v49  ;;  %9233 = vmatpush.msrb.mxu3 %v11231_v63  ;;  %9192 = vmatpush.msrb.mxu2 %v11262_v39  ;;  %v8604_v57 = vpop.f32.mrf.mxu0 }
0x15bc   : > { %9108 = vmatpush.msrb.mxu0 %v11246_v2  ;;  %9155 = vmatpush.msrb.mxu1 %v11302_v12  ;;  %v8605_v51 = vadd.f32 %v8604_v57, %v8574_v37  ;;  %v8666_v36 = vpop.f32.mrf.mxu2 }
0x15bd   : > { %8739 = vmatmul.f32.gmra.mxu0 %v8738_v21  ;;  %8962 = vmatmul.f32.vlgmr.msra.gmra.mxu1 %v8726_v7  ;;  %v8693_v5 = vpop.f32.mrf.mxu3 }
0x15be   : > { %9111 = vmatpush.msrb.mxu0 %v11268_v42  ;;  %9235 = vmatpush.msrb.mxu3 %v11250_v29  ;;  %v8636_v13 = vadd.f32 %v8635_v41, %v8605_v51  ;;  %v10419_v41 = vld [vmem:[%s12418_s13 + $0x4] ss:$0 sm:$0xff] }
0x15bf   : > { %9196 = vmatpush.msrb.mxu2 %v12530_v26  ;;  %9311 = vmatpush.msra.mxu1 %v12531_v59 }
0x15c0   : > { %9114 = vmatpush.msrb.mxu0 %v12532_v60  ;;  %9237 = vmatpush.msrb.mxu3 %v11265_v1  ;;  %v8667_v45 = vadd.f32 %v8666_v36, %v8636_v13 }
0x15c1   : > { %9200 = vmatpush.msrb.mxu2 %v12533_v48 }
0x15c2   : > { %9117 = vmatpush.msrb.mxu0 %v12534_v30  ;;  %9239 = vmatpush.msrb.mxu3 %v11283_v27  ;;  %v8694_v21 = vadd.f32 %v8693_v5, %v8667_v45 }
0x15c3   : > { %9204 = vmatpush.msrb.mxu2 %v12535_v62 }
0x15c4   : > { %9120 = vmatpush.msrb.mxu0 %v12536_v8  ;;  %9241 = vmatpush.msrb.mxu3 %v11302_v12 }
0x15c5   : > { %8929 = vmatmul.f32.vlgmr.msra.gmra.mxu0 %v8726_v7  ;;  %8966 = vmatmul.f32.gmra.mxu1 %v8734_v47  ;;  %v8630_v7 = vadd.f32 %v8629_v56, %v8600_v28 }
0x15c6   : > { %9208 = vmatpush.msrb.mxu2 %v12537_v54  ;;  %9273 = vmatpush.msra.mxu0 %v12538_v33 }
0x15c7   : > { %v8663_v40 = vadd.f32 %v8662_v6, %v8630_v7 }
0x15c9   : > { %v8690_v0 = vadd.f32 %v8689_v52, %v8663_v40 }
0x15cd   : > { %8933 = vmatmul.f32.gmra.mxu0 %v8734_v47 }
0x162a   : > { %v8801_v11 = vpop.f32.mrf.mxu1 }
0x1632   : > { %v8732_v46 = vpop.f32.mrf.mxu0  ;;  %v8805_v47 = vpop.f32.mrf.mxu1 }
0x1633   : > { %v8733_v58 = vadd.f32 %v8732_v46, %v8690_v0  ;;  %v8843_v34 = vpop.f32.mrf.mxu2 }
0x1634   : > { %v8879_v44 = vpop.f32.mrf.mxu3 }
0x1635   : > { %v8802_v50 = vadd.f32 %v8801_v11, %v8733_v58 }
0x1637   : > { %v8844_v23 = vadd.f32 %v8843_v34, %v8802_v50  ;;  %v12539_v34 = vld [vmem:[#allocation23_spill] sm:$0xff] }
0x1639   : > { %v8880_v38 = vadd.f32 %v8879_v44, %v8844_v23 }
0x163a   : > { %v8740_v49 = vpop.f32.mrf.mxu0  ;;  %v8963_v14 = vpop.f32.mrf.mxu1 }
0x163b   : > { %v8741_v43 = vadd.f32 %v8740_v49, %v8694_v21  ;;  %v8848_v28 = vpop.f32.mrf.mxu2 }
0x163c   : > { %v8885_v7 = vpop.f32.mrf.mxu3 }
0x163d   : > { %v8806_v56 = vadd.f32 %v8805_v47, %v8741_v43 }
0x163f   : > { %v8849_v52 = vadd.f32 %v8848_v28, %v8806_v56 }
0x1641   : > { %v8886_v11 = vadd.f32 %v8885_v7, %v8849_v52 }
0x1642   : > { %v8930_v35 = vpop.f32.mrf.mxu0  ;;  %v8967_v13 = vpop.f32.mrf.mxu1 }
0x1643   : > { %v8931_v6 = vadd.f32 %v8930_v35, %v8880_v38  ;;  %v12540_v38 = vld [vmem:[#allocation22_spill] sm:$0xff] }
0x1645   : > { %v8964_v57 = vadd.f32 %v8963_v14, %v8931_v6 }
0x1647   : > { %v12195_v37 = vadd.f32 %v10419_v41, %v8964_v57 }
0x1649   : > { %v8975_v40 = vmax.f32 %v12195_v37, 0.0 }
0x164a   : > { %v8934_v51 = vpop.f32.mrf.mxu0 }
0x164b   : > { %v8978_v36 = vsel %vm3939_vm3, %v8975_v40, 0  ;;  %v8935_v46 = vadd.f32 %v8934_v51, %v8886_v11 }
0x164c   : > { %v9007_v0 = vand.u32 4294901760, %v8978_v36 }
0x164d   : > { %v8968_v5 = vadd.f32 %v8967_v13, %v8935_v46 }
0x164e   : > { %v9008_v58 = vsub.f32 %v8978_v36, %v9007_v0  ;;  %9081 = vmatmul.f32.vlgmr.msra.gmra.mxu3 %v9007_v0 }
0x164f   : > { %v12201_v45 = vadd.f32 %v10419_v41, %v8968_v5  ;;  %9366 = vmatpush.msra.mxu3 %v12538_v33 }
0x1650   : > { %9123 = vmatmul.f32.vlgmr.msrb.gmra.mxu0 %v9008_v58  ;;  %v9009_v47 = vand.u32 4294901760, %v9008_v58 }
0x1651   : > { %v8976_v50 = vmax.f32 %v12201_v45, 0.0  ;;  %9398 = vmatpush.msrb.mxu0 %v12539_v34 }
0x1652   : > { %9159 = vmatmul.f32.vlgmr.msrb.gmra.mxu1 %v9009_v47  ;;  %v9010_v49 = vsub.f32 %v9008_v58, %v9009_v47 }
0x1653   : > { %v8981_v21 = vsel %vm3939_vm3, %v8976_v50, 0  ;;  %9424 = vmatpush.msrb.mxu1 %v12538_v33 }
0x1654   : > { %v9011_v23 = vand.u32 4294901760, %v9010_v49  ;;  %v9015_v43 = vand.u32 4294901760, %v8981_v21 }
0x1656   : > { %9012 = vmatmul.f32.vlgmr.msra.gmra.mxu2 %v9011_v23  ;;  %9085 = vmatmul.f32.gmra.mxu3 %v9015_v43  ;;  %v9016_v44 = vsub.f32 %v8981_v21, %v9015_v43 }
0x1657   : > { %9338 = vmatpush.msra.mxu2 %v12540_v38 }
0x1658   : > { %9128 = vmatmul.f32.gmra.mxu0 %v9016_v44  ;;  %v9017_v56 = vand.u32 4294901760, %v9016_v44 }
0x165a   : > { %9165 = vmatmul.f32.gmra.mxu1 %v9017_v56  ;;  %v9018_v14 = vsub.f32 %v9016_v44, %v9017_v56 }
0x165c   : > { %v9019_v35 = vand.u32 4294901760, %v9018_v14 }
0x165e   : > { %9020 = vmatmul.f32.gmra.mxu2 %v9019_v35  ;;  %9243 = vmatmul.f32.vlgmr.msrb.gmra.mxu3 %v9007_v0 }
0x165f   : > { %9498 = vmatpush.msrb.mxu3 %v12522_v24 }
0x1661   : > { %9504 = vmatpush.msrb.mxu3 %v12523_v53 }
0x1663   : > { %9510 = vmatpush.msrb.mxu3 %v12524_v17 }
0x1665   : > { %9516 = vmatpush.msrb.mxu3 %v12525_v61 }
0x1666   : > { %9210 = vmatmul.f32.vlgmr.msrb.gmra.mxu2 %v9007_v0  ;;  %9247 = vmatmul.f32.gmra.mxu3 %v9015_v43 }
0x1667   : > { %9453 = vmatpush.msrb.mxu2 %v11189_v18  ;;  %9522 = vmatpush.msrb.mxu3 %v12526_v32 }
0x1669   : > { %9455 = vmatpush.msrb.mxu2 %v11197_v4  ;;  %9528 = vmatpush.msrb.mxu3 %v12527_v55 }
0x166b   : > { %9457 = vmatpush.msrb.mxu2 %v11213_v25  ;;  %9534 = vmatpush.msrb.mxu3 %v12528_v16 }
0x166d   : > { %9459 = vmatpush.msrb.mxu2 %v11231_v63  ;;  %9540 = vmatpush.msrb.mxu3 %v12529_v10 }
0x166e   : > { %9214 = vmatmul.f32.gmra.mxu2 %v9015_v43 }
0x166f   : > { %9461 = vmatpush.msrb.mxu2 %v11250_v29 }
0x1671   : > { %9463 = vmatpush.msrb.mxu2 %v11265_v1 }
0x1673   : > { %9465 = vmatpush.msrb.mxu2 %v11283_v27 }
0x1675   : > { %9467 = vmatpush.msrb.mxu2 %v11302_v12 }
0x16cd   : > { %v9124_v32 = vpop.f32.mrf.mxu0 }
0x16cf   : > { %v9160_v6 = vpop.f32.mrf.mxu1 }
0x16d1   : > { %v9082_v24 = vpop.f32.mrf.mxu3 }
0x16d5   : > { %v9129_v7 = vpop.f32.mrf.mxu0 }
0x16d7   : > { %v9166_v46 = vpop.f32.mrf.mxu1 }
0x16d9   : > { %v9013_v53 = vpop.f32.mrf.mxu2  ;;  %v9086_v17 = vpop.f32.mrf.mxu3 }
0x16da   : > { %v9083_v61 = vadd.f32 %v9082_v24, %v9013_v53 }
0x16dc   : > { %v9125_v16 = vadd.f32 %v9124_v32, %v9083_v61 }
0x16de   : > { %v9161_v28 = vadd.f32 %v9160_v6, %v9125_v16 }
0x16e1   : > { %v9021_v55 = vpop.f32.mrf.mxu2  ;;  %v9244_v10 = vpop.f32.mrf.mxu3 }
0x16e2   : > { %v9087_v41 = vadd.f32 %v9086_v17, %v9021_v55 }
0x16e4   : > { %v9130_v11 = vadd.f32 %v9129_v7, %v9087_v41 }
0x16e6   : > { %v9167_v13 = vadd.f32 %v9166_v46, %v9130_v11 }
0x16e9   : > { %v9211_v52 = vpop.f32.mrf.mxu2  ;;  %v9248_v21 = vpop.f32.mrf.mxu3 }
0x16ea   : > { %v9212_v57 = vadd.f32 %v9211_v52, %v9161_v28 }
0x16ec   : > { %v9245_v51 = vadd.f32 %v9244_v10, %v9212_v57 }
0x16ee   : > { %v9252_v36 = vsel %vm1258_vm2, %v9245_v51, 0 }
0x16ef   : > { %v9274_v0 = vand.u32 4294901760, %v9252_v36 }
0x16f1   : > { %v9275_v5 = vsub.f32 %v9252_v36, %v9274_v0  ;;  %v9215_v58 = vpop.f32.mrf.mxu2  ;;  %9313 = vmatmul.f32.vlgmr.msra.gmra.mxu1 %v9274_v0 }
0x16f2   : > { %v9216_v47 = vadd.f32 %v9215_v58, %v9167_v13  ;;  %9602 = vmatpush.msra.mxu1 %v11189_v18 }
0x16f3   : > { %v9276_v49 = vand.u32 4294901760, %v9275_v5  ;;  %9341 = vmatmul.f32.vlgmr.msra.gmra.mxu2 %v9275_v5 }
0x16f4   : > { %v9249_v23 = vadd.f32 %v9248_v21, %v9216_v47  ;;  %9604 = vmatpush.msra.mxu1 %v11197_v4  ;;  %9641 = vmatpush.msra.mxu2 %v11207_v15 }
0x16f5   : > { %v9277_v43 = vsub.f32 %v9275_v5, %v9276_v49  ;;  %9370 = vmatmul.f32.vlgmr.msra.gmra.mxu3 %v9276_v49 }
0x16f6   : > { %v9255_v44 = vsel %vm1258_vm2, %v9249_v23, 0  ;;  %9606 = vmatpush.msra.mxu1 %v11213_v25  ;;  %9688 = vmatpush.msra.mxu3 %v11189_v18 }
0x16f7   : > { %v9278_v56 = vand.u32 4294901760, %v9277_v43  ;;  %v9282_v14 = vand.u32 4294901760, %v9255_v44  ;;  %9645 = vmatpush.msra.mxu2 %v11225_v31 }
0x16f8   : > { %9608 = vmatpush.msra.mxu1 %v11231_v63  ;;  %9690 = vmatpush.msra.mxu3 %v11197_v4 }
0x16f9   : > { %9279 = vmatmul.f32.vlgmr.msra.gmra.mxu0 %v9278_v56  ;;  %9317 = vmatmul.f32.gmra.mxu1 %v9282_v14  ;;  %v9283_v35 = vsub.f32 %v9255_v44, %v9282_v14 }
0x16fa   : > { %9560 = vmatpush.msra.mxu0 %v11195_v3  ;;  %9610 = vmatpush.msra.mxu1 %v11250_v29 }
0x16fb   : > { %9346 = vmatmul.f32.gmra.mxu2 %v9283_v35  ;;  %v9284_v15 = vand.u32 4294901760, %v9283_v35  ;;  %9692 = vmatpush.msra.mxu3 %v11213_v25 }
0x16fc   : > { %9563 = vmatpush.msra.mxu0 %v11210_v19  ;;  %9612 = vmatpush.msra.mxu1 %v11265_v1 }
0x16fd   : > { %9376 = vmatmul.f32.gmra.mxu3 %v9284_v15  ;;  %v9285_v18 = vsub.f32 %v9283_v35, %v9284_v15  ;;  %9649 = vmatpush.msra.mxu2 %v11243_v20 }
0x16fe   : > { %9566 = vmatpush.msra.mxu0 %v11228_v9  ;;  %9614 = vmatpush.msra.mxu1 %v11283_v27 }
0x16ff   : > { %v9286_v4 = vand.u32 4294901760, %v9285_v18  ;;  %9694 = vmatpush.msra.mxu3 %v11231_v63  ;;  %9653 = vmatpush.msra.mxu2 %v11262_v39 }
0x1700   : > { %9569 = vmatpush.msra.mxu0 %v11246_v2  ;;  %9616 = vmatpush.msra.mxu1 %v11302_v12 }
0x1701   : > { %9287 = vmatmul.f32.gmra.mxu0 %v9286_v4  ;;  %9426 = vmatmul.f32.vlgmr.msrb.gmra.mxu1 %v9274_v0 }
0x1702   : > { %9572 = vmatpush.msra.mxu0 %v11268_v42  ;;  %9696 = vmatpush.msra.mxu3 %v11250_v29 }
0x1703   : > { %9657 = vmatpush.msra.mxu2 %v12530_v26  ;;  %9792 = vmatpush.msrb.mxu1 %v12531_v59 }
0x1704   : > { %9575 = vmatpush.msra.mxu0 %v12532_v60  ;;  %9698 = vmatpush.msra.mxu3 %v11265_v1 }
0x1705   : > { %9661 = vmatpush.msra.mxu2 %v12533_v48 }
0x1706   : > { %9578 = vmatpush.msra.mxu0 %v12534_v30  ;;  %9700 = vmatpush.msra.mxu3 %v11283_v27 }
0x1707   : > { %9665 = vmatpush.msra.mxu2 %v12535_v62 }
0x1708   : > { %9581 = vmatpush.msra.mxu0 %v12536_v8  ;;  %9702 = vmatpush.msra.mxu3 %v11302_v12 }
0x1709   : > { %9400 = vmatmul.f32.vlgmr.msrb.gmra.mxu0 %v9274_v0  ;;  %9430 = vmatmul.f32.gmra.mxu1 %v9282_v14 }
0x170a   : > { %9669 = vmatpush.msra.mxu2 %v12537_v54  ;;  %9754 = vmatpush.msrb.mxu0 %v12538_v33 }
0x1711   : > { %9404 = vmatmul.f32.gmra.mxu0 %v9282_v14 }
0x176e   : > { %v9314_v3 = vpop.f32.mrf.mxu1 }
0x1776   : > { %v9280_v19 = vpop.f32.mrf.mxu0  ;;  %v9318_v25 = vpop.f32.mrf.mxu1 }
0x1777   : > { %v9315_v31 = vadd.f32 %v9314_v3, %v9280_v19  ;;  %v9342_v9 = vpop.f32.mrf.mxu2 }
0x1778   : > { %v9371_v2 = vpop.f32.mrf.mxu3 }
0x1779   : > { %v9343_v20 = vadd.f32 %v9342_v9, %v9315_v31 }
0x177b   : > { %v9372_v29 = vadd.f32 %v9371_v2, %v9343_v20 }
0x177e   : > { %v9288_v63 = vpop.f32.mrf.mxu0  ;;  %v9427_v1 = vpop.f32.mrf.mxu1 }
0x177f   : > { %v9319_v39 = vadd.f32 %v9318_v25, %v9288_v63  ;;  %v9347_v12 = vpop.f32.mrf.mxu2 }
0x1780   : > { %v9377_v48 = vpop.f32.mrf.mxu3 }
0x1781   : > { %v9348_v26 = vadd.f32 %v9347_v12, %v9319_v39 }
0x1783   : > { %v9378_v30 = vadd.f32 %v9377_v48, %v9348_v26 }
0x1786   : > { %v9401_v42 = vpop.f32.mrf.mxu0  ;;  %v9431_v17 = vpop.f32.mrf.mxu1 }
0x1787   : > { %v9402_v27 = vadd.f32 %v9401_v42, %v9372_v29 }
0x1789   : > { %v9428_v59 = vadd.f32 %v9427_v1, %v9402_v27 }
0x178b   : > { %v12265_v60 = vsub.f32 %v8975_v40, %v9428_v59 }
0x178d   : > { %v9436_v62 = vmul.f32 %v12265_v60, %v12265_v60 }
0x178e   : > { %v9405_v8 = vpop.f32.mrf.mxu0 }
0x178f   : > { %v9439_v54 = vsel %vm3939_vm3, %v9436_v62, 0  ;;  %v9406_v24 = vadd.f32 %v9405_v8, %v9378_v30 }
0x1790   : > { %v9468_v53 = vand.u32 4294901760, %v9439_v54 }
0x1791   : > { %v9432_v61 = vadd.f32 %v9431_v17, %v9406_v24 }
0x1792   : > { %v9469_v32 = vsub.f32 %v9439_v54, %v9468_v53  ;;  %9542 = vmatmul.f32.vlgmr.msrb.gmra.mxu3 %v9468_v53 }
0x1793   : > { %v12272_v55 = vsub.f32 %v8976_v50, %v9432_v61  ;;  %9847 = vmatpush.msrb.mxu3 %v12538_v33 }
0x1794   : > { %9584 = vmatmul.f32.vlgmr.msra.gmra.mxu0 %v9469_v32  ;;  %v9470_v37 = vand.u32 4294901760, %v9469_v32 }
0x1795   : > { %v9437_v40 = vmul.f32 %v12272_v55, %v12272_v55  ;;  %9879 = vmatpush.msra.mxu0 %v12539_v34 }
0x1796   : > { %9620 = vmatmul.f32.vlgmr.msra.gmra.mxu1 %v9470_v37  ;;  %v9471_v16 = vsub.f32 %v9469_v32, %v9470_v37  ;;  %v10383_v32 = vld [vmem:[%s12505_s24 + $0x78] sm:$0xff] }
0x1797   : > { %v9442_v6 = vsel %vm3939_vm3, %v9437_v40, 0  ;;  %9905 = vmatpush.msra.mxu1 %v12538_v33  ;;  %v12286_v37 = vand.u32 4294901760, %v10383_v32  ;;  %v10382_v40 = vld [vmem:[%s12505_s24 + $0x70] sm:$0xff] }
0x1798   : > { %v9472_v41 = vand.u32 4294901760, %v9471_v16  ;;  %v9476_v28 = vand.u32 4294901760, %v9442_v6 }
0x1799   : > { %v12292_v16 = vsub.f32 %v10383_v32, %v12286_v37 }
0x179a   : > { %9473 = vmatmul.f32.vlgmr.msrb.gmra.mxu2 %v9472_v41  ;;  %9546 = vmatmul.f32.gmra.mxu3 %v9476_v28  ;;  %v9477_v45 = vsub.f32 %v9442_v6, %v9476_v28  ;;  %v12294_v6 = vand.u32 4294901760, %v10382_v40  ;;  %v10381_v41 = vld [vmem:[%s12505_s24 + $0x68] sm:$0xff] }
0x179b   : > { %9819 = vmatpush.msrb.mxu2 %v12540_v38 }
0x179c   : > { %9589 = vmatmul.f32.gmra.mxu0 %v9477_v45  ;;  %v9478_v50 = vand.u32 4294901760, %v9477_v45 }
0x179e   : > { %9626 = vmatmul.f32.gmra.mxu1 %v9478_v50  ;;  %v9479_v10 = vsub.f32 %v9477_v45, %v9478_v50  ;;  %v12303_v45 = vsub.f32 %v10382_v40, %v12294_v6  ;;  %v12306_v50 = vand.u32 4294901760, %v10381_v41 }
0x17a0   : > { %v9480_v52 = vand.u32 4294901760, %v9479_v10  ;;  %v10380_v10 = vld [vmem:[%s12505_s24 + $0x60] sm:$0xff] }
0x17a2   : > { %9481 = vmatmul.f32.gmra.mxu2 %v9480_v52  ;;  %9704 = vmatmul.f32.vlgmr.msra.gmra.mxu3 %v9468_v53 }
0x17aa   : > { %9671 = vmatmul.f32.vlgmr.msra.gmra.mxu2 %v9468_v53  ;;  %9708 = vmatmul.f32.gmra.mxu3 %v9476_v28 }
0x17ab   : > { %9954 = vmatpush.msra.mxu2 %v12286_v37 }
0x17ad   : > { %9956 = vmatpush.msra.mxu2 %v12294_v6 }
0x17af   : > { %9958 = vmatpush.msra.mxu2 %v12306_v50 }
0x17b2   : > { %9675 = vmatmul.f32.gmra.mxu2 %v9476_v28  ;;  %v9996_v28 = vand.u32 4294901760, %v12292_v16 }
0x17b4   : > { %v9997_v52 = vsub.f32 %v12292_v16, %v9996_v28 }
0x1811   : > { %v9585_v51 = vpop.f32.mrf.mxu0 }
0x1813   : > { %v9621_v38 = vpop.f32.mrf.mxu1 }
0x1815   : > { %v9543_v34 = vpop.f32.mrf.mxu3 }
0x1819   : > { %v9590_v21 = vpop.f32.mrf.mxu0 }
0x181b   : > { %v9627_v44 = vpop.f32.mrf.mxu1 }
0x181d   : > { %v9474_v57 = vpop.f32.mrf.mxu2  ;;  %v9547_v7 = vpop.f32.mrf.mxu3 }
0x181e   : > { %v9475_v33 = vadd.f32 1e-05, %v9474_v57  ;;  %v12318_v57 = vsub.f32 %v10381_v41, %v12306_v50  ;;  %v10421_v41 = vld [vmem:[%s12418_s13 + $0x6] ss:$0 sm:$0xff] }
0x1820   : > { %v9544_v11 = vadd.f32 %v9543_v34, %v9475_v33  ;;  %v10002_v34 = vand.u32 4294901760, %v12303_v45  ;;  %v12321_v33 = vand.u32 4294901760, %v10380_v10 }
0x1822   : > { %v9586_v0 = vadd.f32 %v9585_v51, %v9544_v11  ;;  %v9998_v11 = vand.u32 4294901760, %v9997_v52  ;;  %v10003_v51 = vsub.f32 %v12303_v45, %v10002_v34  ;;  %9960 = vmatpush.msra.mxu2 %v12321_v33 }
0x1824   : > { %v9622_v5 = vadd.f32 %v9621_v38, %v9586_v0  ;;  %v10378_v38 = vld [vmem:[%s12505_s24 + $0x50] sm:$0xff]  ;;  %9999 = vmatpush.msra.mxu3 %v9998_v11 }
0x1825   : > { %v9482_v36 = vpop.f32.mrf.mxu2  ;;  %v9705_v58 = vpop.f32.mrf.mxu3 }
0x1826   : > { %v9483_v46 = vadd.f32 1e-05, %v9482_v36  ;;  %v10008_v36 = vand.u32 4294901760, %v12318_v57 }
0x1828   : > { %v9548_v13 = vadd.f32 %v9547_v7, %v9483_v46  ;;  %v10379_v7 = vld [vmem:[%s12505_s24 + $0x58] sm:$0xff]  ;;  %v10013_v46 = vsub.f32 %v10380_v10, %v12321_v33 }
0x1829   : > { %v12335_v0 = vand.u32 4294901760, %v10379_v7 }
0x182a   : > { %v9591_v43 = vadd.f32 %v9590_v21, %v9548_v13  ;;  %v10004_v13 = vand.u32 4294901760, %v10003_v51  ;;  %v10377_v21 = vld [vmem:[%s12505_s24 + $0x48] sm:$0xff] }
0x182b   : > { %9962 = vmatpush.msra.mxu2 %v12335_v0 }
0x182c   : > { %v9628_v56 = vadd.f32 %v9627_v44, %v9591_v43  ;;  %10005 = vmatpush.msra.mxu3 %v10004_v13 }
0x182d   : > { %v9672_v47 = vpop.f32.mrf.mxu2  ;;  %v9709_v15 = vpop.f32.mrf.mxu3 }
0x182e   : > { %v9673_v49 = vadd.f32 %v9672_v47, %v9622_v5  ;;  %v10009_v5 = vsub.f32 %v12318_v57, %v10008_v36  ;;  %v9963_v47 = vand.u32 4294901760, %v10378_v38 }
0x1830   : > { %v9706_v23 = vadd.f32 %v9705_v58, %v9673_v49  ;;  %v10014_v58 = vand.u32 4294901760, %v10013_v46  ;;  %v10019_v49 = vsub.f32 %v10379_v7, %v12335_v0  ;;  %v10025_v44 = vsub.f32 %v10378_v38, %v9963_v47  ;;  %9964 = vmatpush.msra.mxu2 %v9963_v47 }
0x1832   : > { %10475 = vrsqrt.f32 %v9706_v23  ;;  %vm9718_vm1 = vweird.f32 %v9706_v23  ;;  %v10015_v43 = vsub.f32 %v10013_v46, %v10014_v58 }
0x1835   : > { %v9676_v14 = vpop.f32.mrf.mxu2 }
0x1836   : > { %v9677_v35 = vadd.f32 %v9676_v14, %v9628_v56  ;;  %v9965_v56 = vand.u32 4294901760, %v10377_v21  ;;  %v10020_v14 = vand.u32 4294901760, %v10019_v49 }
0x1838   : > { %v10476_v18 = vpop.eup %10475  ;;  %v9710_v4 = vadd.f32 %v9709_v15, %v9677_v35  ;;  %v10376_v35 = vld [vmem:[%s12505_s24 + $0x40] sm:$0xff]  ;;  %v10016_v15 = vand.u32 4294901760, %v10015_v43  ;;  %9966 = vmatpush.msra.mxu2 %v9965_v56 }
0x1839   : > { %v9713_v3 = vmul.f32 %v10476_v18, %v9706_v23  ;;  %vm9719_vm0 = vweird.f32 %v10476_v18  ;;  %v10010_v23 = vand.u32 4294901760, %v10009_v5  ;;  %v10418_v43 = vld [vmem:[%s12541_s18] ss:$0 sm:$0xff] }
0x183a   : > { %10477 = vrsqrt.f32 %v9710_v4  ;;  %vm9720_vm15 = vmor %vm9718_vm1, %vm9719_vm0  ;;  %vm9728_vm12 = vweird.f32 %v9710_v4 }
0x183b   : > { %v9714_v19 = vmul.f32 %v10476_v18, %v9713_v3  ;;  %10011 = vmatpush.msra.mxu3 %v10010_v23  ;;  %v9967_v3 = vand.u32 4294901760, %v10376_v35 }
0x183d   : > { %v9715_v25 = vmul.f32 0.5, %v9714_v19  ;;  %v10021_v19 = vsub.f32 %v10019_v49, %v10020_v14  ;;  %10017 = vmatpush.msra.mxu3 %v10016_v15  ;;  %9968 = vmatpush.msra.mxu2 %v9967_v3  ;;  %v12542_v15 = vld [vmem:[#allocation25_spill] sm:$0xff] }
0x183f   : > { %v9716_v31 = vsub.f32 1.5, %v9715_v25 }
0x1840   : > { %v10478_v9 = vpop.eup %10477 }
0x1841   : > { %v9717_v63 = vmul.f32 %v10476_v18, %v9716_v31  ;;  %v9723_v20 = vmul.f32 %v10478_v9, %v9710_v4  ;;  %vm9729_vm11 = vweird.f32 %v10478_v9  ;;  %v10031_v4 = vsub.f32 %v10377_v21, %v9965_v56 }
0x1842   : > { %vm9730_vm13 = vmor %vm9728_vm12, %vm9729_vm11 }
0x1843   : > { %v9721_v2 = vsel %vm9720_vm15, %v10476_v18, %v9717_v63  ;;  %v9724_v29 = vmul.f32 %v10478_v9, %v9723_v20  ;;  %v10026_v18 = vand.u32 4294901760, %v10025_v44  ;;  %v10032_v31 = vand.u32 4294901760, %v10031_v4 }
0x1844   : > { %v9733_v39 = vsel %vm1258_vm2, %v9721_v2, 0  ;;  %v10022_v63 = vand.u32 4294901760, %v10021_v19 }
0x1845   : > { %v9725_v1 = vmul.f32 0.5, %v9724_v29  ;;  %v9755_v42 = vand.u32 4294901760, %v9733_v39  ;;  %v10027_v25 = vsub.f32 %v10025_v44, %v10026_v18  ;;  %v10033_v2 = vsub.f32 %v10031_v4, %v10032_v31 }
0x1846   : > { %10023 = vmatpush.msra.mxu3 %v10022_v63  ;;  %v12544_v63 = vld [vmem:[#allocation27_spill] sm:$0xff] }
0x1847   : > { %v9726_v27 = vsub.f32 1.5, %v9725_v1  ;;  %9794 = vmatmul.f32.vlgmr.msrb.gmra.mxu1 %v9755_v42  ;;  %v9756_v12 = vsub.f32 %v9733_v39, %v9755_v42  ;;  %v10028_v20 = vand.u32 4294901760, %v10027_v25  ;;  %v10034_v39 = vand.u32 4294901760, %v10033_v2 }
0x1848   : > { %10103 = vmatpush.msrb.mxu1 %v12286_v37 }
0x1849   : > { %v9727_v26 = vmul.f32 %v10478_v9, %v9726_v27  ;;  %9822 = vmatmul.f32.vlgmr.msrb.gmra.mxu2 %v9756_v12  ;;  %v9757_v59 = vand.u32 4294901760, %v9756_v12  ;;  %10029 = vmatpush.msra.mxu3 %v10028_v20 }
0x184a   : > { %10105 = vmatpush.msrb.mxu1 %v12294_v6  ;;  %10142 = vmatpush.msrb.mxu2 %v9996_v28 }
0x184b   : > { %9851 = vmatmul.f32.vlgmr.msrb.gmra.mxu3 %v9757_v59  ;;  %v9758_v48 = vsub.f32 %v9756_v12, %v9757_v59  ;;  %v9731_v30 = vsel %vm9730_vm13, %v10478_v9, %v9727_v26  ;;  %v10037_v9 = vsub.f32 %v10376_v35, %v9967_v3 }
0x184c   : > { %v9736_v62 = vsel %vm1258_vm2, %v9731_v30, 0  ;;  %10107 = vmatpush.msrb.mxu1 %v12306_v50  ;;  %10146 = vmatpush.msrb.mxu2 %v10002_v34  ;;  %vm10215_vm2 = vcmask 31744  }
0x184d   : > { %v9759_v8 = vand.u32 4294901760, %v9758_v48  ;;  %v9763_v54 = vand.u32 4294901760, %v9736_v62  ;;  %v10038_v29 = vand.u32 4294901760, %v10037_v9  ;;  %10035 = vmatpush.msra.mxu3 %v10034_v39 }
0x184e   : > { %10109 = vmatpush.msrb.mxu1 %v12321_v33  ;;  %10150 = vmatpush.msrb.mxu2 %v10008_v36 }
0x184f   : > { %9760 = vmatmul.f32.vlgmr.msrb.gmra.mxu0 %v9759_v8  ;;  %9798 = vmatmul.f32.gmra.mxu1 %v9763_v54  ;;  %v9764_v24 = vsub.f32 %v9736_v62, %v9763_v54  ;;  %v10039_v1 = vsub.f32 %v10037_v9, %v10038_v29 }
0x1850   : > { %10061 = vmatpush.msrb.mxu0 %v12292_v16  ;;  %10111 = vmatpush.msrb.mxu1 %v12335_v0  ;;  %v10420_v16 = vld [vmem:[%s12418_s13 + $0x5] ss:$0 sm:$0xff] }
0x1851   : > { %9827 = vmatmul.f32.gmra.mxu2 %v9764_v24  ;;  %v9765_v53 = vand.u32 4294901760, %v9764_v24  ;;  %v10040_v27 = vand.u32 4294901760, %v10039_v1  ;;  %v12546_v1 = vld [vmem:[#allocation26_spill] sm:$0xff] }
0x1852   : > { %10064 = vmatpush.msrb.mxu0 %v12303_v45  ;;  %10113 = vmatpush.msrb.mxu1 %v9963_v47 }
0x1853   : > { %9857 = vmatmul.f32.gmra.mxu3 %v9765_v53  ;;  %v9766_v17 = vsub.f32 %v9764_v24, %v9765_v53  ;;  %10154 = vmatpush.msrb.mxu2 %v10014_v58 }
0x1854   : > { %10067 = vmatpush.msrb.mxu0 %v12318_v57  ;;  %10115 = vmatpush.msrb.mxu1 %v9965_v56 }
0x1855   : > { %v9767_v61 = vand.u32 4294901760, %v9766_v17  ;;  %10041 = vmatpush.msra.mxu3 %v10040_v27  ;;  %10158 = vmatpush.msrb.mxu2 %v10020_v14  ;;  %v5217_v14 = vadd.f32 %v10418_v43, %v11702_v22  ;;  %v12547_v27 = vld [vmem:[#allocation28_spill] sm:$0xff] }
0x1856   : > { %10070 = vmatpush.msrb.mxu0 %v10013_v46  ;;  %10117 = vmatpush.msrb.mxu1 %v9967_v3 }
0x1857   : > { %9768 = vmatmul.f32.gmra.mxu0 %v9767_v61  ;;  %9907 = vmatmul.f32.vlgmr.msra.gmra.mxu1 %v9755_v42 }
0x1858   : > { %10073 = vmatpush.msrb.mxu0 %v10019_v49  ;;  %10189 = vmatpush.msrb.mxu3 %v12286_v37 }
0x1859   : > { %10162 = vmatpush.msrb.mxu2 %v10026_v18  ;;  %v5286_v18 = vadd.f32 %v12542_v15, %v5217_v14 }
0x185a   : > { %10076 = vmatpush.msrb.mxu0 %v10025_v44  ;;  %10191 = vmatpush.msrb.mxu3 %v12294_v6  ;;  %v10422_v44 = vld [vmem:[%s12541_s18 + $0x1] ss:$0 sm:$0xff] }
0x185b   : > { %10166 = vmatpush.msrb.mxu2 %v10032_v31  ;;  %v12543_v31 = vld [vmem:[#allocation29_spill] sm:$0xff]  ;;  %v5328_v20 = vadd.f32 %v12544_v63, %v5286_v18 }
0x185c   : > { %10079 = vmatpush.msrb.mxu0 %v10031_v4  ;;  %10193 = vmatpush.msrb.mxu3 %v12306_v50 }
0x185d   : > { %10170 = vmatpush.msrb.mxu2 %v10038_v29  ;;  %v5364_v22 = vadd.f32 %v12547_v27, %v5328_v20 }
0x185e   : > { %10082 = vmatpush.msrb.mxu0 %v10037_v9  ;;  %10195 = vmatpush.msrb.mxu3 %v12321_v33  ;;  %v5225_v9 = vadd.f32 %v10418_v43, %v12543_v31 }
0x185f   : > { %9881 = vmatmul.f32.vlgmr.msra.gmra.mxu0 %v9755_v42  ;;  %9911 = vmatmul.f32.gmra.mxu1 %v9763_v54 }
0x1860   : > { %10197 = vmatpush.msrb.mxu3 %v12335_v0 }
0x1862   : > { %10199 = vmatpush.msrb.mxu3 %v9963_v47 }
0x1864   : > { %10201 = vmatpush.msrb.mxu3 %v9965_v56 }
0x1866   : > { %10203 = vmatpush.msrb.mxu3 %v9967_v3 }
0x1867   : > { %9885 = vmatmul.f32.gmra.mxu0 %v9763_v54 }
0x18c4   : > { %v9795_v42 = vpop.f32.mrf.mxu1 }
0x18cc   : > { %v9761_v12 = vpop.f32.mrf.mxu0  ;;  %v9799_v26 = vpop.f32.mrf.mxu1 }
0x18cd   : > { %v9796_v59 = vadd.f32 %v9795_v42, %v9761_v12  ;;  %v9823_v48 = vpop.f32.mrf.mxu2  ;;  %v5290_v42 = vadd.f32 %v12546_v1, %v5225_v9  ;;  %v12549_v12 = vld [vmem:[#allocation33_spill] sm:$0xff] }
0x18ce   : > { %v9852_v8 = vpop.f32.mrf.mxu3 }
0x18cf   : > { %v9824_v62 = vadd.f32 %v9823_v48, %v9796_v59 }
0x18d1   : > { %v9853_v54 = vadd.f32 %v9852_v8, %v9824_v62  ;;  %v12550_v8 = vld [vmem:[#allocation31_spill] sm:$0xff] }
0x18d4   : > { %v9769_v30 = vpop.f32.mrf.mxu0  ;;  %v9908_v53 = vpop.f32.mrf.mxu1 }
0x18d5   : > { %v9800_v24 = vadd.f32 %v9799_v26, %v9769_v30  ;;  %v9828_v32 = vpop.f32.mrf.mxu2  ;;  %v5415_v26 = vadd.f32 %v12549_v12, %v5364_v22 }
0x18d6   : > { %v9858_v28 = vpop.f32.mrf.mxu3 }
0x18d7   : > { %v9829_v37 = vadd.f32 %v9828_v32, %v9800_v24 }
0x18d9   : > { %v9859_v45 = vadd.f32 %v9858_v28, %v9829_v37  ;;  %v12554_v28 = vld [vmem:[#allocation35_spill] sm:$0xff] }
0x18dc   : > { %v9882_v17 = vpop.f32.mrf.mxu0  ;;  %v9912_v57 = vpop.f32.mrf.mxu1 }
0x18dd   : > { %v9883_v61 = vadd.f32 %v9882_v17, %v9853_v54  ;;  %v5333_v54 = vadd.f32 %v12550_v8, %v5290_v42  ;;  %v12551_v17 = vld [vmem:[#allocation30_spill] sm:$0xff] }
0x18df   : > { %v9909_v40 = vadd.f32 %v9908_v53, %v9883_v61  ;;  %v5448_v61 = vadd.f32 %v12551_v17, %v5415_v26 }
0x18e1   : > { %v9915_v6 = vmul.f32 %v9909_v40, %v12265_v60  ;;  %v12553_v40 = vld [vmem:[#allocation32_spill] sm:$0xff] }
0x18e3   : > { %v9919_v50 = vmul.f32 %v10420_v16, %v9915_v6 }
0x18e4   : > { %v9886_v10 = vpop.f32.mrf.mxu0 }
0x18e5   : > { %v9923_v52 = vadd.f32 %v10421_v41, %v9919_v50  ;;  %v9887_v34 = vadd.f32 %v9886_v10, %v9859_v45 }
0x18e7   : > { %v9940_v33 = vsel %vm3939_vm3, %v9923_v52, 0  ;;  %v9913_v7 = vadd.f32 %v9912_v57, %v9887_v34  ;;  %v12555_v57 = vld [vmem:[#allocation34_spill] sm:$0xff] }
0x18e8   : > { %v9969_v11 = vand.u32 4294901760, %v9940_v33 }
0x18e9   : > { %v9916_v51 = vmul.f32 %v9913_v7, %v12272_v55 }
0x18ea   : > { %v9970_v36 = vsub.f32 %v9940_v33, %v9969_v11  ;;  %10043 = vmatmul.f32.vlgmr.msra.gmra.mxu3 %v9969_v11 }
0x18eb   : > { %v9920_v60 = vmul.f32 %v10420_v16, %v9916_v51  ;;  %v5370_v16 = vadd.f32 %v12553_v40, %v5333_v54 }
0x18ec   : > { %10085 = vmatmul.f32.vlgmr.msrb.gmra.mxu0 %v9970_v36  ;;  %v9971_v46 = vand.u32 4294901760, %v9970_v36 }
0x18ed   : > { %v9924_v0 = vadd.f32 %v10421_v41, %v9920_v60  ;;  %v5419_v45 = vadd.f32 %v12554_v28, %v5370_v16 }
0x18ee   : > { %10121 = vmatmul.f32.vlgmr.msrb.gmra.mxu1 %v9971_v46  ;;  %v9972_v38 = vsub.f32 %v9970_v36, %v9971_v46 }
0x18ef   : > { %v9943_v13 = vsel %vm3939_vm3, %v9924_v0, 0  ;;  %v5452_v33 = vadd.f32 %v12555_v57, %v5419_v45 }
0x18f0   : > { %v9973_v5 = vand.u32 4294901760, %v9972_v38  ;;  %v9977_v58 = vand.u32 4294901760, %v9943_v13 }
0x18f2   : > { %9974 = vmatmul.f32.vlgmr.msra.gmra.mxu2 %v9973_v5  ;;  %10047 = vmatmul.f32.gmra.mxu3 %v9977_v58  ;;  %v9978_v47 = vsub.f32 %v9943_v13, %v9977_v58 }
0x18f4   : > { %10090 = vmatmul.f32.gmra.mxu0 %v9978_v47  ;;  %v9979_v49 = vand.u32 4294901760, %v9978_v47 }
0x18f6   : > { %10127 = vmatmul.f32.gmra.mxu1 %v9979_v49  ;;  %v9980_v21 = vsub.f32 %v9978_v47, %v9979_v49 }
0x18f8   : > { %v9981_v55 = vand.u32 4294901760, %v9980_v21 }
0x18fa   : > { %9982 = vmatmul.f32.gmra.mxu2 %v9981_v55  ;;  %10205 = vmatmul.f32.vlgmr.msrb.gmra.mxu3 %v9969_v11 }
0x1902   : > { %10172 = vmatmul.f32.vlgmr.msrb.gmra.mxu2 %v9969_v11  ;;  %10209 = vmatmul.f32.gmra.mxu3 %v9977_v58 }
0x190a   : > { %10176 = vmatmul.f32.gmra.mxu2 %v9977_v58 }
0x1969   : > { %v10086_v19 = vpop.f32.mrf.mxu0 }
0x196b   : > { %v10122_v39 = vpop.f32.mrf.mxu1 }
0x196d   : > { %v10044_v23 = vpop.f32.mrf.mxu3 }
0x1971   : > { %v10091_v53 = vpop.f32.mrf.mxu0 }
0x1973   : > { %v10128_v41 = vpop.f32.mrf.mxu1 }
0x1975   : > { %v9975_v56 = vpop.f32.mrf.mxu2  ;;  %v10048_v4 = vpop.f32.mrf.mxu3 }
0x1976   : > { %v9976_v35 = vadd.f32 %v10422_v44, %v9975_v56 }
0x1978   : > { %v10045_v3 = vadd.f32 %v10044_v23, %v9976_v35 }
0x197a   : > { %v10087_v29 = vadd.f32 %v10086_v19, %v10045_v3 }
0x197c   : > { %v10123_v48 = vadd.f32 %v10122_v39, %v10087_v29 }
0x197d   : > { %v9983_v25 = vpop.f32.mrf.mxu2  ;;  %v10206_v30 = vpop.f32.mrf.mxu3 }
0x197e   : > { %v9984_v2 = vadd.f32 %v10422_v44, %v9983_v25 }
0x1980   : > { %v10049_v59 = vadd.f32 %v10048_v4, %v9984_v2 }
0x1982   : > { %v10092_v37 = vadd.f32 %v10091_v53, %v10049_v59 }
0x1984   : > { %v10129_v50 = vadd.f32 %v10128_v41, %v10092_v37 }
0x1985   : > { %v10173_v62 = vpop.f32.mrf.mxu2  ;;  %v10210_v34 = vpop.f32.mrf.mxu3 }
0x1986   : > { %v10174_v24 = vadd.f32 %v10173_v62, %v10123_v48 }
0x1988   : > { %v10207_v32 = vadd.f32 %v10206_v30, %v10174_v24 }
0x198a   : > { %v10213_v6 = vadd.f32 %v10207_v32, %v5448_v61 }
0x198c   : > { %10216 = vst.msk [vmem:[%s682_s29] sm:$0xff] %vm10215_vm2, %v10213_v6 }
0x198d   : > { %v10177_v10 = vpop.f32.mrf.mxu2 }
0x198e   : > { %v10178_v52 = vadd.f32 %v10177_v10, %v10129_v50 }
0x1990   : > { %v10211_v7 = vadd.f32 %v10210_v34, %v10178_v52 }
0x1992   : > { %v10214_v11 = vadd.f32 %v10211_v7, %v5452_v33 }
0x1994   : > { %10217 = vst.msk [vmem:[%s682_s29 + $0x8] sm:$0xff] %vm10215_vm2, %v10214_v11 }
0x1995 PF: > { %s12556_s29 = sld [smem:[#allocation4_spill]]  ;;  %s12558_s27 = smov %s10499_s28 }
0x1996   : > { %s12557_s25 = sld [smem:[#allocation5_spill]] }
0x199b   : > { %p25_p9 = scmp.ge.s32.totalorder %s12556_s29, 4  }
0x199c   : > { %s12559_s28 = smov %s12557_s25 }
0x199d   :  { %27 = sbr.rel (!%p25_p9) target bundleno = 9 (0x9), region = 236 }

</bundles_post_ra>
